<compile_context>
chip_gen: v6e
topology: v6e:2x2x1
jax: 0.10.0
libtpu: 0.0.40
codegen_flags: <defaults>
</compile_context>

<pallas_src>
import functools
import math

import jax
import jax.numpy as jnp
from jax import lax
from jax.experimental import pallas as pl
from jax.experimental.pallas import tpu as pltpu

# ---- ESM-1b alphabet constants (hardcoded, matching esm.data.Alphabet) -------
PADDING_IDX = 1
MASK_IDX = 32
CLS_IDX = 0
EOS_IDX = 2
ALPHABET_SIZE = 33

LN_EPS = 1e-5
NEG_INF = -1e30          # used in place of float("-inf"): identical post-softmax
Q_TILE = 256             # query tile for flash attention
KV_TILE = 512            # key/value tile for flash attention
FFN_HIDDEN_TILE = 2048   # max per-step slab of the 4*D FFN hidden dimension


def _vmem_cap_bytes():
    # Derive a per-call VMEM budget from the chip (v5e/v6e: 128 MiB -> ~96 MiB,
    # v7x: 64 MiB -> ~48 MiB), leaving headroom for compiler scratch.
    try:
        info = pltpu.get_tpu_info()
        cap = int(getattr(info, "vmem_capacity_bytes", 64 << 20))
    except Exception:  # pragma: no cover - defensive fallback
        cap = 64 << 20
    cap = max(32 << 20, min(cap, 128 << 20))
    return (cap * 3) // 4


_VMEM_CAP = _vmem_cap_bytes()
TILE_ROWS = 512 if _VMEM_CAP >= (80 << 20) else 256


# ----------------------------- kernel helpers --------------------------------
def _layernorm(x, w, b):
    mean = jnp.mean(x, axis=-1, keepdims=True)
    var = jnp.mean(jnp.square(x - mean), axis=-1, keepdims=True)
    return (x - mean) / jnp.sqrt(var + LN_EPS) * w + b


def _gelu(x):
    # exact ESM gelu: x * 0.5 * (1 + erf(x / sqrt(2)))
    return x * 0.5 * (1.0 + lax.erf(x * (1.0 / math.sqrt(2.0))))


def _bf16(x):
    return x.astype(jnp.bfloat16)


# -------------------------------- kernels ------------------------------------
def layernorm_kernel(x_ref, w_ref, b_ref, o_ref):
    o_ref[...] = _layernorm(x_ref[...], w_ref[...], b_ref[...])


def ln_qkv_kernel(x_ref, lnw_ref, lnb_ref, w_ref, b_ref, q_ref, k_ref, v_ref, *, d):
    # fused pre-LN + fused Q/K/V projection; bf16 MXU with f32 accumulation,
    # outputs written in bf16 and split into three head-major (N, D) tensors.
    xn = _layernorm(x_ref[...], lnw_ref[...], lnb_ref[...])
    y = jnp.dot(_bf16(xn), w_ref[...], preferred_element_type=jnp.float32) + b_ref[...]
    q_ref[...] = _bf16(y[:, :d])
    k_ref[...] = _bf16(y[:, d:2 * d])
    v_ref[...] = _bf16(y[:, 2 * d:])


def attn_out_res_kernel(a_ref, res_ref, w_ref, b_ref, o_ref):
    # fused attention output projection + residual add
    o_ref[...] = (
        res_ref[...]
        + jnp.dot(_bf16(a_ref[...]), w_ref[...], preferred_element_type=jnp.float32)
        + b_ref[...]
    )


def ln_ffn_res_kernel(x_ref, lnw_ref, lnb_ref, w1_ref, b1_ref, w2_ref, b2_ref,
                      o_ref, xn_sc, acc_sc):
    # fused pre-LN + FC1 + GELU + FC2 + residual, with the 4*D hidden dimension
    # tiled over the second (reduction) grid axis and an f32 VMEM accumulator.
    h_idx = pl.program_id(1)

    @pl.when(h_idx == 0)
    def _init():
        xn_sc[...] = _bf16(_layernorm(x_ref[...], lnw_ref[...], lnb_ref[...]))
        acc_sc[...] = jnp.zeros(acc_sc.shape, jnp.float32)

    h = jnp.dot(xn_sc[...], w1_ref[...], preferred_element_type=jnp.float32) + b1_ref[...]
    acc_sc[...] += jnp.dot(_bf16(_gelu(h)), w2_ref[...],
                           preferred_element_type=jnp.float32)

    @pl.when(h_idx == pl.num_programs(1) - 1)
    def _finalize():
        o_ref[...] = x_ref[...] + acc_sc[...] + b2_ref[...]


def lmhead_kernel(x_ref, wd_ref, bd_ref, lnw_ref, lnb_ref, wo_ref, bo_ref, o_ref):
    # RobertaLMHead: dense -> gelu -> layernorm -> tied output projection (padded V)
    h = jnp.dot(_bf16(x_ref[...]), wd_ref[...], preferred_element_type=jnp.float32) + bd_ref[...]
    h = _gelu(h)
    h = _layernorm(h, lnw_ref[...], lnb_ref[...])
    o_ref[...] = (
        jnp.dot(_bf16(h), wo_ref[...], preferred_element_type=jnp.float32) + bo_ref[...]
    )


def attention_kernel(q_ref, k_ref, v_ref, cosq_ref, sinq_ref, cosk_ref, sink_ref,
                     bias_ref, o_ref, q_sc, m_sc, l_sc, acc_sc,
                     *, scale, group, head_dim):
    # Flash-style attention for one (batch, head-group, q-tile) block.
    #   q block:   (1, q_tile, G*hd) bf16     k/v blocks: (1, kv_tile, G*hd) bf16
    #   cos/sin:   (q_tile|kv_tile, hd) f32   bias: (1, 1, kv_tile) key-padding bias
    #   scratch:   roped+scaled Q (bf16), m/l (f32), acc (f32), all per q-tile.
    kv = pl.program_id(3)
    hd = head_dim
    G = group

    def rope(x, cos, sin_rot):
        # x*cos + rotate_half(x)*sin; rotate_half's sign is folded into sin_rot
        # so the half swap is a single XLU roll.
        return x * cos + pltpu.roll(x, shift=hd // 2, axis=x.ndim - 1) * sin_rot

    @pl.when(kv == 0)
    def _init():
        cos_q = cosq_ref[...]
        sin_q = sinq_ref[...]
        qb = q_ref[0]
        for g in range(G):
            qg = qb[:, g * hd:(g + 1) * hd].astype(jnp.float32)
            q_sc[g] = _bf16(rope(qg, cos_q, sin_q) * scale)
        m_sc[...] = jnp.full(m_sc.shape, -jnp.inf, dtype=jnp.float32)
        l_sc[...] = jnp.zeros(l_sc.shape, jnp.float32)
        acc_sc[...] = jnp.zeros(acc_sc.shape, jnp.float32)

    cos_k = cosk_ref[...]
    sin_k = sink_ref[...]
    bias = bias_ref[0]                      # (1, kv_tile), broadcasts over queries
    kb = k_ref[0]
    vb = v_ref[0]

    for g in range(G):
        kg = _bf16(rope(kb[:, g * hd:(g + 1) * hd].astype(jnp.float32), cos_k, sin_k))
        s = lax.dot_general(q_sc[g], kg, (((1,), (1,)), ((), ())),
                            preferred_element_type=jnp.float32)
        s = s + bias
        m_prev = m_sc[g]
        m_new = jnp.maximum(m_prev, jnp.max(s, axis=-1, keepdims=True))
        alpha = jnp.exp(m_prev - m_new)
        p = jnp.exp(s - m_new)
        l_sc[g] = alpha * l_sc[g] + jnp.sum(p, axis=-1, keepdims=True)
        vg = vb[:, g * hd:(g + 1) * hd]
        acc_sc[g] = alpha * acc_sc[g] + jnp.dot(_bf16(p), vg,
                                                preferred_element_type=jnp.float32)
        m_sc[g] = m_new

    @pl.when(kv == pl.num_programs(3) - 1)
    def _finalize():
        parts = []
        for g in range(G):
            inv_l = pl.reciprocal(l_sc[g], approx=True)
            parts.append(_bf16(acc_sc[g] * inv_l))
        o_ref[0] = parts[0] if G == 1 else jnp.concatenate(parts, axis=-1)


# ----------------------------- pallas wrappers --------------------------------
def _row_tile(n, max_rows=None):
    max_rows = TILE_ROWS if max_rows is None else max_rows
    if n >= max_rows:
        return max_rows
    return max(8, ((n + 7) // 8) * 8)


def _seq_tile(total, cap):
    # largest multiple-of-128 divisor of `total` that is <= cap (else the whole axis)
    if total <= cap:
        return total
    best = 0
    t = 128
    while t <= cap:
        if total % t == 0:
            best = t
        t += 128
    return best if best else total


def _head_group(num_heads, head_dim):
    # heads per attention block: keep G*hd lane-dense (multiple of 128) and modest.
    for g in (8, 4, 2, 1):
        if num_heads % g == 0 and (g * head_dim) % 128 == 0 and g * head_dim <= 512:
            return g
    return num_heads          # fall back to a full-width (D) block


def _tiled_rows(kernel, row_inputs, const_inputs, outs):
    """Run `kernel` over row tiles of (N, d_i) inputs; weights stay VMEM-resident.

    row_inputs:   list of (N, d_i) arrays, tiled (tile, d_i) over a parallel grid.
    const_inputs: list of 2-D weight/bias arrays, whole-block with constant index.
    outs:         list of (out_dim, dtype); returns a single array or a tuple.
    """
    n = row_inputs[0].shape[0]
    tile = _row_tile(n)
    n_pad = pl.cdiv(n, tile) * tile
    if n_pad != n:
        row_inputs = [jnp.pad(r, ((0, n_pad - n), (0, 0))) for r in row_inputs]

    in_specs = [pl.BlockSpec((tile, r.shape[1]), lambda i: (i, 0)) for r in row_inputs]
    in_specs += [pl.BlockSpec(tuple(c.shape), lambda i: (0, 0)) for c in const_inputs]

    out_shape = tuple(jax.ShapeDtypeStruct((n_pad, d), dt) for d, dt in outs)
    out_specs = tuple(pl.BlockSpec((tile, d), lambda i: (i, 0)) for d, _ in outs)
    single = len(outs) == 1

    res = pl.pallas_call(
        kernel,
        out_shape=out_shape[0] if single else out_shape,
        grid=(n_pad // tile,),
        in_specs=in_specs,
        out_specs=out_specs[0] if single else out_specs,
        compiler_params=pltpu.CompilerParams(
            dimension_semantics=("parallel",),
            vmem_limit_bytes=_VMEM_CAP),
    )(*row_inputs, *const_inputs)

    if single:
        return res[:n] if n_pad != n else res
    return tuple(r[:n] if n_pad != n else r for r in res)


def _ffn(x2d, layer, d_model):
    # pre-LN FFN with the 4*D hidden dimension split over a reduction grid axis.
    n = x2d.shape[0]
    tile = _row_tile(n)
    n_pad = pl.cdiv(n, tile) * tile
    x_in = jnp.pad(x2d, ((0, n_pad - n), (0, 0))) if n_pad != n else x2d

    h4 = layer["w1"].shape[1]
    h_tile = _seq_tile(h4, FFN_HIDDEN_TILE) if h4 > FFN_HIDDEN_TILE else h4

    out = pl.pallas_call(
        ln_ffn_res_kernel,
        out_shape=jax.ShapeDtypeStruct((n_pad, d_model), jnp.float32),
        grid=(n_pad // tile, h4 // h_tile),
        in_specs=[
            pl.BlockSpec((tile, d_model), lambda i, h: (i, 0)),
            pl.BlockSpec((1, d_model), lambda i, h: (0, 0)),
            pl.BlockSpec((1, d_model), lambda i, h: (0, 0)),
            pl.BlockSpec((d_model, h_tile), lambda i, h: (0, h)),
            pl.BlockSpec((1, h_tile), lambda i, h: (0, h)),
            pl.BlockSpec((h_tile, d_model), lambda i, h: (h, 0)),
            pl.BlockSpec((1, d_model), lambda i, h: (0, 0)),
        ],
        out_specs=pl.BlockSpec((tile, d_model), lambda i, h: (i, 0)),
        scratch_shapes=[
            pltpu.VMEM((tile, d_model), jnp.bfloat16),   # LN(x), reused per h tile
            pltpu.VMEM((tile, d_model), jnp.float32),    # FC2 accumulator
        ],
        compiler_params=pltpu.CompilerParams(
            dimension_semantics=("parallel", "arbitrary"),
            vmem_limit_bytes=_VMEM_CAP),
    )(x_in, layer["ln2_w"], layer["ln2_b"], layer["w1"], layer["b1"],
      layer["w2"], layer["b2"])
    return out[:n] if n_pad != n else out


def _attention(q, k, v, cos, sin_rot, bias, *, scale, heads, head_dim):
    # q, k, v, out: (B, T_pad, D) bf16 in head-major feature layout (no transposes)
    B, T_pad, D = q.shape
    hd = head_dim
    G = _head_group(heads, hd)
    gd = G * hd
    q_tile = _seq_tile(T_pad, Q_TILE)
    kv_tile = _seq_tile(T_pad, KV_TILE)
    grid = (B, heads // G, T_pad // q_tile, T_pad // kv_tile)

    kernel = functools.partial(attention_kernel, scale=scale, group=G, head_dim=hd)
    return pl.pallas_call(
        kernel,
        out_shape=jax.ShapeDtypeStruct((B, T_pad, D), jnp.bfloat16),
        grid=grid,
        in_specs=[
            pl.BlockSpec((1, q_tile, gd), lambda b, g, qi, kv: (b, qi, g)),
            pl.BlockSpec((1, kv_tile, gd), lambda b, g, qi, kv: (b, kv, g)),
            pl.BlockSpec((1, kv_tile, gd), lambda b, g, qi, kv: (b, kv, g)),
            pl.BlockSpec((q_tile, hd), lambda b, g, qi, kv: (qi, 0)),
            pl.BlockSpec((q_tile, hd), lambda b, g, qi, kv: (qi, 0)),
            pl.BlockSpec((kv_tile, hd), lambda b, g, qi, kv: (kv, 0)),
            pl.BlockSpec((kv_tile, hd), lambda b, g, qi, kv: (kv, 0)),
            pl.BlockSpec((1, 1, kv_tile), lambda b, g, qi, kv: (b, 0, kv)),
        ],
        out_specs=pl.BlockSpec((1, q_tile, gd), lambda b, g, qi, kv: (b, qi, g)),
        scratch_shapes=[
            pltpu.VMEM((G, q_tile, hd), jnp.bfloat16),   # roped + scaled Q cache
            pltpu.VMEM((G, q_tile, 1), jnp.float32),     # running max
            pltpu.VMEM((G, q_tile, 1), jnp.float32),     # running denom
            pltpu.VMEM((G, q_tile, hd), jnp.float32),    # output accumulator
        ],
        compiler_params=pltpu.CompilerParams(
            dimension_semantics=("parallel", "parallel", "parallel", "arbitrary"),
            vmem_limit_bytes=_VMEM_CAP),
    )(q, k, v, cos, sin_rot, cos, sin_rot, bias)


# ------------------------------- parameters ----------------------------------
def init_esm2_params(key, num_layers, embed_dim, vocab):
    keys = jax.random.split(key, 2 + num_layers)

    def dense(k, din, dout, scale=0.02):
        return jax.random.normal(k, (din, dout), jnp.float32) * scale

    # nn.Embedding(alphabet_size, embed_dim, padding_idx) -> padding row is zero
    embed = jax.random.normal(keys[0], (vocab, embed_dim), jnp.float32) * 0.02
    embed = embed.at[PADDING_IDX].set(0.0)

    layers = []
    for li in range(num_layers):
        lk = jax.random.split(keys[2 + li], 6)
        wqkv = jnp.concatenate(
            [dense(lk[0], embed_dim, embed_dim),
             dense(lk[1], embed_dim, embed_dim),
             dense(lk[2], embed_dim, embed_dim)], axis=1)
        layers.append(dict(
            ln1_w=jnp.ones((1, embed_dim)), ln1_b=jnp.zeros((1, embed_dim)),
            wqkv=wqkv.astype(jnp.bfloat16),            # fused Q/K/V projection
            bqkv=jnp.zeros((1, 3 * embed_dim)),
            wo=dense(lk[3], embed_dim, embed_dim).astype(jnp.bfloat16),
            bo=jnp.zeros((1, embed_dim)),
            ln2_w=jnp.ones((1, embed_dim)), ln2_b=jnp.zeros((1, embed_dim)),
            w1=dense(lk[4], embed_dim, 4 * embed_dim).astype(jnp.bfloat16),
            b1=jnp.zeros((1, 4 * embed_dim)),
            w2=dense(lk[5], 4 * embed_dim, embed_dim).astype(jnp.bfloat16),
            b2=jnp.zeros((1, embed_dim)),
        ))

    vocab_pad = pl.cdiv(vocab, 128) * 128              # lane-dense LM-head output
    lm_out_w = jnp.zeros((embed_dim, vocab_pad), jnp.float32)
    lm_out_w = lm_out_w.at[:, :vocab].set(embed.T)     # tied to embed_tokens.weight

    return dict(
        embed=embed, layers=layers,
        lnf_w=jnp.ones((1, embed_dim)), lnf_b=jnp.zeros((1, embed_dim)),
        lm_dense_w=dense(keys[1], embed_dim, embed_dim).astype(jnp.bfloat16),
        lm_dense_b=jnp.zeros((1, embed_dim)),
        lm_ln_w=jnp.ones((1, embed_dim)), lm_ln_b=jnp.zeros((1, embed_dim)),
        lm_out_w=lm_out_w.astype(jnp.bfloat16),
        lm_out_b=jnp.zeros((1, vocab_pad)),
    )


# -------------------------------- forward ------------------------------------
def esm2_forward(params, tokens, heads, repr_layers=()):
    """ESM2.forward(tokens) (token_dropout=True, eval mode).

    Returns {'logits': (B, T, V), 'representations': {layer: (B, T, D)}}.
    """
    repr_layers = set(repr_layers)
    B, T = tokens.shape
    V, D = params["embed"].shape
    H = heads
    hd = D // H
    num_layers = len(params["layers"])

    # pad the sequence so attention tiles are aligned; padded positions behave
    # exactly like <pad> tokens (zero embedding, NEG_INF key bias) and every
    # returned tensor is sliced back to length T.
    T_pad = pl.cdiv(T, 8) * 8
    if T_pad > 128:
        T_pad = pl.cdiv(T, 128) * 128
    if T_pad != T:
        tokens = jnp.pad(tokens, ((0, 0), (0, T_pad - T)),
                         constant_values=PADDING_IDX)

    padding_mask = tokens == PADDING_IDX                        # (B, T_pad) bool
    x = jnp.take(params["embed"], tokens, axis=0)               # embed_scale == 1

    # token dropout rescaling
    mask_tok = tokens == MASK_IDX
    x = jnp.where(mask_tok[..., None], 0.0, x)
    mask_ratio_train = 0.15 * 0.8
    # maximum(., 1) guards the degenerate all-padding row (reference would NaN)
    src_lengths = jnp.maximum(jnp.sum(~padding_mask, axis=-1), 1).astype(x.dtype)
    mask_ratio_observed = jnp.sum(mask_tok, axis=-1).astype(x.dtype) / src_lengths
    x = x * (1 - mask_ratio_train) / (1 - mask_ratio_observed)[:, None, None]

    # zero-out padding positions
    x = x * (1.0 - padding_mask[..., None].astype(x.dtype))

    hidden = {}
    if 0 in repr_layers:
        hidden[0] = x[:, :T]

    # rotary cos/sin tables (RotaryEmbedding, dim = head_dim); rotate_half's sign
    # is folded into the sin table so the kernel only needs a roll + 2 multiplies.
    inv_freq = 1.0 / (10000.0 ** (jnp.arange(0, hd, 2, dtype=jnp.float32) / hd))
    pos = jnp.arange(T_pad, dtype=jnp.float32)
    emb = jnp.concatenate([jnp.outer(pos, inv_freq)] * 2, axis=-1)   # (T_pad, hd)
    cos = jnp.cos(emb)
    sign = jnp.concatenate([-jnp.ones((hd // 2,), jnp.float32),
                            jnp.ones((hd // 2,), jnp.float32)])
    sin_rot = jnp.sin(emb) * sign

    # additive key-padding bias kept at (B, 1, T_pad) (no per-head HBM broadcast)
    bias = (padding_mask.astype(jnp.float32) * NEG_INF)[:, None, :]

    scale = hd ** -0.5      # q scaling applied inside the attention kernel
    N = B * T_pad
    x2d = x.reshape(N, D)

    for li, p in enumerate(params["layers"]):
        # ---- self-attention block (pre-LN; fused LN+QKV, flash attention,
        #      fused out-proj + residual; no XLA-side head transposes) ----
        q2d, k2d, v2d = _tiled_rows(
            functools.partial(ln_qkv_kernel, d=D), [x2d],
            [p["ln1_w"], p["ln1_b"], p["wqkv"], p["bqkv"]],
            [(D, jnp.bfloat16)] * 3)

        o = _attention(q2d.reshape(B, T_pad, D), k2d.reshape(B, T_pad, D),
                       v2d.reshape(B, T_pad, D), cos, sin_rot, bias,
                       scale=scale, heads=H, head_dim=hd)

        x2d = _tiled_rows(attn_out_res_kernel, [o.reshape(N, D), x2d],
                          [p["wo"], p["bo"]], [(D, jnp.float32)])

        # ---- feed-forward block (pre-LN; LN+FC1+GELU+FC2+residual, 4D-tiled) ----
        x2d = _ffn(x2d, p, D)

        if li + 1 in repr_layers:
            hidden[li + 1] = x2d.reshape(B, T_pad, D)[:, :T]

    # final layer norm + LM head (output padded to a lane-dense width, sliced back)
    xn = _tiled_rows(layernorm_kernel, [x2d],
                     [params["lnf_w"], params["lnf_b"]], [(D, jnp.float32)])
    if num_layers in repr_layers:
        hidden[num_layers] = xn.reshape(B, T_pad, D)[:, :T]

    vp = params["lm_out_w"].shape[1]
    logits = _tiled_rows(
        lmhead_kernel, [xn],
        [params["lm_dense_w"], params["lm_dense_b"],
         params["lm_ln_w"], params["lm_ln_b"],
         params["lm_out_w"], params["lm_out_b"]], [(vp, jnp.float32)])
    logits = logits[:, :V].reshape(B, T_pad, V)[:, :T]

    # TODO(synk): need_head_weights / return_contacts (ContactPredictionHead) paths
    # are not implemented; only the default forward (logits + representations).
    return {"logits": logits, "representations": hidden}


# ---------------------------------- main --------------------------------------
if __name__ == "__main__":
    key = jax.random.PRNGKey(0)

    # small synthetic config: 2 transformer layers, embed_dim=256, 2 heads
    # (head_dim=128 keeps the in-kernel rotary roll on a full 128-lane axis);
    # real ESM2 is 33 layers / 1280 / 20 heads (head_dim=64, handled via G=4
    # head groups so blocks stay lane-dense).
    num_layers, embed_dim, heads = 2, 256, 2
    params = init_esm2_params(key, num_layers, embed_dim, ALPHABET_SIZE)

    # tokens: batch=2, seq=8 (cls ... eos, with one <mask> and one <pad>)
    tokens = jnp.array(
        [
            [CLS_IDX, 5, 6, MASK_IDX, 7, 8, EOS_IDX, PADDING_IDX],
            [CLS_IDX, 9, 10, 11, 12, 13, 14, EOS_IDX],
        ],
        dtype=jnp.int32,
    )

    fwd = jax.jit(lambda pr, tok: esm2_forward(pr, tok, heads,
                                               repr_layers=(0, num_layers)))
    out = fwd(params, tokens)
    logits = jax.block_until_ready(out["logits"])

    assert logits.shape == (2, 8, ALPHABET_SIZE), logits.shape
    assert bool(jnp.all(jnp.isfinite(logits)))
    assert out["representations"][num_layers].shape == (2, 8, embed_dim)
    print("KERNEL_OK")
</pallas_src>

<mosaic_0001>
module attributes {stable_mosaic.version = 11 : i64} {
  func.func @ln_qkv_kernel(%arg0: i32, %arg1: memref<16x256xf32, #tpu.memory_space<vmem>>, %arg2: memref<1x256xf32, #tpu.memory_space<vmem>>, %arg3: memref<1x256xf32, #tpu.memory_space<vmem>>, %arg4: memref<256x768xbf16, #tpu.memory_space<vmem>>, %arg5: memref<1x768xf32, #tpu.memory_space<vmem>>, %arg6: memref<16x256xbf16, #tpu.memory_space<vmem>>, %arg7: memref<16x256xbf16, #tpu.memory_space<vmem>>, %arg8: memref<16x256xbf16, #tpu.memory_space<vmem>>) attributes {dimension_semantics = [#tpu.dimension_semantics<parallel>], iteration_bounds = array<i64: 1>, scalar_prefetch = 0 : i64, scratch_operands = 0 : i64, tpu.core_type = #tpu.core_type<tc>, window_params = [{transform_indices = @transform_0, window_bounds = array<i64: 16, 256>}, {pipeline_mode = #tpu.pipeline_mode<synchronous>, transform_indices = @transform_1, window_bounds = array<i64: 1, 256>}, {pipeline_mode = #tpu.pipeline_mode<synchronous>, transform_indices = @transform_2, window_bounds = array<i64: 1, 256>}, {pipeline_mode = #tpu.pipeline_mode<synchronous>, transform_indices = @transform_3, window_bounds = array<i64: 256, 768>}, {pipeline_mode = #tpu.pipeline_mode<synchronous>, transform_indices = @transform_4, window_bounds = array<i64: 1, 768>}, {transform_indices = @transform_5, window_bounds = array<i64: 16, 256>}, {transform_indices = @transform_6, window_bounds = array<i64: 16, 256>}, {transform_indices = @transform_7, window_bounds = array<i64: 16, 256>}]} {
    %c0 = arith.constant 0 : index
    %c0_0 = arith.constant 0 : index
    %0 = vector.load %arg1[%c0, %c0_0] : memref<16x256xf32, #tpu.memory_space<vmem>>, vector<16x256xf32>
    %c0_1 = arith.constant 0 : index
    %c0_2 = arith.constant 0 : index
    %1 = vector.load %arg2[%c0_1, %c0_2] : memref<1x256xf32, #tpu.memory_space<vmem>>, vector<1x256xf32>
    %c0_3 = arith.constant 0 : index
    %c0_4 = arith.constant 0 : index
    %2 = vector.load %arg3[%c0_3, %c0_4] : memref<1x256xf32, #tpu.memory_space<vmem>>, vector<1x256xf32>
    %cst = arith.constant dense<0.000000e+00> : vector<16xf32>
    %3 = vector.multi_reduction <add>, %0, %cst [1] : vector<16x256xf32> to vector<16xf32>
    %4 = vector.shape_cast %3 : vector<16xf32> to vector<16x1xf32>
    %cst_5 = arith.constant 2.560000e+02 : f32
    %5 = vector.broadcast %cst_5 : f32 to vector<16x1xf32>
    %6 = arith.divf %4, %5 : vector<16x1xf32>
    %7 = vector.broadcast %6 : vector<16x1xf32> to vector<16x256xf32>
    %8 = arith.subf %0, %7 : vector<16x256xf32>
    %9 = arith.mulf %8, %8 : vector<16x256xf32>
    %cst_6 = arith.constant dense<0.000000e+00> : vector<16xf32>
    %10 = vector.multi_reduction <add>, %9, %cst_6 [1] : vector<16x256xf32> to vector<16xf32>
    %11 = vector.shape_cast %10 : vector<16xf32> to vector<16x1xf32>
    %cst_7 = arith.constant 2.560000e+02 : f32
    %12 = vector.broadcast %cst_7 : f32 to vector<16x1xf32>
    %13 = arith.divf %11, %12 : vector<16x1xf32>
    %14 = vector.broadcast %6 : vector<16x1xf32> to vector<16x256xf32>
    %15 = arith.subf %0, %14 : vector<16x256xf32>
    %cst_8 = arith.constant 9.99999974E-6 : f32
    %16 = vector.broadcast %cst_8 : f32 to vector<16x1xf32>
    %17 = arith.addf %13, %16 : vector<16x1xf32>
    %18 = math.sqrt %17 : vector<16x1xf32>
    %19 = vector.broadcast %18 : vector<16x1xf32> to vector<16x256xf32>
    %20 = arith.divf %15, %19 : vector<16x256xf32>
    %21 = vector.broadcast %1 : vector<1x256xf32> to vector<16x256xf32>
    %22 = arith.mulf %20, %21 : vector<16x256xf32>
    %23 = vector.broadcast %2 : vector<1x256xf32> to vector<16x256xf32>
    %24 = arith.addf %22, %23 : vector<16x256xf32>
    %25 = arith.truncf %24 : vector<16x256xf32> to vector<16x256xbf16>
    %c0_9 = arith.constant 0 : index
    %c0_10 = arith.constant 0 : index
    %26 = vector.load %arg4[%c0_9, %c0_10] : memref<256x768xbf16, #tpu.memory_space<vmem>>, vector<256x768xbf16>
    %cst_11 = arith.constant dense<0.000000e+00> : vector<16x768xf32>
    %27 = tpu.matmul %25, %26, %cst_11 {dimension_numbers = #tpu.dot_dimension_numbers<[1], [0], [0], [1], [0, 0, 1, 1], [], []>} : vector<16x256xbf16>, vector<256x768xbf16>, vector<16x768xf32> -> vector<16x768xf32>
    %c0_12 = arith.constant 0 : index
    %c0_13 = arith.constant 0 : index
    %28 = vector.load %arg5[%c0_12, %c0_13] : memref<1x768xf32, #tpu.memory_space<vmem>>, vector<1x768xf32>
    %29 = vector.broadcast %28 : vector<1x768xf32> to vector<16x768xf32>
    %30 = arith.addf %27, %29 : vector<16x768xf32>
    %31 = vector.extract_strided_slice %30 {offsets = [0, 0], sizes = [16, 256], strides = [1, 1]} : vector<16x768xf32> to vector<16x256xf32>
    %32 = arith.truncf %31 : vector<16x256xf32> to vector<16x256xbf16>
    %c0_14 = arith.constant 0 : index
    %c0_15 = arith.constant 0 : index
    %33 = vector.load %arg6[%c0_14, %c0_15] : memref<16x256xbf16, #tpu.memory_space<vmem>>, vector<16x256xbf16>
    tpu.vector_store %arg6[%c0_14, %c0_15], %32 {strides = array<i32>} : memref<16x256xbf16, #tpu.memory_space<vmem>>, vector<16x256xbf16>,
    %34 = vector.extract_strided_slice %30 {offsets = [0, 256], sizes = [16, 256], strides = [1, 1]} : vector<16x768xf32> to vector<16x256xf32>
    %35 = arith.truncf %34 : vector<16x256xf32> to vector<16x256xbf16>
    %c0_16 = arith.constant 0 : index
    %c0_17 = arith.constant 0 : index
    %36 = vector.load %arg7[%c0_16, %c0_17] : memref<16x256xbf16, #tpu.memory_space<vmem>>, vector<16x256xbf16>
    tpu.vector_store %arg7[%c0_16, %c0_17], %35 {strides = array<i32>} : memref<16x256xbf16, #tpu.memory_space<vmem>>, vector<16x256xbf16>,
    %37 = vector.extract_strided_slice %30 {offsets = [0, 512], sizes = [16, 256], strides = [1, 1]} : vector<16x768xf32> to vector<16x256xf32>
    %38 = arith.truncf %37 : vector<16x256xf32> to vector<16x256xbf16>
    %c0_18 = arith.constant 0 : index
    %c0_19 = arith.constant 0 : index
    %39 = vector.load %arg8[%c0_18, %c0_19] : memref<16x256xbf16, #tpu.memory_space<vmem>>, vector<16x256xbf16>
    tpu.vector_store %arg8[%c0_18, %c0_19], %38 {strides = array<i32>} : memref<16x256xbf16, #tpu.memory_space<vmem>>, vector<16x256xbf16>,
    return
  }
  func.func @transform_0(%arg0: i32) -> (i32, i32) {
    %c0_i32 = arith.constant 0 : i32
    %c0_i32_0 = arith.constant 0 : i32
    return %arg0, %c0_i32 : i32, i32
  }
  func.func @transform_1(%arg0: i32) -> (i32, i32) {
    %c0_i32 = arith.constant 0 : i32
    %c0_i32_0 = arith.constant 0 : i32
    %c0_i32_1 = arith.constant 0 : i32
    return %c0_i32, %c0_i32_0 : i32, i32
  }
  func.func @transform_2(%arg0: i32) -> (i32, i32) {
    %c0_i32 = arith.constant 0 : i32
    %c0_i32_0 = arith.constant 0 : i32
    %c0_i32_1 = arith.constant 0 : i32
    return %c0_i32, %c0_i32_0 : i32, i32
  }
  func.func @transform_3(%arg0: i32) -> (i32, i32) {
    %c0_i32 = arith.constant 0 : i32
    %c0_i32_0 = arith.constant 0 : i32
    %c0_i32_1 = arith.constant 0 : i32
    return %c0_i32, %c0_i32_0 : i32, i32
  }
  func.func @transform_4(%arg0: i32) -> (i32, i32) {
    %c0_i32 = arith.constant 0 : i32
    %c0_i32_0 = arith.constant 0 : i32
    %c0_i32_1 = arith.constant 0 : i32
    return %c0_i32, %c0_i32_0 : i32, i32
  }
  func.func @transform_5(%arg0: i32) -> (i32, i32) {
    %c0_i32 = arith.constant 0 : i32
    %c0_i32_0 = arith.constant 0 : i32
    return %arg0, %c0_i32 : i32, i32
  }
  func.func @transform_6(%arg0: i32) -> (i32, i32) {
    %c0_i32 = arith.constant 0 : i32
    %c0_i32_0 = arith.constant 0 : i32
    return %arg0, %c0_i32 : i32, i32
  }
  func.func @transform_7(%arg0: i32) -> (i32, i32) {
    %c0_i32 = arith.constant 0 : i32
    %c0_i32_0 = arith.constant 0 : i32
    return %arg0, %c0_i32 : i32, i32
  }
}

module attributes {stable_mosaic.version = 11 : i64} {
  func.func @attn_out_res_kernel(%arg0: i32, %arg1: memref<16x256xbf16, #tpu.memory_space<vmem>>, %arg2: memref<16x256xf32, #tpu.memory_space<vmem>>, %arg3: memref<256x256xbf16, #tpu.memory_space<vmem>>, %arg4: memref<1x256xf32, #tpu.memory_space<vmem>>, %arg5: memref<16x256xf32, #tpu.memory_space<vmem>>) attributes {dimension_semantics = [#tpu.dimension_semantics<parallel>], iteration_bounds = array<i64: 1>, scalar_prefetch = 0 : i64, scratch_operands = 0 : i64, tpu.core_type = #tpu.core_type<tc>, window_params = [{transform_indices = @transform_0, window_bounds = array<i64: 16, 256>}, {transform_indices = @transform_1, window_bounds = array<i64: 16, 256>}, {pipeline_mode = #tpu.pipeline_mode<synchronous>, transform_indices = @transform_2, window_bounds = array<i64: 256, 256>}, {pipeline_mode = #tpu.pipeline_mode<synchronous>, transform_indices = @transform_3, window_bounds = array<i64: 1, 256>}, {transform_indices = @transform_4, window_bounds = array<i64: 16, 256>}]} {
    %c0 = arith.constant 0 : index
    %c0_0 = arith.constant 0 : index
    %0 = vector.load %arg2[%c0, %c0_0] : memref<16x256xf32, #tpu.memory_space<vmem>>, vector<16x256xf32>
    %c0_1 = arith.constant 0 : index
    %c0_2 = arith.constant 0 : index
    %1 = vector.load %arg1[%c0_1, %c0_2] : memref<16x256xbf16, #tpu.memory_space<vmem>>, vector<16x256xbf16>
    %c0_3 = arith.constant 0 : index
    %c0_4 = arith.constant 0 : index
    %2 = vector.load %arg3[%c0_3, %c0_4] : memref<256x256xbf16, #tpu.memory_space<vmem>>, vector<256x256xbf16>
    %cst = arith.constant dense<0.000000e+00> : vector<16x256xf32>
    %3 = tpu.matmul %1, %2, %cst {dimension_numbers = #tpu.dot_dimension_numbers<[1], [0], [0], [1], [0, 0, 1, 1], [], []>} : vector<16x256xbf16>, vector<256x256xbf16>, vector<16x256xf32> -> vector<16x256xf32>
    %4 = arith.addf %0, %3 : vector<16x256xf32>
    %c0_5 = arith.constant 0 : index
    %c0_6 = arith.constant 0 : index
    %5 = vector.load %arg4[%c0_5, %c0_6] : memref<1x256xf32, #tpu.memory_space<vmem>>, vector<1x256xf32>
    %6 = vector.broadcast %5 : vector<1x256xf32> to vector<16x256xf32>
    %7 = arith.addf %4, %6 : vector<16x256xf32>
    %c0_7 = arith.constant 0 : index
    %c0_8 = arith.constant 0 : index
    %8 = vector.load %arg5[%c0_7, %c0_8] : memref<16x256xf32, #tpu.memory_space<vmem>>, vector<16x256xf32>
    tpu.vector_store %arg5[%c0_7, %c0_8], %7 {strides = array<i32>} : memref<16x256xf32, #tpu.memory_space<vmem>>, vector<16x256xf32>,
    return
  }
  func.func @transform_0(%arg0: i32) -> (i32, i32) {
    %c0_i32 = arith.constant 0 : i32
    %c0_i32_0 = arith.constant 0 : i32
    return %arg0, %c0_i32 : i32, i32
  }
  func.func @transform_1(%arg0: i32) -> (i32, i32) {
    %c0_i32 = arith.constant 0 : i32
    %c0_i32_0 = arith.constant 0 : i32
    return %arg0, %c0_i32 : i32, i32
  }
  func.func @transform_2(%arg0: i32) -> (i32, i32) {
    %c0_i32 = arith.constant 0 : i32
    %c0_i32_0 = arith.constant 0 : i32
    %c0_i32_1 = arith.constant 0 : i32
    return %c0_i32, %c0_i32_0 : i32, i32
  }
  func.func @transform_3(%arg0: i32) -> (i32, i32) {
    %c0_i32 = arith.constant 0 : i32
    %c0_i32_0 = arith.constant 0 : i32
    %c0_i32_1 = arith.constant 0 : i32
    return %c0_i32, %c0_i32_0 : i32, i32
  }
  func.func @transform_4(%arg0: i32) -> (i32, i32) {
    %c0_i32 = arith.constant 0 : i32
    %c0_i32_0 = arith.constant 0 : i32
    return %arg0, %c0_i32 : i32, i32
  }
}

module attributes {stable_mosaic.version = 11 : i64} {
  func.func @attention_kernel(%arg0: i32, %arg1: i32, %arg2: i32, %arg3: i32, %arg4: memref<1x8x256xbf16, #tpu.memory_space<vmem>>, %arg5: memref<1x8x256xbf16, #tpu.memory_space<vmem>>, %arg6: memref<1x8x256xbf16, #tpu.memory_space<vmem>>, %arg7: memref<8x128xf32, #tpu.memory_space<vmem>>, %arg8: memref<8x128xf32, #tpu.memory_space<vmem>>, %arg9: memref<8x128xf32, #tpu.memory_space<vmem>>, %arg10: memref<8x128xf32, #tpu.memory_space<vmem>>, %arg11: memref<1x1x8xf32, #tpu.memory_space<vmem>>, %arg12: memref<1x8x256xbf16, #tpu.memory_space<vmem>>, %arg13: memref<2x8x128xbf16, #tpu.memory_space<vmem>>, %arg14: memref<2x8x1xf32, #tpu.memory_space<vmem>>, %arg15: memref<2x8x1xf32, #tpu.memory_space<vmem>>, %arg16: memref<2x8x128xf32, #tpu.memory_space<vmem>>) attributes {dimension_semantics = [#tpu.dimension_semantics<parallel>, #tpu.dimension_semantics<parallel>, #tpu.dimension_semantics<parallel>, #tpu.dimension_semantics<arbitrary>], iteration_bounds = array<i64: 2, 1, 1, 1>, scalar_prefetch = 0 : i64, scratch_operands = 4 : i64, tpu.core_type = #tpu.core_type<tc>, window_params = [{transform_indices = @transform_0, window_bounds = array<i64: 1, 8, 256>}, {transform_indices = @transform_1, window_bounds = array<i64: 1, 8, 256>}, {transform_indices = @transform_2, window_bounds = array<i64: 1, 8, 256>}, {transform_indices = @transform_3, window_bounds = array<i64: 8, 128>}, {transform_indices = @transform_4, window_bounds = array<i64: 8, 128>}, {transform_indices = @transform_5, window_bounds = array<i64: 8, 128>}, {transform_indices = @transform_6, window_bounds = array<i64: 8, 128>}, {transform_indices = @transform_7, window_bounds = array<i64: 1, 1, 8>}, {transform_indices = @transform_8, window_bounds = array<i64: 1, 8, 256>}]} {
    %c0_i32 = arith.constant 0 : i32
    %0 = arith.cmpi eq, %arg3, %c0_i32 : i32
    %1 = arith.extui %0 : i1 to i32
    %c0_i32_0 = arith.constant 0 : i32
    %2 = arith.cmpi ne, %1, %c0_i32_0 : i32
    scf.if %2 {
      %c0_64 = arith.constant 0 : index
      %c0_65 = arith.constant 0 : index
      %104 = vector.load %arg7[%c0_64, %c0_65] : memref<8x128xf32, #tpu.memory_space<vmem>>, vector<8x128xf32>
      %c0_66 = arith.constant 0 : index
      %c0_67 = arith.constant 0 : index
      %105 = vector.load %arg8[%c0_66, %c0_67] : memref<8x128xf32, #tpu.memory_space<vmem>>, vector<8x128xf32>
      %c0_68 = arith.constant 0 : index
      %c0_69 = arith.constant 0 : index
      %c0_70 = arith.constant 0 : index
      %106 = vector.load %arg4[%c0_68, %c0_69, %c0_70] : memref<1x8x256xbf16, #tpu.memory_space<vmem>>, vector<1x8x256xbf16>
      %107 = vector.shape_cast %106 : vector<1x8x256xbf16> to vector<8x256xbf16>
      %108 = vector.extract_strided_slice %107 {offsets = [0, 0], sizes = [8, 128], strides = [1, 1]} : vector<8x256xbf16> to vector<8x128xbf16>
      %109 = arith.extf %108 : vector<8x128xbf16> to vector<8x128xf32>
      %110 = arith.mulf %109, %104 : vector<8x128xf32>
      %c64_i32_71 = arith.constant 64 : i32
      %111 = tpu.dynamic_rotate %109 by %c64_i32_71 dim 1 : vector<8x128xf32>, i32 -> vector<8x128xf32>
      %112 = arith.mulf %111, %105 : vector<8x128xf32>
      %113 = arith.addf %110, %112 : vector<8x128xf32>
      %cst_72 = arith.constant 0.0883883461 : f32
      %114 = vector.broadcast %cst_72 : f32 to vector<8x128xf32>
      %115 = arith.mulf %113, %114 : vector<8x128xf32>
      %116 = arith.truncf %115 : vector<8x128xf32> to vector<8x128xbf16>
      %c0_73 = arith.constant 0 : index
      %c0_74 = arith.constant 0 : index
      %c0_75 = arith.constant 0 : index
      %117 = vector.load %arg13[%c0_73, %c0_74, %c0_75] : memref<2x8x128xbf16, #tpu.memory_space<vmem>>, vector<1x8x128xbf16>
      %118 = vector.shape_cast %117 : vector<1x8x128xbf16> to vector<8x128xbf16>
      %119 = vector.shape_cast %116 : vector<8x128xbf16> to vector<1x8x128xbf16>
      tpu.vector_store %arg13[%c0_73, %c0_74, %c0_75], %119 {strides = array<i32>} : memref<2x8x128xbf16, #tpu.memory_space<vmem>>, vector<1x8x128xbf16>,
      %120 = vector.extract_strided_slice %107 {offsets = [0, 128], sizes = [8, 128], strides = [1, 1]} : vector<8x256xbf16> to vector<8x128xbf16>
      %121 = arith.extf %120 : vector<8x128xbf16> to vector<8x128xf32>
      %122 = arith.mulf %121, %104 : vector<8x128xf32>
      %c64_i32_76 = arith.constant 64 : i32
      %123 = tpu.dynamic_rotate %121 by %c64_i32_76 dim 1 : vector<8x128xf32>, i32 -> vector<8x128xf32>
      %124 = arith.mulf %123, %105 : vector<8x128xf32>
      %125 = arith.addf %122, %124 : vector<8x128xf32>
      %cst_77 = arith.constant 0.0883883461 : f32
      %126 = vector.broadcast %cst_77 : f32 to vector<8x128xf32>
      %127 = arith.mulf %125, %126 : vector<8x128xf32>
      %128 = arith.truncf %127 : vector<8x128xf32> to vector<8x128xbf16>
      %c1_78 = arith.constant 1 : index
      %c0_79 = arith.constant 0 : index
      %c0_80 = arith.constant 0 : index
      %129 = vector.load %arg13[%c1_78, %c0_79, %c0_80] : memref<2x8x128xbf16, #tpu.memory_space<vmem>>, vector<1x8x128xbf16>
      %130 = vector.shape_cast %129 : vector<1x8x128xbf16> to vector<8x128xbf16>
      %131 = vector.shape_cast %128 : vector<8x128xbf16> to vector<1x8x128xbf16>
      tpu.vector_store %arg13[%c1_78, %c0_79, %c0_80], %131 {strides = array<i32>} : memref<2x8x128xbf16, #tpu.memory_space<vmem>>, vector<1x8x128xbf16>,
      %cst_81 = arith.constant 0xFF800000 : f32
      %132 = vector.broadcast %cst_81 : f32 to vector<2x8x1xf32>
      %c0_82 = arith.constant 0 : index
      %c0_83 = arith.constant 0 : index
      %c0_84 = arith.constant 0 : index
      %133 = vector.load %arg14[%c0_82, %c0_83, %c0_84] : memref<2x8x1xf32, #tpu.memory_space<vmem>>, vector<2x8x1xf32>
      tpu.vector_store %arg14[%c0_82, %c0_83, %c0_84], %132 {strides = array<i32>} : memref<2x8x1xf32, #tpu.memory_space<vmem>>, vector<2x8x1xf32>,
      %cst_85 = arith.constant 0.000000e+00 : f32
      %134 = vector.broadcast %cst_85 : f32 to vector<2x8x1xf32>
      %c0_86 = arith.constant 0 : index
      %c0_87 = arith.constant 0 : index
      %c0_88 = arith.constant 0 : index
      %135 = vector.load %arg15[%c0_86, %c0_87, %c0_88] : memref<2x8x1xf32, #tpu.memory_space<vmem>>, vector<2x8x1xf32>
      tpu.vector_store %arg15[%c0_86, %c0_87, %c0_88], %134 {strides = array<i32>} : memref<2x8x1xf32, #tpu.memory_space<vmem>>, vector<2x8x1xf32>,
      %cst_89 = arith.constant 0.000000e+00 : f32
      %136 = vector.broadcast %cst_89 : f32 to vector<2x8x128xf32>
      %c0_90 = arith.constant 0 : index
      %c0_91 = arith.constant 0 : index
      %c0_92 = arith.constant 0 : index
      %137 = vector.load %arg16[%c0_90, %c0_91, %c0_92] : memref<2x8x128xf32, #tpu.memory_space<vmem>>, vector<2x8x128xf32>
      tpu.vector_store %arg16[%c0_90, %c0_91, %c0_92], %136 {strides = array<i32>} : memref<2x8x128xf32, #tpu.memory_space<vmem>>, vector<2x8x128xf32>,
    } else {
    }
    %c0 = arith.constant 0 : index
    %c0_1 = arith.constant 0 : index
    %3 = vector.load %arg9[%c0, %c0_1] : memref<8x128xf32, #tpu.memory_space<vmem>>, vector<8x128xf32>
    %c0_2 = arith.constant 0 : index
    %c0_3 = arith.constant 0 : index
    %4 = vector.load %arg10[%c0_2, %c0_3] : memref<8x128xf32, #tpu.memory_space<vmem>>, vector<8x128xf32>
    %c0_4 = arith.constant 0 : index
    %c0_5 = arith.constant 0 : index
    %c0_6 = arith.constant 0 : index
    %5 = vector.load %arg11[%c0_4, %c0_5, %c0_6] : memref<1x1x8xf32, #tpu.memory_space<vmem>>, vector<1x1x8xf32>
    %6 = vector.shape_cast %5 : vector<1x1x8xf32> to vector<1x8xf32>
    %c0_7 = arith.constant 0 : index
    %c0_8 = arith.constant 0 : index
    %c0_9 = arith.constant 0 : index
    %7 = vector.load %arg5[%c0_7, %c0_8, %c0_9] : memref<1x8x256xbf16, #tpu.memory_space<vmem>>, vector<1x8x256xbf16>
    %8 = vector.shape_cast %7 : vector<1x8x256xbf16> to vector<8x256xbf16>
    %c0_10 = arith.constant 0 : index
    %c0_11 = arith.constant 0 : index
    %c0_12 = arith.constant 0 : index
    %9 = vector.load %arg6[%c0_10, %c0_11, %c0_12] : memref<1x8x256xbf16, #tpu.memory_space<vmem>>, vector<1x8x256xbf16>
    %10 = vector.shape_cast %9 : vector<1x8x256xbf16> to vector<8x256xbf16>
    %11 = vector.extract_strided_slice %8 {offsets = [0, 0], sizes = [8, 128], strides = [1, 1]} : vector<8x256xbf16> to vector<8x128xbf16>
    %12 = arith.extf %11 : vector<8x128xbf16> to vector<8x128xf32>
    %13 = arith.mulf %12, %3 : vector<8x128xf32>
    %c64_i32 = arith.constant 64 : i32
    %14 = tpu.dynamic_rotate %12 by %c64_i32 dim 1 : vector<8x128xf32>, i32 -> vector<8x128xf32>
    %15 = arith.mulf %14, %4 : vector<8x128xf32>
    %16 = arith.addf %13, %15 : vector<8x128xf32>
    %17 = arith.truncf %16 : vector<8x128xf32> to vector<8x128xbf16>
    %c0_13 = arith.constant 0 : index
    %c0_14 = arith.constant 0 : index
    %c0_15 = arith.constant 0 : index
    %18 = vector.load %arg13[%c0_13, %c0_14, %c0_15] : memref<2x8x128xbf16, #tpu.memory_space<vmem>>, vector<1x8x128xbf16>
    %19 = vector.shape_cast %18 : vector<1x8x128xbf16> to vector<8x128xbf16>
    %cst = arith.constant dense<0.000000e+00> : vector<8x8xf32>
    %20 = tpu.matmul %19, %17, %cst {dimension_numbers = #tpu.dot_dimension_numbers<[1], [1], [0], [0], [0, 0, 1, 0], [], []>} : vector<8x128xbf16>, vector<8x128xbf16>, vector<8x8xf32> -> vector<8x8xf32>
    %21 = vector.broadcast %6 : vector<1x8xf32> to vector<8x8xf32>
    %22 = arith.addf %20, %21 : vector<8x8xf32>
    %c0_16 = arith.constant 0 : index
    %c0_17 = arith.constant 0 : index
    %c0_18 = arith.constant 0 : index
    %23 = vector.load %arg14[%c0_16, %c0_17, %c0_18] : memref<2x8x1xf32, #tpu.memory_space<vmem>>, vector<1x8x1xf32>
    %24 = vector.shape_cast %23 : vector<1x8x1xf32> to vector<8x1xf32>
    %cst_19 = arith.constant dense<0xFF800000> : vector<8xf32>
    %25 = vector.multi_reduction <maximumf>, %22, %cst_19 [1] : vector<8x8xf32> to vector<8xf32>
    %26 = vector.shape_cast %25 : vector<8xf32> to vector<8x1xf32>
    %27 = arith.maximumf %24, %26 : vector<8x1xf32>
    %28 = arith.subf %24, %27 : vector<8x1xf32>
    %29 = math.exp %28 : vector<8x1xf32>
    %30 = vector.broadcast %27 : vector<8x1xf32> to vector<8x8xf32>
    %31 = arith.subf %22, %30 : vector<8x8xf32>
    %32 = math.exp %31 : vector<8x8xf32>
    %c0_20 = arith.constant 0 : index
    %c0_21 = arith.constant 0 : index
    %c0_22 = arith.constant 0 : index
    %33 = vector.load %arg15[%c0_20, %c0_21, %c0_22] : memref<2x8x1xf32, #tpu.memory_space<vmem>>, vector<1x8x1xf32>
    %34 = vector.shape_cast %33 : vector<1x8x1xf32> to vector<8x1xf32>
    %35 = arith.mulf %29, %34 : vector<8x1xf32>
    %cst_23 = arith.constant dense<0.000000e+00> : vector<8xf32>
    %36 = vector.multi_reduction <add>, %32, %cst_23 [1] : vector<8x8xf32> to vector<8xf32>
    %37 = vector.shape_cast %36 : vector<8xf32> to vector<8x1xf32>
    %38 = arith.addf %35, %37 : vector<8x1xf32>
    %c0_24 = arith.constant 0 : index
    %c0_25 = arith.constant 0 : index
    %c0_26 = arith.constant 0 : index
    %39 = vector.load %arg15[%c0_24, %c0_25, %c0_26] : memref<2x8x1xf32, #tpu.memory_space<vmem>>, vector<1x8x1xf32>
    %40 = vector.shape_cast %39 : vector<1x8x1xf32> to vector<8x1xf32>
    %41 = vector.shape_cast %38 : vector<8x1xf32> to vector<1x8x1xf32>
    tpu.vector_store %arg15[%c0_24, %c0_25, %c0_26], %41 {strides = array<i32>} : memref<2x8x1xf32, #tpu.memory_space<vmem>>, vector<1x8x1xf32>,
    %42 = vector.extract_strided_slice %10 {offsets = [0, 0], sizes = [8, 128], strides = [1, 1]} : vector<8x256xbf16> to vector<8x128xbf16>
    %c0_27 = arith.constant 0 : index
    %c0_28 = arith.constant 0 : index
    %c0_29 = arith.constant 0 : index
    %43 = vector.load %arg16[%c0_27, %c0_28, %c0_29] : memref<2x8x128xf32, #tpu.memory_space<vmem>>, vector<1x8x128xf32>
    %44 = vector.shape_cast %43 : vector<1x8x128xf32> to vector<8x128xf32>
    %45 = vector.broadcast %29 : vector<8x1xf32> to vector<8x128xf32>
    %46 = arith.mulf %45, %44 : vector<8x128xf32>
    %47 = arith.truncf %32 : vector<8x8xf32> to vector<8x8xbf16>
    %cst_30 = arith.constant dense<0.000000e+00> : vector<8x128xf32>
    %48 = tpu.matmul %47, %42, %cst_30 {dimension_numbers = #tpu.dot_dimension_numbers<[1], [0], [0], [1], [0, 0, 1, 1], [], []>} : vector<8x8xbf16>, vector<8x128xbf16>, vector<8x128xf32> -> vector<8x128xf32>
    %49 = arith.addf %46, %48 : vector<8x128xf32>
    %c0_31 = arith.constant 0 : index
    %c0_32 = arith.constant 0 : index
    %c0_33 = arith.constant 0 : index
    %50 = vector.load %arg16[%c0_31, %c0_32, %c0_33] : memref<2x8x128xf32, #tpu.memory_space<vmem>>, vector<1x8x128xf32>
    %51 = vector.shape_cast %50 : vector<1x8x128xf32> to vector<8x128xf32>
    %52 = vector.shape_cast %49 : vector<8x128xf32> to vector<1x8x128xf32>
    tpu.vector_store %arg16[%c0_31, %c0_32, %c0_33], %52 {strides = array<i32>} : memref<2x8x128xf32, #tpu.memory_space<vmem>>, vector<1x8x128xf32>,
    %c0_34 = arith.constant 0 : index
    %c0_35 = arith.constant 0 : index
    %c0_36 = arith.constant 0 : index
    %53 = vector.load %arg14[%c0_34, %c0_35, %c0_36] : memref<2x8x1xf32, #tpu.memory_space<vmem>>, vector<1x8x1xf32>
    %54 = vector.shape_cast %53 : vector<1x8x1xf32> to vector<8x1xf32>
    %55 = vector.shape_cast %27 : vector<8x1xf32> to vector<1x8x1xf32>
    tpu.vector_store %arg14[%c0_34, %c0_35, %c0_36], %55 {strides = array<i32>} : memref<2x8x1xf32, #tpu.memory_space<vmem>>, vector<1x8x1xf32>,
    %56 = vector.extract_strided_slice %8 {offsets = [0, 128], sizes = [8, 128], strides = [1, 1]} : vector<8x256xbf16> to vector<8x128xbf16>
    %57 = arith.extf %56 : vector<8x128xbf16> to vector<8x128xf32>
    %58 = arith.mulf %57, %3 : vector<8x128xf32>
    %c64_i32_37 = arith.constant 64 : i32
    %59 = tpu.dynamic_rotate %57 by %c64_i32_37 dim 1 : vector<8x128xf32>, i32 -> vector<8x128xf32>
    %60 = arith.mulf %59, %4 : vector<8x128xf32>
    %61 = arith.addf %58, %60 : vector<8x128xf32>
    %62 = arith.truncf %61 : vector<8x128xf32> to vector<8x128xbf16>
    %c1 = arith.constant 1 : index
    %c0_38 = arith.constant 0 : index
    %c0_39 = arith.constant 0 : index
    %63 = vector.load %arg13[%c1, %c0_38, %c0_39] : memref<2x8x128xbf16, #tpu.memory_space<vmem>>, vector<1x8x128xbf16>
    %64 = vector.shape_cast %63 : vector<1x8x128xbf16> to vector<8x128xbf16>
    %cst_40 = arith.constant dense<0.000000e+00> : vector<8x8xf32>
    %65 = tpu.matmul %64, %62, %cst_40 {dimension_numbers = #tpu.dot_dimension_numbers<[1], [1], [0], [0], [0, 0, 1, 0], [], []>} : vector<8x128xbf16>, vector<8x128xbf16>, vector<8x8xf32> -> vector<8x8xf32>
    %66 = vector.broadcast %6 : vector<1x8xf32> to vector<8x8xf32>
    %67 = arith.addf %65, %66 : vector<8x8xf32>
    %c1_41 = arith.constant 1 : index
    %c0_42 = arith.constant 0 : index
    %c0_43 = arith.constant 0 : index
    %68 = vector.load %arg14[%c1_41, %c0_42, %c0_43] : memref<2x8x1xf32, #tpu.memory_space<vmem>>, vector<1x8x1xf32>
    %69 = vector.shape_cast %68 : vector<1x8x1xf32> to vector<8x1xf32>
    %cst_44 = arith.constant dense<0xFF800000> : vector<8xf32>
    %70 = vector.multi_reduction <maximumf>, %67, %cst_44 [1] : vector<8x8xf32> to vector<8xf32>
    %71 = vector.shape_cast %70 : vector<8xf32> to vector<8x1xf32>
    %72 = arith.maximumf %69, %71 : vector<8x1xf32>
    %73 = arith.subf %69, %72 : vector<8x1xf32>
    %74 = math.exp %73 : vector<8x1xf32>
    %75 = vector.broadcast %72 : vector<8x1xf32> to vector<8x8xf32>
    %76 = arith.subf %67, %75 : vector<8x8xf32>
    %77 = math.exp %76 : vector<8x8xf32>
    %c1_45 = arith.constant 1 : index
    %c0_46 = arith.constant 0 : index
    %c0_47 = arith.constant 0 : index
    %78 = vector.load %arg15[%c1_45, %c0_46, %c0_47] : memref<2x8x1xf32, #tpu.memory_space<vmem>>, vector<1x8x1xf32>
    %79 = vector.shape_cast %78 : vector<1x8x1xf32> to vector<8x1xf32>
    %80 = arith.mulf %74, %79 : vector<8x1xf32>
    %cst_48 = arith.constant dense<0.000000e+00> : vector<8xf32>
    %81 = vector.multi_reduction <add>, %77, %cst_48 [1] : vector<8x8xf32> to vector<8xf32>
    %82 = vector.shape_cast %81 : vector<8xf32> to vector<8x1xf32>
    %83 = arith.addf %80, %82 : vector<8x1xf32>
    %c1_49 = arith.constant 1 : index
    %c0_50 = arith.constant 0 : index
    %c0_51 = arith.constant 0 : index
    %84 = vector.load %arg15[%c1_49, %c0_50, %c0_51] : memref<2x8x1xf32, #tpu.memory_space<vmem>>, vector<1x8x1xf32>
    %85 = vector.shape_cast %84 : vector<1x8x1xf32> to vector<8x1xf32>
    %86 = vector.shape_cast %83 : vector<8x1xf32> to vector<1x8x1xf32>
    tpu.vector_store %arg15[%c1_49, %c0_50, %c0_51], %86 {strides = array<i32>} : memref<2x8x1xf32, #tpu.memory_space<vmem>>, vector<1x8x1xf32>,
    %87 = vector.extract_strided_slice %10 {offsets = [0, 128], sizes = [8, 128], strides = [1, 1]} : vector<8x256xbf16> to vector<8x128xbf16>
    %c1_52 = arith.constant 1 : index
    %c0_53 = arith.constant 0 : index
    %c0_54 = arith.constant 0 : index
    %88 = vector.load %arg16[%c1_52, %c0_53, %c0_54] : memref<2x8x128xf32, #tpu.memory_space<vmem>>, vector<1x8x128xf32>
    %89 = vector.shape_cast %88 : vector<1x8x128xf32> to vector<8x128xf32>
    %90 = vector.broadcast %74 : vector<8x1xf32> to vector<8x128xf32>
    %91 = arith.mulf %90, %89 : vector<8x128xf32>
    %92 = arith.truncf %77 : vector<8x8xf32> to vector<8x8xbf16>
    %cst_55 = arith.constant dense<0.000000e+00> : vector<8x128xf32>
    %93 = tpu.matmul %92, %87, %cst_55 {dimension_numbers = #tpu.dot_dimension_numbers<[1], [0], [0], [1], [0, 0, 1, 1], [], []>} : vector<8x8xbf16>, vector<8x128xbf16>, vector<8x128xf32> -> vector<8x128xf32>
    %94 = arith.addf %91, %93 : vector<8x128xf32>
    %c1_56 = arith.constant 1 : index
    %c0_57 = arith.constant 0 : index
    %c0_58 = arith.constant 0 : index
    %95 = vector.load %arg16[%c1_56, %c0_57, %c0_58] : memref<2x8x128xf32, #tpu.memory_space<vmem>>, vector<1x8x128xf32>
    %96 = vector.shape_cast %95 : vector<1x8x128xf32> to vector<8x128xf32>
    %97 = vector.shape_cast %94 : vector<8x128xf32> to vector<1x8x128xf32>
    tpu.vector_store %arg16[%c1_56, %c0_57, %c0_58], %97 {strides = array<i32>} : memref<2x8x128xf32, #tpu.memory_space<vmem>>, vector<1x8x128xf32>,
    %c1_59 = arith.constant 1 : index
    %c0_60 = arith.constant 0 : index
    %c0_61 = arith.constant 0 : index
    %98 = vector.load %arg14[%c1_59, %c0_60, %c0_61] : memref<2x8x1xf32, #tpu.memory_space<vmem>>, vector<1x8x1xf32>
    %99 = vector.shape_cast %98 : vector<1x8x1xf32> to vector<8x1xf32>
    %100 = vector.shape_cast %72 : vector<8x1xf32> to vector<1x8x1xf32>
    tpu.vector_store %arg14[%c1_59, %c0_60, %c0_61], %100 {strides = array<i32>} : memref<2x8x1xf32, #tpu.memory_space<vmem>>, vector<1x8x1xf32>,
    %c0_i32_62 = arith.constant 0 : i32
    %101 = arith.cmpi eq, %arg3, %c0_i32_62 : i32
    %102 = arith.extui %101 : i1 to i32
    %c0_i32_63 = arith.constant 0 : i32
    %103 = arith.cmpi ne, %102, %c0_i32_63 : i32
    scf.if %103 {
      %c0_64 = arith.constant 0 : index
      %c0_65 = arith.constant 0 : index
      %c0_66 = arith.constant 0 : index
      %104 = vector.load %arg15[%c0_64, %c0_65, %c0_66] : memref<2x8x1xf32, #tpu.memory_space<vmem>>, vector<1x8x1xf32>
      %105 = vector.shape_cast %104 : vector<1x8x1xf32> to vector<8x1xf32>
      %106 = tpu.reciprocal %105 {approx = true} : vector<8x1xf32> -> vector<8x1xf32>
      %c0_67 = arith.constant 0 : index
      %c0_68 = arith.constant 0 : index
      %c0_69 = arith.constant 0 : index
      %107 = vector.load %arg16[%c0_67, %c0_68, %c0_69] : memref<2x8x128xf32, #tpu.memory_space<vmem>>, vector<1x8x128xf32>
      %108 = vector.shape_cast %107 : vector<1x8x128xf32> to vector<8x128xf32>
      %109 = vector.broadcast %106 : vector<8x1xf32> to vector<8x128xf32>
      %110 = arith.mulf %108, %109 : vector<8x128xf32>
      %111 = arith.truncf %110 : vector<8x128xf32> to vector<8x128xbf16>
      %c1_70 = arith.constant 1 : index
      %c0_71 = arith.constant 0 : index
      %c0_72 = arith.constant 0 : index
      %112 = vector.load %arg15[%c1_70, %c0_71, %c0_72] : memref<2x8x1xf32, #tpu.memory_space<vmem>>, vector<1x8x1xf32>
      %113 = vector.shape_cast %112 : vector<1x8x1xf32> to vector<8x1xf32>
      %114 = tpu.reciprocal %113 {approx = true} : vector<8x1xf32> -> vector<8x1xf32>
      %c1_73 = arith.constant 1 : index
      %c0_74 = arith.constant 0 : index
      %c0_75 = arith.constant 0 : index
      %115 = vector.load %arg16[%c1_73, %c0_74, %c0_75] : memref<2x8x128xf32, #tpu.memory_space<vmem>>, vector<1x8x128xf32>
      %116 = vector.shape_cast %115 : vector<1x8x128xf32> to vector<8x128xf32>
      %117 = vector.broadcast %114 : vector<8x1xf32> to vector<8x128xf32>
      %118 = arith.mulf %116, %117 : vector<8x128xf32>
      %119 = arith.truncf %118 : vector<8x128xf32> to vector<8x128xbf16>
      %120 = tpu.concatenate %111, %119 in 1 : vector<8x128xbf16>, vector<8x128xbf16> -> vector<8x256xbf16>
      %c0_76 = arith.constant 0 : index
      %c0_77 = arith.constant 0 : index
      %c0_78 = arith.constant 0 : index
      %121 = vector.load %arg12[%c0_76, %c0_77, %c0_78] : memref<1x8x256xbf16, #tpu.memory_space<vmem>>, vector<1x8x256xbf16>
      %122 = vector.shape_cast %121 : vector<1x8x256xbf16> to vector<8x256xbf16>
      %123 = vector.shape_cast %120 : vector<8x256xbf16> to vector<1x8x256xbf16>
      tpu.vector_store %arg12[%c0_76, %c0_77, %c0_78], %123 {strides = array<i32>} : memref<1x8x256xbf16, #tpu.memory_space<vmem>>, vector<1x8x256xbf16>,
    } else {
    }
    return
  }
  func.func @transform_0(%arg0: i32, %arg1: i32, %arg2: i32, %arg3: i32) -> (i32, i32, i32) {
    %c0_i32 = arith.constant 0 : i32
    return %arg0, %arg2, %arg1 : i32, i32, i32
  }
  func.func @transform_1(%arg0: i32, %arg1: i32, %arg2: i32, %arg3: i32) -> (i32, i32, i32) {
    %c0_i32 = arith.constant 0 : i32
    return %arg0, %arg3, %arg1 : i32, i32, i32
  }
  func.func @transform_2(%arg0: i32, %arg1: i32, %arg2: i32, %arg3: i32) -> (i32, i32, i32) {
    %c0_i32 = arith.constant 0 : i32
    return %arg0, %arg3, %arg1 : i32, i32, i32
  }
  func.func @transform_3(%arg0: i32, %arg1: i32, %arg2: i32, %arg3: i32) -> (i32, i32) {
    %c0_i32 = arith.constant 0 : i32
    %c0_i32_0 = arith.constant 0 : i32
    return %arg2, %c0_i32 : i32, i32
  }
  func.func @transform_4(%arg0: i32, %arg1: i32, %arg2: i32, %arg3: i32) -> (i32, i32) {
    %c0_i32 = arith.constant 0 : i32
    %c0_i32_0 = arith.constant 0 : i32
    return %arg2, %c0_i32 : i32, i32
  }
  func.func @transform_5(%arg0: i32, %arg1: i32, %arg2: i32, %arg3: i32) -> (i32, i32) {
    %c0_i32 = arith.constant 0 : i32
    %c0_i32_0 = arith.constant 0 : i32
    return %arg3, %c0_i32 : i32, i32
  }
  func.func @transform_6(%arg0: i32, %arg1: i32, %arg2: i32, %arg3: i32) -> (i32, i32) {
    %c0_i32 = arith.constant 0 : i32
    %c0_i32_0 = arith.constant 0 : i32
    return %arg3, %c0_i32 : i32, i32
  }
  func.func @transform_7(%arg0: i32, %arg1: i32, %arg2: i32, %arg3: i32) -> (i32, i32, i32) {
    %c0_i32 = arith.constant 0 : i32
    %c0_i32_0 = arith.constant 0 : i32
    return %arg0, %c0_i32, %arg3 : i32, i32, i32
  }
  func.func @transform_8(%arg0: i32, %arg1: i32, %arg2: i32, %arg3: i32) -> (i32, i32, i32) {
    %c0_i32 = arith.constant 0 : i32
    return %arg0, %arg2, %arg1 : i32, i32, i32
  }
}

module attributes {stable_mosaic.version = 11 : i64} {
  func.func @ln_ffn_res_kernel(%arg0: i32, %arg1: i32, %arg2: memref<16x256xf32, #tpu.memory_space<vmem>>, %arg3: memref<1x256xf32, #tpu.memory_space<vmem>>, %arg4: memref<1x256xf32, #tpu.memory_space<vmem>>, %arg5: memref<256x1024xbf16, #tpu.memory_space<vmem>>, %arg6: memref<1x1024xf32, #tpu.memory_space<vmem>>, %arg7: memref<1024x256xbf16, #tpu.memory_space<vmem>>, %arg8: memref<1x256xf32, #tpu.memory_space<vmem>>, %arg9: memref<16x256xf32, #tpu.memory_space<vmem>>, %arg10: memref<16x256xbf16, #tpu.memory_space<vmem>>, %arg11: memref<16x256xf32, #tpu.memory_space<vmem>>) attributes {dimension_semantics = [#tpu.dimension_semantics<parallel>, #tpu.dimension_semantics<arbitrary>], iteration_bounds = array<i64: 1, 1>, scalar_prefetch = 0 : i64, scratch_operands = 2 : i64, tpu.core_type = #tpu.core_type<tc>, window_params = [{transform_indices = @transform_0, window_bounds = array<i64: 16, 256>}, {pipeline_mode = #tpu.pipeline_mode<synchronous>, transform_indices = @transform_1, window_bounds = array<i64: 1, 256>}, {pipeline_mode = #tpu.pipeline_mode<synchronous>, transform_indices = @transform_2, window_bounds = array<i64: 1, 256>}, {transform_indices = @transform_3, window_bounds = array<i64: 256, 1024>}, {transform_indices = @transform_4, window_bounds = array<i64: 1, 1024>}, {transform_indices = @transform_5, window_bounds = array<i64: 1024, 256>}, {pipeline_mode = #tpu.pipeline_mode<synchronous>, transform_indices = @transform_6, window_bounds = array<i64: 1, 256>}, {transform_indices = @transform_7, window_bounds = array<i64: 16, 256>}]} {
    %c0_i32 = arith.constant 0 : i32
    %0 = arith.cmpi eq, %arg1, %c0_i32 : i32
    %1 = arith.extui %0 : i1 to i32
    %c0_i32_0 = arith.constant 0 : i32
    %2 = arith.cmpi ne, %1, %c0_i32_0 : i32
    scf.if %2 {
      %c0_18 = arith.constant 0 : index
      %c0_19 = arith.constant 0 : index
      %26 = vector.load %arg2[%c0_18, %c0_19] : memref<16x256xf32, #tpu.memory_space<vmem>>, vector<16x256xf32>
      %c0_20 = arith.constant 0 : index
      %c0_21 = arith.constant 0 : index
      %27 = vector.load %arg3[%c0_20, %c0_21] : memref<1x256xf32, #tpu.memory_space<vmem>>, vector<1x256xf32>
      %c0_22 = arith.constant 0 : index
      %c0_23 = arith.constant 0 : index
      %28 = vector.load %arg4[%c0_22, %c0_23] : memref<1x256xf32, #tpu.memory_space<vmem>>, vector<1x256xf32>
      %cst_24 = arith.constant dense<0.000000e+00> : vector<16xf32>
      %29 = vector.multi_reduction <add>, %26, %cst_24 [1] : vector<16x256xf32> to vector<16xf32>
      %30 = vector.shape_cast %29 : vector<16xf32> to vector<16x1xf32>
      %cst_25 = arith.constant 2.560000e+02 : f32
      %31 = vector.broadcast %cst_25 : f32 to vector<16x1xf32>
      %32 = arith.divf %30, %31 : vector<16x1xf32>
      %33 = vector.broadcast %32 : vector<16x1xf32> to vector<16x256xf32>
      %34 = arith.subf %26, %33 : vector<16x256xf32>
      %35 = arith.mulf %34, %34 : vector<16x256xf32>
      %cst_26 = arith.constant dense<0.000000e+00> : vector<16xf32>
      %36 = vector.multi_reduction <add>, %35, %cst_26 [1] : vector<16x256xf32> to vector<16xf32>
      %37 = vector.shape_cast %36 : vector<16xf32> to vector<16x1xf32>
      %cst_27 = arith.constant 2.560000e+02 : f32
      %38 = vector.broadcast %cst_27 : f32 to vector<16x1xf32>
      %39 = arith.divf %37, %38 : vector<16x1xf32>
      %40 = vector.broadcast %32 : vector<16x1xf32> to vector<16x256xf32>
      %41 = arith.subf %26, %40 : vector<16x256xf32>
      %cst_28 = arith.constant 9.99999974E-6 : f32
      %42 = vector.broadcast %cst_28 : f32 to vector<16x1xf32>
      %43 = arith.addf %39, %42 : vector<16x1xf32>
      %44 = math.sqrt %43 : vector<16x1xf32>
      %45 = vector.broadcast %44 : vector<16x1xf32> to vector<16x256xf32>
      %46 = arith.divf %41, %45 : vector<16x256xf32>
      %47 = vector.broadcast %27 : vector<1x256xf32> to vector<16x256xf32>
      %48 = arith.mulf %46, %47 : vector<16x256xf32>
      %49 = vector.broadcast %28 : vector<1x256xf32> to vector<16x256xf32>
      %50 = arith.addf %48, %49 : vector<16x256xf32>
      %51 = arith.truncf %50 : vector<16x256xf32> to vector<16x256xbf16>
      %c0_29 = arith.constant 0 : index
      %c0_30 = arith.constant 0 : index
      %52 = vector.load %arg10[%c0_29, %c0_30] : memref<16x256xbf16, #tpu.memory_space<vmem>>, vector<16x256xbf16>
      tpu.vector_store %arg10[%c0_29, %c0_30], %51 {strides = array<i32>} : memref<16x256xbf16, #tpu.memory_space<vmem>>, vector<16x256xbf16>,
      %cst_31 = arith.constant 0.000000e+00 : f32
      %53 = vector.broadcast %cst_31 : f32 to vector<16x256xf32>
      %c0_32 = arith.constant 0 : index
      %c0_33 = arith.constant 0 : index
      %54 = vector.load %arg11[%c0_32, %c0_33] : memref<16x256xf32, #tpu.memory_space<vmem>>, vector<16x256xf32>
      tpu.vector_store %arg11[%c0_32, %c0_33], %53 {strides = array<i32>} : memref<16x256xf32, #tpu.memory_space<vmem>>, vector<16x256xf32>,
    } else {
    }
    %c0 = arith.constant 0 : index
    %c0_1 = arith.constant 0 : index
    %3 = vector.load %arg10[%c0, %c0_1] : memref<16x256xbf16, #tpu.memory_space<vmem>>, vector<16x256xbf16>
    %c0_2 = arith.constant 0 : index
    %c0_3 = arith.constant 0 : index
    %4 = vector.load %arg5[%c0_2, %c0_3] : memref<256x1024xbf16, #tpu.memory_space<vmem>>, vector<256x1024xbf16>
    %cst = arith.constant dense<0.000000e+00> : vector<16x1024xf32>
    %5 = tpu.matmul %3, %4, %cst {dimension_numbers = #tpu.dot_dimension_numbers<[1], [0], [0], [1], [0, 0, 1, 1], [], []>} : vector<16x256xbf16>, vector<256x1024xbf16>, vector<16x1024xf32> -> vector<16x1024xf32>
    %c0_4 = arith.constant 0 : index
    %c0_5 = arith.constant 0 : index
    %6 = vector.load %arg6[%c0_4, %c0_5] : memref<1x1024xf32, #tpu.memory_space<vmem>>, vector<1x1024xf32>
    %7 = vector.broadcast %6 : vector<1x1024xf32> to vector<16x1024xf32>
    %8 = arith.addf %5, %7 : vector<16x1024xf32>
    %c0_6 = arith.constant 0 : index
    %c0_7 = arith.constant 0 : index
    %9 = vector.load %arg11[%c0_6, %c0_7] : memref<16x256xf32, #tpu.memory_space<vmem>>, vector<16x256xf32>
    %cst_8 = arith.constant 5.000000e-01 : f32
    %10 = vector.broadcast %cst_8 : f32 to vector<16x1024xf32>
    %11 = arith.mulf %8, %10 : vector<16x1024xf32>
    %cst_9 = arith.constant 0.707106769 : f32
    %12 = vector.broadcast %cst_9 : f32 to vector<16x1024xf32>
    %13 = arith.mulf %8, %12 : vector<16x1024xf32>
    %14 = math.erf %13 : vector<16x1024xf32>
    %cst_10 = arith.constant 1.000000e+00 : f32
    %15 = vector.broadcast %cst_10 : f32 to vector<16x1024xf32>
    %16 = arith.addf %15, %14 : vector<16x1024xf32>
    %17 = arith.mulf %11, %16 : vector<16x1024xf32>
    %18 = arith.truncf %17 : vector<16x1024xf32> to vector<16x1024xbf16>
    %c0_11 = arith.constant 0 : index
    %c0_12 = arith.constant 0 : index
    %19 = vector.load %arg7[%c0_11, %c0_12] : memref<1024x256xbf16, #tpu.memory_space<vmem>>, vector<1024x256xbf16>
    %cst_13 = arith.constant dense<0.000000e+00> : vector<16x256xf32>
    %20 = tpu.matmul %18, %19, %cst_13 {dimension_numbers = #tpu.dot_dimension_numbers<[1], [0], [0], [1], [0, 0, 1, 1], [], []>} : vector<16x1024xbf16>, vector<1024x256xbf16>, vector<16x256xf32> -> vector<16x256xf32>
    %21 = arith.addf %9, %20 : vector<16x256xf32>
    %c0_14 = arith.constant 0 : index
    %c0_15 = arith.constant 0 : index
    %22 = vector.load %arg11[%c0_14, %c0_15] : memref<16x256xf32, #tpu.memory_space<vmem>>, vector<16x256xf32>
    tpu.vector_store %arg11[%c0_14, %c0_15], %21 {strides = array<i32>} : memref<16x256xf32, #tpu.memory_space<vmem>>, vector<16x256xf32>,
    %c0_i32_16 = arith.constant 0 : i32
    %23 = arith.cmpi eq, %arg1, %c0_i32_16 : i32
    %24 = arith.extui %23 : i1 to i32
    %c0_i32_17 = arith.constant 0 : i32
    %25 = arith.cmpi ne, %24, %c0_i32_17 : i32
    scf.if %25 {
      %c0_18 = arith.constant 0 : index
      %c0_19 = arith.constant 0 : index
      %26 = vector.load %arg2[%c0_18, %c0_19] : memref<16x256xf32, #tpu.memory_space<vmem>>, vector<16x256xf32>
      %c0_20 = arith.constant 0 : index
      %c0_21 = arith.constant 0 : index
      %27 = vector.load %arg11[%c0_20, %c0_21] : memref<16x256xf32, #tpu.memory_space<vmem>>, vector<16x256xf32>
      %28 = arith.addf %26, %27 : vector<16x256xf32>
      %c0_22 = arith.constant 0 : index
      %c0_23 = arith.constant 0 : index
      %29 = vector.load %arg8[%c0_22, %c0_23] : memref<1x256xf32, #tpu.memory_space<vmem>>, vector<1x256xf32>
      %30 = vector.broadcast %29 : vector<1x256xf32> to vector<16x256xf32>
      %31 = arith.addf %28, %30 : vector<16x256xf32>
      %c0_24 = arith.constant 0 : index
      %c0_25 = arith.constant 0 : index
      %32 = vector.load %arg9[%c0_24, %c0_25] : memref<16x256xf32, #tpu.memory_space<vmem>>, vector<16x256xf32>
      tpu.vector_store %arg9[%c0_24, %c0_25], %31 {strides = array<i32>} : memref<16x256xf32, #tpu.memory_space<vmem>>, vector<16x256xf32>,
    } else {
    }
    return
  }
  func.func @transform_0(%arg0: i32, %arg1: i32) -> (i32, i32) {
    %c0_i32 = arith.constant 0 : i32
    %c0_i32_0 = arith.constant 0 : i32
    return %arg0, %c0_i32 : i32, i32
  }
  func.func @transform_1(%arg0: i32, %arg1: i32) -> (i32, i32) {
    %c0_i32 = arith.constant 0 : i32
    %c0_i32_0 = arith.constant 0 : i32
    %c0_i32_1 = arith.constant 0 : i32
    return %c0_i32, %c0_i32_0 : i32, i32
  }
  func.func @transform_2(%arg0: i32, %arg1: i32) -> (i32, i32) {
    %c0_i32 = arith.constant 0 : i32
    %c0_i32_0 = arith.constant 0 : i32
    %c0_i32_1 = arith.constant 0 : i32
    return %c0_i32, %c0_i32_0 : i32, i32
  }
  func.func @transform_3(%arg0: i32, %arg1: i32) -> (i32, i32) {
    %c0_i32 = arith.constant 0 : i32
    %c0_i32_0 = arith.constant 0 : i32
    return %c0_i32, %arg1 : i32, i32
  }
  func.func @transform_4(%arg0: i32, %arg1: i32) -> (i32, i32) {
    %c0_i32 = arith.constant 0 : i32
    %c0_i32_0 = arith.constant 0 : i32
    return %c0_i32, %arg1 : i32, i32
  }
  func.func @transform_5(%arg0: i32, %arg1: i32) -> (i32, i32) {
    %c0_i32 = arith.constant 0 : i32
    %c0_i32_0 = arith.constant 0 : i32
    return %arg1, %c0_i32 : i32, i32
  }
  func.func @transform_6(%arg0: i32, %arg1: i32) -> (i32, i32) {
    %c0_i32 = arith.constant 0 : i32
    %c0_i32_0 = arith.constant 0 : i32
    %c0_i32_1 = arith.constant 0 : i32
    return %c0_i32, %c0_i32_0 : i32, i32
  }
  func.func @transform_7(%arg0: i32, %arg1: i32) -> (i32, i32) {
    %c0_i32 = arith.constant 0 : i32
    %c0_i32_0 = arith.constant 0 : i32
    return %arg0, %c0_i32 : i32, i32
  }
}

module attributes {stable_mosaic.version = 11 : i64} {
  func.func @ln_qkv_kernel(%arg0: i32, %arg1: memref<16x256xf32, #tpu.memory_space<vmem>>, %arg2: memref<1x256xf32, #tpu.memory_space<vmem>>, %arg3: memref<1x256xf32, #tpu.memory_space<vmem>>, %arg4: memref<256x768xbf16, #tpu.memory_space<vmem>>, %arg5: memref<1x768xf32, #tpu.memory_space<vmem>>, %arg6: memref<16x256xbf16, #tpu.memory_space<vmem>>, %arg7: memref<16x256xbf16, #tpu.memory_space<vmem>>, %arg8: memref<16x256xbf16, #tpu.memory_space<vmem>>) attributes {dimension_semantics = [#tpu.dimension_semantics<parallel>], iteration_bounds = array<i64: 1>, scalar_prefetch = 0 : i64, scratch_operands = 0 : i64, tpu.core_type = #tpu.core_type<tc>, window_params = [{transform_indices = @transform_0, window_bounds = array<i64: 16, 256>}, {pipeline_mode = #tpu.pipeline_mode<synchronous>, transform_indices = @transform_1, window_bounds = array<i64: 1, 256>}, {pipeline_mode = #tpu.pipeline_mode<synchronous>, transform_indices = @transform_2, window_bounds = array<i64: 1, 256>}, {pipeline_mode = #tpu.pipeline_mode<synchronous>, transform_indices = @transform_3, window_bounds = array<i64: 256, 768>}, {pipeline_mode = #tpu.pipeline_mode<synchronous>, transform_indices = @transform_4, window_bounds = array<i64: 1, 768>}, {transform_indices = @transform_5, window_bounds = array<i64: 16, 256>}, {transform_indices = @transform_6, window_bounds = array<i64: 16, 256>}, {transform_indices = @transform_7, window_bounds = array<i64: 16, 256>}]} {
    %c0 = arith.constant 0 : index
    %c0_0 = arith.constant 0 : index
    %0 = vector.load %arg1[%c0, %c0_0] : memref<16x256xf32, #tpu.memory_space<vmem>>, vector<16x256xf32>
    %c0_1 = arith.constant 0 : index
    %c0_2 = arith.constant 0 : index
    %1 = vector.load %arg2[%c0_1, %c0_2] : memref<1x256xf32, #tpu.memory_space<vmem>>, vector<1x256xf32>
    %c0_3 = arith.constant 0 : index
    %c0_4 = arith.constant 0 : index
    %2 = vector.load %arg3[%c0_3, %c0_4] : memref<1x256xf32, #tpu.memory_space<vmem>>, vector<1x256xf32>
    %cst = arith.constant dense<0.000000e+00> : vector<16xf32>
    %3 = vector.multi_reduction <add>, %0, %cst [1] : vector<16x256xf32> to vector<16xf32>
    %4 = vector.shape_cast %3 : vector<16xf32> to vector<16x1xf32>
    %cst_5 = arith.constant 2.560000e+02 : f32
    %5 = vector.broadcast %cst_5 : f32 to vector<16x1xf32>
    %6 = arith.divf %4, %5 : vector<16x1xf32>
    %7 = vector.broadcast %6 : vector<16x1xf32> to vector<16x256xf32>
    %8 = arith.subf %0, %7 : vector<16x256xf32>
    %9 = arith.mulf %8, %8 : vector<16x256xf32>
    %cst_6 = arith.constant dense<0.000000e+00> : vector<16xf32>
    %10 = vector.multi_reduction <add>, %9, %cst_6 [1] : vector<16x256xf32> to vector<16xf32>
    %11 = vector.shape_cast %10 : vector<16xf32> to vector<16x1xf32>
    %cst_7 = arith.constant 2.560000e+02 : f32
    %12 = vector.broadcast %cst_7 : f32 to vector<16x1xf32>
    %13 = arith.divf %11, %12 : vector<16x1xf32>
    %14 = vector.broadcast %6 : vector<16x1xf32> to vector<16x256xf32>
    %15 = arith.subf %0, %14 : vector<16x256xf32>
    %cst_8 = arith.constant 9.99999974E-6 : f32
    %16 = vector.broadcast %cst_8 : f32 to vector<16x1xf32>
    %17 = arith.addf %13, %16 : vector<16x1xf32>
    %18 = math.sqrt %17 : vector<16x1xf32>
    %19 = vector.broadcast %18 : vector<16x1xf32> to vector<16x256xf32>
    %20 = arith.divf %15, %19 : vector<16x256xf32>
    %21 = vector.broadcast %1 : vector<1x256xf32> to vector<16x256xf32>
    %22 = arith.mulf %20, %21 : vector<16x256xf32>
    %23 = vector.broadcast %2 : vector<1x256xf32> to vector<16x256xf32>
    %24 = arith.addf %22, %23 : vector<16x256xf32>
    %25 = arith.truncf %24 : vector<16x256xf32> to vector<16x256xbf16>
    %c0_9 = arith.constant 0 : index
    %c0_10 = arith.constant 0 : index
    %26 = vector.load %arg4[%c0_9, %c0_10] : memref<256x768xbf16, #tpu.memory_space<vmem>>, vector<256x768xbf16>
    %cst_11 = arith.constant dense<0.000000e+00> : vector<16x768xf32>
    %27 = tpu.matmul %25, %26, %cst_11 {dimension_numbers = #tpu.dot_dimension_numbers<[1], [0], [0], [1], [0, 0, 1, 1], [], []>} : vector<16x256xbf16>, vector<256x768xbf16>, vector<16x768xf32> -> vector<16x768xf32>
    %c0_12 = arith.constant 0 : index
    %c0_13 = arith.constant 0 : index
    %28 = vector.load %arg5[%c0_12, %c0_13] : memref<1x768xf32, #tpu.memory_space<vmem>>, vector<1x768xf32>
    %29 = vector.broadcast %28 : vector<1x768xf32> to vector<16x768xf32>
    %30 = arith.addf %27, %29 : vector<16x768xf32>
    %31 = vector.extract_strided_slice %30 {offsets = [0, 0], sizes = [16, 256], strides = [1, 1]} : vector<16x768xf32> to vector<16x256xf32>
    %32 = arith.truncf %31 : vector<16x256xf32> to vector<16x256xbf16>
    %c0_14 = arith.constant 0 : index
    %c0_15 = arith.constant 0 : index
    %33 = vector.load %arg6[%c0_14, %c0_15] : memref<16x256xbf16, #tpu.memory_space<vmem>>, vector<16x256xbf16>
    tpu.vector_store %arg6[%c0_14, %c0_15], %32 {strides = array<i32>} : memref<16x256xbf16, #tpu.memory_space<vmem>>, vector<16x256xbf16>,
    %34 = vector.extract_strided_slice %30 {offsets = [0, 256], sizes = [16, 256], strides = [1, 1]} : vector<16x768xf32> to vector<16x256xf32>
    %35 = arith.truncf %34 : vector<16x256xf32> to vector<16x256xbf16>
    %c0_16 = arith.constant 0 : index
    %c0_17 = arith.constant 0 : index
    %36 = vector.load %arg7[%c0_16, %c0_17] : memref<16x256xbf16, #tpu.memory_space<vmem>>, vector<16x256xbf16>
    tpu.vector_store %arg7[%c0_16, %c0_17], %35 {strides = array<i32>} : memref<16x256xbf16, #tpu.memory_space<vmem>>, vector<16x256xbf16>,
    %37 = vector.extract_strided_slice %30 {offsets = [0, 512], sizes = [16, 256], strides = [1, 1]} : vector<16x768xf32> to vector<16x256xf32>
    %38 = arith.truncf %37 : vector<16x256xf32> to vector<16x256xbf16>
    %c0_18 = arith.constant 0 : index
    %c0_19 = arith.constant 0 : index
    %39 = vector.load %arg8[%c0_18, %c0_19] : memref<16x256xbf16, #tpu.memory_space<vmem>>, vector<16x256xbf16>
    tpu.vector_store %arg8[%c0_18, %c0_19], %38 {strides = array<i32>} : memref<16x256xbf16, #tpu.memory_space<vmem>>, vector<16x256xbf16>,
    return
  }
  func.func @transform_0(%arg0: i32) -> (i32, i32) {
    %c0_i32 = arith.constant 0 : i32
    %c0_i32_0 = arith.constant 0 : i32
    return %arg0, %c0_i32 : i32, i32
  }
  func.func @transform_1(%arg0: i32) -> (i32, i32) {
    %c0_i32 = arith.constant 0 : i32
    %c0_i32_0 = arith.constant 0 : i32
    %c0_i32_1 = arith.constant 0 : i32
    return %c0_i32, %c0_i32_0 : i32, i32
  }
  func.func @transform_2(%arg0: i32) -> (i32, i32) {
    %c0_i32 = arith.constant 0 : i32
    %c0_i32_0 = arith.constant 0 : i32
    %c0_i32_1 = arith.constant 0 : i32
    return %c0_i32, %c0_i32_0 : i32, i32
  }
  func.func @transform_3(%arg0: i32) -> (i32, i32) {
    %c0_i32 = arith.constant 0 : i32
    %c0_i32_0 = arith.constant 0 : i32
    %c0_i32_1 = arith.constant 0 : i32
    return %c0_i32, %c0_i32_0 : i32, i32
  }
  func.func @transform_4(%arg0: i32) -> (i32, i32) {
    %c0_i32 = arith.constant 0 : i32
    %c0_i32_0 = arith.constant 0 : i32
    %c0_i32_1 = arith.constant 0 : i32
    return %c0_i32, %c0_i32_0 : i32, i32
  }
  func.func @transform_5(%arg0: i32) -> (i32, i32) {
    %c0_i32 = arith.constant 0 : i32
    %c0_i32_0 = arith.constant 0 : i32
    return %arg0, %c0_i32 : i32, i32
  }
  func.func @transform_6(%arg0: i32) -> (i32, i32) {
    %c0_i32 = arith.constant 0 : i32
    %c0_i32_0 = arith.constant 0 : i32
    return %arg0, %c0_i32 : i32, i32
  }
  func.func @transform_7(%arg0: i32) -> (i32, i32) {
    %c0_i32 = arith.constant 0 : i32
    %c0_i32_0 = arith.constant 0 : i32
    return %arg0, %c0_i32 : i32, i32
  }
}

module attributes {stable_mosaic.version = 11 : i64} {
  func.func @ln_ffn_res_kernel(%arg0: i32, %arg1: i32, %arg2: memref<16x256xf32, #tpu.memory_space<vmem>>, %arg3: memref<1x256xf32, #tpu.memory_space<vmem>>, %arg4: memref<1x256xf32, #tpu.memory_space<vmem>>, %arg5: memref<256x1024xbf16, #tpu.memory_space<vmem>>, %arg6: memref<1x1024xf32, #tpu.memory_space<vmem>>, %arg7: memref<1024x256xbf16, #tpu.memory_space<vmem>>, %arg8: memref<1x256xf32, #tpu.memory_space<vmem>>, %arg9: memref<16x256xf32, #tpu.memory_space<vmem>>, %arg10: memref<16x256xbf16, #tpu.memory_space<vmem>>, %arg11: memref<16x256xf32, #tpu.memory_space<vmem>>) attributes {dimension_semantics = [#tpu.dimension_semantics<parallel>, #tpu.dimension_semantics<arbitrary>], iteration_bounds = array<i64: 1, 1>, scalar_prefetch = 0 : i64, scratch_operands = 2 : i64, tpu.core_type = #tpu.core_type<tc>, window_params = [{transform_indices = @transform_0, window_bounds = array<i64: 16, 256>}, {pipeline_mode = #tpu.pipeline_mode<synchronous>, transform_indices = @transform_1, window_bounds = array<i64: 1, 256>}, {pipeline_mode = #tpu.pipeline_mode<synchronous>, transform_indices = @transform_2, window_bounds = array<i64: 1, 256>}, {transform_indices = @transform_3, window_bounds = array<i64: 256, 1024>}, {transform_indices = @transform_4, window_bounds = array<i64: 1, 1024>}, {transform_indices = @transform_5, window_bounds = array<i64: 1024, 256>}, {pipeline_mode = #tpu.pipeline_mode<synchronous>, transform_indices = @transform_6, window_bounds = array<i64: 1, 256>}, {transform_indices = @transform_7, window_bounds = array<i64: 16, 256>}]} {
    %c0_i32 = arith.constant 0 : i32
    %0 = arith.cmpi eq, %arg1, %c0_i32 : i32
    %1 = arith.extui %0 : i1 to i32
    %c0_i32_0 = arith.constant 0 : i32
    %2 = arith.cmpi ne, %1, %c0_i32_0 : i32
    scf.if %2 {
      %c0_18 = arith.constant 0 : index
      %c0_19 = arith.constant 0 : index
      %26 = vector.load %arg2[%c0_18, %c0_19] : memref<16x256xf32, #tpu.memory_space<vmem>>, vector<16x256xf32>
      %c0_20 = arith.constant 0 : index
      %c0_21 = arith.constant 0 : index
      %27 = vector.load %arg3[%c0_20, %c0_21] : memref<1x256xf32, #tpu.memory_space<vmem>>, vector<1x256xf32>
      %c0_22 = arith.constant 0 : index
      %c0_23 = arith.constant 0 : index
      %28 = vector.load %arg4[%c0_22, %c0_23] : memref<1x256xf32, #tpu.memory_space<vmem>>, vector<1x256xf32>
      %cst_24 = arith.constant dense<0.000000e+00> : vector<16xf32>
      %29 = vector.multi_reduction <add>, %26, %cst_24 [1] : vector<16x256xf32> to vector<16xf32>
      %30 = vector.shape_cast %29 : vector<16xf32> to vector<16x1xf32>
      %cst_25 = arith.constant 2.560000e+02 : f32
      %31 = vector.broadcast %cst_25 : f32 to vector<16x1xf32>
      %32 = arith.divf %30, %31 : vector<16x1xf32>
      %33 = vector.broadcast %32 : vector<16x1xf32> to vector<16x256xf32>
      %34 = arith.subf %26, %33 : vector<16x256xf32>
      %35 = arith.mulf %34, %34 : vector<16x256xf32>
      %cst_26 = arith.constant dense<0.000000e+00> : vector<16xf32>
      %36 = vector.multi_reduction <add>, %35, %cst_26 [1] : vector<16x256xf32> to vector<16xf32>
      %37 = vector.shape_cast %36 : vector<16xf32> to vector<16x1xf32>
      %cst_27 = arith.constant 2.560000e+02 : f32
      %38 = vector.broadcast %cst_27 : f32 to vector<16x1xf32>
      %39 = arith.divf %37, %38 : vector<16x1xf32>
      %40 = vector.broadcast %32 : vector<16x1xf32> to vector<16x256xf32>
      %41 = arith.subf %26, %40 : vector<16x256xf32>
      %cst_28 = arith.constant 9.99999974E-6 : f32
      %42 = vector.broadcast %cst_28 : f32 to vector<16x1xf32>
      %43 = arith.addf %39, %42 : vector<16x1xf32>
      %44 = math.sqrt %43 : vector<16x1xf32>
      %45 = vector.broadcast %44 : vector<16x1xf32> to vector<16x256xf32>
      %46 = arith.divf %41, %45 : vector<16x256xf32>
      %47 = vector.broadcast %27 : vector<1x256xf32> to vector<16x256xf32>
      %48 = arith.mulf %46, %47 : vector<16x256xf32>
      %49 = vector.broadcast %28 : vector<1x256xf32> to vector<16x256xf32>
      %50 = arith.addf %48, %49 : vector<16x256xf32>
      %51 = arith.truncf %50 : vector<16x256xf32> to vector<16x256xbf16>
      %c0_29 = arith.constant 0 : index
      %c0_30 = arith.constant 0 : index
      %52 = vector.load %arg10[%c0_29, %c0_30] : memref<16x256xbf16, #tpu.memory_space<vmem>>, vector<16x256xbf16>
      tpu.vector_store %arg10[%c0_29, %c0_30], %51 {strides = array<i32>} : memref<16x256xbf16, #tpu.memory_space<vmem>>, vector<16x256xbf16>,
      %cst_31 = arith.constant 0.000000e+00 : f32
      %53 = vector.broadcast %cst_31 : f32 to vector<16x256xf32>
      %c0_32 = arith.constant 0 : index
      %c0_33 = arith.constant 0 : index
      %54 = vector.load %arg11[%c0_32, %c0_33] : memref<16x256xf32, #tpu.memory_space<vmem>>, vector<16x256xf32>
      tpu.vector_store %arg11[%c0_32, %c0_33], %53 {strides = array<i32>} : memref<16x256xf32, #tpu.memory_space<vmem>>, vector<16x256xf32>,
    } else {
    }
    %c0 = arith.constant 0 : index
    %c0_1 = arith.constant 0 : index
    %3 = vector.load %arg10[%c0, %c0_1] : memref<16x256xbf16, #tpu.memory_space<vmem>>, vector<16x256xbf16>
    %c0_2 = arith.constant 0 : index
    %c0_3 = arith.constant 0 : index
    %4 = vector.load %arg5[%c0_2, %c0_3] : memref<256x1024xbf16, #tpu.memory_space<vmem>>, vector<256x1024xbf16>
    %cst = arith.constant dense<0.000000e+00> : vector<16x1024xf32>
    %5 = tpu.matmul %3, %4, %cst {dimension_numbers = #tpu.dot_dimension_numbers<[1], [0], [0], [1], [0, 0, 1, 1], [], []>} : vector<16x256xbf16>, vector<256x1024xbf16>, vector<16x1024xf32> -> vector<16x1024xf32>
    %c0_4 = arith.constant 0 : index
    %c0_5 = arith.constant 0 : index
    %6 = vector.load %arg6[%c0_4, %c0_5] : memref<1x1024xf32, #tpu.memory_space<vmem>>, vector<1x1024xf32>
    %7 = vector.broadcast %6 : vector<1x1024xf32> to vector<16x1024xf32>
    %8 = arith.addf %5, %7 : vector<16x1024xf32>
    %c0_6 = arith.constant 0 : index
    %c0_7 = arith.constant 0 : index
    %9 = vector.load %arg11[%c0_6, %c0_7] : memref<16x256xf32, #tpu.memory_space<vmem>>, vector<16x256xf32>
    %cst_8 = arith.constant 5.000000e-01 : f32
    %10 = vector.broadcast %cst_8 : f32 to vector<16x1024xf32>
    %11 = arith.mulf %8, %10 : vector<16x1024xf32>
    %cst_9 = arith.constant 0.707106769 : f32
    %12 = vector.broadcast %cst_9 : f32 to vector<16x1024xf32>
    %13 = arith.mulf %8, %12 : vector<16x1024xf32>
    %14 = math.erf %13 : vector<16x1024xf32>
    %cst_10 = arith.constant 1.000000e+00 : f32
    %15 = vector.broadcast %cst_10 : f32 to vector<16x1024xf32>
    %16 = arith.addf %15, %14 : vector<16x1024xf32>
    %17 = arith.mulf %11, %16 : vector<16x1024xf32>
    %18 = arith.truncf %17 : vector<16x1024xf32> to vector<16x1024xbf16>
    %c0_11 = arith.constant 0 : index
    %c0_12 = arith.constant 0 : index
    %19 = vector.load %arg7[%c0_11, %c0_12] : memref<1024x256xbf16, #tpu.memory_space<vmem>>, vector<1024x256xbf16>
    %cst_13 = arith.constant dense<0.000000e+00> : vector<16x256xf32>
    %20 = tpu.matmul %18, %19, %cst_13 {dimension_numbers = #tpu.dot_dimension_numbers<[1], [0], [0], [1], [0, 0, 1, 1], [], []>} : vector<16x1024xbf16>, vector<1024x256xbf16>, vector<16x256xf32> -> vector<16x256xf32>
    %21 = arith.addf %9, %20 : vector<16x256xf32>
    %c0_14 = arith.constant 0 : index
    %c0_15 = arith.constant 0 : index
    %22 = vector.load %arg11[%c0_14, %c0_15] : memref<16x256xf32, #tpu.memory_space<vmem>>, vector<16x256xf32>
    tpu.vector_store %arg11[%c0_14, %c0_15], %21 {strides = array<i32>} : memref<16x256xf32, #tpu.memory_space<vmem>>, vector<16x256xf32>,
    %c0_i32_16 = arith.constant 0 : i32
    %23 = arith.cmpi eq, %arg1, %c0_i32_16 : i32
    %24 = arith.extui %23 : i1 to i32
    %c0_i32_17 = arith.constant 0 : i32
    %25 = arith.cmpi ne, %24, %c0_i32_17 : i32
    scf.if %25 {
      %c0_18 = arith.constant 0 : index
      %c0_19 = arith.constant 0 : index
      %26 = vector.load %arg2[%c0_18, %c0_19] : memref<16x256xf32, #tpu.memory_space<vmem>>, vector<16x256xf32>
      %c0_20 = arith.constant 0 : index
      %c0_21 = arith.constant 0 : index
      %27 = vector.load %arg11[%c0_20, %c0_21] : memref<16x256xf32, #tpu.memory_space<vmem>>, vector<16x256xf32>
      %28 = arith.addf %26, %27 : vector<16x256xf32>
      %c0_22 = arith.constant 0 : index
      %c0_23 = arith.constant 0 : index
      %29 = vector.load %arg8[%c0_22, %c0_23] : memref<1x256xf32, #tpu.memory_space<vmem>>, vector<1x256xf32>
      %30 = vector.broadcast %29 : vector<1x256xf32> to vector<16x256xf32>
      %31 = arith.addf %28, %30 : vector<16x256xf32>
      %c0_24 = arith.constant 0 : index
      %c0_25 = arith.constant 0 : index
      %32 = vector.load %arg9[%c0_24, %c0_25] : memref<16x256xf32, #tpu.memory_space<vmem>>, vector<16x256xf32>
      tpu.vector_store %arg9[%c0_24, %c0_25], %31 {strides = array<i32>} : memref<16x256xf32, #tpu.memory_space<vmem>>, vector<16x256xf32>,
    } else {
    }
    return
  }
  func.func @transform_0(%arg0: i32, %arg1: i32) -> (i32, i32) {
    %c0_i32 = arith.constant 0 : i32
    %c0_i32_0 = arith.constant 0 : i32
    return %arg0, %c0_i32 : i32, i32
  }
  func.func @transform_1(%arg0: i32, %arg1: i32) -> (i32, i32) {
    %c0_i32 = arith.constant 0 : i32
    %c0_i32_0 = arith.constant 0 : i32
    %c0_i32_1 = arith.constant 0 : i32
    return %c0_i32, %c0_i32_0 : i32, i32
  }
  func.func @transform_2(%arg0: i32, %arg1: i32) -> (i32, i32) {
    %c0_i32 = arith.constant 0 : i32
    %c0_i32_0 = arith.constant 0 : i32
    %c0_i32_1 = arith.constant 0 : i32
    return %c0_i32, %c0_i32_0 : i32, i32
  }
  func.func @transform_3(%arg0: i32, %arg1: i32) -> (i32, i32) {
    %c0_i32 = arith.constant 0 : i32
    %c0_i32_0 = arith.constant 0 : i32
    return %c0_i32, %arg1 : i32, i32
  }
  func.func @transform_4(%arg0: i32, %arg1: i32) -> (i32, i32) {
    %c0_i32 = arith.constant 0 : i32
    %c0_i32_0 = arith.constant 0 : i32
    return %c0_i32, %arg1 : i32, i32
  }
  func.func @transform_5(%arg0: i32, %arg1: i32) -> (i32, i32) {
    %c0_i32 = arith.constant 0 : i32
    %c0_i32_0 = arith.constant 0 : i32
    return %arg1, %c0_i32 : i32, i32
  }
  func.func @transform_6(%arg0: i32, %arg1: i32) -> (i32, i32) {
    %c0_i32 = arith.constant 0 : i32
    %c0_i32_0 = arith.constant 0 : i32
    %c0_i32_1 = arith.constant 0 : i32
    return %c0_i32, %c0_i32_0 : i32, i32
  }
  func.func @transform_7(%arg0: i32, %arg1: i32) -> (i32, i32) {
    %c0_i32 = arith.constant 0 : i32
    %c0_i32_0 = arith.constant 0 : i32
    return %arg0, %c0_i32 : i32, i32
  }
}

module attributes {stable_mosaic.version = 11 : i64} {
  func.func @layernorm_kernel(%arg0: i32, %arg1: memref<16x256xf32, #tpu.memory_space<vmem>>, %arg2: memref<1x256xf32, #tpu.memory_space<vmem>>, %arg3: memref<1x256xf32, #tpu.memory_space<vmem>>, %arg4: memref<16x256xf32, #tpu.memory_space<vmem>>) attributes {dimension_semantics = [#tpu.dimension_semantics<parallel>], iteration_bounds = array<i64: 1>, scalar_prefetch = 0 : i64, scratch_operands = 0 : i64, tpu.core_type = #tpu.core_type<tc>, window_params = [{transform_indices = @transform_0, window_bounds = array<i64: 16, 256>}, {pipeline_mode = #tpu.pipeline_mode<synchronous>, transform_indices = @transform_1, window_bounds = array<i64: 1, 256>}, {pipeline_mode = #tpu.pipeline_mode<synchronous>, transform_indices = @transform_2, window_bounds = array<i64: 1, 256>}, {transform_indices = @transform_3, window_bounds = array<i64: 16, 256>}]} {
    %c0 = arith.constant 0 : index
    %c0_0 = arith.constant 0 : index
    %0 = vector.load %arg1[%c0, %c0_0] : memref<16x256xf32, #tpu.memory_space<vmem>>, vector<16x256xf32>
    %c0_1 = arith.constant 0 : index
    %c0_2 = arith.constant 0 : index
    %1 = vector.load %arg2[%c0_1, %c0_2] : memref<1x256xf32, #tpu.memory_space<vmem>>, vector<1x256xf32>
    %c0_3 = arith.constant 0 : index
    %c0_4 = arith.constant 0 : index
    %2 = vector.load %arg3[%c0_3, %c0_4] : memref<1x256xf32, #tpu.memory_space<vmem>>, vector<1x256xf32>
    %cst = arith.constant dense<0.000000e+00> : vector<16xf32>
    %3 = vector.multi_reduction <add>, %0, %cst [1] : vector<16x256xf32> to vector<16xf32>
    %4 = vector.shape_cast %3 : vector<16xf32> to vector<16x1xf32>
    %cst_5 = arith.constant 2.560000e+02 : f32
    %5 = vector.broadcast %cst_5 : f32 to vector<16x1xf32>
    %6 = arith.divf %4, %5 : vector<16x1xf32>
    %7 = vector.broadcast %6 : vector<16x1xf32> to vector<16x256xf32>
    %8 = arith.subf %0, %7 : vector<16x256xf32>
    %9 = arith.mulf %8, %8 : vector<16x256xf32>
    %cst_6 = arith.constant dense<0.000000e+00> : vector<16xf32>
    %10 = vector.multi_reduction <add>, %9, %cst_6 [1] : vector<16x256xf32> to vector<16xf32>
    %11 = vector.shape_cast %10 : vector<16xf32> to vector<16x1xf32>
    %cst_7 = arith.constant 2.560000e+02 : f32
    %12 = vector.broadcast %cst_7 : f32 to vector<16x1xf32>
    %13 = arith.divf %11, %12 : vector<16x1xf32>
    %14 = vector.broadcast %6 : vector<16x1xf32> to vector<16x256xf32>
    %15 = arith.subf %0, %14 : vector<16x256xf32>
    %cst_8 = arith.constant 9.99999974E-6 : f32
    %16 = vector.broadcast %cst_8 : f32 to vector<16x1xf32>
    %17 = arith.addf %13, %16 : vector<16x1xf32>
    %18 = math.sqrt %17 : vector<16x1xf32>
    %19 = vector.broadcast %18 : vector<16x1xf32> to vector<16x256xf32>
    %20 = arith.divf %15, %19 : vector<16x256xf32>
    %21 = vector.broadcast %1 : vector<1x256xf32> to vector<16x256xf32>
    %22 = arith.mulf %20, %21 : vector<16x256xf32>
    %23 = vector.broadcast %2 : vector<1x256xf32> to vector<16x256xf32>
    %24 = arith.addf %22, %23 : vector<16x256xf32>
    %c0_9 = arith.constant 0 : index
    %c0_10 = arith.constant 0 : index
    %25 = vector.load %arg4[%c0_9, %c0_10] : memref<16x256xf32, #tpu.memory_space<vmem>>, vector<16x256xf32>
    tpu.vector_store %arg4[%c0_9, %c0_10], %24 {strides = array<i32>} : memref<16x256xf32, #tpu.memory_space<vmem>>, vector<16x256xf32>,
    return
  }
  func.func @transform_0(%arg0: i32) -> (i32, i32) {
    %c0_i32 = arith.constant 0 : i32
    %c0_i32_0 = arith.constant 0 : i32
    return %arg0, %c0_i32 : i32, i32
  }
  func.func @transform_1(%arg0: i32) -> (i32, i32) {
    %c0_i32 = arith.constant 0 : i32
    %c0_i32_0 = arith.constant 0 : i32
    %c0_i32_1 = arith.constant 0 : i32
    return %c0_i32, %c0_i32_0 : i32, i32
  }
  func.func @transform_2(%arg0: i32) -> (i32, i32) {
    %c0_i32 = arith.constant 0 : i32
    %c0_i32_0 = arith.constant 0 : i32
    %c0_i32_1 = arith.constant 0 : i32
    return %c0_i32, %c0_i32_0 : i32, i32
  }
  func.func @transform_3(%arg0: i32) -> (i32, i32) {
    %c0_i32 = arith.constant 0 : i32
    %c0_i32_0 = arith.constant 0 : i32
    return %arg0, %c0_i32 : i32, i32
  }
}

module attributes {stable_mosaic.version = 11 : i64} {
  func.func @lmhead_kernel(%arg0: i32, %arg1: memref<16x256xf32, #tpu.memory_space<vmem>>, %arg2: memref<256x256xbf16, #tpu.memory_space<vmem>>, %arg3: memref<1x256xf32, #tpu.memory_space<vmem>>, %arg4: memref<1x256xf32, #tpu.memory_space<vmem>>, %arg5: memref<1x256xf32, #tpu.memory_space<vmem>>, %arg6: memref<256x128xbf16, #tpu.memory_space<vmem>>, %arg7: memref<1x128xf32, #tpu.memory_space<vmem>>, %arg8: memref<16x128xf32, #tpu.memory_space<vmem>>) attributes {dimension_semantics = [#tpu.dimension_semantics<parallel>], iteration_bounds = array<i64: 1>, scalar_prefetch = 0 : i64, scratch_operands = 0 : i64, tpu.core_type = #tpu.core_type<tc>, window_params = [{transform_indices = @transform_0, window_bounds = array<i64: 16, 256>}, {pipeline_mode = #tpu.pipeline_mode<synchronous>, transform_indices = @transform_1, window_bounds = array<i64: 256, 256>}, {pipeline_mode = #tpu.pipeline_mode<synchronous>, transform_indices = @transform_2, window_bounds = array<i64: 1, 256>}, {pipeline_mode = #tpu.pipeline_mode<synchronous>, transform_indices = @transform_3, window_bounds = array<i64: 1, 256>}, {pipeline_mode = #tpu.pipeline_mode<synchronous>, transform_indices = @transform_4, window_bounds = array<i64: 1, 256>}, {pipeline_mode = #tpu.pipeline_mode<synchronous>, transform_indices = @transform_5, window_bounds = array<i64: 256, 128>}, {pipeline_mode = #tpu.pipeline_mode<synchronous>, transform_indices = @transform_6, window_bounds = array<i64: 1, 128>}, {transform_indices = @transform_7, window_bounds = array<i64: 16, 128>}]} {
    %c0 = arith.constant 0 : index
    %c0_0 = arith.constant 0 : index
    %0 = vector.load %arg1[%c0, %c0_0] : memref<16x256xf32, #tpu.memory_space<vmem>>, vector<16x256xf32>
    %1 = arith.truncf %0 : vector<16x256xf32> to vector<16x256xbf16>
    %c0_1 = arith.constant 0 : index
    %c0_2 = arith.constant 0 : index
    %2 = vector.load %arg2[%c0_1, %c0_2] : memref<256x256xbf16, #tpu.memory_space<vmem>>, vector<256x256xbf16>
    %cst = arith.constant dense<0.000000e+00> : vector<16x256xf32>
    %3 = tpu.matmul %1, %2, %cst {dimension_numbers = #tpu.dot_dimension_numbers<[1], [0], [0], [1], [0, 0, 1, 1], [], []>} : vector<16x256xbf16>, vector<256x256xbf16>, vector<16x256xf32> -> vector<16x256xf32>
    %c0_3 = arith.constant 0 : index
    %c0_4 = arith.constant 0 : index
    %4 = vector.load %arg3[%c0_3, %c0_4] : memref<1x256xf32, #tpu.memory_space<vmem>>, vector<1x256xf32>
    %5 = vector.broadcast %4 : vector<1x256xf32> to vector<16x256xf32>
    %6 = arith.addf %3, %5 : vector<16x256xf32>
    %cst_5 = arith.constant 5.000000e-01 : f32
    %7 = vector.broadcast %cst_5 : f32 to vector<16x256xf32>
    %8 = arith.mulf %6, %7 : vector<16x256xf32>
    %cst_6 = arith.constant 0.707106769 : f32
    %9 = vector.broadcast %cst_6 : f32 to vector<16x256xf32>
    %10 = arith.mulf %6, %9 : vector<16x256xf32>
    %11 = math.erf %10 : vector<16x256xf32>
    %cst_7 = arith.constant 1.000000e+00 : f32
    %12 = vector.broadcast %cst_7 : f32 to vector<16x256xf32>
    %13 = arith.addf %12, %11 : vector<16x256xf32>
    %14 = arith.mulf %8, %13 : vector<16x256xf32>
    %c0_8 = arith.constant 0 : index
    %c0_9 = arith.constant 0 : index
    %15 = vector.load %arg4[%c0_8, %c0_9] : memref<1x256xf32, #tpu.memory_space<vmem>>, vector<1x256xf32>
    %c0_10 = arith.constant 0 : index
    %c0_11 = arith.constant 0 : index
    %16 = vector.load %arg5[%c0_10, %c0_11] : memref<1x256xf32, #tpu.memory_space<vmem>>, vector<1x256xf32>
    %cst_12 = arith.constant dense<0.000000e+00> : vector<16xf32>
    %17 = vector.multi_reduction <add>, %14, %cst_12 [1] : vector<16x256xf32> to vector<16xf32>
    %18 = vector.shape_cast %17 : vector<16xf32> to vector<16x1xf32>
    %cst_13 = arith.constant 2.560000e+02 : f32
    %19 = vector.broadcast %cst_13 : f32 to vector<16x1xf32>
    %20 = arith.divf %18, %19 : vector<16x1xf32>
    %21 = vector.broadcast %20 : vector<16x1xf32> to vector<16x256xf32>
    %22 = arith.subf %14, %21 : vector<16x256xf32>
    %23 = arith.mulf %22, %22 : vector<16x256xf32>
    %cst_14 = arith.constant dense<0.000000e+00> : vector<16xf32>
    %24 = vector.multi_reduction <add>, %23, %cst_14 [1] : vector<16x256xf32> to vector<16xf32>
    %25 = vector.shape_cast %24 : vector<16xf32> to vector<16x1xf32>
    %cst_15 = arith.constant 2.560000e+02 : f32
    %26 = vector.broadcast %cst_15 : f32 to vector<16x1xf32>
    %27 = arith.divf %25, %26 : vector<16x1xf32>
    %28 = vector.broadcast %20 : vector<16x1xf32> to vector<16x256xf32>
    %29 = arith.subf %14, %28 : vector<16x256xf32>
    %cst_16 = arith.constant 9.99999974E-6 : f32
    %30 = vector.broadcast %cst_16 : f32 to vector<16x1xf32>
    %31 = arith.addf %27, %30 : vector<16x1xf32>
    %32 = math.sqrt %31 : vector<16x1xf32>
    %33 = vector.broadcast %32 : vector<16x1xf32> to vector<16x256xf32>
    %34 = arith.divf %29, %33 : vector<16x256xf32>
    %35 = vector.broadcast %15 : vector<1x256xf32> to vector<16x256xf32>
    %36 = arith.mulf %34, %35 : vector<16x256xf32>
    %37 = vector.broadcast %16 : vector<1x256xf32> to vector<16x256xf32>
    %38 = arith.addf %36, %37 : vector<16x256xf32>
    %39 = arith.truncf %38 : vector<16x256xf32> to vector<16x256xbf16>
    %c0_17 = arith.constant 0 : index
    %c0_18 = arith.constant 0 : index
    %40 = vector.load %arg6[%c0_17, %c0_18] : memref<256x128xbf16, #tpu.memory_space<vmem>>, vector<256x128xbf16>
    %cst_19 = arith.constant dense<0.000000e+00> : vector<16x128xf32>
    %41 = tpu.matmul %39, %40, %cst_19 {dimension_numbers = #tpu.dot_dimension_numbers<[1], [0], [0], [1], [0, 0, 1, 1], [], []>} : vector<16x256xbf16>, vector<256x128xbf16>, vector<16x128xf32> -> vector<16x128xf32>
    %c0_20 = arith.constant 0 : index
    %c0_21 = arith.constant 0 : index
    %42 = vector.load %arg7[%c0_20, %c0_21] : memref<1x128xf32, #tpu.memory_space<vmem>>, vector<1x128xf32>
    %43 = vector.broadcast %42 : vector<1x128xf32> to vector<16x128xf32>
    %44 = arith.addf %41, %43 : vector<16x128xf32>
    %c0_22 = arith.constant 0 : index
    %c0_23 = arith.constant 0 : index
    %45 = vector.load %arg8[%c0_22, %c0_23] : memref<16x128xf32, #tpu.memory_space<vmem>>, vector<16x128xf32>
    tpu.vector_store %arg8[%c0_22, %c0_23], %44 {strides = array<i32>} : memref<16x128xf32, #tpu.memory_space<vmem>>, vector<16x128xf32>,
    return
  }
  func.func @transform_0(%arg0: i32) -> (i32, i32) {
    %c0_i32 = arith.constant 0 : i32
    %c0_i32_0 = arith.constant 0 : i32
    return %arg0, %c0_i32 : i32, i32
  }
  func.func @transform_1(%arg0: i32) -> (i32, i32) {
    %c0_i32 = arith.constant 0 : i32
    %c0_i32_0 = arith.constant 0 : i32
    %c0_i32_1 = arith.constant 0 : i32
    return %c0_i32, %c0_i32_0 : i32, i32
  }
  func.func @transform_2(%arg0: i32) -> (i32, i32) {
    %c0_i32 = arith.constant 0 : i32
    %c0_i32_0 = arith.constant 0 : i32
    %c0_i32_1 = arith.constant 0 : i32
    return %c0_i32, %c0_i32_0 : i32, i32
  }
  func.func @transform_3(%arg0: i32) -> (i32, i32) {
    %c0_i32 = arith.constant 0 : i32
    %c0_i32_0 = arith.constant 0 : i32
    %c0_i32_1 = arith.constant 0 : i32
    return %c0_i32, %c0_i32_0 : i32, i32
  }
  func.func @transform_4(%arg0: i32) -> (i32, i32) {
    %c0_i32 = arith.constant 0 : i32
    %c0_i32_0 = arith.constant 0 : i32
    %c0_i32_1 = arith.constant 0 : i32
    return %c0_i32, %c0_i32_0 : i32, i32
  }
  func.func @transform_5(%arg0: i32) -> (i32, i32) {
    %c0_i32 = arith.constant 0 : i32
    %c0_i32_0 = arith.constant 0 : i32
    %c0_i32_1 = arith.constant 0 : i32
    return %c0_i32, %c0_i32_0 : i32, i32
  }
  func.func @transform_6(%arg0: i32) -> (i32, i32) {
    %c0_i32 = arith.constant 0 : i32
    %c0_i32_0 = arith.constant 0 : i32
    %c0_i32_1 = arith.constant 0 : i32
    return %c0_i32, %c0_i32_0 : i32, i32
  }
  func.func @transform_7(%arg0: i32) -> (i32, i32) {
    %c0_i32 = arith.constant 0 : i32
    %c0_i32_0 = arith.constant 0 : i32
    return %arg0, %c0_i32 : i32, i32
  }
}

</mosaic_0001>

<bundles_post_ra>
// kernel: _lambda_.12
= control target key start
LH: loop header
LB: loop body
LE: loop exit
PB: predicated region body
PF: predicated region fallthrough
CT: control target
= control target key end

     0   :  { %v274_v34 = vlaneseq  ;;  %s535_s2 = inlined_call_operand.vmem [shape: bf16[256,256], index: 2, kind: input, shape index: {}]   ;;  %s536_s0 = inlined_call_operand.vmem [shape: bf16[16,256], index: 0, kind: input, shape index: {}]   ;;  %s537_s3 = inlined_call_operand.vmem [shape: f32[1,256], index: 3, kind: input, shape index: {}]   ;;  %s538_s1 = inlined_call_operand.vmem [shape: f32[16,256], index: 1, kind: input, shape index: {}]   ;;  %s539_s4 = inlined_call_operand.vmem [shape: f32[16,256], index: 4, kind: output, shape index: {}]  }
   0x1   :  { %v330_v0 = vld [vmem:[%s535_s2 + $0x74] ss:$8 sps:$4 sm:$0xff]   ;;  %v332_v1 = vld [vmem:[%s535_s2 + $0x70] ss:$8 sps:$4 sm:$0xff]   ;;  %v333_v2 = vld [vmem:[%s535_s2 + $0x64] ss:$8 sps:$4 sm:$0xff]  }
   0x2   :  { %225 = vmatprep.subr.bf16.mxu0 %v330_v0  ;;  %v335_v3 = vld [vmem:[%s535_s2 + $0x60] ss:$8 sps:$4 sm:$0xff]   ;;  %v336_v4 = vld [vmem:[%s535_s2 + $0x54] ss:$8 sps:$4 sm:$0xff]   ;;  %v338_v5 = vld [vmem:[%s535_s2 + $0x50] ss:$8 sps:$4 sm:$0xff]  }
   0x3   :  { %226 = vmatpush1.bf16.msra.mxu0 %v332_v1  ;;  %v339_v6 = vld [vmem:[%s535_s2 + $0x44] ss:$8 sps:$4 sm:$0xff]   ;;  %v341_v7 = vld [vmem:[%s535_s2 + $0x40] ss:$8 sps:$4 sm:$0xff]   ;;  %v342_v8 = vld [vmem:[%s535_s2 + $0x34] ss:$8 sps:$4 sm:$0xff]  }
   0x4   :  { %227 = vmatprep.subr.bf16.mxu0 %v333_v2  ;;  %v344_v9 = vld [vmem:[%s535_s2 + $0x30] ss:$8 sps:$4 sm:$0xff]   ;;  %v345_v10 = vld [vmem:[%s535_s2 + $0x24] ss:$8 sps:$4 sm:$0xff]   ;;  %v347_v11 = vld [vmem:[%s535_s2 + $0x20] ss:$8 sps:$4 sm:$0xff]  }
   0x5   :  { %v348_v12 = vld [vmem:[%s535_s2 + $0x14] ss:$8 sps:$4 sm:$0xff]   ;;  %v380_v13 = vld [vmem:[%s536_s0 + $0x4] ss:$8 sps:$4 sm:$0xff]   ;;  %v350_v14 = vld [vmem:[%s535_s2 + $0x10] ss:$8 sps:$4 sm:$0xff]  }
   0x6   :  { %v351_v15 = vld [vmem:[%s535_s2 + $0x4] ss:$8 sps:$4 sm:$0xff]   ;;  %257 = vmatprep.mubr.bf16.mxu0 %v380_v13  ;;  %v353_v16 = vld [vmem:[%s535_s2] ss:$8 sps:$4 sm:$0xff]   ;;  %v354_v17 = vld [vmem:[%s535_s2 + $0xf4] ss:$8 sps:$4 sm:$0xff]  }
   0x7   :  { %228 = vmatpush1.bf16.msra.mxu0 %v335_v3  ;;  %v356_v18 = vld [vmem:[%s535_s2 + $0xf0] ss:$8 sps:$4 sm:$0xff]   ;;  %v357_v19 = vld [vmem:[%s535_s2 + $0xe4] ss:$8 sps:$4 sm:$0xff]   ;;  %v359_v20 = vld [vmem:[%s535_s2 + $0xe0] ss:$8 sps:$4 sm:$0xff]  }
   0x8   :  { %229 = vmatprep.subr.bf16.mxu0 %v336_v4  ;;  %v360_v21 = vld [vmem:[%s535_s2 + $0xd4] ss:$8 sps:$4 sm:$0xff]   ;;  %v362_v22 = vld [vmem:[%s535_s2 + $0xd0] ss:$8 sps:$4 sm:$0xff]   ;;  %v363_v23 = vld [vmem:[%s535_s2 + $0xc4] ss:$8 sps:$4 sm:$0xff]  }
   0x9   :  { %v365_v24 = vld [vmem:[%s535_s2 + $0xc0] ss:$8 sps:$4 sm:$0xff]   ;;  %v366_v25 = vld [vmem:[%s535_s2 + $0xb4] ss:$8 sps:$4 sm:$0xff]   ;;  %v368_v26 = vld [vmem:[%s535_s2 + $0xb0] ss:$8 sps:$4 sm:$0xff]  }
   0xa   :  { %v369_v27 = vld [vmem:[%s535_s2 + $0xa4] ss:$8 sps:$4 sm:$0xff]   ;;  %v371_v28 = vld [vmem:[%s535_s2 + $0xa0] ss:$8 sps:$4 sm:$0xff]   ;;  %v372_v29 = vld [vmem:[%s535_s2 + $0x94] ss:$8 sps:$4 sm:$0xff]  }
   0xb   :  { %230 = vmatpush1.bf16.msra.mxu0 %v338_v5  ;;  %v374_v30 = vld [vmem:[%s535_s2 + $0x90] ss:$8 sps:$4 sm:$0xff]   ;;  %v375_v31 = vld [vmem:[%s535_s2 + $0x84] ss:$8 sps:$4 sm:$0xff]   ;;  %v377_v32 = vld [vmem:[%s535_s2 + $0x80] ss:$8 sps:$4 sm:$0xff]  }
   0xc   :  { %231 = vmatprep.subr.bf16.mxu0 %v339_v6  ;;  %v378_v33 = vld [vmem:[%s536_s0] ss:$8 sps:$4 sm:$0xff]   ;;  %v275_v35 = vshrl.u32 %v274_v34, 7  ;;  %v19_v46 = vld [vmem:[%s538_s1 + $0x10] sm:$0xff]  ;;  %v20_v50 = vld [vmem:[%s538_s1 + $0x18] sm:$0xff] }
   0xd   :  { %v272_v37 = vld [vmem:[%s537_s3] sm:$0x3]  ;;  %v18_v42 = vld [vmem:[%s538_s1 + $0x8] sm:$0xff] }
   0xe   :  { %v276_v36 = vsub.s32 0, %v275_v35  ;;  %v280_v38 = vsub.s32 1, %v275_v35  ;;  %v17_v39 = vld [vmem:[%s538_s1] sm:$0xff] }
   0xf   :  { %232 = vmatpush1.bf16.msra.mxu0 %v341_v7 }
  0x10   :  { %233 = vmatprep.subr.bf16.mxu0 %v342_v8  ;;  %v277_v40 = vrot.slane %v272_v37, %v276_v36  ;;  %v281_v44 = vrot.slane %v272_v37, %v280_v38 }
  0x13   :  { %234 = vmatpush1.bf16.msra.mxu0 %v344_v9 }
  0x14   :  { %235 = vmatprep.subr.bf16.mxu0 %v345_v10 }
  0x17   :  { %236 = vmatpush1.bf16.msra.mxu0 %v347_v11 }
  0x18   :  { %237 = vmatprep.subr.bf16.mxu0 %v348_v12 }
  0x1b   :  { %238 = vmatpush1.bf16.msra.mxu0 %v350_v14 }
  0x1c   :  { %239 = vmatprep.subr.bf16.mxu0 %v351_v15 }
  0x1f   :  { %240 = vmatpush1.bf16.msra.mxu0 %v353_v16 }
  0x20   :  { %241 = vmatprep.subr.bf16.mxu0 %v354_v17 }
  0x23   :  { %242 = vmatpush2.bf16.msra.mxu0 %v356_v18 }
  0x24   :  { %243 = vmatprep.subr.bf16.mxu0 %v357_v19 }
  0x27   :  { %244 = vmatpush2.bf16.msra.mxu0 %v359_v20 }
  0x28   :  { %245 = vmatprep.subr.bf16.mxu0 %v360_v21 }
  0x2b   :  { %246 = vmatpush2.bf16.msra.mxu0 %v362_v22 }
  0x2c   :  { %247 = vmatprep.subr.bf16.mxu0 %v363_v23 }
  0x2f   :  { %248 = vmatpush2.bf16.msra.mxu0 %v365_v24 }
  0x30   :  { %249 = vmatprep.subr.bf16.mxu0 %v366_v25 }
  0x33   :  { %250 = vmatpush2.bf16.msra.mxu0 %v368_v26 }
  0x34   :  { %251 = vmatprep.subr.bf16.mxu0 %v369_v27 }
  0x37   :  { %252 = vmatpush2.bf16.msra.mxu0 %v371_v28 }
  0x38   :  { %253 = vmatprep.subr.bf16.mxu0 %v372_v29 }
  0x3b   :  { %254 = vmatpush2.bf16.msra.mxu0 %v374_v30 }
  0x3c   :  { %255 = vmatprep.subr.bf16.mxu0 %v375_v31 }
  0x3f   :  { %256 = vmatpush2.bf16.msra.mxu0 %v377_v32 }
  0x42   :  { %258 = vmatmul.mubr.bf16.vlgmr.msra.gmra.mxu0 %v378_v33 }
 0x102   :  { %v259_v41 = vpop.f32.mrf.mxu0 }
 0x103   :  { %v268_v43 = vadd.f32 %v259_v41, %v17_v39 }
 0x104   :  { %v261_v45 = vpop.f32.mrf.mxu0 }
 0x105   :  { %v284_v47 = vadd.f32 %v277_v40, %v268_v43  ;;  %v269_v48 = vadd.f32 %v261_v45, %v18_v42 }
 0x106   :  { %v263_v49 = vpop.f32.mrf.mxu0 }
 0x107   :  { %288 = vst [vmem:[%s539_s4] sm:$0xff] %v284_v47  ;;  %v285_v51 = vadd.f32 %v281_v44, %v269_v48  ;;  %v270_v52 = vadd.f32 %v263_v49, %v19_v46 }
 0x108   :  { %v265_v53 = vpop.f32.mrf.mxu0 }
 0x109   :  { %289 = vst [vmem:[%s539_s4 + $0x8] sm:$0xff] %v285_v51  ;;  %v286_v54 = vadd.f32 %v277_v40, %v270_v52  ;;  %v271_v55 = vadd.f32 %v265_v53, %v20_v50 }
 0x10b   :  { %290 = vst [vmem:[%s539_s4 + $0x10] sm:$0xff] %v286_v54  ;;  %v287_v56 = vadd.f32 %v281_v44, %v271_v55 }
 0x10d   :  { %291 = vst [vmem:[%s539_s4 + $0x18] sm:$0xff] %v287_v56 }

// kernel: _lambda_.11
= control target key start
LH: loop header
LB: loop body
LE: loop exit
PB: predicated region body
PF: predicated region fallthrough
CT: control target
= control target key end

     0   :  { %s1337_s27 = smov 0   ;;  %s1339_s28 = smov 0   ;;  %s1456_s0 = inlined_call_operand.vmem [shape: bf16[2,8,256], index: 0, kind: input, shape index: {}]   ;;  %s1457_s1 = inlined_call_operand.vmem [shape: bf16[2,8,256], index: 1, kind: input, shape index: {}]   ;;  %s1458_s2 = inlined_call_operand.vmem [shape: bf16[2,8,256], index: 2, kind: input, shape index: {}]   ;;  %s1459_s3 = inlined_call_operand.vmem [shape: f32[8,128], index: 3, kind: input, shape index: {}, may-alias: {3,5}]   ;;  %s1460_s4 = inlined_call_operand.vmem [shape: f32[8,128], index: 4, kind: input, shape index: {}, may-alias: {4,6}]   ;;  %s1461_s5 = inlined_call_operand.vmem [shape: f32[8,128], index: 5, kind: input, shape index: {}, may-alias: {3,5}]   ;;  %s1462_s6 = inlined_call_operand.vmem [shape: f32[8,128], index: 6, kind: input, shape index: {}, may-alias: {4,6}]   ;;  %s1463_s7 = inlined_call_operand.vmem [shape: f32[2,1,8], index: 7, kind: input, shape index: {}]   ;;  %s1464_s8 = inlined_call_operand.vmem [shape: bf16[2,8,256], index: 8, kind: output, shape index: {}]  }
   0x1   :  { %s1341_s29 = smov 0  }
   0x2 LB: > { %s44_s30 = sadd.s32 1, %s1281_s28  ;;  %p1166_p0 = scmp.ge.s32.totalorder %s1285_s29, 1  ;;  %s1285_s29 = sphi %s1341_s29, %s18_s29   ;;  %s1281_s28 = sphi %s1339_s28, %s1466_s28   ;;  %s1277_s27 = sphi %s1337_s27, %s1465_s27  }
   0x3   : > { %p46_p1 = scmp.ge.s32.totalorder %s44_s30, 2  ;;  %p400_p2 = scmp.lt.s32.totalorder %s1285_s29, 3 }
   0x5   : > { %s1468_s30 = smov (%p46_p1, %s44_s30), 0  ;;  %p401_p3 = pnand %p1166_p0, %p400_p2 }
   0x6   : > { %p499_p4 = scmp.lt.s32.totalorder (!%p401_p3), %s1277_s27, 1  ;;  %s1289_s16 = smov (!%p401_p3), 64  }
   0x7   : > { %404 = sbr.rel (%p401_p3) target bundleno = 1408 (0x580), region = 52 }
   0xc   : > { %s1470_s27 = smov (!%p499_p4, %s1277_s27), 1  ;;  %v1287_v0 = vmov 0.0   ;;  %vm1288_vm0 = vmmov 0   ;;  %v581_v5 = vld [vmem:[%s1459_s3] sm:$0xff]  ;;  %vm606_vm1 = vcmask 7168   ;;  %v1290_v21 = vmov -inf  }
   0xd   : > { %s1358_s9 = sshll.u32 %s1470_s27, 3  ;;  %1195 = vmatprep.subr.bf16.mxu0 %v1287_v0  ;;  %1201 = vmatprep.subr.bf16.mxu1 %v1287_v0  ;;  %v582_v6 = vld [vmem:[%s1460_s4] sm:$0xff]  ;;  %607 = vst.msk [vmem:[#allocation3] sm:$0xff] %vm606_vm1, %v1290_v21  ;;  %608 = vst.msk [vmem:[#allocation3 + $0x8] sm:$0xff] %vm606_vm1, %v1290_v21  ;;  %s561_s10 = scalar_lea.vmem %s1463_s7, %s1470_s27  ;;  %vm673_vm2 = vcmask 64512   ;;  %v1291_v29 = vmov 0  }
   0xe   : > { %s510_s12 = scalar_lea.vmem %s1456_s0, %s1358_s9  ;;  %s524_s15 = scalar_lea.vmem %s1457_s1, %s1358_s9  ;;  %1197 = vmatprep.mubr.msk.bf16.mxu0 %vm1288_vm0, %v1287_v0  ;;  %1203 = vmatprep.mubr.msk.bf16.mxu1 %vm1288_vm0, %v1287_v0  ;;  %v1385_v9 = vld [vmem:[%s1461_s5] sm:$0xff]  ;;  %609 = vst.msk [vmem:[#allocation4] sm:$0xff] %vm606_vm1, %v1287_v0  ;;  %610 = vst.msk [vmem:[#allocation4 + $0x8] sm:$0xff] %vm606_vm1, %v1287_v0  ;;  %vm708_vm3 = vcmask 1043456  }
   0xf   : > { %v583_v1 = vld [vmem:[%s510_s12] sm:$0xff]  ;;  %1248 = vset.pattern.permute.xlu1 %v1291_v29  ;;  %1249 = vset.pattern.permute.xlu0 %v1291_v29  ;;  %s538_s12 = scalar_lea.vmem %s1458_s2, %s1358_s9 }
  0x10   : > { %v616_v2 = vld [vmem:[%s524_s15] sm:$0xff]  ;;  %v584_v3 = vunpack.c.l.bf16 %v583_v1  ;;  %v594_v30 = vrot.slane %v583_v1, 4  ;;  %s574_s15 = scalar_lea.vmem %s1464_s8, %s1358_s9 }
  0x11   : > { %v618_v4 = vunpack.c.l.bf16 %v616_v2  ;;  %v1390_v11 = vld [vmem:[%s1462_s6] sm:$0xff]  ;;  %v756_v32 = vrot.slane %v616_v2, 4 }
  0x12   : > { %586 = vrot.lane.b32.xlu0 %v584_v3, %s1289_s16  ;;  %v585_v7 = vmul.f32 %v584_v3, %v581_v5  ;;  %v1175_v22 = vld [vmem:[%s561_s10] ss:$0 sm:$0xff]  ;;  %v596_v31 = vunpack.c.l.bf16 %v594_v30 }
  0x13   : > { %v619_v13 = vmul.f32 %v618_v4, %v1385_v9  ;;  %v758_v33 = vunpack.c.l.bf16 %v756_v32  ;;  %v617_v41 = vld [vmem:[%s538_s12] sm:$0xff] }
  0x14   : > { %v1410_v34 = vld [vmem:[#allocation3] sm:$0xff]  ;;  %v597_v38 = vmul.f32 %v596_v31, %v581_v5  ;;  %v710_v42 = vsel %vm708_vm3, %v617_v41, 0  ;;  %v1177_v43 = vcombine.high %v617_v41, %v617_v41 }
  0x15   : > { %1202 = vmatpush3.bf16.msra.mxu1 %v710_v42  ;;  %v759_v52 = vmul.f32 %v758_v33, %v1385_v9 }
  0x16   : > { %620 = vrot.lane.b32.xlu0 %v618_v4, %s1289_s16  ;;  %v848_v45 = vsel %vm708_vm3, %v1177_v43, 0  ;;  %1207 = vmatprep.subr.bf16.mxu1 %v1287_v0 }
  0x1a   : > { %598 = vrot.lane.b32.xlu0 %v596_v31, %s1289_s16 }
  0x1e   : > { %760 = vrot.lane.b32.xlu0 %v758_v33, %s1289_s16 }
  0x84   : > { %v587_v8 = vpop.permute.xlu0 %586 }
  0x85   : > { %v588_v10 = vmul.f32 %v587_v8, %v582_v6 }
  0x87   : > { %v589_v12 = vadd.f32 %v588_v10, %v585_v7 }
  0x88   : > { %v621_v14 = vpop.permute.xlu0 %620 }
  0x89   : > { %v590_v15 = vmul.f32 0.088388346, %v589_v12  ;;  %v622_v16 = vmul.f32 %v621_v14, %v1390_v11 }
  0x8b   : > { %v591_v17 = vpack.c.bf16 %v590_v15, %v590_v15  ;;  %v623_v18 = vadd.f32 %v622_v16, %v619_v13 }
  0x8c   : > { %v599_v39 = vpop.permute.xlu0 %598 }
  0x8d   : > { %592 = vst [vmem:[#allocation2] sm:$0xf] %v591_v17  ;;  %v624_v19 = vpack.c.bf16 %v623_v18, %v623_v18  ;;  %v600_v40 = vmul.f32 %v599_v39, %v582_v6  ;;  %v808_v6 = vld [vmem:[#allocation3 + $0x8] sm:$0xff] }
  0x8f   : > { %1196 = vmatpush3.bf16.xpose.msra.mxu0 %v624_v19  ;;  %v601_v44 = vadd.f32 %v600_v40, %v597_v38 }
  0x90   : > { %1213 = vmatprep.subr.bf16.mxu0 %v1287_v0  ;;  %v761_v51 = vpop.permute.xlu0 %760 }
  0x91   : > { %v602_v46 = vmul.f32 0.088388346, %v601_v44  ;;  %v762_v53 = vmul.f32 %v761_v51, %v1390_v11 }
  0x93   : > { %v603_v47 = vpack.c.bf16 %v602_v46, %v602_v46  ;;  %v763_v54 = vadd.f32 %v762_v53, %v759_v52 }
  0x94   : > { %v625_v20 = vld [vmem:[#allocation2] sm:$0xf] }
  0x95   : > { %605 = vst [vmem:[#allocation2 + $0x4] sm:$0xf] %v603_v47  ;;  %v764_v56 = vpack.c.bf16 %v763_v54, %v763_v54 }
  0x96   : > { %1198 = vmatmul.mubr.bf16.vlgmr.msra.gmra.mxu0 %v625_v20  ;;  %v689_v20 = vld [vmem:[#allocation4] sm:$0xff] }
  0x97   : > { %1215 = vmatprep.mubr.msk.bf16.mxu0 %vm1288_vm0, %v1287_v0  ;;  %1214 = vmatpush3.bf16.msra.mxu0 %v848_v45 }
  0x9c   : > { %v766_v58 = vld [vmem:[#allocation2 + $0x4] sm:$0xf] }
 0x156   : > { %v666_v23 = vpop.f32.mrf.mxu0 }
 0x157   : > { %v667_v24 = vadd.f32 %v1175_v22, %v666_v23 }
 0x158   : > { %v1199_v25 = vpop.f32.mrf.mxu0 }
 0x159   : > { %v674_v26 = vsel %vm673_vm2, %v667_v24, -inf }
 0x15a   : > { %675 = vmax.xlane.f32.xlu1 %v674_v26  ;;  %v669_v27 = vpop.f32.mrf.mxu0  ;;  %v825_v26 = vld [vmem:[#allocation4 + $0x8] sm:$0xff] }
 0x15c   : > { %v1200_v28 = vpop.f32.mrf.mxu0 }
 0x1e3   : > { %v676_v35 = vpop.xlane.xlu1 %675 }
 0x1e4   : > { %v1413_v36 = vmax.f32 %v1410_v34, %v676_v35 }
 0x1e6   : > { %v678_v37 = vsub.f32 %v1410_v34, %v1413_v36  ;;  %754 = vst.msk [vmem:[#allocation3] sm:$0xff] %vm606_vm1, %v1413_v36  ;;  %683 = vperm.xlu1 %1248, %v1413_v36  }
 0x1e8   : > { %v679_v18 = vmul.f32 1.442695, %v678_v37 }
 0x261   : > { %v684_v48 = vpop.permute.xlu1 %683 }
 0x262   : > { %v686_v49 = vsub.f32 %v667_v24, %v684_v48 }
 0x264   : > { %v687_v50 = vmul.f32 1.442695, %v686_v49 }
 0x266   : > { %1251 = vpow2.f32 %v687_v50 }
 0x273   : > { %v1252_v55 = vpop.eup %1251 }
 0x274   : > { %v704_v57 = vpack.c.bf16 %v1252_v55, %v1252_v55  ;;  %v691_v10 = vsel %vm673_vm2, %v1252_v55, 0.0 }
 0x276   : > { %1204 = vmatmul.mubr.msk.bf16.vlgmr.msra.gmra.mxu1 %vm673_vm2, %v704_v57 }
 0x277   : > { %1208 = vmatpush3.bf16.xpose.msra.mxu1 %v764_v56  ;;  %1209 = vmatprep.mubr.msk.bf16.mxu1 %vm1288_vm0, %v1287_v0 }
 0x27e   : > { %1210 = vmatmul.mubr.bf16.vlgmr.msra.gmra.mxu1 %v766_v58 }
 0x336   : > { %v1430_v59 = vpop.f32.mrf.mxu1 }
 0x338   : > { %v1205_v60 = vpop.f32.mrf.mxu1 }
 0x33a   : > { %v749_v61 = vpop.f32.mrf.mxu1 }
 0x33c   : > { %v1206_v62 = vpop.f32.mrf.mxu1 }
 0x33e   : > { %v801_v63 = vpop.f32.mrf.mxu1 }
 0x33f   : > { %v802_v1 = vadd.f32 %v1175_v22, %v801_v63 }
 0x340   : > { %v1211_v2 = vpop.f32.mrf.mxu1 }
 0x341   : > { %v809_v3 = vsel %vm673_vm2, %v802_v1, -inf }
 0x342   : > { %810 = vmax.xlane.f32.xlu0 %v809_v3  ;;  %v804_v4 = vpop.f32.mrf.mxu1 }
 0x344   : > { %v1212_v5 = vpop.f32.mrf.mxu1 }
 0x3cb   : > { %v811_v7 = vpop.xlane.xlu0 %810 }
 0x3cc   : > { %v812_v8 = vmax.f32 %v808_v6, %v811_v7 }
 0x3ce   : > { %892 = vst.msk [vmem:[#allocation3 + $0x8] sm:$0xff] %vm606_vm1, %v812_v8  ;;  %818 = vperm.xlu1 %1248, %v812_v8   ;;  %v813_v0 = vsub.f32 %v808_v6, %v812_v8 }
 0x3d0   : > { %v814_v9 = vmul.f32 1.442695, %v813_v0 }
 0x3d2   : > { %1253 = vpow2.f32 %v814_v9 }
 0x3df   : > { %v1254_v11 = vpop.eup %1253 }
 0x3e0   : > { %v826_v27 = vmul.f32 %v1254_v11, %v825_v26 }
 0x3f2   : > { %692 = vadd.xlane.f32.xlu1 %v691_v10 }
 0x403   : > { %836 = vperm.xlu1 %1248, %v1254_v11  }
 0x449   : > { %v819_v12 = vpop.permute.xlu1 %818 }
 0x44a   : > { %v821_v13 = vsub.f32 %v802_v1, %v819_v12 }
 0x44c   : > { %v822_v14 = vmul.f32 1.442695, %v821_v13 }
 0x44e   : > { %1255 = vpow2.f32 %v822_v14 }
 0x44f   : > { %1257 = vpow2.f32 %v679_v18 }
 0x45b   : > { %v1256_v15 = vpop.eup %1255 }
 0x45c   : > { %v827_v16 = vsel %vm673_vm2, %v1256_v15, 0.0  ;;  %v840_v17 = vpack.c.bf16 %v1256_v15, %v1256_v15  ;;  %v1258_v19 = vpop.eup %1257 }
 0x45d   : > { %828 = vadd.xlane.f32.xlu0 %v827_v16  ;;  %v690_v21 = vmul.f32 %v1258_v19, %v689_v20 }
 0x45e   : > { %1216 = vmatmul.mubr.msk.bf16.vlgmr.msra.gmra.mxu0 %vm673_vm2, %v840_v17 }
 0x473   : > { %700 = vperm.xlu0 %1249, %v1258_v19  }
 0x47b   : > { %v693_v22 = vpop.xlane.xlu1 %692 }
 0x47c   : > { %v694_v23 = vadd.f32 %v693_v22, %v690_v21 }
 0x47e   : > { %696 = vst.msk [vmem:[#allocation4] sm:$0xff] %vm606_vm1, %v694_v23 }
 0x47f   : > { %v837_v36 = vpop.permute.xlu1 %836 }
 0x480   : > { %v839_v40 = vmul.f32 0.0, %v837_v36 }
 0x485   : > { %v896_v24 = vld [vmem:[#allocation4] sm:$0xff] }
 0x486   : > { %1259 = vrcp.f32 %v896_v24 }
 0x493   : > { %v1260_v25 = vpop.eup %1259 }
 0x494   : > { %901 = vperm.xlu1 %1248, %v1260_v25  }
 0x4e6   : > { %v829_v28 = vpop.xlane.xlu0 %828 }
 0x4e7   : > { %v830_v29 = vadd.f32 %v829_v28, %v826_v27 }
 0x4e9   : > { %831 = vst.msk [vmem:[#allocation4 + $0x8] sm:$0xff] %vm606_vm1, %v830_v29 }
 0x4ee   : > { %v701_v37 = vpop.permute.xlu0 %700 }
 0x4ef   : > { %v703_v38 = vmul.f32 0.0, %v701_v37 }
 0x4f0   : > { %v906_v30 = vld [vmem:[#allocation4 + $0x8] sm:$0xff] }
 0x4f1   : > { %1261 = vrcp.f32 %v906_v30  ;;  %v752_v41 = vadd.f32 %v1430_v59, %v703_v38 }
 0x4fe   : > { %v1262_v31 = vpop.eup %1261 }
 0x4ff   : > { %911 = vperm.xlu1 %1248, %v1262_v31  }
 0x50f   : > { %v902_v39 = vpop.permute.xlu1 %901 }
 0x510   : > { %v904_v44 = vmul.f32 %v902_v39, %v752_v41 }
 0x51e   : > { %v884_v32 = vpop.f32.mrf.mxu0 }
 0x51f   : > { %v890_v42 = vadd.f32 %v884_v32, %v839_v40 }
 0x520   : > { %v1217_v33 = vpop.f32.mrf.mxu0 }
 0x522   : > { %v887_v34 = vpop.f32.mrf.mxu0 }
 0x524   : > { %v1218_v35 = vpop.f32.mrf.mxu0 }
 0x57a   : > { %v912_v43 = vpop.permute.xlu1 %911 }
 0x57b   : > { %v914_v45 = vmul.f32 %v912_v43, %v890_v42 }
 0x57d   : > { %v1186_v46 = vpack.c.bf16 %v914_v45, %v904_v44 }
 0x57f   : > { %922 = vst [vmem:[%s574_s15] sm:$0xff] %v1186_v46 }
 0x580 PF: > { %s18_s29 = sadd.s32 1, %s1285_s29   ;;  %s1465_s27 = smov %s1281_s28 }
 0x581   : > { %p15_p5 = scmp.ge.s32.totalorder %s18_s29, 4   ;;  %s1466_s28 = smov %s1468_s30 }
 0x583   :  { %17 = sbr.rel (!%p15_p5) target bundleno = 2 (0x2), region = 116 }

// kernel: _lambda_.10
= control target key start
LH: loop header
LB: loop body
LE: loop exit
PB: predicated region body
PF: predicated region fallthrough
CT: control target
= control target key end

     0   :  { %13 = vsyncpa [#allocation3], 0  ;;  %s1434_s0 = inlined_call_operand.vmem [shape: f32[16,256], index: 0, kind: input, shape index: {}]   ;;  %s1435_s1 = inlined_call_operand.hbm [shape: f32[1,256], index: 1, kind: input, shape index: {}]   ;;  %s1436_s2 = inlined_call_operand.hbm [shape: f32[1,256], index: 2, kind: input, shape index: {}]   ;;  %s1437_s3 = inlined_call_operand.hbm [shape: bf16[256,768], index: 3, kind: input, shape index: {}]   ;;  %s1438_s4 = inlined_call_operand.hbm [shape: f32[1,768], index: 4, kind: input, shape index: {}]   ;;  %s1439_s5 = inlined_call_operand.vmem [shape: bf16[16,256], index: 5, kind: output, shape index: {0}]   ;;  %s1440_s6 = inlined_call_operand.vmem [shape: bf16[16,256], index: 6, kind: output, shape index: {1}]   ;;  %s1441_s7 = inlined_call_operand.vmem [shape: bf16[16,256], index: 7, kind: output, shape index: {2}]  }
   0x1   :  { %14 = vsyncpa [#allocation5], 0 }
   0x2   :  { %15 = vsyncpa [#allocation8], 0  ;;  %s1303_s24 = smov [#allocation4]   ;;  %s1304_s26 = smov [#allocation2]  }
   0x3   :  { %s34_s25 = sshll.u32 %s1303_s24, 4  ;;  %s24_s27 = sshll.u32 %s1304_s26, 4  ;;  %s35_s25 = int_to_ptr.vmem [resolvable:$true] %s34_s25  ;;  %s25_s27 = int_to_ptr.vmem [resolvable:$true] %s24_s27 }
   0x4   :  { %s1225_s28 = scalar_lea.vmem %s35_s25, 32  ;;  %p1230_p1 = scmp.lt.s32.totalorder %s35_s25, %s35_s25 }
   0x5   :  { %p1226_p0 = scmp.ne.s32.totalorder %s35_s25, %s1225_s28  ;;  %p1231_p2 = scmp.lt.s32.totalorder %s1225_s28, %s1225_s28 }
   0x7   :  { %p1232_p3 = por %p1231_p2, %p1230_p1 }
   0x9   :  { %p1233_p4 = pnand %p1232_p3, %p1226_p0 }
   0xb   :  { %1236 = shalt.err (!%p1233_p4)
}
   0xc   :  { %37 = dma.hbm_to_vmem [thread:$0]  %s1436_s2, 32, %s35_s25, [#allocation5]  }
   0xd   :  { %s1245_s8 = scalar_lea.vmem %s25_s27, 32  ;;  %p1250_p6 = scmp.lt.s32.totalorder %s25_s27, %s25_s27 }
   0xe   :  { %p1246_p5 = scmp.ne.s32.totalorder %s25_s27, %s1245_s8  ;;  %p1251_p7 = scmp.lt.s32.totalorder %s1245_s8, %s1245_s8 }
  0x10   :  { %p1252_p8 = por %p1251_p7, %p1250_p6 }
  0x12   :  { %p1253_p9 = pnand %p1252_p8, %p1246_p5 }
  0x14   :  { %1256 = shalt.err (!%p1253_p9)
}
  0x15   :  { %27 = dma.hbm_to_vmem [thread:$0]  %s1435_s1, 32, %s25_s27, [#allocation3]  }
  0x16   :  { %s1305_s11 = smov [#allocation6]  }
  0x17   :  { %s43_s12 = sshll.u32 %s1305_s11, 4  ;;  %s44_s12 = int_to_ptr.vmem [resolvable:$true] %s43_s12 }
  0x18   :  { %s1265_s13 = scalar_lea.vmem %s44_s12, 12288  ;;  %p1270_p11 = scmp.lt.s32.totalorder %s44_s12, %s44_s12 }
  0x19   :  { %p1266_p10 = scmp.ne.s32.totalorder %s44_s12, %s1265_s13  ;;  %p1271_p12 = scmp.lt.s32.totalorder %s1265_s13, %s1265_s13 }
  0x1b   :  { %p1272_p13 = por %p1271_p12, %p1270_p11 }
  0x1d   :  { %p1273_p0 = pnand %p1272_p13, %p1266_p10 }
  0x1f   :  { %1276 = shalt.err (!%p1273_p0)
}
  0x20   :  { %s1306_s2 = smov 384   ;;  %s1307_s14 = smov 24  }
  0x21   :  { %49 = dma.hbm_to_vmem [thread:$0]  %s1437_s3, 12288, %s44_s12, [#allocation5], %s1306_s2, %s1306_s2, %s1307_s14  }
  0x22   :  { %s1308_s17 = smov [#allocation7]  }
  0x23   :  { %s56_s18 = sshll.u32 %s1308_s17, 4  ;;  %s57_s18 = int_to_ptr.vmem [resolvable:$true] %s56_s18 }
  0x24   :  { %s1285_s1 = scalar_lea.vmem %s57_s18, 96  ;;  %p1290_p2 = scmp.lt.s32.totalorder %s57_s18, %s57_s18 }
  0x25   :  { %p1286_p1 = scmp.ne.s32.totalorder %s57_s18, %s1285_s1  ;;  %p1291_p3 = scmp.lt.s32.totalorder %s1285_s1, %s1285_s1 }
  0x27   :  { %p1292_p4 = por %p1291_p3, %p1290_p2 }
  0x29   :  { %p1293_p5 = pnand %p1292_p4, %p1286_p1 }
  0x2b   :  { %1296 = shalt.err (!%p1293_p5)
}
  0x2c   :  { %59 = dma.hbm_to_vmem [thread:$0]  %s1438_s4, 96, %s57_s18, [#allocation8]  }
  0x2d   :  { %1297 = dma.done.wait [#allocation3], 32  }
  0x2e   :  { %1298 = vsyncadd [#allocation3], 4294967264 }
  0x2f   :  { %1299 = dma.done.wait [#allocation5], 12320  }
  0x30   :  { %1300 = vsyncadd [#allocation5], 4294954976 }
  0x31   :  { %1301 = dma.done.wait [#allocation8], 96  }
  0x32   :  { %1302 = vsyncadd [#allocation8], 4294967200  ;;  %v72_v0 = vld [vmem:[%s1434_s0] sm:$0xff]  ;;  %v73_v1 = vld [vmem:[%s1434_s0 + $0x8] sm:$0xff] }
  0x33   :  { %v74_v2 = vld [vmem:[%s1434_s0 + $0x10] sm:$0xff]  ;;  %v78_v3 = vadd.f32 %v73_v1, %v72_v0  ;;  %v75_v4 = vld [vmem:[%s1434_s0 + $0x18] sm:$0xff]  ;;  %v1071_v10 = vld [vmem:[#allocation6 + $0x124] ss:$24 sps:$4 sm:$0xff]  }
  0x34   :  { %v81_v5 = vadd.f32 %v75_v4, %v74_v2  ;;  %v1065_v6 = vld [vmem:[#allocation6 + $0x154] ss:$24 sps:$4 sm:$0xff]   ;;  %v1067_v7 = vld [vmem:[#allocation6 + $0x150] ss:$24 sps:$4 sm:$0xff]   ;;  %v1073_v12 = vld [vmem:[#allocation6 + $0x120] ss:$24 sps:$4 sm:$0xff]  }
  0x35   :  { %79 = vadd.xlane.f32.xlu0 %v78_v3  ;;  %v1068_v8 = vld [vmem:[#allocation6 + $0x15c] ss:$24 sps:$4 sm:$0xff]   ;;  %v1070_v9 = vld [vmem:[#allocation6 + $0x158] ss:$24 sps:$4 sm:$0xff]   ;;  %765 = vmatprep.subr.bf16.mxu0 %v1065_v6  ;;  %v1074_v11 = vld [vmem:[#allocation6 + $0x12c] ss:$24 sps:$4 sm:$0xff]  }
  0x36   :  { %808 = vmatprep.subr.bf16.mxu1 %v1068_v8  ;;  %766 = vmatpush1.bf16.msra.mxu0 %v1067_v7  ;;  %v1076_v13 = vld [vmem:[#allocation6 + $0x128] ss:$24 sps:$4 sm:$0xff]   ;;  %v1077_v14 = vld [vmem:[#allocation6 + $0xf4] ss:$24 sps:$4 sm:$0xff]   ;;  %v1082_v17 = vld [vmem:[#allocation6 + $0xf8] ss:$24 sps:$4 sm:$0xff]  }
  0x37   :  { %809 = vmatpush1.bf16.msra.mxu1 %v1070_v9  ;;  %767 = vmatprep.subr.bf16.mxu0 %v1071_v10  ;;  %v1080_v15 = vld [vmem:[#allocation6 + $0xfc] ss:$24 sps:$4 sm:$0xff]   ;;  %v1079_v16 = vld [vmem:[#allocation6 + $0xf0] ss:$24 sps:$4 sm:$0xff]   ;;  %v1086_v19 = vld [vmem:[#allocation6 + $0xcc] ss:$24 sps:$4 sm:$0xff]  }
  0x38   :  { %810 = vmatprep.subr.bf16.mxu1 %v1074_v11  ;;  %v1083_v18 = vld [vmem:[#allocation6 + $0xc4] ss:$24 sps:$4 sm:$0xff]   ;;  %v1085_v20 = vld [vmem:[#allocation6 + $0xc0] ss:$24 sps:$4 sm:$0xff]   ;;  %v1089_v36 = vld [vmem:[#allocation6 + $0x94] ss:$24 sps:$4 sm:$0xff]  }
  0x39   :  { %82 = vadd.xlane.f32.xlu0 %v81_v5  ;;  %v1088_v21 = vld [vmem:[#allocation6 + $0xc8] ss:$24 sps:$4 sm:$0xff]   ;;  %v1092_v38 = vld [vmem:[#allocation6 + $0x9c] ss:$24 sps:$4 sm:$0xff]   ;;  %v1094_v39 = vld [vmem:[#allocation6 + $0x98] ss:$24 sps:$4 sm:$0xff]  }
  0x3a   :  { %768 = vmatpush1.bf16.msra.mxu0 %v1073_v12  ;;  %v1091_v37 = vld [vmem:[#allocation6 + $0x90] ss:$24 sps:$4 sm:$0xff]   ;;  %v1095_v40 = vld [vmem:[#allocation6 + $0x64] ss:$24 sps:$4 sm:$0xff]   ;;  %v1097_v41 = vld [vmem:[#allocation6 + $0x60] ss:$24 sps:$4 sm:$0xff]  }
  0x3b   :  { %811 = vmatpush1.bf16.msra.mxu1 %v1076_v13  ;;  %769 = vmatprep.subr.bf16.mxu0 %v1077_v14  ;;  %v1098_v42 = vld [vmem:[#allocation6 + $0x6c] ss:$24 sps:$4 sm:$0xff]   ;;  %v1100_v43 = vld [vmem:[#allocation6 + $0x68] ss:$24 sps:$4 sm:$0xff]   ;;  %v1104_v46 = vld [vmem:[#allocation6 + $0x3c] ss:$24 sps:$4 sm:$0xff]  }
  0x3c   :  { %812 = vmatprep.subr.bf16.mxu1 %v1080_v15  ;;  %v1101_v44 = vld [vmem:[#allocation6 + $0x34] ss:$24 sps:$4 sm:$0xff]   ;;  %v1103_v45 = vld [vmem:[#allocation6 + $0x30] ss:$24 sps:$4 sm:$0xff]   ;;  %v1107_v48 = vld [vmem:[#allocation6 + $0x4] ss:$24 sps:$4 sm:$0xff]  }
  0x3d   :  { %v1106_v47 = vld [vmem:[#allocation6 + $0x38] ss:$24 sps:$4 sm:$0xff]   ;;  %v1110_v50 = vld [vmem:[#allocation6 + $0xc] ss:$24 sps:$4 sm:$0xff]   ;;  %v1112_v51 = vld [vmem:[#allocation6 + $0x8] ss:$24 sps:$4 sm:$0xff]  }
  0x3e   :  { %770 = vmatpush1.bf16.msra.mxu0 %v1079_v16  ;;  %v1109_v49 = vld [vmem:[#allocation6] ss:$24 sps:$4 sm:$0xff]   ;;  %v1113_v52 = vld [vmem:[#allocation6 + $0x2d4] ss:$24 sps:$4 sm:$0xff]   ;;  %v1115_v53 = vld [vmem:[#allocation6 + $0x2d0] ss:$24 sps:$4 sm:$0xff]  }
  0x3f   :  { %813 = vmatpush1.bf16.msra.mxu1 %v1082_v17  ;;  %771 = vmatprep.subr.bf16.mxu0 %v1083_v18  ;;  %v1116_v54 = vld [vmem:[#allocation6 + $0x2dc] ss:$24 sps:$4 sm:$0xff]   ;;  %v1118_v55 = vld [vmem:[#allocation6 + $0x2d8] ss:$24 sps:$4 sm:$0xff]   ;;  %v1122_v58 = vld [vmem:[#allocation6 + $0x2ac] ss:$24 sps:$4 sm:$0xff]  }
  0x40   :  { %814 = vmatprep.subr.bf16.mxu1 %v1086_v19  ;;  %v1119_v56 = vld [vmem:[#allocation6 + $0x2a4] ss:$24 sps:$4 sm:$0xff]   ;;  %v1121_v57 = vld [vmem:[#allocation6 + $0x2a0] ss:$24 sps:$4 sm:$0xff]   ;;  %v1125_v60 = vld [vmem:[#allocation6 + $0x274] ss:$24 sps:$4 sm:$0xff]  }
  0x41   :  { %v1124_v59 = vld [vmem:[#allocation6 + $0x2a8] ss:$24 sps:$4 sm:$0xff]   ;;  %v1128_v62 = vld [vmem:[#allocation6 + $0x27c] ss:$24 sps:$4 sm:$0xff]   ;;  %v1130_v63 = vld [vmem:[#allocation6 + $0x278] ss:$24 sps:$4 sm:$0xff]  }
  0x42   :  { %772 = vmatpush1.bf16.msra.mxu0 %v1085_v20  ;;  %v1127_v61 = vld [vmem:[#allocation6 + $0x270] ss:$24 sps:$4 sm:$0xff]   ;;  %v1140_v5 = vld [vmem:[#allocation6 + $0x21c] ss:$24 sps:$4 sm:$0xff]   ;;  %v1146_v9 = vld [vmem:[#allocation6 + $0x1ec] ss:$24 sps:$4 sm:$0xff]  }
  0x43   :  { %815 = vmatpush1.bf16.msra.mxu1 %v1088_v21  ;;  %773 = vmatprep.subr.bf16.mxu0 %v1089_v36  ;;  %v1136_v3 = vld [vmem:[#allocation6 + $0x248] ss:$24 sps:$4 sm:$0xff]   ;;  %v1142_v7 = vld [vmem:[#allocation6 + $0x218] ss:$24 sps:$4 sm:$0xff]   ;;  %v1143_v8 = vld [vmem:[#allocation6 + $0x1e4] ss:$24 sps:$4 sm:$0xff]  }
  0x44   :  { %816 = vmatprep.subr.bf16.mxu1 %v1092_v38  ;;  %v1139_v6 = vld [vmem:[#allocation6 + $0x210] ss:$24 sps:$4 sm:$0xff]   ;;  %v1145_v10 = vld [vmem:[#allocation6 + $0x1e0] ss:$24 sps:$4 sm:$0xff]   ;;  %v1149_v12 = vld [vmem:[#allocation6 + $0x1b4] ss:$24 sps:$4 sm:$0xff]  }
  0x45   :  { %v1148_v11 = vld [vmem:[#allocation6 + $0x1e8] ss:$24 sps:$4 sm:$0xff]   ;;  %v1152_v13 = vld [vmem:[#allocation6 + $0x1bc] ss:$24 sps:$4 sm:$0xff]   ;;  %v1154_v15 = vld [vmem:[#allocation6 + $0x1b8] ss:$24 sps:$4 sm:$0xff]  }
  0x46   :  { %774 = vmatpush1.bf16.msra.mxu0 %v1091_v37  ;;  %v1151_v14 = vld [vmem:[#allocation6 + $0x1b0] ss:$24 sps:$4 sm:$0xff]   ;;  %v1155_v16 = vld [vmem:[#allocation6 + $0x184] ss:$24 sps:$4 sm:$0xff]   ;;  %v1157_v18 = vld [vmem:[#allocation6 + $0x180] ss:$24 sps:$4 sm:$0xff]  }
  0x47   :  { %817 = vmatpush1.bf16.msra.mxu1 %v1094_v39  ;;  %775 = vmatprep.subr.bf16.mxu0 %v1095_v40  ;;  %v1158_v17 = vld [vmem:[#allocation6 + $0x18c] ss:$24 sps:$4 sm:$0xff]   ;;  %v1160_v19 = vld [vmem:[#allocation6 + $0x188] ss:$24 sps:$4 sm:$0xff]   ;;  %v126_v40 = vlaneseq }
  0x48   :  { %818 = vmatprep.subr.bf16.mxu1 %v1098_v42  ;;  %v1163_v20 = vld [vmem:[#allocation6 + $0x164] ss:$24 sps:$4 sm:$0xff]  }
  0x49   :  { %v1389_v42 = vshrl.u32 %v126_v40, 7 }
  0x4a   :  { %776 = vmatpush1.bf16.msra.mxu0 %v1097_v41 }
  0x4b   :  { %819 = vmatpush1.bf16.msra.mxu1 %v1100_v43  ;;  %777 = vmatprep.subr.bf16.mxu0 %v1101_v44  ;;  %v1392_v43 = vsub.s32 1, %v1389_v42  ;;  %v1395_v44 = vsub.s32 0, %v1389_v42 }
  0x4c   :  { %820 = vmatprep.subr.bf16.mxu1 %v1104_v46 }
  0x4e   :  { %778 = vmatpush1.bf16.msra.mxu0 %v1103_v45  ;;  %v76_v45 = vld [vmem:[#allocation2] sm:$0x3] }
  0x4f   :  { %821 = vmatpush1.bf16.msra.mxu1 %v1106_v47  ;;  %779 = vmatprep.subr.bf16.mxu0 %v1107_v48  ;;  %v77_v47 = vld [vmem:[#allocation4] sm:$0x3] }
  0x50   :  { %822 = vmatprep.subr.bf16.mxu1 %v1110_v50 }
  0x52   :  { %780 = vmatpush1.bf16.msra.mxu0 %v1109_v49  ;;  %v133_v49 = vrot.slane %v76_v45, %v1392_v43 }
  0x53   :  { %823 = vmatpush1.bf16.msra.mxu1 %v1112_v51  ;;  %781 = vmatprep.subr.bf16.mxu0 %v1113_v52  ;;  %v129_v51 = vrot.slane %v76_v45, %v1395_v44 }
  0x54   :  { %824 = vmatprep.subr.bf16.mxu1 %v1116_v54  ;;  %v144_v54 = vrot.slane %v77_v47, %v1395_v44 }
  0x56   :  { %782 = vmatpush2.bf16.msra.mxu0 %v1115_v53  ;;  %v148_v53 = vrot.slane %v77_v47, %v1392_v43 }
  0x57   :  { %825 = vmatpush2.bf16.msra.mxu1 %v1118_v55  ;;  %783 = vmatprep.subr.bf16.mxu0 %v1119_v56 }
  0x58   :  { %826 = vmatprep.subr.bf16.mxu1 %v1122_v58 }
  0x5a   :  { %784 = vmatpush2.bf16.msra.mxu0 %v1121_v57 }
  0x5b   :  { %827 = vmatpush2.bf16.msra.mxu1 %v1124_v59  ;;  %785 = vmatprep.subr.bf16.mxu0 %v1125_v60 }
  0x5c   :  { %828 = vmatprep.subr.bf16.mxu1 %v1128_v62 }
  0x5e   :  { %786 = vmatpush2.bf16.msra.mxu0 %v1127_v61 }
  0x5f   :  { %829 = vmatpush2.bf16.msra.mxu1 %v1130_v63 }
  0xbe   :  { %v80_v22 = vpop.xlane.xlu0 %79 }
  0xbf   :  { %v85_v23 = vmul.f32 0.00390625, %v80_v22 }
  0xc1   :  { %v1373_v24 = vsub.f32 %v72_v0, %v85_v23  ;;  %v1375_v25 = vsub.f32 %v73_v1, %v85_v23  ;;  %v1131_v0 = vld [vmem:[#allocation6 + $0x244] ss:$24 sps:$4 sm:$0xff]   ;;  %v1133_v1 = vld [vmem:[#allocation6 + $0x240] ss:$24 sps:$4 sm:$0xff]  }
  0xc2   :  { %v83_v26 = vpop.xlane.xlu0 %82  ;;  %787 = vmatprep.subr.bf16.mxu0 %v1131_v0  ;;  %v1161_v0 = vld [vmem:[#allocation6 + $0x160] ss:$24 sps:$4 sm:$0xff]  }
  0xc3   :  { %v86_v27 = vmul.f32 0.00390625, %v83_v26  ;;  %v91_v28 = vmul.f32 %v1373_v24, %v1373_v24  ;;  %v92_v29 = vmul.f32 %v1375_v25, %v1375_v25  ;;  %788 = vmatpush2.bf16.msra.mxu0 %v1133_v1 }
  0xc5   :  { %v1381_v30 = vsub.f32 %v74_v2, %v86_v27  ;;  %v1383_v31 = vsub.f32 %v75_v4, %v86_v27  ;;  %v95_v32 = vadd.f32 %v92_v29, %v91_v28  ;;  %v1134_v2 = vld [vmem:[#allocation6 + $0x24c] ss:$24 sps:$4 sm:$0xff]  }
  0xc6   :  { %v1137_v4 = vld [vmem:[#allocation6 + $0x214] ss:$24 sps:$4 sm:$0xff]   ;;  %830 = vmatprep.subr.bf16.mxu1 %v1134_v2 }
  0xc7   :  { %96 = vadd.xlane.f32.xlu1 %v95_v32  ;;  %v93_v33 = vmul.f32 %v1381_v30, %v1381_v30  ;;  %v94_v34 = vmul.f32 %v1383_v31, %v1383_v31  ;;  %831 = vmatpush2.bf16.msra.mxu1 %v1136_v3  ;;  %v1166_v2 = vld [vmem:[#allocation6 + $0x134] ss:$24 sps:$4 sm:$0xff]   ;;  %v1167_v3 = vld [vmem:[#allocation6 + $0x100] ss:$24 sps:$4 sm:$0xff]  }
  0xc8   :  { %789 = vmatprep.subr.bf16.mxu0 %v1137_v4  ;;  %832 = vmatprep.subr.bf16.mxu1 %v1140_v5  ;;  %v1172_v4 = vld [vmem:[#allocation6 + $0xd4] ss:$24 sps:$4 sm:$0xff]   ;;  %v1170_v5 = vld [vmem:[#allocation6 + $0xd0] ss:$24 sps:$4 sm:$0xff]  }
  0xc9   :  { %v98_v35 = vadd.f32 %v94_v34, %v93_v33  ;;  %790 = vmatpush2.bf16.msra.mxu0 %v1139_v6  ;;  %v1175_v6 = vld [vmem:[#allocation6 + $0xa4] ss:$24 sps:$4 sm:$0xff]  }
  0xca   :  { %791 = vmatprep.subr.bf16.mxu0 %v1143_v8  ;;  %v1178_v8 = vld [vmem:[#allocation6 + $0x74] ss:$24 sps:$4 sm:$0xff]  }
  0xcb   :  { %99 = vadd.xlane.f32.xlu1 %v98_v35  ;;  %833 = vmatpush2.bf16.msra.mxu1 %v1142_v7  ;;  %v1173_v7 = vld [vmem:[#allocation6 + $0xa0] ss:$24 sps:$4 sm:$0xff]  }
  0xcc   :  { %834 = vmatprep.subr.bf16.mxu1 %v1146_v9  ;;  %v1176_v9 = vld [vmem:[#allocation6 + $0x70] ss:$24 sps:$4 sm:$0xff]  }
  0xcd   :  { %792 = vmatpush2.bf16.msra.mxu0 %v1145_v10  ;;  %v1181_v10 = vld [vmem:[#allocation6 + $0x44] ss:$24 sps:$4 sm:$0xff]  }
  0xce   :  { %793 = vmatprep.subr.bf16.mxu0 %v1149_v12  ;;  %v1184_v12 = vld [vmem:[#allocation6 + $0x14] ss:$24 sps:$4 sm:$0xff]  }
  0xcf   :  { %835 = vmatpush2.bf16.msra.mxu1 %v1148_v11  ;;  %v1179_v11 = vld [vmem:[#allocation6 + $0x40] ss:$24 sps:$4 sm:$0xff]  }
  0xd0   :  { %836 = vmatprep.subr.bf16.mxu1 %v1152_v13  ;;  %v1182_v13 = vld [vmem:[#allocation6 + $0x10] ss:$24 sps:$4 sm:$0xff]  }
  0xd1   :  { %794 = vmatpush2.bf16.msra.mxu0 %v1151_v14  ;;  %v1187_v14 = vld [vmem:[#allocation6 + $0x2e4] ss:$24 sps:$4 sm:$0xff]  }
  0xd2   :  { %795 = vmatprep.subr.bf16.mxu0 %v1155_v16  ;;  %v1190_v16 = vld [vmem:[#allocation6 + $0x2b4] ss:$24 sps:$4 sm:$0xff]  }
  0xd3   :  { %837 = vmatpush2.bf16.msra.mxu1 %v1154_v15  ;;  %v1185_v15 = vld [vmem:[#allocation6 + $0x2e0] ss:$24 sps:$4 sm:$0xff]  }
  0xd4   :  { %838 = vmatprep.subr.bf16.mxu1 %v1158_v17  ;;  %v1188_v17 = vld [vmem:[#allocation6 + $0x2b0] ss:$24 sps:$4 sm:$0xff]  }
  0xd5   :  { %796 = vmatpush2.bf16.msra.mxu0 %v1157_v18  ;;  %v1193_v18 = vld [vmem:[#allocation6 + $0x284] ss:$24 sps:$4 sm:$0xff]  }
  0xd6   :  { %851 = vmatprep.subr.bf16.mxu0 %v1163_v20  ;;  %v1196_v20 = vld [vmem:[#allocation6 + $0x254] ss:$24 sps:$4 sm:$0xff]  }
  0xd7   :  { %839 = vmatpush2.bf16.msra.mxu1 %v1160_v19  ;;  %v1191_v19 = vld [vmem:[#allocation6 + $0x280] ss:$24 sps:$4 sm:$0xff]  }
 0x150   :  { %v97_v21 = vpop.xlane.xlu1 %96 }
 0x151   :  { %v101_v22 = vmul.f32 0.00390625, %v97_v21  ;;  %v1194_v21 = vld [vmem:[#allocation6 + $0x250] ss:$24 sps:$4 sm:$0xff]  }
 0x153   :  { %v103_v23 = vadd.f32 1e-05, %v101_v22  ;;  %v1199_v22 = vld [vmem:[#allocation6 + $0x224] ss:$24 sps:$4 sm:$0xff]  }
 0x154   :  { %v100_v26 = vpop.xlane.xlu1 %99 }
 0x155   :  { %1209 = vrsqrt.f32 %v103_v23  ;;  %v102_v27 = vmul.f32 0.00390625, %v100_v26  ;;  %vm107_vm0 = vcmp.eq.f32.partialorder %v103_v23, inf  ;;  %v110_v33 = vand.u32 2147483648, %v103_v23  ;;  %v1202_v26 = vld [vmem:[#allocation6 + $0x1f4] ss:$24 sps:$4 sm:$0xff]  }
 0x156   :  { %vm109_vm1 = vcmp.eq.f32.partialorder %v103_v23, 0.0 }
 0x157   :  { %v104_v28 = vadd.f32 1e-05, %v102_v27  ;;  %v1200_v27 = vld [vmem:[#allocation6 + $0x1f0] ss:$24 sps:$4 sm:$0xff]  }
 0x159   :  { %1211 = vrsqrt.f32 %v104_v28  ;;  %vm114_vm2 = vcmp.eq.f32.partialorder %v104_v28, inf  ;;  %v117_v38 = vand.u32 2147483648, %v104_v28  ;;  %vm116_vm3 = vcmp.eq.f32.partialorder %v104_v28, 0.0 }
 0x162   :  { %v1210_v29 = vpop.eup %1209 }
 0x163   :  { %v106_v32 = vmul.f32 %v1210_v29, %v103_v23  ;;  %v1203_v29 = vld [vmem:[#allocation6 + $0x1c0] ss:$24 sps:$4 sm:$0xff]  }
 0x165   :  { %v108_v34 = vsel %vm107_vm0, %v103_v23, %v106_v32  ;;  %v1197_v23 = vld [vmem:[#allocation6 + $0x220] ss:$24 sps:$4 sm:$0xff]   ;;  %v1208_v32 = vld [vmem:[#allocation6 + $0x194] ss:$24 sps:$4 sm:$0xff]  }
 0x166   :  { %v111_v35 = vsel %vm109_vm1, %v110_v33, %v108_v34  ;;  %v1212_v36 = vpop.eup %1211  ;;  %v1206_v33 = vld [vmem:[#allocation6 + $0x190] ss:$24 sps:$4 sm:$0xff]   ;;  %v265_v34 = vsub.s32 2, %v1389_v42 }
 0x167   :  { %1213 = vrcp.f32 %v111_v35  ;;  %v113_v37 = vmul.f32 %v1212_v36, %v104_v28  ;;  %v269_v35 = vsub.s32 3, %v1389_v42  ;;  %v253_v36 = vld [vmem:[#allocation7] sm:$0x3f] }
 0x169   :  { %v115_v39 = vsel %vm114_vm2, %v104_v28, %v113_v37  ;;  %v1205_v28 = vld [vmem:[#allocation6 + $0x1c4] ss:$24 sps:$4 sm:$0xff]   ;;  %v258_v37 = vrot.slane %v253_v36, %v1395_v44  ;;  %v270_v40 = vrot.slane %v253_v36, %v269_v35 }
 0x16a   :  { %v118_v41 = vsel %vm116_vm3, %v117_v38, %v115_v39  ;;  %v266_v38 = vrot.slane %v253_v36, %v265_v34  ;;  %v262_v39 = vrot.slane %v253_v36, %v1392_v43 }
 0x16b   :  { %1215 = vrcp.f32 %v118_v41 }
 0x174   :  { %v1214_v46 = vpop.eup %1213 }
 0x175   :  { %v121_v48 = vmul.f32 %v1214_v46, %v1375_v25  ;;  %v120_v50 = vmul.f32 %v1214_v46, %v1373_v24 }
 0x177   :  { %v137_v56 = vmul.f32 %v133_v49, %v121_v48  ;;  %v136_v58 = vmul.f32 %v129_v51, %v120_v50 }
 0x178   :  { %v1216_v52 = vpop.eup %1215 }
 0x179   :  { %v124_v55 = vmul.f32 %v1216_v52, %v1383_v31  ;;  %v123_v57 = vmul.f32 %v1216_v52, %v1381_v30  ;;  %v152_v25 = vadd.f32 %v148_v53, %v137_v56  ;;  %v151_v62 = vadd.f32 %v144_v54, %v136_v58  ;;  %v1164_v30 = vld [vmem:[#allocation6 + $0x130] ss:$24 sps:$4 sm:$0xff]   ;;  %v1169_v31 = vld [vmem:[#allocation6 + $0x104] ss:$24 sps:$4 sm:$0xff]  }
 0x17b   :  { %v139_v59 = vmul.f32 %v133_v49, %v124_v55  ;;  %v138_v60 = vmul.f32 %v129_v51, %v123_v57 }
 0x17d   :  { %v154_v61 = vadd.f32 %v148_v53, %v139_v59  ;;  %v153_v63 = vadd.f32 %v144_v54, %v138_v60 }
 0x17f   :  { %v156_v24 = vpack.c.bf16 %v154_v61, %v152_v25  ;;  %v1405_v1 = vpack.c.bf16 %v153_v63, %v151_v62  ;;  %v273_v61 = vsub.s32 4, %v1389_v42  ;;  %v277_v62 = vsub.s32 5, %v1389_v42 }
 0x181   :  { %797 = vmatprep.mubr.bf16.mxu0 %v156_v24  ;;  %840 = vmatprep.mubr.bf16.mxu1 %v156_v24  ;;  %v274_v63 = vrot.slane %v253_v36, %v273_v61 }
 0x182   :  { %798 = vmatmul.mubr.bf16.vlgmr.msra.gmra.mxu0 %v1405_v1  ;;  %841 = vmatmul.mubr.bf16.vlgmr.msra.gmra.mxu1 %v1405_v1 }
 0x183   :  { %852 = vmatpush1.bf16.msra.mxu0 %v1161_v0  ;;  %883 = vmatprep.mubr.bf16.mxu0 %v156_v24  ;;  %v278_v24 = vrot.slane %v253_v36, %v277_v62 }
 0x184   :  { %853 = vmatprep.subr.bf16.mxu0 %v1166_v2 }
 0x187   :  { %854 = vmatpush1.bf16.msra.mxu0 %v1164_v30 }
 0x188   :  { %855 = vmatprep.subr.bf16.mxu0 %v1169_v31 }
 0x18b   :  { %856 = vmatpush1.bf16.msra.mxu0 %v1167_v3 }
 0x18c   :  { %857 = vmatprep.subr.bf16.mxu0 %v1172_v4 }
 0x18f   :  { %858 = vmatpush1.bf16.msra.mxu0 %v1170_v5 }
 0x190   :  { %859 = vmatprep.subr.bf16.mxu0 %v1175_v6 }
 0x193   :  { %860 = vmatpush1.bf16.msra.mxu0 %v1173_v7 }
 0x194   :  { %861 = vmatprep.subr.bf16.mxu0 %v1178_v8 }
 0x197   :  { %862 = vmatpush1.bf16.msra.mxu0 %v1176_v9 }
 0x198   :  { %863 = vmatprep.subr.bf16.mxu0 %v1181_v10 }
 0x19b   :  { %864 = vmatpush1.bf16.msra.mxu0 %v1179_v11 }
 0x19c   :  { %865 = vmatprep.subr.bf16.mxu0 %v1184_v12 }
 0x19f   :  { %866 = vmatpush1.bf16.msra.mxu0 %v1182_v13 }
 0x1a0   :  { %867 = vmatprep.subr.bf16.mxu0 %v1187_v14 }
 0x1a3   :  { %868 = vmatpush2.bf16.msra.mxu0 %v1185_v15 }
 0x1a4   :  { %869 = vmatprep.subr.bf16.mxu0 %v1190_v16 }
 0x1a7   :  { %870 = vmatpush2.bf16.msra.mxu0 %v1188_v17 }
 0x1a8   :  { %871 = vmatprep.subr.bf16.mxu0 %v1193_v18 }
 0x1ab   :  { %872 = vmatpush2.bf16.msra.mxu0 %v1191_v19 }
 0x1ac   :  { %873 = vmatprep.subr.bf16.mxu0 %v1196_v20 }
 0x1af   :  { %874 = vmatpush2.bf16.msra.mxu0 %v1194_v21 }
 0x1b0   :  { %875 = vmatprep.subr.bf16.mxu0 %v1199_v22 }
 0x1b3   :  { %876 = vmatpush2.bf16.msra.mxu0 %v1197_v23 }
 0x1b4   :  { %877 = vmatprep.subr.bf16.mxu0 %v1202_v26 }
 0x1b7   :  { %878 = vmatpush2.bf16.msra.mxu0 %v1200_v27 }
 0x1b8   :  { %879 = vmatprep.subr.bf16.mxu0 %v1205_v28 }
 0x1bb   :  { %880 = vmatpush2.bf16.msra.mxu0 %v1203_v29 }
 0x1bc   :  { %881 = vmatprep.subr.bf16.mxu0 %v1208_v32 }
 0x1bf   :  { %882 = vmatpush2.bf16.msra.mxu0 %v1206_v33 }
 0x1c2   :  { %884 = vmatmul.mubr.bf16.vlgmr.msra.gmra.mxu0 %v1405_v1 }
 0x242   :  { %v799_v41 = vpop.f32.mrf.mxu0  ;;  %v842_v45 = vpop.f32.mrf.mxu1 }
 0x243   :  { %v800_v48 = vadd.f32 %v799_v41, %v258_v37  ;;  %v843_v49 = vadd.f32 %v842_v45, %v266_v38 }
 0x244   :  { %v801_v46 = vpop.f32.mrf.mxu0  ;;  %v844_v47 = vpop.f32.mrf.mxu1 }
 0x245   :  { %v802_v50 = vadd.f32 %v801_v46, %v262_v39  ;;  %v845_v51 = vadd.f32 %v844_v47, %v270_v40 }
 0x246   :  { %v803_v52 = vpop.f32.mrf.mxu0  ;;  %v846_v53 = vpop.f32.mrf.mxu1 }
 0x247   :  { %v1053_v54 = vpack.c.bf16 %v802_v50, %v800_v48  ;;  %v1055_v55 = vpack.c.bf16 %v845_v51, %v843_v49  ;;  %v804_v43 = vadd.f32 %v803_v52, %v258_v37  ;;  %v847_v44 = vadd.f32 %v846_v53, %v266_v38 }
 0x248   :  { %v805_v56 = vpop.f32.mrf.mxu0  ;;  %v848_v57 = vpop.f32.mrf.mxu1 }
 0x249   :  { %906 = vst [vmem:[%s1439_s5] sm:$0xff] %v1053_v54  ;;  %920 = vst [vmem:[%s1440_s6] sm:$0xff] %v1055_v55  ;;  %v806_v58 = vadd.f32 %v805_v56, %v262_v39  ;;  %v849_v59 = vadd.f32 %v848_v57, %v270_v40 }
 0x24b   :  { %v1054_v60 = vpack.c.bf16 %v806_v58, %v804_v43  ;;  %v1056_v25 = vpack.c.bf16 %v849_v59, %v847_v44 }
 0x24d   :  { %907 = vst [vmem:[%s1439_s5 + $0x8] sm:$0xff] %v1054_v60  ;;  %921 = vst [vmem:[%s1440_s6 + $0x8] sm:$0xff] %v1056_v25 }
 0x282   :  { %v885_v0 = vpop.f32.mrf.mxu0 }
 0x283   :  { %v886_v2 = vadd.f32 %v885_v0, %v274_v63 }
 0x284   :  { %v887_v1 = vpop.f32.mrf.mxu0 }
 0x285   :  { %v888_v30 = vadd.f32 %v887_v1, %v278_v24 }
 0x286   :  { %v889_v31 = vpop.f32.mrf.mxu0 }
 0x287   :  { %v1057_v3 = vpack.c.bf16 %v888_v30, %v886_v2  ;;  %v890_v5 = vadd.f32 %v889_v31, %v274_v63 }
 0x288   :  { %v891_v4 = vpop.f32.mrf.mxu0 }
 0x289   :  { %934 = vst [vmem:[%s1441_s7] sm:$0xff] %v1057_v3  ;;  %v892_v6 = vadd.f32 %v891_v4, %v278_v24 }
 0x28b   :  { %v1058_v7 = vpack.c.bf16 %v892_v6, %v890_v5 }
 0x28d   :  { %935 = vst [vmem:[%s1441_s7 + $0x8] sm:$0xff] %v1058_v7 }
 0x28e   :  { %948 = vsyncpa [#allocation3], 1 }
 0x28f   :  { %949 = vsyncpa [#allocation5], 1 }
 0x290   :  { %950 = vsyncpa [#allocation8], 1 }

// kernel: _lambda_.18
= control target key start
LH: loop header
LB: loop body
LE: loop exit
PB: predicated region body
PF: predicated region fallthrough
CT: control target
= control target key end

     0   :  { %v68_v32 = vlaneseq  ;;  %s163_s0 = inlined_call_operand.vmem [shape: f32[16,256], index: 0, kind: input, shape index: {}]   ;;  %s164_s1 = inlined_call_operand.vmem [shape: f32[1,256], index: 1, kind: input, shape index: {}]   ;;  %s165_s2 = inlined_call_operand.vmem [shape: f32[1,256], index: 2, kind: input, shape index: {}]   ;;  %s166_s3 = inlined_call_operand.vmem [shape: f32[16,256], index: 3, kind: output, shape index: {}]  }
   0x1   :  { %v14_v0 = vld [vmem:[%s163_s0] sm:$0xff]  ;;  %v15_v1 = vld [vmem:[%s163_s0 + $0x8] sm:$0xff]  ;;  %v16_v2 = vld [vmem:[%s163_s0 + $0x10] sm:$0xff] }
   0x2   :  { %v20_v3 = vadd.f32 %v15_v1, %v14_v0  ;;  %v17_v4 = vld [vmem:[%s163_s0 + $0x18] sm:$0xff]  ;;  %v69_v36 = vshrl.u32 %v68_v32, 7  ;;  %v18_v40 = vld [vmem:[%s164_s1] sm:$0x3] }
   0x3   :  { %v23_v5 = vadd.f32 %v17_v4, %v16_v2  ;;  %v19_v41 = vld [vmem:[%s165_s2] sm:$0x3] }
   0x4   :  { %21 = vadd.xlane.f32.xlu0 %v20_v3  ;;  %v70_v38 = vsub.s32 0, %v69_v36  ;;  %v74_v39 = vsub.s32 1, %v69_v36 }
   0x6   :  { %v71_v42 = vrot.slane %v18_v40, %v70_v38  ;;  %v75_v43 = vrot.slane %v18_v40, %v74_v39  ;;  %v86_v45 = vrot.slane %v19_v41, %v70_v38  ;;  %v90_v46 = vrot.slane %v19_v41, %v74_v39 }
   0x8   :  { %24 = vadd.xlane.f32.xlu0 %v23_v5 }
  0x8d   :  { %v22_v6 = vpop.xlane.xlu0 %21 }
  0x8e   :  { %v27_v7 = vmul.f32 0.00390625, %v22_v6 }
  0x90   :  { %v29_v8 = vsub.f32 %v14_v0, %v27_v7  ;;  %v30_v9 = vsub.f32 %v15_v1, %v27_v7 }
  0x91   :  { %v25_v10 = vpop.xlane.xlu0 %24 }
  0x92   :  { %v28_v11 = vmul.f32 0.00390625, %v25_v10  ;;  %v33_v12 = vmul.f32 %v29_v8, %v29_v8  ;;  %v34_v13 = vmul.f32 %v30_v9, %v30_v9 }
  0x94   :  { %v31_v14 = vsub.f32 %v16_v2, %v28_v11  ;;  %v32_v15 = vsub.f32 %v17_v4, %v28_v11  ;;  %v37_v16 = vadd.f32 %v34_v13, %v33_v12 }
  0x96   :  { %38 = vadd.xlane.f32.xlu1 %v37_v16  ;;  %v35_v17 = vmul.f32 %v31_v14, %v31_v14  ;;  %v36_v18 = vmul.f32 %v32_v15, %v32_v15 }
  0x98   :  { %v40_v19 = vadd.f32 %v36_v18, %v35_v17 }
  0x9a   :  { %41 = vadd.xlane.f32.xlu1 %v40_v19 }
 0x11f   :  { %v39_v20 = vpop.xlane.xlu1 %38 }
 0x120   :  { %v43_v21 = vmul.f32 0.00390625, %v39_v20 }
 0x122   :  { %v45_v22 = vadd.f32 1e-05, %v43_v21 }
 0x123   :  { %v42_v23 = vpop.xlane.xlu1 %41 }
 0x124   :  { %105 = vrsqrt.f32 %v45_v22  ;;  %v44_v24 = vmul.f32 0.00390625, %v42_v23  ;;  %vm49_vm0 = vcmp.eq.f32.partialorder %v45_v22, inf  ;;  %v52_v28 = vand.u32 2147483648, %v45_v22 }
 0x125   :  { %vm51_vm1 = vcmp.eq.f32.partialorder %v45_v22, 0.0 }
 0x126   :  { %v46_v25 = vadd.f32 1e-05, %v44_v24 }
 0x128   :  { %107 = vrsqrt.f32 %v46_v25  ;;  %vm56_vm2 = vcmp.eq.f32.partialorder %v46_v25, inf  ;;  %v59_v34 = vand.u32 2147483648, %v46_v25  ;;  %vm58_vm3 = vcmp.eq.f32.partialorder %v46_v25, 0.0 }
 0x131   :  { %v106_v26 = vpop.eup %105 }
 0x132   :  { %v48_v27 = vmul.f32 %v106_v26, %v45_v22 }
 0x134   :  { %v50_v29 = vsel %vm49_vm0, %v45_v22, %v48_v27 }
 0x135   :  { %v53_v30 = vsel %vm51_vm1, %v52_v28, %v50_v29  ;;  %v108_v31 = vpop.eup %107 }
 0x136   :  { %109 = vrcp.f32 %v53_v30  ;;  %v55_v33 = vmul.f32 %v108_v31, %v46_v25 }
 0x138   :  { %v57_v35 = vsel %vm56_vm2, %v46_v25, %v55_v33 }
 0x139   :  { %v60_v37 = vsel %vm58_vm3, %v59_v34, %v57_v35 }
 0x13a   :  { %111 = vrcp.f32 %v60_v37 }
 0x143   :  { %v110_v44 = vpop.eup %109 }
 0x144   :  { %v62_v47 = vmul.f32 %v110_v44, %v29_v8  ;;  %v63_v48 = vmul.f32 %v110_v44, %v30_v9 }
 0x146   :  { %v78_v49 = vmul.f32 %v71_v42, %v62_v47  ;;  %v79_v50 = vmul.f32 %v75_v43, %v63_v48 }
 0x147   :  { %v112_v51 = vpop.eup %111 }
 0x148   :  { %v93_v52 = vadd.f32 %v86_v45, %v78_v49  ;;  %v94_v53 = vadd.f32 %v90_v46, %v79_v50  ;;  %v65_v54 = vmul.f32 %v112_v51, %v31_v14  ;;  %v66_v55 = vmul.f32 %v112_v51, %v32_v15 }
 0x14a   :  { %97 = vst [vmem:[%s166_s3] sm:$0xff] %v93_v52  ;;  %98 = vst [vmem:[%s166_s3 + $0x8] sm:$0xff] %v94_v53  ;;  %v80_v56 = vmul.f32 %v71_v42, %v65_v54  ;;  %v81_v57 = vmul.f32 %v75_v43, %v66_v55 }
 0x14c   :  { %v95_v58 = vadd.f32 %v86_v45, %v80_v56  ;;  %v96_v59 = vadd.f32 %v90_v46, %v81_v57 }
 0x14e   :  { %99 = vst [vmem:[%s166_s3 + $0x10] sm:$0xff] %v95_v58  ;;  %100 = vst [vmem:[%s166_s3 + $0x18] sm:$0xff] %v96_v59 }

// kernel: _lambda_.14
= control target key start
LH: loop header
LB: loop body
LE: loop exit
PB: predicated region body
PF: predicated region fallthrough
CT: control target
= control target key end

     0   :  { %s1569_s0 = inlined_call_operand.vmem [shape: f32[16,256], index: 0, kind: input, shape index: {}]   ;;  %s1570_s3 = inlined_call_operand.vmem [shape: bf16[256,768], index: 3, kind: input, shape index: {}]   ;;  %s1571_s1 = inlined_call_operand.vmem [shape: f32[1,256], index: 1, kind: input, shape index: {}]   ;;  %s1572_s2 = inlined_call_operand.vmem [shape: f32[1,256], index: 2, kind: input, shape index: {}]   ;;  %s1573_s4 = inlined_call_operand.vmem [shape: f32[1,768], index: 4, kind: input, shape index: {}]   ;;  %s1574_s5 = inlined_call_operand.vmem [shape: bf16[16,256], index: 5, kind: output, shape index: {0}]   ;;  %s1575_s6 = inlined_call_operand.vmem [shape: bf16[16,256], index: 6, kind: output, shape index: {1}]   ;;  %s1576_s7 = inlined_call_operand.vmem [shape: bf16[16,256], index: 7, kind: output, shape index: {2}]  }
   0x1   :  { %v23_v0 = vld [vmem:[%s1569_s0] sm:$0xff]  ;;  %v24_v1 = vld [vmem:[%s1569_s0 + $0x8] sm:$0xff]  ;;  %v25_v2 = vld [vmem:[%s1569_s0 + $0x10] sm:$0xff] }
   0x2   :  { %v29_v3 = vadd.f32 %v24_v1, %v23_v0  ;;  %v26_v4 = vld [vmem:[%s1569_s0 + $0x18] sm:$0xff]  ;;  %v1007_v6 = vld [vmem:[%s1570_s3 + $0x154] ss:$24 sps:$4 sm:$0xff]   ;;  %v1009_v7 = vld [vmem:[%s1570_s3 + $0x150] ss:$24 sps:$4 sm:$0xff]  }
   0x3   :  { %v32_v5 = vadd.f32 %v26_v4, %v25_v2  ;;  %716 = vmatprep.subr.bf16.mxu0 %v1007_v6  ;;  %v1010_v8 = vld [vmem:[%s1570_s3 + $0x15c] ss:$24 sps:$4 sm:$0xff]   ;;  %v1012_v9 = vld [vmem:[%s1570_s3 + $0x158] ss:$24 sps:$4 sm:$0xff]   ;;  %v1016_v12 = vld [vmem:[%s1570_s3 + $0x12c] ss:$24 sps:$4 sm:$0xff]  }
   0x4   :  { %30 = vadd.xlane.f32.xlu0 %v29_v3  ;;  %717 = vmatpush1.bf16.msra.mxu0 %v1009_v7  ;;  %v1013_v10 = vld [vmem:[%s1570_s3 + $0x124] ss:$24 sps:$4 sm:$0xff]   ;;  %v1015_v11 = vld [vmem:[%s1570_s3 + $0x120] ss:$24 sps:$4 sm:$0xff]   ;;  %v1019_v14 = vld [vmem:[%s1570_s3 + $0xf4] ss:$24 sps:$4 sm:$0xff]  }
   0x5   :  { %759 = vmatprep.subr.bf16.mxu1 %v1010_v8  ;;  %718 = vmatprep.subr.bf16.mxu0 %v1013_v10  ;;  %v1018_v13 = vld [vmem:[%s1570_s3 + $0x128] ss:$24 sps:$4 sm:$0xff]   ;;  %v1022_v16 = vld [vmem:[%s1570_s3 + $0xfc] ss:$24 sps:$4 sm:$0xff]   ;;  %v1024_v18 = vld [vmem:[%s1570_s3 + $0xf8] ss:$24 sps:$4 sm:$0xff]  }
   0x6   :  { %760 = vmatpush1.bf16.msra.mxu1 %v1012_v9  ;;  %v1021_v15 = vld [vmem:[%s1570_s3 + $0xf0] ss:$24 sps:$4 sm:$0xff]   ;;  %v1025_v17 = vld [vmem:[%s1570_s3 + $0xc4] ss:$24 sps:$4 sm:$0xff]   ;;  %v1027_v19 = vld [vmem:[%s1570_s3 + $0xc0] ss:$24 sps:$4 sm:$0xff]  }
   0x7   :  { %761 = vmatprep.subr.bf16.mxu1 %v1016_v12  ;;  %v1028_v20 = vld [vmem:[%s1570_s3 + $0xcc] ss:$24 sps:$4 sm:$0xff]   ;;  %v1030_v21 = vld [vmem:[%s1570_s3 + $0xc8] ss:$24 sps:$4 sm:$0xff]   ;;  %v1034_v38 = vld [vmem:[%s1570_s3 + $0x9c] ss:$24 sps:$4 sm:$0xff]  }
   0x8   :  { %33 = vadd.xlane.f32.xlu0 %v32_v5  ;;  %719 = vmatpush1.bf16.msra.mxu0 %v1015_v11  ;;  %v1031_v36 = vld [vmem:[%s1570_s3 + $0x94] ss:$24 sps:$4 sm:$0xff]   ;;  %v1033_v37 = vld [vmem:[%s1570_s3 + $0x90] ss:$24 sps:$4 sm:$0xff]   ;;  %v1037_v40 = vld [vmem:[%s1570_s3 + $0x64] ss:$24 sps:$4 sm:$0xff]  }
   0x9   :  { %720 = vmatprep.subr.bf16.mxu0 %v1019_v14  ;;  %v1036_v39 = vld [vmem:[%s1570_s3 + $0x98] ss:$24 sps:$4 sm:$0xff]   ;;  %v1040_v42 = vld [vmem:[%s1570_s3 + $0x6c] ss:$24 sps:$4 sm:$0xff]   ;;  %v1042_v43 = vld [vmem:[%s1570_s3 + $0x68] ss:$24 sps:$4 sm:$0xff]  }
   0xa   :  { %762 = vmatpush1.bf16.msra.mxu1 %v1018_v13  ;;  %v1039_v41 = vld [vmem:[%s1570_s3 + $0x60] ss:$24 sps:$4 sm:$0xff]   ;;  %v1043_v44 = vld [vmem:[%s1570_s3 + $0x34] ss:$24 sps:$4 sm:$0xff]   ;;  %v1045_v45 = vld [vmem:[%s1570_s3 + $0x30] ss:$24 sps:$4 sm:$0xff]  }
   0xb   :  { %763 = vmatprep.subr.bf16.mxu1 %v1022_v16  ;;  %v1046_v46 = vld [vmem:[%s1570_s3 + $0x3c] ss:$24 sps:$4 sm:$0xff]   ;;  %v1048_v47 = vld [vmem:[%s1570_s3 + $0x38] ss:$24 sps:$4 sm:$0xff]   ;;  %v1052_v50 = vld [vmem:[%s1570_s3 + $0xc] ss:$24 sps:$4 sm:$0xff]  }
   0xc   :  { %721 = vmatpush1.bf16.msra.mxu0 %v1021_v15  ;;  %v1049_v48 = vld [vmem:[%s1570_s3 + $0x4] ss:$24 sps:$4 sm:$0xff]   ;;  %v1051_v49 = vld [vmem:[%s1570_s3] ss:$24 sps:$4 sm:$0xff]   ;;  %v1055_v52 = vld [vmem:[%s1570_s3 + $0x2d4] ss:$24 sps:$4 sm:$0xff]  }
   0xd   :  { %722 = vmatprep.subr.bf16.mxu0 %v1025_v17  ;;  %v1054_v51 = vld [vmem:[%s1570_s3 + $0x8] ss:$24 sps:$4 sm:$0xff]   ;;  %v1058_v54 = vld [vmem:[%s1570_s3 + $0x2dc] ss:$24 sps:$4 sm:$0xff]   ;;  %v1060_v55 = vld [vmem:[%s1570_s3 + $0x2d8] ss:$24 sps:$4 sm:$0xff]  }
   0xe   :  { %764 = vmatpush1.bf16.msra.mxu1 %v1024_v18  ;;  %v1057_v53 = vld [vmem:[%s1570_s3 + $0x2d0] ss:$24 sps:$4 sm:$0xff]   ;;  %v1061_v56 = vld [vmem:[%s1570_s3 + $0x2a4] ss:$24 sps:$4 sm:$0xff]   ;;  %v1063_v57 = vld [vmem:[%s1570_s3 + $0x2a0] ss:$24 sps:$4 sm:$0xff]  }
   0xf   :  { %765 = vmatprep.subr.bf16.mxu1 %v1028_v20  ;;  %v1064_v58 = vld [vmem:[%s1570_s3 + $0x2ac] ss:$24 sps:$4 sm:$0xff]   ;;  %v1066_v59 = vld [vmem:[%s1570_s3 + $0x2a8] ss:$24 sps:$4 sm:$0xff]   ;;  %v1070_v62 = vld [vmem:[%s1570_s3 + $0x27c] ss:$24 sps:$4 sm:$0xff]  }
  0x10   :  { %723 = vmatpush1.bf16.msra.mxu0 %v1027_v19  ;;  %v1067_v60 = vld [vmem:[%s1570_s3 + $0x274] ss:$24 sps:$4 sm:$0xff]   ;;  %v1069_v61 = vld [vmem:[%s1570_s3 + $0x270] ss:$24 sps:$4 sm:$0xff]   ;;  %v1085_v8 = vld [vmem:[%s1570_s3 + $0x1e4] ss:$24 sps:$4 sm:$0xff]  }
  0x11   :  { %724 = vmatprep.subr.bf16.mxu0 %v1031_v36  ;;  %v1072_v63 = vld [vmem:[%s1570_s3 + $0x278] ss:$24 sps:$4 sm:$0xff]   ;;  %v1078_v3 = vld [vmem:[%s1570_s3 + $0x248] ss:$24 sps:$4 sm:$0xff]   ;;  %v1082_v5 = vld [vmem:[%s1570_s3 + $0x21c] ss:$24 sps:$4 sm:$0xff]  }
  0x12   :  { %766 = vmatpush1.bf16.msra.mxu1 %v1030_v21  ;;  %v1081_v6 = vld [vmem:[%s1570_s3 + $0x210] ss:$24 sps:$4 sm:$0xff]   ;;  %v1088_v9 = vld [vmem:[%s1570_s3 + $0x1ec] ss:$24 sps:$4 sm:$0xff]   ;;  %v1087_v10 = vld [vmem:[%s1570_s3 + $0x1e0] ss:$24 sps:$4 sm:$0xff]  }
  0x13   :  { %767 = vmatprep.subr.bf16.mxu1 %v1034_v38  ;;  %v1084_v7 = vld [vmem:[%s1570_s3 + $0x218] ss:$24 sps:$4 sm:$0xff]   ;;  %v1090_v11 = vld [vmem:[%s1570_s3 + $0x1e8] ss:$24 sps:$4 sm:$0xff]   ;;  %v1091_v12 = vld [vmem:[%s1570_s3 + $0x1b4] ss:$24 sps:$4 sm:$0xff]  }
  0x14   :  { %725 = vmatpush1.bf16.msra.mxu0 %v1033_v37  ;;  %v1094_v13 = vld [vmem:[%s1570_s3 + $0x1bc] ss:$24 sps:$4 sm:$0xff]   ;;  %v1093_v14 = vld [vmem:[%s1570_s3 + $0x1b0] ss:$24 sps:$4 sm:$0xff]   ;;  %v1100_v17 = vld [vmem:[%s1570_s3 + $0x18c] ss:$24 sps:$4 sm:$0xff]  }
  0x15   :  { %726 = vmatprep.subr.bf16.mxu0 %v1037_v40  ;;  %v1096_v15 = vld [vmem:[%s1570_s3 + $0x1b8] ss:$24 sps:$4 sm:$0xff]   ;;  %v1097_v16 = vld [vmem:[%s1570_s3 + $0x184] ss:$24 sps:$4 sm:$0xff]   ;;  %v1102_v19 = vld [vmem:[%s1570_s3 + $0x188] ss:$24 sps:$4 sm:$0xff]   ;;  %v77_v40 = vlaneseq }
  0x16   :  { %768 = vmatpush1.bf16.msra.mxu1 %v1036_v39  ;;  %v1099_v18 = vld [vmem:[%s1570_s3 + $0x180] ss:$24 sps:$4 sm:$0xff]   ;;  %v1105_v20 = vld [vmem:[%s1570_s3 + $0x164] ss:$24 sps:$4 sm:$0xff]  }
  0x17   :  { %769 = vmatprep.subr.bf16.mxu1 %v1040_v42  ;;  %v1422_v42 = vshrl.u32 %v77_v40, 7 }
  0x18   :  { %727 = vmatpush1.bf16.msra.mxu0 %v1039_v41 }
  0x19   :  { %728 = vmatprep.subr.bf16.mxu0 %v1043_v44  ;;  %v1428_v44 = vsub.s32 0, %v1422_v42 }
  0x1a   :  { %770 = vmatpush1.bf16.msra.mxu1 %v1042_v43  ;;  %v1425_v43 = vsub.s32 1, %v1422_v42 }
  0x1b   :  { %771 = vmatprep.subr.bf16.mxu1 %v1046_v46 }
  0x1c   :  { %729 = vmatpush1.bf16.msra.mxu0 %v1045_v45  ;;  %v27_v45 = vld [vmem:[%s1571_s1] sm:$0x3] }
  0x1d   :  { %730 = vmatprep.subr.bf16.mxu0 %v1049_v48 }
  0x1e   :  { %772 = vmatpush1.bf16.msra.mxu1 %v1048_v47  ;;  %v28_v47 = vld [vmem:[%s1572_s2] sm:$0x3] }
  0x1f   :  { %773 = vmatprep.subr.bf16.mxu1 %v1052_v50 }
  0x20   :  { %731 = vmatpush1.bf16.msra.mxu0 %v1051_v49  ;;  %v84_v49 = vrot.slane %v27_v45, %v1425_v43 }
  0x21   :  { %732 = vmatprep.subr.bf16.mxu0 %v1055_v52 }
  0x22   :  { %774 = vmatpush1.bf16.msra.mxu1 %v1054_v51  ;;  %v80_v51 = vrot.slane %v27_v45, %v1428_v44 }
  0x23   :  { %775 = vmatprep.subr.bf16.mxu1 %v1058_v54  ;;  %v95_v54 = vrot.slane %v28_v47, %v1428_v44 }
  0x24   :  { %733 = vmatpush2.bf16.msra.mxu0 %v1057_v53  ;;  %v99_v53 = vrot.slane %v28_v47, %v1425_v43 }
  0x25   :  { %734 = vmatprep.subr.bf16.mxu0 %v1061_v56 }
  0x26   :  { %776 = vmatpush2.bf16.msra.mxu1 %v1060_v55 }
  0x27   :  { %777 = vmatprep.subr.bf16.mxu1 %v1064_v58 }
  0x28   :  { %735 = vmatpush2.bf16.msra.mxu0 %v1063_v57 }
  0x29   :  { %736 = vmatprep.subr.bf16.mxu0 %v1067_v60 }
  0x2a   :  { %778 = vmatpush2.bf16.msra.mxu1 %v1066_v59 }
  0x2b   :  { %779 = vmatprep.subr.bf16.mxu1 %v1070_v62 }
  0x2c   :  { %737 = vmatpush2.bf16.msra.mxu0 %v1069_v61 }
  0x2e   :  { %780 = vmatpush2.bf16.msra.mxu1 %v1072_v63 }
  0x8d   :  { %v31_v22 = vpop.xlane.xlu0 %30 }
  0x8e   :  { %v36_v23 = vmul.f32 0.00390625, %v31_v22 }
  0x90   :  { %v1259_v24 = vsub.f32 %v23_v0, %v36_v23  ;;  %v1261_v25 = vsub.f32 %v24_v1, %v36_v23  ;;  %v1073_v0 = vld [vmem:[%s1570_s3 + $0x244] ss:$24 sps:$4 sm:$0xff]   ;;  %v1075_v1 = vld [vmem:[%s1570_s3 + $0x240] ss:$24 sps:$4 sm:$0xff]  }
  0x91   :  { %v34_v26 = vpop.xlane.xlu0 %33  ;;  %738 = vmatprep.subr.bf16.mxu0 %v1073_v0  ;;  %v1103_v0 = vld [vmem:[%s1570_s3 + $0x160] ss:$24 sps:$4 sm:$0xff]  }
  0x92   :  { %v37_v27 = vmul.f32 0.00390625, %v34_v26  ;;  %v42_v28 = vmul.f32 %v1259_v24, %v1259_v24  ;;  %v43_v29 = vmul.f32 %v1261_v25, %v1261_v25  ;;  %739 = vmatpush2.bf16.msra.mxu0 %v1075_v1 }
  0x94   :  { %v1267_v30 = vsub.f32 %v25_v2, %v37_v27  ;;  %v1269_v31 = vsub.f32 %v26_v4, %v37_v27  ;;  %v46_v32 = vadd.f32 %v43_v29, %v42_v28  ;;  %v1076_v2 = vld [vmem:[%s1570_s3 + $0x24c] ss:$24 sps:$4 sm:$0xff]  }
  0x95   :  { %v1079_v4 = vld [vmem:[%s1570_s3 + $0x214] ss:$24 sps:$4 sm:$0xff]   ;;  %781 = vmatprep.subr.bf16.mxu1 %v1076_v2  ;;  %v1111_v2 = vld [vmem:[%s1570_s3 + $0x104] ss:$24 sps:$4 sm:$0xff]  }
  0x96   :  { %47 = vadd.xlane.f32.xlu1 %v46_v32  ;;  %v44_v33 = vmul.f32 %v1267_v30, %v1267_v30  ;;  %v45_v34 = vmul.f32 %v1269_v31, %v1269_v31  ;;  %782 = vmatpush2.bf16.msra.mxu1 %v1078_v3  ;;  %v1109_v3 = vld [vmem:[%s1570_s3 + $0x100] ss:$24 sps:$4 sm:$0xff]  }
  0x97   :  { %740 = vmatprep.subr.bf16.mxu0 %v1079_v4  ;;  %783 = vmatprep.subr.bf16.mxu1 %v1082_v5  ;;  %v1114_v4 = vld [vmem:[%s1570_s3 + $0xd4] ss:$24 sps:$4 sm:$0xff]   ;;  %v1112_v5 = vld [vmem:[%s1570_s3 + $0xd0] ss:$24 sps:$4 sm:$0xff]  }
  0x98   :  { %v49_v35 = vadd.f32 %v45_v34, %v44_v33  ;;  %741 = vmatpush2.bf16.msra.mxu0 %v1081_v6  ;;  %v1117_v6 = vld [vmem:[%s1570_s3 + $0xa4] ss:$24 sps:$4 sm:$0xff]  }
  0x99   :  { %742 = vmatprep.subr.bf16.mxu0 %v1085_v8  ;;  %v1120_v8 = vld [vmem:[%s1570_s3 + $0x74] ss:$24 sps:$4 sm:$0xff]  }
  0x9a   :  { %50 = vadd.xlane.f32.xlu1 %v49_v35  ;;  %784 = vmatpush2.bf16.msra.mxu1 %v1084_v7  ;;  %v1115_v7 = vld [vmem:[%s1570_s3 + $0xa0] ss:$24 sps:$4 sm:$0xff]  }
  0x9b   :  { %785 = vmatprep.subr.bf16.mxu1 %v1088_v9  ;;  %v1118_v9 = vld [vmem:[%s1570_s3 + $0x70] ss:$24 sps:$4 sm:$0xff]  }
  0x9c   :  { %743 = vmatpush2.bf16.msra.mxu0 %v1087_v10  ;;  %v1123_v10 = vld [vmem:[%s1570_s3 + $0x44] ss:$24 sps:$4 sm:$0xff]  }
  0x9d   :  { %744 = vmatprep.subr.bf16.mxu0 %v1091_v12  ;;  %v1126_v12 = vld [vmem:[%s1570_s3 + $0x14] ss:$24 sps:$4 sm:$0xff]  }
  0x9e   :  { %786 = vmatpush2.bf16.msra.mxu1 %v1090_v11  ;;  %v1121_v11 = vld [vmem:[%s1570_s3 + $0x40] ss:$24 sps:$4 sm:$0xff]  }
  0x9f   :  { %787 = vmatprep.subr.bf16.mxu1 %v1094_v13  ;;  %v1124_v13 = vld [vmem:[%s1570_s3 + $0x10] ss:$24 sps:$4 sm:$0xff]  }
  0xa0   :  { %745 = vmatpush2.bf16.msra.mxu0 %v1093_v14  ;;  %v1129_v14 = vld [vmem:[%s1570_s3 + $0x2e4] ss:$24 sps:$4 sm:$0xff]  }
  0xa1   :  { %746 = vmatprep.subr.bf16.mxu0 %v1097_v16  ;;  %v1132_v16 = vld [vmem:[%s1570_s3 + $0x2b4] ss:$24 sps:$4 sm:$0xff]  }
  0xa2   :  { %788 = vmatpush2.bf16.msra.mxu1 %v1096_v15  ;;  %v1127_v15 = vld [vmem:[%s1570_s3 + $0x2e0] ss:$24 sps:$4 sm:$0xff]  }
  0xa3   :  { %789 = vmatprep.subr.bf16.mxu1 %v1100_v17  ;;  %v1130_v17 = vld [vmem:[%s1570_s3 + $0x2b0] ss:$24 sps:$4 sm:$0xff]  }
  0xa4   :  { %747 = vmatpush2.bf16.msra.mxu0 %v1099_v18  ;;  %v1135_v18 = vld [vmem:[%s1570_s3 + $0x284] ss:$24 sps:$4 sm:$0xff]  }
  0xa5   :  { %802 = vmatprep.subr.bf16.mxu0 %v1105_v20  ;;  %v1138_v20 = vld [vmem:[%s1570_s3 + $0x254] ss:$24 sps:$4 sm:$0xff]  }
  0xa6   :  { %790 = vmatpush2.bf16.msra.mxu1 %v1102_v19  ;;  %v1133_v19 = vld [vmem:[%s1570_s3 + $0x280] ss:$24 sps:$4 sm:$0xff]  }
 0x11f   :  { %v48_v21 = vpop.xlane.xlu1 %47 }
 0x120   :  { %v52_v22 = vmul.f32 0.00390625, %v48_v21  ;;  %v1136_v21 = vld [vmem:[%s1570_s3 + $0x250] ss:$24 sps:$4 sm:$0xff]  }
 0x122   :  { %v54_v23 = vadd.f32 1e-05, %v52_v22  ;;  %v1141_v22 = vld [vmem:[%s1570_s3 + $0x224] ss:$24 sps:$4 sm:$0xff]  }
 0x123   :  { %v51_v26 = vpop.xlane.xlu1 %50 }
 0x124   :  { %1151 = vrsqrt.f32 %v54_v23  ;;  %v53_v27 = vmul.f32 0.00390625, %v51_v26  ;;  %vm58_vm0 = vcmp.eq.f32.partialorder %v54_v23, inf  ;;  %v61_v33 = vand.u32 2147483648, %v54_v23  ;;  %v1144_v26 = vld [vmem:[%s1570_s3 + $0x1f4] ss:$24 sps:$4 sm:$0xff]  }
 0x125   :  { %vm60_vm1 = vcmp.eq.f32.partialorder %v54_v23, 0.0 }
 0x126   :  { %v55_v28 = vadd.f32 1e-05, %v53_v27  ;;  %v1142_v27 = vld [vmem:[%s1570_s3 + $0x1f0] ss:$24 sps:$4 sm:$0xff]  }
 0x128   :  { %1153 = vrsqrt.f32 %v55_v28  ;;  %vm65_vm2 = vcmp.eq.f32.partialorder %v55_v28, inf  ;;  %v68_v38 = vand.u32 2147483648, %v55_v28  ;;  %vm67_vm3 = vcmp.eq.f32.partialorder %v55_v28, 0.0 }
 0x131   :  { %v1152_v29 = vpop.eup %1151 }
 0x132   :  { %v57_v32 = vmul.f32 %v1152_v29, %v54_v23  ;;  %v1145_v29 = vld [vmem:[%s1570_s3 + $0x1c0] ss:$24 sps:$4 sm:$0xff]  }
 0x134   :  { %v59_v34 = vsel %vm58_vm0, %v54_v23, %v57_v32  ;;  %v1139_v23 = vld [vmem:[%s1570_s3 + $0x220] ss:$24 sps:$4 sm:$0xff]   ;;  %v1150_v32 = vld [vmem:[%s1570_s3 + $0x194] ss:$24 sps:$4 sm:$0xff]  }
 0x135   :  { %v62_v35 = vsel %vm60_vm1, %v61_v33, %v59_v34  ;;  %v1154_v36 = vpop.eup %1153  ;;  %v1148_v33 = vld [vmem:[%s1570_s3 + $0x190] ss:$24 sps:$4 sm:$0xff]   ;;  %v216_v34 = vsub.s32 2, %v1422_v42 }
 0x136   :  { %1155 = vrcp.f32 %v62_v35  ;;  %v64_v37 = vmul.f32 %v1154_v36, %v55_v28  ;;  %v220_v35 = vsub.s32 3, %v1422_v42  ;;  %v204_v36 = vld [vmem:[%s1573_s4] sm:$0x3f] }
 0x138   :  { %v66_v39 = vsel %vm65_vm2, %v55_v28, %v64_v37  ;;  %v1147_v28 = vld [vmem:[%s1570_s3 + $0x1c4] ss:$24 sps:$4 sm:$0xff]   ;;  %v209_v37 = vrot.slane %v204_v36, %v1428_v44  ;;  %v221_v40 = vrot.slane %v204_v36, %v220_v35 }
 0x139   :  { %v69_v41 = vsel %vm67_vm3, %v68_v38, %v66_v39  ;;  %v217_v38 = vrot.slane %v204_v36, %v216_v34  ;;  %v213_v39 = vrot.slane %v204_v36, %v1425_v43 }
 0x13a   :  { %1157 = vrcp.f32 %v69_v41 }
 0x143   :  { %v1156_v46 = vpop.eup %1155 }
 0x144   :  { %v72_v48 = vmul.f32 %v1156_v46, %v1261_v25  ;;  %v71_v50 = vmul.f32 %v1156_v46, %v1259_v24 }
 0x146   :  { %v88_v56 = vmul.f32 %v84_v49, %v72_v48  ;;  %v87_v58 = vmul.f32 %v80_v51, %v71_v50 }
 0x147   :  { %v1158_v52 = vpop.eup %1157 }
 0x148   :  { %v75_v55 = vmul.f32 %v1158_v52, %v1269_v31  ;;  %v74_v57 = vmul.f32 %v1158_v52, %v1267_v30  ;;  %v103_v25 = vadd.f32 %v99_v53, %v88_v56  ;;  %v102_v62 = vadd.f32 %v95_v54, %v87_v58  ;;  %v1108_v31 = vld [vmem:[%s1570_s3 + $0x134] ss:$24 sps:$4 sm:$0xff]   ;;  %v1106_v30 = vld [vmem:[%s1570_s3 + $0x130] ss:$24 sps:$4 sm:$0xff]  }
 0x14a   :  { %v90_v59 = vmul.f32 %v84_v49, %v75_v55  ;;  %v89_v60 = vmul.f32 %v80_v51, %v74_v57 }
 0x14c   :  { %v105_v61 = vadd.f32 %v99_v53, %v90_v59  ;;  %v104_v63 = vadd.f32 %v95_v54, %v89_v60 }
 0x14e   :  { %v107_v24 = vpack.c.bf16 %v105_v61, %v103_v25  ;;  %v1447_v1 = vpack.c.bf16 %v104_v63, %v102_v62  ;;  %v224_v61 = vsub.s32 4, %v1422_v42  ;;  %v228_v62 = vsub.s32 5, %v1422_v42 }
 0x150   :  { %748 = vmatprep.mubr.bf16.mxu0 %v107_v24  ;;  %791 = vmatprep.mubr.bf16.mxu1 %v107_v24  ;;  %v225_v63 = vrot.slane %v204_v36, %v224_v61 }
 0x151   :  { %749 = vmatmul.mubr.bf16.vlgmr.msra.gmra.mxu0 %v1447_v1  ;;  %792 = vmatmul.mubr.bf16.vlgmr.msra.gmra.mxu1 %v1447_v1 }
 0x152   :  { %803 = vmatpush1.bf16.msra.mxu0 %v1103_v0  ;;  %834 = vmatprep.mubr.bf16.mxu0 %v107_v24  ;;  %v229_v24 = vrot.slane %v204_v36, %v228_v62 }
 0x153   :  { %804 = vmatprep.subr.bf16.mxu0 %v1108_v31 }
 0x156   :  { %805 = vmatpush1.bf16.msra.mxu0 %v1106_v30 }
 0x157   :  { %806 = vmatprep.subr.bf16.mxu0 %v1111_v2 }
 0x15a   :  { %807 = vmatpush1.bf16.msra.mxu0 %v1109_v3 }
 0x15b   :  { %808 = vmatprep.subr.bf16.mxu0 %v1114_v4 }
 0x15e   :  { %809 = vmatpush1.bf16.msra.mxu0 %v1112_v5 }
 0x15f   :  { %810 = vmatprep.subr.bf16.mxu0 %v1117_v6 }
 0x162   :  { %811 = vmatpush1.bf16.msra.mxu0 %v1115_v7 }
 0x163   :  { %812 = vmatprep.subr.bf16.mxu0 %v1120_v8 }
 0x166   :  { %813 = vmatpush1.bf16.msra.mxu0 %v1118_v9 }
 0x167   :  { %814 = vmatprep.subr.bf16.mxu0 %v1123_v10 }
 0x16a   :  { %815 = vmatpush1.bf16.msra.mxu0 %v1121_v11 }
 0x16b   :  { %816 = vmatprep.subr.bf16.mxu0 %v1126_v12 }
 0x16e   :  { %817 = vmatpush1.bf16.msra.mxu0 %v1124_v13 }
 0x16f   :  { %818 = vmatprep.subr.bf16.mxu0 %v1129_v14 }
 0x172   :  { %819 = vmatpush2.bf16.msra.mxu0 %v1127_v15 }
 0x173   :  { %820 = vmatprep.subr.bf16.mxu0 %v1132_v16 }
 0x176   :  { %821 = vmatpush2.bf16.msra.mxu0 %v1130_v17 }
 0x177   :  { %822 = vmatprep.subr.bf16.mxu0 %v1135_v18 }
 0x17a   :  { %823 = vmatpush2.bf16.msra.mxu0 %v1133_v19 }
 0x17b   :  { %824 = vmatprep.subr.bf16.mxu0 %v1138_v20 }
 0x17e   :  { %825 = vmatpush2.bf16.msra.mxu0 %v1136_v21 }
 0x17f   :  { %826 = vmatprep.subr.bf16.mxu0 %v1141_v22 }
 0x182   :  { %827 = vmatpush2.bf16.msra.mxu0 %v1139_v23 }
 0x183   :  { %828 = vmatprep.subr.bf16.mxu0 %v1144_v26 }
 0x186   :  { %829 = vmatpush2.bf16.msra.mxu0 %v1142_v27 }
 0x187   :  { %830 = vmatprep.subr.bf16.mxu0 %v1147_v28 }
 0x18a   :  { %831 = vmatpush2.bf16.msra.mxu0 %v1145_v29 }
 0x18b   :  { %832 = vmatprep.subr.bf16.mxu0 %v1150_v32 }
 0x18e   :  { %833 = vmatpush2.bf16.msra.mxu0 %v1148_v33 }
 0x191   :  { %835 = vmatmul.mubr.bf16.vlgmr.msra.gmra.mxu0 %v1447_v1 }
 0x211   :  { %v750_v41 = vpop.f32.mrf.mxu0  ;;  %v793_v45 = vpop.f32.mrf.mxu1 }
 0x212   :  { %v751_v48 = vadd.f32 %v750_v41, %v209_v37  ;;  %v794_v49 = vadd.f32 %v793_v45, %v217_v38 }
 0x213   :  { %v752_v46 = vpop.f32.mrf.mxu0  ;;  %v795_v47 = vpop.f32.mrf.mxu1 }
 0x214   :  { %v753_v50 = vadd.f32 %v752_v46, %v213_v39  ;;  %v796_v51 = vadd.f32 %v795_v47, %v221_v40 }
 0x215   :  { %v754_v52 = vpop.f32.mrf.mxu0  ;;  %v797_v53 = vpop.f32.mrf.mxu1 }
 0x216   :  { %v1001_v54 = vpack.c.bf16 %v753_v50, %v751_v48  ;;  %v1003_v55 = vpack.c.bf16 %v796_v51, %v794_v49  ;;  %v755_v43 = vadd.f32 %v754_v52, %v209_v37  ;;  %v798_v44 = vadd.f32 %v797_v53, %v217_v38 }
 0x217   :  { %v756_v56 = vpop.f32.mrf.mxu0  ;;  %v799_v57 = vpop.f32.mrf.mxu1 }
 0x218   :  { %857 = vst [vmem:[%s1574_s5] sm:$0xff] %v1001_v54  ;;  %871 = vst [vmem:[%s1575_s6] sm:$0xff] %v1003_v55  ;;  %v757_v58 = vadd.f32 %v756_v56, %v213_v39  ;;  %v800_v59 = vadd.f32 %v799_v57, %v221_v40 }
 0x21a   :  { %v1002_v60 = vpack.c.bf16 %v757_v58, %v755_v43  ;;  %v1004_v25 = vpack.c.bf16 %v800_v59, %v798_v44 }
 0x21c   :  { %858 = vst [vmem:[%s1574_s5 + $0x8] sm:$0xff] %v1002_v60  ;;  %872 = vst [vmem:[%s1575_s6 + $0x8] sm:$0xff] %v1004_v25 }
 0x251   :  { %v836_v0 = vpop.f32.mrf.mxu0 }
 0x252   :  { %v837_v31 = vadd.f32 %v836_v0, %v225_v63 }
 0x253   :  { %v838_v1 = vpop.f32.mrf.mxu0 }
 0x254   :  { %v839_v30 = vadd.f32 %v838_v1, %v229_v24 }
 0x255   :  { %v840_v2 = vpop.f32.mrf.mxu0 }
 0x256   :  { %v1005_v3 = vpack.c.bf16 %v839_v30, %v837_v31  ;;  %v841_v5 = vadd.f32 %v840_v2, %v225_v63 }
 0x257   :  { %v842_v4 = vpop.f32.mrf.mxu0 }
 0x258   :  { %885 = vst [vmem:[%s1576_s7] sm:$0xff] %v1005_v3  ;;  %v843_v6 = vadd.f32 %v842_v4, %v229_v24 }
 0x25a   :  { %v1006_v7 = vpack.c.bf16 %v843_v6, %v841_v5 }
 0x25c   :  { %886 = vst [vmem:[%s1576_s7 + $0x8] sm:$0xff] %v1006_v7 }

// kernel: _lambda_.13
= control target key start
LH: loop header
LB: loop body
LE: loop exit
PB: predicated region body
PF: predicated region fallthrough
CT: control target
= control target key end

     0   :  { %12 = vsyncpa [#allocation5], 0  ;;  %s2740_s24 = smov [#allocation4]   ;;  %s3326_s0 = inlined_call_operand.vmem [shape: f32[16,256], index: 0, kind: input, shape index: {}]   ;;  %s3327_s1 = inlined_call_operand.vmem [shape: f32[1,256], index: 1, kind: input, shape index: {}]   ;;  %s3328_s2 = inlined_call_operand.vmem [shape: f32[1,256], index: 2, kind: input, shape index: {}]   ;;  %s3329_s3 = inlined_call_operand.vmem [shape: bf16[256,1024], index: 3, kind: input, shape index: {}]   ;;  %s3330_s4 = inlined_call_operand.vmem [shape: f32[1,1024], index: 4, kind: input, shape index: {}]   ;;  %s3331_s5 = inlined_call_operand.hbm [shape: bf16[1024,256], index: 5, kind: input, shape index: {}]   ;;  %s3332_s6 = inlined_call_operand.vmem [shape: f32[1,256], index: 6, kind: input, shape index: {}]   ;;  %s3333_s7 = inlined_call_operand.vmem [shape: f32[16,256], index: 7, kind: output, shape index: {}]  }
   0x1   :  { %s28_s25 = sshll.u32 %s2740_s24, 4  ;;  %s29_s25 = int_to_ptr.vmem [resolvable:$true] %s28_s25 }
   0x2   :  { %s2726_s26 = scalar_lea.vmem %s29_s25, 16384  ;;  %p2731_p1 = scmp.lt.s32.totalorder %s29_s25, %s29_s25 }
   0x3   :  { %p2727_p0 = scmp.ne.s32.totalorder %s29_s25, %s2726_s26  ;;  %p2732_p2 = scmp.lt.s32.totalorder %s2726_s26, %s2726_s26 }
   0x5   :  { %p2733_p3 = por %p2732_p2, %p2731_p1 }
   0x7   :  { %p2734_p4 = pnand %p2733_p3, %p2727_p0 }
   0x9   :  { %2737 = shalt.err (!%p2734_p4)
}
   0xa   :  { %s2741_s27 = smov 128   ;;  %s2742_s28 = smov 8  }
   0xb   :  { %34 = dma.hbm_to_vmem [thread:$0]  %s3331_s5, 16384, %s29_s25, [#allocation5], %s2741_s27, %s2741_s27, %s2742_s28  }
   0xc   :  { %2738 = dma.done.wait [#allocation5], 16384  }
   0xd   :  { %2739 = vsyncadd [#allocation5], 4294950912  ;;  %v44_v0 = vld [vmem:[%s3326_s0] sm:$0xff]  ;;  %v45_v1 = vld [vmem:[%s3326_s0 + $0x8] sm:$0xff] }
   0xe   :  { %v46_v2 = vld [vmem:[%s3326_s0 + $0x10] sm:$0xff]  ;;  %v50_v3 = vadd.f32 %v45_v1, %v44_v0  ;;  %v47_v4 = vld [vmem:[%s3326_s0 + $0x18] sm:$0xff]  ;;  %v203_v6 = vld [vmem:[%s3329_s3 + $0x1c0] sm:$0xff] }
   0xf   :  { %v53_v5 = vadd.f32 %v47_v4, %v46_v2  ;;  %v207_v7 = vld [vmem:[%s3329_s3 + $0x1e0] sm:$0xff]  ;;  %v204_v8 = vld [vmem:[%s3329_s3 + $0x1c8] sm:$0xff] }
  0x10   :  { %51 = vadd.xlane.f32.xlu0 %v50_v3  ;;  %v2280_v9 = vcombine.high %v203_v6, %v207_v7  ;;  %v208_v10 = vld [vmem:[%s3329_s3 + $0x1e8] sm:$0xff]  ;;  %v2279_v11 = vcombine.low %v203_v6, %v207_v7  ;;  %v195_v12 = vld [vmem:[%s3329_s3 + $0x180] sm:$0xff] }
  0x11   :  { %v199_v13 = vld [vmem:[%s3329_s3 + $0x1a0] sm:$0xff]  ;;  %v2282_v14 = vcombine.high %v204_v8, %v208_v10  ;;  %v2281_v15 = vcombine.low %v204_v8, %v208_v10  ;;  %v196_v17 = vld [vmem:[%s3329_s3 + $0x188] sm:$0xff] }
  0x12   :  { %v2272_v16 = vcombine.high %v195_v12, %v199_v13  ;;  %v200_v18 = vld [vmem:[%s3329_s3 + $0x1a8] sm:$0xff]  ;;  %v187_v19 = vld [vmem:[%s3329_s3 + $0x140] sm:$0xff]  ;;  %967 = vmatprep.subr.bf16.mxu0 %v2280_v9  ;;  %v2271_v24 = vcombine.low %v195_v12, %v199_v13 }
  0x13   :  { %v2274_v20 = vcombine.high %v196_v17, %v200_v18  ;;  %v191_v21 = vld [vmem:[%s3329_s3 + $0x160] sm:$0xff]  ;;  %v188_v22 = vld [vmem:[%s3329_s3 + $0x148] sm:$0xff]  ;;  %1010 = vmatprep.subr.bf16.mxu1 %v2282_v14  ;;  %968 = vmatpush1.bf16.msra.mxu0 %v2279_v11  ;;  %v2273_v27 = vcombine.low %v196_v17, %v200_v18 }
  0x14   :  { %54 = vadd.xlane.f32.xlu0 %v53_v5  ;;  %v192_v23 = vld [vmem:[%s3329_s3 + $0x168] sm:$0xff]  ;;  %v179_v25 = vld [vmem:[%s3329_s3 + $0x100] sm:$0xff]  ;;  %1011 = vmatpush1.bf16.msra.mxu1 %v2281_v15  ;;  %v2264_v28 = vcombine.high %v187_v19, %v191_v21  ;;  %v2263_v32 = vcombine.low %v187_v19, %v191_v21 }
  0x15   :  { %v183_v26 = vld [vmem:[%s3329_s3 + $0x120] sm:$0xff]  ;;  %969 = vmatprep.subr.bf16.mxu0 %v2272_v16  ;;  %v180_v29 = vld [vmem:[%s3329_s3 + $0x108] sm:$0xff]  ;;  %1012 = vmatprep.subr.bf16.mxu1 %v2274_v20  ;;  %v2266_v31 = vcombine.high %v188_v22, %v192_v23  ;;  %v2265_v33 = vcombine.low %v188_v22, %v192_v23 }
  0x16   :  { %v184_v30 = vld [vmem:[%s3329_s3 + $0x128] sm:$0xff]  ;;  %v2256_v34 = vcombine.high %v179_v25, %v183_v26  ;;  %v2255_v36 = vcombine.low %v179_v25, %v183_v26  ;;  %v171_v52 = vld [vmem:[%s3329_s3 + $0xc0] sm:$0xff] }
  0x17   :  { %970 = vmatpush1.bf16.msra.mxu0 %v2271_v24  ;;  %v2258_v35 = vcombine.high %v180_v29, %v184_v30  ;;  %v2257_v37 = vcombine.low %v180_v29, %v184_v30  ;;  %v175_v53 = vld [vmem:[%s3329_s3 + $0xe0] sm:$0xff]  ;;  %v172_v54 = vld [vmem:[%s3329_s3 + $0xc8] sm:$0xff] }
  0x18   :  { %1013 = vmatpush1.bf16.msra.mxu1 %v2273_v27  ;;  %971 = vmatprep.subr.bf16.mxu0 %v2264_v28  ;;  %v2248_v55 = vcombine.high %v171_v52, %v175_v53  ;;  %v176_v56 = vld [vmem:[%s3329_s3 + $0xe8] sm:$0xff]  ;;  %v2247_v58 = vcombine.low %v171_v52, %v175_v53  ;;  %v163_v60 = vld [vmem:[%s3329_s3 + $0x80] sm:$0xff] }
  0x19   :  { %1014 = vmatprep.subr.bf16.mxu1 %v2266_v31  ;;  %v2250_v57 = vcombine.high %v172_v54, %v176_v56  ;;  %v2249_v59 = vcombine.low %v172_v54, %v176_v56  ;;  %v167_v61 = vld [vmem:[%s3329_s3 + $0xa0] sm:$0xff]  ;;  %v164_v62 = vld [vmem:[%s3329_s3 + $0x88] sm:$0xff] }
  0x1a   :  { %v2240_v63 = vcombine.high %v163_v60, %v167_v61  ;;  %v159_v5 = vld [vmem:[%s3329_s3 + $0x60] sm:$0xff]  ;;  %v156_v6 = vld [vmem:[%s3329_s3 + $0x48] sm:$0xff] }
  0x1b   :  { %972 = vmatpush1.bf16.msra.mxu0 %v2263_v32  ;;  %v160_v8 = vld [vmem:[%s3329_s3 + $0x68] sm:$0xff]  ;;  %v147_v12 = vld [vmem:[%s3329_s3] sm:$0xff] }
  0x1c   :  { %1015 = vmatpush1.bf16.msra.mxu1 %v2265_v33  ;;  %973 = vmatprep.subr.bf16.mxu0 %v2256_v34  ;;  %v2234_v9 = vcombine.high %v156_v6, %v160_v8  ;;  %v2233_v11 = vcombine.low %v156_v6, %v160_v8  ;;  %v151_v13 = vld [vmem:[%s3329_s3 + $0x20] sm:$0xff]  ;;  %v148_v14 = vld [vmem:[%s3329_s3 + $0x8] sm:$0xff] }
  0x1d   :  { %1016 = vmatprep.subr.bf16.mxu1 %v2258_v35  ;;  %v2224_v15 = vcombine.high %v147_v12, %v151_v13  ;;  %v152_v16 = vld [vmem:[%s3329_s3 + $0x28] sm:$0xff]  ;;  %v2223_v18 = vcombine.low %v147_v12, %v151_v13  ;;  %v267_v20 = vld [vmem:[%s3329_s3 + $0x3c0] sm:$0xff] }
  0x1e   :  { %v2226_v17 = vcombine.high %v148_v14, %v152_v16  ;;  %v2225_v19 = vcombine.low %v148_v14, %v152_v16  ;;  %v271_v21 = vld [vmem:[%s3329_s3 + $0x3e0] sm:$0xff]  ;;  %v268_v22 = vld [vmem:[%s3329_s3 + $0x3c8] sm:$0xff] }
  0x1f   :  { %974 = vmatpush1.bf16.msra.mxu0 %v2255_v36  ;;  %v2344_v23 = vcombine.high %v267_v20, %v271_v21  ;;  %v272_v24 = vld [vmem:[%s3329_s3 + $0x3e8] sm:$0xff]  ;;  %v2343_v26 = vcombine.low %v267_v20, %v271_v21  ;;  %v259_v28 = vld [vmem:[%s3329_s3 + $0x380] sm:$0xff] }
  0x20   :  { %1017 = vmatpush1.bf16.msra.mxu1 %v2257_v37  ;;  %975 = vmatprep.subr.bf16.mxu0 %v2248_v55  ;;  %v2346_v25 = vcombine.high %v268_v22, %v272_v24  ;;  %v2345_v27 = vcombine.low %v268_v22, %v272_v24  ;;  %v263_v29 = vld [vmem:[%s3329_s3 + $0x3a0] sm:$0xff]  ;;  %v260_v30 = vld [vmem:[%s3329_s3 + $0x388] sm:$0xff]  ;;  %v3009_v24 = vld [vmem:[%s3329_s3 + $0x1d0] sm:$0xff] }
  0x21   :  { %1018 = vmatprep.subr.bf16.mxu1 %v2250_v57  ;;  %v2336_v31 = vcombine.high %v259_v28, %v263_v29  ;;  %v264_v32 = vld [vmem:[%s3329_s3 + $0x3a8] sm:$0xff]  ;;  %v2335_v34 = vcombine.low %v259_v28, %v263_v29  ;;  %v251_v36 = vld [vmem:[%s3329_s3 + $0x340] sm:$0xff]  ;;  %v3026_v28 = vld [vmem:[%s3329_s3 + $0x1f8] sm:$0xff] }
  0x22   :  { %v2338_v33 = vcombine.high %v260_v30, %v264_v32  ;;  %v2337_v35 = vcombine.low %v260_v30, %v264_v32  ;;  %v255_v37 = vld [vmem:[%s3329_s3 + $0x360] sm:$0xff]  ;;  %v248_v52 = vld [vmem:[%s3329_s3 + $0x328] sm:$0xff] }
  0x23   :  { %976 = vmatpush1.bf16.msra.mxu0 %v2247_v58  ;;  %v235_v54 = vld [vmem:[%s3329_s3 + $0x2c0] sm:$0xff]  ;;  %v220_v8 = vld [vmem:[%s3329_s3 + $0x248] sm:$0xff] }
  0x24   :  { %1019 = vmatpush1.bf16.msra.mxu1 %v2249_v59  ;;  %977 = vmatprep.subr.bf16.mxu0 %v2240_v63  ;;  %v239_v55 = vld [vmem:[%s3329_s3 + $0x2e0] sm:$0xff]  ;;  %v236_v59 = vld [vmem:[%s3329_s3 + $0x2c8] sm:$0xff] }
  0x25   :  { %v2312_v58 = vcombine.high %v235_v54, %v239_v55  ;;  %v231_v63 = vld [vmem:[%s3329_s3 + $0x2a0] sm:$0xff]  ;;  %v212_v16 = vld [vmem:[%s3329_s3 + $0x208] sm:$0xff] }
  0x26   :  { %v219_v6 = vld [vmem:[%s3329_s3 + $0x240] sm:$0xff] }
  0x27   :  { %v211_v14 = vld [vmem:[%s3329_s3 + $0x200] sm:$0xff] }
  0x99   :  { %v52_v38 = vpop.xlane.xlu0 %51 }
  0x9a   :  { %v57_v39 = vmul.f32 0.00390625, %v52_v38  ;;  %v252_v38 = vld [vmem:[%s3329_s3 + $0x348] sm:$0xff] }
  0x9c   :  { %v2846_v40 = vsub.f32 %v44_v0, %v57_v39  ;;  %v2848_v41 = vsub.f32 %v45_v1, %v57_v39  ;;  %v168_v0 = vld [vmem:[%s3329_s3 + $0xa8] sm:$0xff]  ;;  %v2328_v39 = vcombine.high %v251_v36, %v255_v37 }
  0x9d   :  { %v55_v42 = vpop.xlane.xlu0 %54  ;;  %v2242_v1 = vcombine.high %v164_v62, %v168_v0  ;;  %v2241_v3 = vcombine.low %v164_v62, %v168_v0  ;;  %v228_v0 = vld [vmem:[%s3329_s3 + $0x288] sm:$0xff] }
  0x9e   :  { %v58_v43 = vmul.f32 0.00390625, %v55_v42  ;;  %v63_v44 = vmul.f32 %v2846_v40, %v2846_v40  ;;  %v64_v45 = vmul.f32 %v2848_v41, %v2848_v41  ;;  %v256_v42 = vld [vmem:[%s3329_s3 + $0x368] sm:$0xff] }
  0x9f   :  { %1020 = vmatprep.subr.bf16.mxu1 %v2242_v1  ;;  %v232_v1 = vld [vmem:[%s3329_s3 + $0x2a8] sm:$0xff] }
  0xa0   :  { %v2854_v46 = vsub.f32 %v46_v2, %v58_v43  ;;  %v2856_v47 = vsub.f32 %v47_v4, %v58_v43  ;;  %v67_v48 = vadd.f32 %v64_v45, %v63_v44  ;;  %v2239_v2 = vcombine.low %v163_v60, %v167_v61  ;;  %v155_v4 = vld [vmem:[%s3329_s3 + $0x40] sm:$0xff]  ;;  %1021 = vmatpush1.bf16.msra.mxu1 %v2241_v3  ;;  %v240_v60 = vld [vmem:[%s3329_s3 + $0x2e8] sm:$0xff] }
  0xa1   :  { %v2232_v7 = vcombine.high %v155_v4, %v159_v5  ;;  %v2231_v10 = vcombine.low %v155_v4, %v159_v5  ;;  %1022 = vmatprep.subr.bf16.mxu1 %v2234_v9  ;;  %v2330_v43 = vcombine.high %v252_v38, %v256_v42  ;;  %v2327_v44 = vcombine.low %v251_v36, %v255_v37  ;;  %v227_v61 = vld [vmem:[%s3329_s3 + $0x280] sm:$0xff]  ;;  %v224_v9 = vld [vmem:[%s3329_s3 + $0x268] sm:$0xff] }
  0xa2   :  { %68 = vadd.xlane.f32.xlu1 %v67_v48  ;;  %v65_v49 = vmul.f32 %v2854_v46, %v2854_v46  ;;  %v66_v50 = vmul.f32 %v2856_v47, %v2856_v47  ;;  %978 = vmatpush1.bf16.msra.mxu0 %v2239_v2  ;;  %v2329_v45 = vcombine.low %v252_v38, %v256_v42  ;;  %v243_v48 = vld [vmem:[%s3329_s3 + $0x300] sm:$0xff] }
  0xa3   :  { %979 = vmatprep.subr.bf16.mxu0 %v2232_v7  ;;  %v2314_v62 = vcombine.high %v236_v59, %v240_v60  ;;  %v2311_v2 = vcombine.low %v235_v54, %v239_v55  ;;  %v2313_v3 = vcombine.low %v236_v59, %v240_v60  ;;  %v2304_v4 = vcombine.high %v227_v61, %v231_v63  ;;  %v223_v7 = vld [vmem:[%s3329_s3 + $0x260] sm:$0xff] }
  0xa4   :  { %v70_v51 = vadd.f32 %v66_v50, %v65_v49  ;;  %1023 = vmatpush1.bf16.msra.mxu1 %v2233_v11  ;;  %v247_v49 = vld [vmem:[%s3329_s3 + $0x320] sm:$0xff]  ;;  %v244_v50 = vld [vmem:[%s3329_s3 + $0x308] sm:$0xff]  ;;  %v2306_v5 = vcombine.high %v228_v0, %v232_v1  ;;  %v2305_v11 = vcombine.low %v228_v0, %v232_v1  ;;  %v2296_v12 = vcombine.high %v219_v6, %v223_v7 }
  0xa5   :  { %1024 = vmatprep.subr.bf16.mxu1 %v2226_v17  ;;  %v2319_v53 = vcombine.low %v243_v48, %v247_v49  ;;  %v2322_v56 = vcombine.high %v244_v50, %v248_v52  ;;  %v2321_v57 = vcombine.low %v244_v50, %v248_v52  ;;  %v2298_v13 = vcombine.high %v220_v8, %v224_v9  ;;  %v216_v17 = vld [vmem:[%s3329_s3 + $0x228] sm:$0xff] }
  0xa6   :  { %71 = vadd.xlane.f32.xlu1 %v70_v51  ;;  %980 = vmatpush1.bf16.msra.mxu0 %v2231_v10  ;;  %v2320_v51 = vcombine.high %v243_v48, %v247_v49  ;;  %v2303_v10 = vcombine.low %v227_v61, %v231_v63  ;;  %v2290_v21 = vcombine.high %v212_v16, %v216_v17 }
  0xa7   :  { %981 = vmatprep.subr.bf16.mxu0 %v2224_v15  ;;  %v215_v15 = vld [vmem:[%s3329_s3 + $0x220] sm:$0xff] }
  0xa8   :  { %1025 = vmatpush1.bf16.msra.mxu1 %v2225_v19  ;;  %v2297_v19 = vcombine.low %v220_v8, %v224_v9  ;;  %v2288_v20 = vcombine.high %v211_v14, %v215_v15  ;;  %v2287_v22 = vcombine.low %v211_v14, %v215_v15  ;;  %v189_v14 = vld [vmem:[%s3329_s3 + $0x150] sm:$0xff] }
  0xa9   :  { %1026 = vmatprep.subr.bf16.mxu1 %v2346_v25  ;;  %v3014_v25 = vld [vmem:[%s3329_s3 + $0x1f0] sm:$0xff] }
  0xaa   :  { %982 = vmatpush1.bf16.msra.mxu0 %v2223_v18  ;;  %v2295_v18 = vcombine.low %v219_v6, %v223_v7  ;;  %v2283_v29 = vcombine.low %v3009_v24, %v3014_v25 }
  0xab   :  { %983 = vmatprep.subr.bf16.mxu0 %v2344_v23  ;;  %v2289_v23 = vcombine.low %v212_v16, %v216_v17  ;;  %v193_v17 = vld [vmem:[%s3329_s3 + $0x170] sm:$0xff] }
  0xac   :  { %1027 = vmatpush2.bf16.msra.mxu1 %v2345_v27  ;;  %v2284_v27 = vcombine.high %v3009_v24, %v3014_v25  ;;  %v185_v24 = vld [vmem:[%s3329_s3 + $0x130] sm:$0xff]  ;;  %v182_v25 = vld [vmem:[%s3329_s3 + $0x118] sm:$0xff] }
  0xad   :  { %1028 = vmatprep.subr.bf16.mxu1 %v2338_v33 }
  0xae   :  { %984 = vmatpush2.bf16.msra.mxu0 %v2343_v26  ;;  %v3019_v26 = vld [vmem:[%s3329_s3 + $0x1d8] sm:$0xff] }
  0xaf   :  { %985 = vmatprep.subr.bf16.mxu0 %v2336_v31  ;;  %v2285_v30 = vcombine.low %v3019_v26, %v3026_v28  ;;  %v2286_v31 = vcombine.high %v3019_v26, %v3026_v28  ;;  %v186_v26 = vld [vmem:[%s3329_s3 + $0x138] sm:$0xff]  ;;  %v2267_v28 = vcombine.low %v189_v14, %v193_v17 }
  0xb0   :  { %1029 = vmatpush2.bf16.msra.mxu1 %v2337_v35 }
  0xb1   :  { %1030 = vmatprep.subr.bf16.mxu1 %v2330_v43 }
  0xb2   :  { %986 = vmatpush2.bf16.msra.mxu0 %v2335_v34 }
  0xb3   :  { %987 = vmatprep.subr.bf16.mxu0 %v2328_v39 }
  0xb4   :  { %1031 = vmatpush2.bf16.msra.mxu1 %v2329_v45 }
  0xb5   :  { %1032 = vmatprep.subr.bf16.mxu1 %v2322_v56  ;;  %v48_v56 = vld [vmem:[%s3327_s1] sm:$0x3] }
  0xb6   :  { %988 = vmatpush2.bf16.msra.mxu0 %v2327_v44 }
  0xb7   :  { %989 = vmatprep.subr.bf16.mxu0 %v2320_v51  ;;  %v98_v51 = vlaneseq }
  0xb8   :  { %1033 = vmatpush2.bf16.msra.mxu1 %v2321_v57 }
  0xb9   :  { %1034 = vmatprep.subr.bf16.mxu1 %v2314_v62 }
  0xba   :  { %990 = vmatpush2.bf16.msra.mxu0 %v2319_v53  ;;  %v3034_v53 = vshrl.u32 %v98_v51, 7 }
  0xbb   :  { %991 = vmatprep.subr.bf16.mxu0 %v2312_v58  ;;  %v49_v58 = vld [vmem:[%s3328_s2] sm:$0x3] }
  0xbc   :  { %1035 = vmatpush2.bf16.msra.mxu1 %v2313_v3  ;;  %v3037_v54 = vsub.s32 1, %v3034_v53  ;;  %v3040_v55 = vsub.s32 0, %v3034_v53 }
  0xbd   :  { %1036 = vmatprep.subr.bf16.mxu1 %v2306_v5 }
  0xbe   :  { %992 = vmatpush2.bf16.msra.mxu0 %v2311_v2  ;;  %v105_v60 = vrot.slane %v48_v56, %v3037_v54  ;;  %v101_v62 = vrot.slane %v48_v56, %v3040_v55  ;;  %v120_v0 = vrot.slane %v49_v58, %v3037_v54  ;;  %v116_v1 = vrot.slane %v49_v58, %v3040_v55  ;;  %v161_v56 = vld [vmem:[%s3329_s3 + $0x70] sm:$0xff]  ;;  %v162_v58 = vld [vmem:[%s3329_s3 + $0x78] sm:$0xff] }
  0xbf   :  { %993 = vmatprep.subr.bf16.mxu0 %v2304_v4 }
  0xc0   :  { %1037 = vmatpush2.bf16.msra.mxu1 %v2305_v11  ;;  %v201_v11 = vld [vmem:[%s3329_s3 + $0x1b0] sm:$0xff] }
  0xc1   :  { %1038 = vmatprep.subr.bf16.mxu1 %v2298_v13 }
  0xc2   :  { %994 = vmatpush2.bf16.msra.mxu0 %v2303_v10 }
  0xc3   :  { %995 = vmatprep.subr.bf16.mxu0 %v2296_v12 }
  0xc4   :  { %1039 = vmatpush2.bf16.msra.mxu1 %v2297_v19  ;;  %v194_v19 = vld [vmem:[%s3329_s3 + $0x178] sm:$0xff] }
  0xc5   :  { %1040 = vmatprep.subr.bf16.mxu1 %v2290_v21 }
  0xc6   :  { %996 = vmatpush2.bf16.msra.mxu0 %v2295_v18  ;;  %v190_v18 = vld [vmem:[%s3329_s3 + $0x158] sm:$0xff] }
  0xc7   :  { %997 = vmatprep.subr.bf16.mxu0 %v2288_v20 }
  0xc8   :  { %1041 = vmatpush2.bf16.msra.mxu1 %v2289_v23  ;;  %v2270_v23 = vcombine.high %v190_v18, %v194_v19 }
  0xc9   :  { %1096 = vmatprep.subr.bf16.mxu1 %v2286_v31  ;;  %v2262_v31 = vcombine.high %v182_v25, %v186_v26 }
  0xca   :  { %998 = vmatpush2.bf16.msra.mxu0 %v2287_v22  ;;  %v2268_v22 = vcombine.high %v189_v14, %v193_v17  ;;  %v262_v14 = vld [vmem:[%s3329_s3 + $0x398] sm:$0xff] }
  0xcb   :  { %1053 = vmatprep.subr.bf16.mxu0 %v2284_v27  ;;  %v181_v27 = vld [vmem:[%s3329_s3 + $0x110] sm:$0xff] }
 0x12b   :  { %v69_v32 = vpop.xlane.xlu1 %68 }
 0x12c   :  { %v73_v33 = vmul.f32 0.00390625, %v69_v32  ;;  %v173_v32 = vld [vmem:[%s3329_s3 + $0xd0] sm:$0xff] }
 0x12e   :  { %v75_v34 = vadd.f32 1e-05, %v73_v33  ;;  %v177_v33 = vld [vmem:[%s3329_s3 + $0xf0] sm:$0xff] }
 0x12f   :  { %v72_v35 = vpop.xlane.xlu1 %71 }
 0x130   :  { %2678 = vrsqrt.f32 %v75_v34  ;;  %v74_v36 = vmul.f32 0.00390625, %v72_v35  ;;  %vm79_vm0 = vcmp.eq.f32.partialorder %v75_v34, inf  ;;  %v82_v42 = vand.u32 2147483648, %v75_v34  ;;  %v178_v35 = vld [vmem:[%s3329_s3 + $0xf8] sm:$0xff] }
 0x131   :  { %vm81_vm1 = vcmp.eq.f32.partialorder %v75_v34, 0.0 }
 0x132   :  { %v76_v37 = vadd.f32 1e-05, %v74_v36  ;;  %v2259_v36 = vcombine.low %v181_v27, %v185_v24 }
 0x134   :  { %2680 = vrsqrt.f32 %v76_v37  ;;  %vm86_vm2 = vcmp.eq.f32.partialorder %v76_v37, inf  ;;  %v89_v49 = vand.u32 2147483648, %v76_v37  ;;  %vm88_vm3 = vcmp.eq.f32.partialorder %v76_v37, 0.0 }
 0x13d   :  { %v2679_v38 = vpop.eup %2678 }
 0x13e   :  { %v78_v39 = vmul.f32 %v2679_v38, %v75_v34  ;;  %v2252_v38 = vcombine.high %v173_v32, %v177_v33 }
 0x140   :  { %v80_v43 = vsel %vm79_vm0, %v75_v34, %v78_v39  ;;  %v174_v34 = vld [vmem:[%s3329_s3 + $0xd8] sm:$0xff] }
 0x141   :  { %v83_v44 = vsel %vm81_vm1, %v82_v42, %v80_v43  ;;  %v2681_v45 = vpop.eup %2680  ;;  %v2254_v39 = vcombine.high %v174_v34, %v178_v35  ;;  %v165_v42 = vld [vmem:[%s3329_s3 + $0x90] sm:$0xff] }
 0x142   :  { %2682 = vrcp.f32 %v83_v44  ;;  %v85_v48 = vmul.f32 %v2681_v45, %v76_v37  ;;  %v169_v43 = vld [vmem:[%s3329_s3 + $0xb0] sm:$0xff]  ;;  %v166_v44 = vld [vmem:[%s3329_s3 + $0x98] sm:$0xff] }
 0x143   :  { %v170_v45 = vld [vmem:[%s3329_s3 + $0xb8] sm:$0xff] }
 0x144   :  { %v87_v50 = vsel %vm86_vm2, %v76_v37, %v85_v48  ;;  %v2261_v37 = vcombine.low %v182_v25, %v186_v26  ;;  %v2251_v48 = vcombine.low %v173_v32, %v177_v33  ;;  %v2246_v51 = vcombine.high %v166_v44, %v170_v45 }
 0x145   :  { %v90_v52 = vsel %vm88_vm3, %v89_v49, %v87_v50  ;;  %v2253_v49 = vcombine.low %v174_v34, %v178_v35  ;;  %v2244_v50 = vcombine.high %v165_v42, %v169_v43 }
 0x146   :  { %2684 = vrcp.f32 %v90_v52  ;;  %v157_v52 = vld [vmem:[%s3329_s3 + $0x50] sm:$0xff] }
 0x14f   :  { %v2683_v57 = vpop.eup %2682 }
 0x150   :  { %v93_v59 = vmul.f32 %v2683_v57, %v2848_v41  ;;  %v92_v61 = vmul.f32 %v2683_v57, %v2846_v40  ;;  %v197_v40 = vld [vmem:[%s3329_s3 + $0x190] sm:$0xff]  ;;  %v158_v57 = vld [vmem:[%s3329_s3 + $0x58] sm:$0xff] }
 0x151   :  { %v2276_v15 = vcombine.high %v197_v40, %v201_v11  ;;  %v2275_v20 = vcombine.low %v197_v40, %v201_v11 }
 0x152   :  { %v109_v3 = vmul.f32 %v105_v60, %v93_v59  ;;  %v108_v5 = vmul.f32 %v101_v62, %v92_v61  ;;  %v2243_v59 = vcombine.low %v165_v42, %v169_v43  ;;  %v2236_v61 = vcombine.high %v157_v52, %v161_v56 }
 0x153   :  { %v2685_v63 = vpop.eup %2684 }
 0x154   :  { %v96_v2 = vmul.f32 %v2685_v63, %v2856_v47  ;;  %v95_v4 = vmul.f32 %v2685_v63, %v2854_v46  ;;  %v124_v41 = vadd.f32 %v120_v0, %v109_v3  ;;  %v123_v9 = vadd.f32 %v116_v1, %v108_v5  ;;  %v198_v47 = vld [vmem:[%s3329_s3 + $0x198] sm:$0xff]  ;;  %v149_v63 = vld [vmem:[%s3329_s3 + $0x10] sm:$0xff] }
 0x155   :  { %v202_v46 = vld [vmem:[%s3329_s3 + $0x1b8] sm:$0xff]  ;;  %v2235_v3 = vcombine.low %v157_v52, %v161_v56 }
 0x156   :  { %v111_v6 = vmul.f32 %v105_v60, %v96_v2  ;;  %v110_v7 = vmul.f32 %v101_v62, %v95_v4  ;;  %v2278_v16 = vcombine.high %v198_v47, %v202_v46  ;;  %v2277_v21 = vcombine.low %v198_v47, %v202_v46  ;;  %v154_v2 = vld [vmem:[%s3329_s3 + $0x38] sm:$0xff]  ;;  %v261_v46 = vld [vmem:[%s3329_s3 + $0x390] sm:$0xff] }
 0x157   :  { %v2245_v60 = vcombine.low %v166_v44, %v170_v45  ;;  %v2238_v62 = vcombine.high %v158_v57, %v162_v58  ;;  %v2237_v4 = vcombine.low %v158_v57, %v162_v58 }
 0x158   :  { %v126_v8 = vadd.f32 %v120_v0, %v111_v6  ;;  %v125_v10 = vadd.f32 %v116_v1, %v110_v7  ;;  %v153_v0 = vld [vmem:[%s3329_s3 + $0x30] sm:$0xff]  ;;  %v150_v1 = vld [vmem:[%s3329_s3 + $0x18] sm:$0xff] }
 0x159   :  { %v2228_v5 = vcombine.high %v149_v63, %v153_v0  ;;  %v2230_v6 = vcombine.high %v150_v1, %v154_v2  ;;  %v269_v7 = vld [vmem:[%s3329_s3 + $0x3d0] sm:$0xff]  ;;  %v2229_v40 = vcombine.low %v150_v1, %v154_v2 }
 0x15a   :  { %v2482_v12 = vpack.c.bf16 %v126_v8, %v124_v41  ;;  %v3068_v13 = vpack.c.bf16 %v125_v10, %v123_v9  ;;  %v273_v41 = vld [vmem:[%s3329_s3 + $0x3f0] sm:$0xff]  ;;  %v270_v8 = vld [vmem:[%s3329_s3 + $0x3d8] sm:$0xff]  ;;  %v2227_v10 = vcombine.low %v149_v63, %v153_v0 }
 0x15b   :  { %v274_v9 = vld [vmem:[%s3329_s3 + $0x3f8] sm:$0xff]  ;;  %v2348_v11 = vcombine.high %v269_v7, %v273_v41 }
 0x15c   :  { %999 = vmatprep.mubr.bf16.mxu0 %v2482_v12  ;;  %1042 = vmatprep.mubr.bf16.mxu1 %v2482_v12  ;;  %v2350_v47 = vcombine.high %v270_v8, %v274_v9  ;;  %v2349_v17 = vcombine.low %v270_v8, %v274_v9 }
 0x15d   :  { %1000 = vmatmul.mubr.bf16.vlgmr.msra.gmra.mxu0 %v3068_v13  ;;  %1043 = vmatmul.mubr.bf16.vlgmr.msra.gmra.mxu1 %v3068_v13 }
 0x15e   :  { %1054 = vmatpush1.bf16.msra.mxu0 %v2283_v29  ;;  %1097 = vmatpush1.bf16.msra.mxu1 %v2285_v30  ;;  %v2269_v29 = vcombine.low %v190_v18, %v194_v19  ;;  %v2260_v30 = vcombine.high %v181_v27, %v185_v24 }
 0x15f   :  { %1085 = vmatprep.mubr.bf16.mxu0 %v2482_v12  ;;  %1128 = vmatprep.mubr.bf16.mxu1 %v2482_v12  ;;  %v265_v12 = vld [vmem:[%s3329_s3 + $0x3b0] sm:$0xff] }
 0x160   :  { %1055 = vmatprep.subr.bf16.mxu0 %v2276_v15  ;;  %1098 = vmatprep.subr.bf16.mxu1 %v2278_v16  ;;  %v266_v15 = vld [vmem:[%s3329_s3 + $0x3b8] sm:$0xff]  ;;  %v2347_v16 = vcombine.low %v269_v7, %v273_v41  ;;  %v2340_v18 = vcombine.high %v261_v46, %v265_v12  ;;  %v2339_v27 = vcombine.low %v261_v46, %v265_v12 }
 0x161   :  { %v2342_v19 = vcombine.high %v262_v14, %v266_v15  ;;  %v2341_v24 = vcombine.low %v262_v14, %v266_v15  ;;  %v2486_v46 = vld [vmem:[#allocation4 + $0x70] ss:$8 sps:$4 sm:$0xff]   ;;  %v2494_v14 = vld [vmem:[#allocation4 + $0x64] ss:$8 sps:$4 sm:$0xff]  }
 0x162   :  { %1056 = vmatpush1.bf16.msra.mxu0 %v2275_v20  ;;  %1099 = vmatpush1.bf16.msra.mxu1 %v2277_v21  ;;  %v253_v20 = vld [vmem:[%s3329_s3 + $0x350] sm:$0xff]  ;;  %v2497_v15 = vld [vmem:[#allocation4 + $0x164] ss:$8 sps:$4 sm:$0xff]  }
 0x163   :  { %1057 = vmatprep.subr.bf16.mxu0 %v2268_v22  ;;  %1100 = vmatprep.subr.bf16.mxu1 %v2270_v23  ;;  %v257_v21 = vld [vmem:[%s3329_s3 + $0x370] sm:$0xff]  ;;  %v254_v22 = vld [vmem:[%s3329_s3 + $0x358] sm:$0xff] }
 0x164   :  { %v258_v23 = vld [vmem:[%s3329_s3 + $0x378] sm:$0xff]  ;;  %v2332_v25 = vcombine.high %v253_v20, %v257_v21  ;;  %v2331_v32 = vcombine.low %v253_v20, %v257_v21 }
 0x165   :  { %v2334_v26 = vcombine.high %v254_v22, %v258_v23  ;;  %v2333_v33 = vcombine.low %v254_v22, %v258_v23  ;;  %v2489_v12 = vld [vmem:[#allocation4 + $0x170] ss:$8 sps:$4 sm:$0xff]   ;;  %v2506_v22 = vld [vmem:[#allocation4 + $0x44] ss:$8 sps:$4 sm:$0xff]  }
 0x166   :  { %1058 = vmatpush1.bf16.msra.mxu0 %v2267_v28  ;;  %1101 = vmatpush1.bf16.msra.mxu1 %v2269_v29  ;;  %v245_v28 = vld [vmem:[%s3329_s3 + $0x310] sm:$0xff]  ;;  %v2509_v23 = vld [vmem:[#allocation4 + $0x144] ss:$8 sps:$4 sm:$0xff]  }
 0x167   :  { %1059 = vmatprep.subr.bf16.mxu0 %v2260_v30  ;;  %1102 = vmatprep.subr.bf16.mxu1 %v2262_v31  ;;  %v249_v29 = vld [vmem:[%s3329_s3 + $0x330] sm:$0xff]  ;;  %v246_v30 = vld [vmem:[%s3329_s3 + $0x318] sm:$0xff] }
 0x168   :  { %v250_v31 = vld [vmem:[%s3329_s3 + $0x338] sm:$0xff]  ;;  %v2324_v34 = vcombine.high %v245_v28, %v249_v29  ;;  %v2323_v42 = vcombine.low %v245_v28, %v249_v29  ;;  %v2518_v29 = vld [vmem:[#allocation4 + $0x24] ss:$8 sps:$4 sm:$0xff]  }
 0x169   :  { %v2326_v35 = vcombine.high %v246_v30, %v250_v31  ;;  %v2325_v43 = vcombine.low %v246_v30, %v250_v31  ;;  %v2498_v20 = vld [vmem:[#allocation4 + $0x50] ss:$8 sps:$4 sm:$0xff]   ;;  %v2521_v30 = vld [vmem:[#allocation4 + $0x124] ss:$8 sps:$4 sm:$0xff]   ;;  %v2516_v31 = vld [vmem:[#allocation4 + $0x20] ss:$8 sps:$4 sm:$0xff]  }
 0x16a   :  { %1060 = vmatpush1.bf16.msra.mxu0 %v2259_v36  ;;  %1103 = vmatpush1.bf16.msra.mxu1 %v2261_v37  ;;  %v237_v36 = vld [vmem:[%s3329_s3 + $0x2d0] sm:$0xff] }
 0x16b   :  { %1061 = vmatprep.subr.bf16.mxu0 %v2252_v38  ;;  %1104 = vmatprep.subr.bf16.mxu1 %v2254_v39  ;;  %v241_v37 = vld [vmem:[%s3329_s3 + $0x2f0] sm:$0xff]  ;;  %v238_v38 = vld [vmem:[%s3329_s3 + $0x2d8] sm:$0xff] }
 0x16c   :  { %v242_v39 = vld [vmem:[%s3329_s3 + $0x2f8] sm:$0xff]  ;;  %v2316_v44 = vcombine.high %v237_v36, %v241_v37  ;;  %v2315_v52 = vcombine.low %v237_v36, %v241_v37  ;;  %v2530_v37 = vld [vmem:[#allocation4 + $0x4] ss:$8 sps:$4 sm:$0xff]  }
 0x16d   :  { %v2318_v45 = vcombine.high %v238_v38, %v242_v39  ;;  %v2317_v56 = vcombine.low %v238_v38, %v242_v39  ;;  %v2501_v21 = vld [vmem:[#allocation4 + $0x150] ss:$8 sps:$4 sm:$0xff]   ;;  %v2533_v38 = vld [vmem:[#allocation4 + $0x104] ss:$8 sps:$4 sm:$0xff]   ;;  %v2528_v39 = vld [vmem:[#allocation4] ss:$8 sps:$4 sm:$0xff]  }
 0x16e   :  { %1062 = vmatpush1.bf16.msra.mxu0 %v2251_v48  ;;  %1105 = vmatpush1.bf16.msra.mxu1 %v2253_v49  ;;  %v229_v48 = vld [vmem:[%s3329_s3 + $0x290] sm:$0xff] }
 0x16f   :  { %1063 = vmatprep.subr.bf16.mxu0 %v2244_v50  ;;  %1106 = vmatprep.subr.bf16.mxu1 %v2246_v51  ;;  %v233_v49 = vld [vmem:[%s3329_s3 + $0x2b0] sm:$0xff]  ;;  %v230_v50 = vld [vmem:[%s3329_s3 + $0x298] sm:$0xff] }
 0x170   :  { %v234_v51 = vld [vmem:[%s3329_s3 + $0x2b8] sm:$0xff]  ;;  %v2308_v57 = vcombine.high %v229_v48, %v233_v49  ;;  %v2307_v63 = vcombine.low %v229_v48, %v233_v49  ;;  %v2542_v49 = vld [vmem:[#allocation4 + $0xe4] ss:$8 sps:$4 sm:$0xff]  }
 0x171   :  { %v2310_v58 = vcombine.high %v230_v50, %v234_v51  ;;  %v2309_v0 = vcombine.low %v230_v50, %v234_v51  ;;  %v2513_v28 = vld [vmem:[#allocation4 + $0x130] ss:$8 sps:$4 sm:$0xff]   ;;  %v2545_v50 = vld [vmem:[#allocation4 + $0x1e4] ss:$8 sps:$4 sm:$0xff]   ;;  %v2540_v51 = vld [vmem:[#allocation4 + $0xe0] ss:$8 sps:$4 sm:$0xff]  }
 0x172   :  { %1064 = vmatpush1.bf16.msra.mxu0 %v2243_v59  ;;  %1107 = vmatpush1.bf16.msra.mxu1 %v2245_v60  ;;  %v221_v59 = vld [vmem:[%s3329_s3 + $0x250] sm:$0xff] }
 0x173   :  { %1065 = vmatprep.subr.bf16.mxu0 %v2236_v61  ;;  %1108 = vmatprep.subr.bf16.mxu1 %v2238_v62  ;;  %v225_v60 = vld [vmem:[%s3329_s3 + $0x270] sm:$0xff]  ;;  %v222_v61 = vld [vmem:[%s3329_s3 + $0x258] sm:$0xff] }
 0x174   :  { %v226_v62 = vld [vmem:[%s3329_s3 + $0x278] sm:$0xff]  ;;  %v2300_v1 = vcombine.high %v221_v59, %v225_v60  ;;  %v2299_v7 = vcombine.low %v221_v59, %v225_v60  ;;  %v2554_v60 = vld [vmem:[#allocation4 + $0xc4] ss:$8 sps:$4 sm:$0xff]  }
 0x175   :  { %v2302_v2 = vcombine.high %v222_v61, %v226_v62  ;;  %v2301_v41 = vcombine.low %v222_v61, %v226_v62  ;;  %v2525_v36 = vld [vmem:[#allocation4 + $0x110] ss:$8 sps:$4 sm:$0xff]   ;;  %v2557_v61 = vld [vmem:[#allocation4 + $0x1c4] ss:$8 sps:$4 sm:$0xff]   ;;  %v2552_v62 = vld [vmem:[#allocation4 + $0xc0] ss:$8 sps:$4 sm:$0xff]  }
 0x176   :  { %1066 = vmatpush1.bf16.msra.mxu0 %v2235_v3  ;;  %1109 = vmatpush1.bf16.msra.mxu1 %v2237_v4  ;;  %v213_v3 = vld [vmem:[%s3329_s3 + $0x210] sm:$0xff] }
 0x177   :  { %1067 = vmatprep.subr.bf16.mxu0 %v2228_v5  ;;  %1110 = vmatprep.subr.bf16.mxu1 %v2230_v6  ;;  %v217_v4 = vld [vmem:[%s3329_s3 + $0x230] sm:$0xff]  ;;  %v214_v5 = vld [vmem:[%s3329_s3 + $0x218] sm:$0xff] }
 0x178   :  { %v218_v6 = vld [vmem:[%s3329_s3 + $0x238] sm:$0xff]  ;;  %v2292_v8 = vcombine.high %v213_v3, %v217_v4 }
 0x179   :  { %v2294_v9 = vcombine.high %v214_v5, %v218_v6  ;;  %v2537_v48 = vld [vmem:[#allocation4 + $0x1f0] ss:$8 sps:$4 sm:$0xff]  }
 0x17a   :  { %1068 = vmatpush1.bf16.msra.mxu0 %v2227_v10  ;;  %1111 = vmatpush1.bf16.msra.mxu1 %v2229_v40  ;;  %v2291_v10 = vcombine.low %v213_v3, %v217_v4  ;;  %v2293_v40 = vcombine.low %v214_v5, %v218_v6  ;;  %v2549_v59 = vld [vmem:[#allocation4 + $0x1d0] ss:$8 sps:$4 sm:$0xff]   ;;  %v2566_v4 = vld [vmem:[#allocation4 + $0xa4] ss:$8 sps:$4 sm:$0xff]   ;;  %v2564_v6 = vld [vmem:[#allocation4 + $0xa0] ss:$8 sps:$4 sm:$0xff]  }
 0x17b   :  { %1069 = vmatprep.subr.bf16.mxu0 %v2348_v11  ;;  %1112 = vmatprep.subr.bf16.mxu1 %v2350_v47  ;;  %v2488_v11 = vld [vmem:[#allocation4 + $0x74] ss:$8 sps:$4 sm:$0xff]   ;;  %v2561_v3 = vld [vmem:[#allocation4 + $0x1b0] ss:$8 sps:$4 sm:$0xff]   ;;  %v2569_v5 = vld [vmem:[#allocation4 + $0x1a4] ss:$8 sps:$4 sm:$0xff]  }
 0x17c   :  { %v2491_v47 = vld [vmem:[#allocation4 + $0x174] ss:$8 sps:$4 sm:$0xff]  }
 0x17e   :  { %1070 = vmatpush2.bf16.msra.mxu0 %v2347_v16  ;;  %1113 = vmatpush2.bf16.msra.mxu1 %v2349_v17  ;;  %v2492_v16 = vld [vmem:[#allocation4 + $0x60] ss:$8 sps:$4 sm:$0xff]  }
 0x17f   :  { %1071 = vmatprep.subr.bf16.mxu0 %v2340_v18  ;;  %1114 = vmatprep.subr.bf16.mxu1 %v2342_v19  ;;  %v2495_v17 = vld [vmem:[#allocation4 + $0x160] ss:$8 sps:$4 sm:$0xff]   ;;  %v2500_v18 = vld [vmem:[#allocation4 + $0x54] ss:$8 sps:$4 sm:$0xff]  }
 0x180   :  { %v2503_v19 = vld [vmem:[#allocation4 + $0x154] ss:$8 sps:$4 sm:$0xff]  }
 0x182   :  { %1072 = vmatpush2.bf16.msra.mxu0 %v2339_v27  ;;  %1115 = vmatpush2.bf16.msra.mxu1 %v2341_v24  ;;  %v2504_v27 = vld [vmem:[#allocation4 + $0x40] ss:$8 sps:$4 sm:$0xff]   ;;  %v2512_v24 = vld [vmem:[#allocation4 + $0x34] ss:$8 sps:$4 sm:$0xff]  }
 0x183   :  { %1073 = vmatprep.subr.bf16.mxu0 %v2332_v25  ;;  %1116 = vmatprep.subr.bf16.mxu1 %v2334_v26  ;;  %v2515_v25 = vld [vmem:[#allocation4 + $0x134] ss:$8 sps:$4 sm:$0xff]   ;;  %v2510_v26 = vld [vmem:[#allocation4 + $0x30] ss:$8 sps:$4 sm:$0xff]  }
 0x186   :  { %1074 = vmatpush2.bf16.msra.mxu0 %v2331_v32  ;;  %1117 = vmatpush2.bf16.msra.mxu1 %v2333_v33  ;;  %v2519_v32 = vld [vmem:[#allocation4 + $0x120] ss:$8 sps:$4 sm:$0xff]   ;;  %v2524_v33 = vld [vmem:[#allocation4 + $0x14] ss:$8 sps:$4 sm:$0xff]  }
 0x187   :  { %1075 = vmatprep.subr.bf16.mxu0 %v2324_v34  ;;  %1118 = vmatprep.subr.bf16.mxu1 %v2326_v35  ;;  %v2527_v34 = vld [vmem:[#allocation4 + $0x114] ss:$8 sps:$4 sm:$0xff]   ;;  %v2522_v35 = vld [vmem:[#allocation4 + $0x10] ss:$8 sps:$4 sm:$0xff]  }
 0x18a   :  { %1076 = vmatpush2.bf16.msra.mxu0 %v2323_v42  ;;  %1119 = vmatpush2.bf16.msra.mxu1 %v2325_v43  ;;  %v2531_v42 = vld [vmem:[#allocation4 + $0x100] ss:$8 sps:$4 sm:$0xff]   ;;  %v2536_v43 = vld [vmem:[#allocation4 + $0xf4] ss:$8 sps:$4 sm:$0xff]  }
 0x18b   :  { %1077 = vmatprep.subr.bf16.mxu0 %v2316_v44  ;;  %1120 = vmatprep.subr.bf16.mxu1 %v2318_v45  ;;  %v2539_v44 = vld [vmem:[#allocation4 + $0x1f4] ss:$8 sps:$4 sm:$0xff]   ;;  %v2534_v45 = vld [vmem:[#allocation4 + $0xf0] ss:$8 sps:$4 sm:$0xff]  }
 0x18e   :  { %1078 = vmatpush2.bf16.msra.mxu0 %v2315_v52  ;;  %1121 = vmatpush2.bf16.msra.mxu1 %v2317_v56  ;;  %v2543_v52 = vld [vmem:[#allocation4 + $0x1e0] ss:$8 sps:$4 sm:$0xff]   ;;  %v2548_v56 = vld [vmem:[#allocation4 + $0xd4] ss:$8 sps:$4 sm:$0xff]  }
 0x18f   :  { %1079 = vmatprep.subr.bf16.mxu0 %v2308_v57  ;;  %1122 = vmatprep.subr.bf16.mxu1 %v2310_v58  ;;  %v2551_v57 = vld [vmem:[#allocation4 + $0x1d4] ss:$8 sps:$4 sm:$0xff]   ;;  %v2546_v58 = vld [vmem:[#allocation4 + $0xd0] ss:$8 sps:$4 sm:$0xff]  }
 0x192   :  { %1080 = vmatpush2.bf16.msra.mxu0 %v2307_v63  ;;  %1123 = vmatpush2.bf16.msra.mxu1 %v2309_v0  ;;  %v2555_v63 = vld [vmem:[#allocation4 + $0x1c0] ss:$8 sps:$4 sm:$0xff]   ;;  %v2560_v0 = vld [vmem:[#allocation4 + $0xb4] ss:$8 sps:$4 sm:$0xff]  }
 0x193   :  { %1081 = vmatprep.subr.bf16.mxu0 %v2300_v1  ;;  %1124 = vmatprep.subr.bf16.mxu1 %v2302_v2  ;;  %v2563_v1 = vld [vmem:[#allocation4 + $0x1b4] ss:$8 sps:$4 sm:$0xff]   ;;  %v2558_v2 = vld [vmem:[#allocation4 + $0xb0] ss:$8 sps:$4 sm:$0xff]  }
 0x196   :  { %1082 = vmatpush2.bf16.msra.mxu0 %v2299_v7  ;;  %1125 = vmatpush2.bf16.msra.mxu1 %v2301_v41  ;;  %v2567_v7 = vld [vmem:[#allocation4 + $0x1a0] ss:$8 sps:$4 sm:$0xff]   ;;  %v2572_v41 = vld [vmem:[#allocation4 + $0x94] ss:$8 sps:$4 sm:$0xff]  }
 0x197   :  { %1083 = vmatprep.subr.bf16.mxu0 %v2292_v8  ;;  %1126 = vmatprep.subr.bf16.mxu1 %v2294_v9  ;;  %v2575_v8 = vld [vmem:[#allocation4 + $0x194] ss:$8 sps:$4 sm:$0xff]   ;;  %v2570_v9 = vld [vmem:[#allocation4 + $0x90] ss:$8 sps:$4 sm:$0xff]  }
 0x19a   :  { %1084 = vmatpush2.bf16.msra.mxu0 %v2291_v10  ;;  %1127 = vmatpush2.bf16.msra.mxu1 %v2293_v40  ;;  %v2573_v10 = vld [vmem:[#allocation4 + $0x190] ss:$8 sps:$4 sm:$0xff]   ;;  %v2578_v40 = vld [vmem:[#allocation4 + $0x84] ss:$8 sps:$4 sm:$0xff]  }
 0x19b   :  { %1999 = vmatprep.subr.bf16.mxu0 %v2488_v11  ;;  %2042 = vmatprep.subr.bf16.mxu1 %v2491_v47  ;;  %v2581_v11 = vld [vmem:[#allocation4 + $0x184] ss:$8 sps:$4 sm:$0xff]   ;;  %v2576_v47 = vld [vmem:[#allocation4 + $0x80] ss:$8 sps:$4 sm:$0xff]  }
 0x19d   :  { %1086 = vmatmul.mubr.bf16.vlgmr.msra.gmra.mxu0 %v3068_v13  ;;  %1129 = vmatmul.mubr.bf16.vlgmr.msra.gmra.mxu1 %v3068_v13  ;;  %v2507_v13 = vld [vmem:[#allocation4 + $0x140] ss:$8 sps:$4 sm:$0xff]  }
 0x19e   :  { %2000 = vmatpush1.bf16.msra.mxu0 %v2486_v46  ;;  %2043 = vmatpush1.bf16.msra.mxu1 %v2489_v12  ;;  %v2579_v46 = vld [vmem:[#allocation4 + $0x180] ss:$8 sps:$4 sm:$0xff]   ;;  %v2584_v12 = vld [vmem:[#allocation4 + $0x274] ss:$8 sps:$4 sm:$0xff]  }
 0x19f   :  { %2001 = vmatprep.subr.bf16.mxu0 %v2494_v14  ;;  %2044 = vmatprep.subr.bf16.mxu1 %v2497_v15  ;;  %v2587_v14 = vld [vmem:[#allocation4 + $0x374] ss:$8 sps:$4 sm:$0xff]   ;;  %v287_v15 = vsub.s32 2, %v3034_v53 }
 0x1a2   :  { %2002 = vmatpush1.bf16.msra.mxu0 %v2492_v16  ;;  %2045 = vmatpush1.bf16.msra.mxu1 %v2495_v17  ;;  %v3252_v16 = vld [vmem:[%s3330_s4] sm:$0xff]  ;;  %v291_v17 = vsub.s32 3, %v3034_v53 }
 0x1a3   :  { %2003 = vmatprep.subr.bf16.mxu0 %v2500_v18  ;;  %2046 = vmatprep.subr.bf16.mxu1 %v2503_v19  ;;  %v280_v18 = vrot.slane %v3252_v16, %v3040_v55  ;;  %v288_v19 = vrot.slane %v3252_v16, %v287_v15 }
 0x1a6   :  { %2004 = vmatpush1.bf16.msra.mxu0 %v2498_v20  ;;  %2047 = vmatpush1.bf16.msra.mxu1 %v2501_v21 }
 0x1a7   :  { %2005 = vmatprep.subr.bf16.mxu0 %v2506_v22  ;;  %2048 = vmatprep.subr.bf16.mxu1 %v2509_v23  ;;  %v284_v22 = vrot.slane %v3252_v16, %v3037_v54  ;;  %v292_v23 = vrot.slane %v3252_v16, %v291_v17 }
 0x1aa   :  { %2006 = vmatpush1.bf16.msra.mxu0 %v2504_v27  ;;  %2049 = vmatpush1.bf16.msra.mxu1 %v2507_v13 }
 0x1ab   :  { %2007 = vmatprep.subr.bf16.mxu0 %v2512_v24  ;;  %2050 = vmatprep.subr.bf16.mxu1 %v2515_v25 }
 0x1ae   :  { %2008 = vmatpush1.bf16.msra.mxu0 %v2510_v26  ;;  %2051 = vmatpush1.bf16.msra.mxu1 %v2513_v28 }
 0x1af   :  { %2009 = vmatprep.subr.bf16.mxu0 %v2518_v29  ;;  %2052 = vmatprep.subr.bf16.mxu1 %v2521_v30 }
 0x1b2   :  { %2010 = vmatpush1.bf16.msra.mxu0 %v2516_v31  ;;  %2053 = vmatpush1.bf16.msra.mxu1 %v2519_v32 }
 0x1b3   :  { %2011 = vmatprep.subr.bf16.mxu0 %v2524_v33  ;;  %2054 = vmatprep.subr.bf16.mxu1 %v2527_v34 }
 0x1b6   :  { %2012 = vmatpush1.bf16.msra.mxu0 %v2522_v35  ;;  %2055 = vmatpush1.bf16.msra.mxu1 %v2525_v36 }
 0x1b7   :  { %2013 = vmatprep.subr.bf16.mxu0 %v2530_v37  ;;  %2056 = vmatprep.subr.bf16.mxu1 %v2533_v38 }
 0x1ba   :  { %2014 = vmatpush1.bf16.msra.mxu0 %v2528_v39  ;;  %2057 = vmatpush1.bf16.msra.mxu1 %v2531_v42 }
 0x1bb   :  { %2015 = vmatprep.subr.bf16.mxu0 %v2536_v43  ;;  %2058 = vmatprep.subr.bf16.mxu1 %v2539_v44 }
 0x1be   :  { %2016 = vmatpush2.bf16.msra.mxu0 %v2534_v45  ;;  %2059 = vmatpush2.bf16.msra.mxu1 %v2537_v48 }
 0x1bf   :  { %2017 = vmatprep.subr.bf16.mxu0 %v2542_v49  ;;  %2060 = vmatprep.subr.bf16.mxu1 %v2545_v50 }
 0x1c2   :  { %2018 = vmatpush2.bf16.msra.mxu0 %v2540_v51  ;;  %2061 = vmatpush2.bf16.msra.mxu1 %v2543_v52 }
 0x1c3   :  { %2019 = vmatprep.subr.bf16.mxu0 %v2548_v56  ;;  %2062 = vmatprep.subr.bf16.mxu1 %v2551_v57 }
 0x1c6   :  { %2020 = vmatpush2.bf16.msra.mxu0 %v2546_v58  ;;  %2063 = vmatpush2.bf16.msra.mxu1 %v2549_v59 }
 0x1c7   :  { %2021 = vmatprep.subr.bf16.mxu0 %v2554_v60  ;;  %2064 = vmatprep.subr.bf16.mxu1 %v2557_v61 }
 0x1ca   :  { %2022 = vmatpush2.bf16.msra.mxu0 %v2552_v62  ;;  %2065 = vmatpush2.bf16.msra.mxu1 %v2555_v63 }
 0x1cb   :  { %2023 = vmatprep.subr.bf16.mxu0 %v2560_v0  ;;  %2066 = vmatprep.subr.bf16.mxu1 %v2563_v1 }
 0x1ce   :  { %2024 = vmatpush2.bf16.msra.mxu0 %v2558_v2  ;;  %2067 = vmatpush2.bf16.msra.mxu1 %v2561_v3 }
 0x1cf   :  { %2025 = vmatprep.subr.bf16.mxu0 %v2566_v4  ;;  %2068 = vmatprep.subr.bf16.mxu1 %v2569_v5 }
 0x1d2   :  { %2026 = vmatpush2.bf16.msra.mxu0 %v2564_v6  ;;  %2069 = vmatpush2.bf16.msra.mxu1 %v2567_v7 }
 0x1d3   :  { %2027 = vmatprep.subr.bf16.mxu0 %v2572_v41  ;;  %2070 = vmatprep.subr.bf16.mxu1 %v2575_v8 }
 0x1d6   :  { %2028 = vmatpush2.bf16.msra.mxu0 %v2570_v9  ;;  %2071 = vmatpush2.bf16.msra.mxu1 %v2573_v10 }
 0x1d7   :  { %2029 = vmatprep.subr.bf16.mxu0 %v2578_v40  ;;  %2072 = vmatprep.subr.bf16.mxu1 %v2581_v11 }
 0x1da   :  { %2030 = vmatpush2.bf16.msra.mxu0 %v2576_v47  ;;  %2073 = vmatpush2.bf16.msra.mxu1 %v2579_v46 }
 0x1db   :  { %2085 = vmatprep.subr.bf16.mxu0 %v2584_v12  ;;  %2128 = vmatprep.subr.bf16.mxu1 %v2587_v14 }
 0x21d   :  { %v1001_v20 = vpop.f32.mrf.mxu0  ;;  %v1044_v21 = vpop.f32.mrf.mxu1 }
 0x21e   :  { %v1002_v27 = vadd.f32 %v1001_v20, %v280_v18  ;;  %v1045_v13 = vadd.f32 %v1044_v21, %v288_v19 }
 0x21f   :  { %v1003_v24 = vpop.f32.mrf.mxu0  ;;  %v1046_v25 = vpop.f32.mrf.mxu1 }
 0x220   :  { %v1159_v26 = vmul.f32 0.70710677, %v1002_v27  ;;  %v1161_v28 = vmul.f32 0.70710677, %v1045_v13  ;;  %v1004_v29 = vadd.f32 %v1003_v24, %v284_v22  ;;  %v1047_v30 = vadd.f32 %v1046_v25, %v292_v23  ;;  %v2593_v24 = vld [vmem:[#allocation4 + $0x364] ss:$8 sps:$4 sm:$0xff]  }
 0x221   :  { %v1005_v31 = vpop.f32.mrf.mxu0  ;;  %v1048_v32 = vpop.f32.mrf.mxu1  ;;  %v1143_v58 = vmul.f32 0.5, %v1002_v27  ;;  %v1145_v40 = vmul.f32 0.5, %v1045_v13  ;;  %v2588_v13 = vld [vmem:[#allocation4 + $0x260] ss:$8 sps:$4 sm:$0xff]  }
 0x222   :  { %v1006_v33 = vadd.f32 %v1005_v31, %v280_v18  ;;  %v1049_v34 = vadd.f32 %v1048_v32, %v288_v19  ;;  %2686 = verf.f32 %v1159_v26  ;;  %v1160_v35 = vmul.f32 0.70710677, %v1004_v29  ;;  %v2582_v19 = vld [vmem:[#allocation4 + $0x270] ss:$8 sps:$4 sm:$0xff]   ;;  %v2591_v25 = vld [vmem:[#allocation4 + $0x360] ss:$8 sps:$4 sm:$0xff]  }
 0x223   :  { %v1007_v36 = vpop.f32.mrf.mxu0  ;;  %v1050_v37 = vpop.f32.mrf.mxu1  ;;  %2688 = verf.f32 %v1161_v28  ;;  %v1162_v38 = vmul.f32 0.70710677, %v1047_v30  ;;  %v1144_v59 = vmul.f32 0.5, %v1004_v29  ;;  %v1146_v41 = vmul.f32 0.5, %v1047_v30  ;;  %v2596_v26 = vld [vmem:[#allocation4 + $0x254] ss:$8 sps:$4 sm:$0xff]  }
 0x224   :  { %v1167_v39 = vmul.f32 0.70710677, %v1006_v33  ;;  %2690 = verf.f32 %v1160_v35  ;;  %v1169_v42 = vmul.f32 0.70710677, %v1049_v34  ;;  %v1008_v43 = vadd.f32 %v1007_v36, %v284_v22  ;;  %v2585_v22 = vld [vmem:[#allocation4 + $0x370] ss:$8 sps:$4 sm:$0xff]  }
 0x225   :  { %v1051_v44 = vadd.f32 %v1050_v37, %v292_v23  ;;  %2692 = verf.f32 %v1162_v38  ;;  %v1151_v1 = vmul.f32 0.5, %v1006_v33  ;;  %v1153_v5 = vmul.f32 0.5, %v1049_v34  ;;  %v2590_v23 = vld [vmem:[#allocation4 + $0x264] ss:$8 sps:$4 sm:$0xff]   ;;  %v2599_v28 = vld [vmem:[#allocation4 + $0x354] ss:$8 sps:$4 sm:$0xff]  }
 0x226   :  { %2694 = verf.f32 %v1167_v39  ;;  %v1168_v45 = vmul.f32 0.70710677, %v1008_v43  ;;  %v1152_v6 = vmul.f32 0.5, %v1008_v43  ;;  %v2594_v29 = vld [vmem:[#allocation4 + $0x250] ss:$8 sps:$4 sm:$0xff]  }
 0x227   :  { %2696 = verf.f32 %v1169_v42  ;;  %v1170_v48 = vmul.f32 0.70710677, %v1051_v44  ;;  %v1154_v9 = vmul.f32 0.5, %v1051_v44  ;;  %v2597_v30 = vld [vmem:[#allocation4 + $0x350] ss:$8 sps:$4 sm:$0xff]  }
 0x228   :  { %2698 = verf.f32 %v1168_v45  ;;  %v2602_v31 = vld [vmem:[#allocation4 + $0x244] ss:$8 sps:$4 sm:$0xff]   ;;  %v2600_v33 = vld [vmem:[#allocation4 + $0x240] ss:$8 sps:$4 sm:$0xff]   ;;  %v2608_v35 = vld [vmem:[#allocation4 + $0x234] ss:$8 sps:$4 sm:$0xff]  }
 0x229   :  { %2700 = verf.f32 %v1170_v48  ;;  %v2605_v32 = vld [vmem:[#allocation4 + $0x344] ss:$8 sps:$4 sm:$0xff]   ;;  %v2603_v34 = vld [vmem:[#allocation4 + $0x340] ss:$8 sps:$4 sm:$0xff]   ;;  %v2611_v36 = vld [vmem:[#allocation4 + $0x334] ss:$8 sps:$4 sm:$0xff]  }
 0x22a   :  { %v2606_v37 = vld [vmem:[#allocation4 + $0x230] ss:$8 sps:$4 sm:$0xff]   ;;  %v2614_v39 = vld [vmem:[#allocation4 + $0x224] ss:$8 sps:$4 sm:$0xff]   ;;  %v2612_v43 = vld [vmem:[#allocation4 + $0x220] ss:$8 sps:$4 sm:$0xff]  }
 0x22b   :  { %v2609_v38 = vld [vmem:[#allocation4 + $0x330] ss:$8 sps:$4 sm:$0xff]   ;;  %v2617_v42 = vld [vmem:[#allocation4 + $0x324] ss:$8 sps:$4 sm:$0xff]   ;;  %v2615_v44 = vld [vmem:[#allocation4 + $0x320] ss:$8 sps:$4 sm:$0xff]  }
 0x22c   :  { %v2620_v45 = vld [vmem:[#allocation4 + $0x214] ss:$8 sps:$4 sm:$0xff]  }
 0x22d   :  { %v2623_v48 = vld [vmem:[#allocation4 + $0x314] ss:$8 sps:$4 sm:$0xff]  }
 0x22f   :  { %v2687_v49 = vpop.eup %2686 }
 0x230   :  { %v2689_v50 = vpop.eup %2688  ;;  %v1191_v63 = vadd.f32 1.0, %v2687_v49  ;;  %v2618_v49 = vld [vmem:[#allocation4 + $0x210] ss:$8 sps:$4 sm:$0xff]  }
 0x231   :  { %v2691_v51 = vpop.eup %2690  ;;  %v1193_v4 = vadd.f32 1.0, %v2689_v50  ;;  %v2621_v50 = vld [vmem:[#allocation4 + $0x310] ss:$8 sps:$4 sm:$0xff]  }
 0x232   :  { %v2693_v52 = vpop.eup %2692  ;;  %v1192_v60 = vadd.f32 1.0, %v2691_v51  ;;  %v1207_v12 = vmul.f32 %v1191_v63, %v1143_v58  ;;  %v2626_v51 = vld [vmem:[#allocation4 + $0x204] ss:$8 sps:$4 sm:$0xff]   ;;  %v2624_v58 = vld [vmem:[#allocation4 + $0x200] ss:$8 sps:$4 sm:$0xff]   ;;  %v307_v63 = vsub.s32 7, %v3034_v53 }
 0x233   :  { %v2695_v56 = vpop.eup %2694  ;;  %v1194_v0 = vadd.f32 1.0, %v2693_v52  ;;  %v1209_v17 = vmul.f32 %v1193_v4, %v1145_v40  ;;  %v2629_v52 = vld [vmem:[#allocation4 + $0x304] ss:$8 sps:$4 sm:$0xff]  }
 0x234   :  { %v2697_v57 = vpop.eup %2696  ;;  %v1199_v61 = vadd.f32 1.0, %v2695_v56  ;;  %v1208_v11 = vmul.f32 %v1192_v60, %v1144_v59  ;;  %v295_v56 = vsub.s32 4, %v3034_v53  ;;  %v2627_v59 = vld [vmem:[#allocation4 + $0x300] ss:$8 sps:$4 sm:$0xff]   ;;  %v2632_v60 = vld [vmem:[#allocation4 + $0x2f4] ss:$8 sps:$4 sm:$0xff]  }
 0x235   :  { %v2699_v62 = vpop.eup %2698  ;;  %v1201_v2 = vadd.f32 1.0, %v2697_v57  ;;  %v1210_v14 = vmul.f32 %v1194_v0, %v1146_v41  ;;  %v303_v57 = vsub.s32 6, %v3034_v53  ;;  %v2638_v4 = vld [vmem:[#allocation4 + $0x2e4] ss:$8 sps:$4 sm:$0xff]   ;;  %v308_v41 = vrot.slane %v3252_v16, %v307_v63 }
 0x236   :  { %v2701_v3 = vpop.eup %2700  ;;  %v1200_v7 = vadd.f32 1.0, %v2699_v62  ;;  %v1215_v8 = vmul.f32 %v1199_v61, %v1151_v1  ;;  %v2635_v61 = vld [vmem:[#allocation4 + $0x3f4] ss:$8 sps:$4 sm:$0xff]   ;;  %v299_v62 = vsub.s32 5, %v3034_v53  ;;  %v296_v0 = vrot.slane %v3252_v16, %v295_v56 }
 0x237   :  { %v1202_v10 = vadd.f32 1.0, %v2701_v3  ;;  %v1217_v47 = vmul.f32 %v1201_v2, %v1153_v5  ;;  %v304_v1 = vrot.slane %v3252_v16, %v303_v57  ;;  %v2630_v2 = vld [vmem:[#allocation4 + $0x2f0] ss:$8 sps:$4 sm:$0xff]  }
 0x238   :  { %v1216_v46 = vmul.f32 %v1200_v7, %v1152_v6  ;;  %v1223_v20 = vpack.c.bf16 %v1215_v8, %v1207_v12  ;;  %v2633_v3 = vld [vmem:[#allocation4 + $0x3f0] ss:$8 sps:$4 sm:$0xff]   ;;  %v300_v7 = vrot.slane %v3252_v16, %v299_v62  ;;  %v2641_v8 = vld [vmem:[#allocation4 + $0x3e4] ss:$8 sps:$4 sm:$0xff]  }
 0x239   :  { %v1218_v15 = vmul.f32 %v1202_v10, %v1154_v9  ;;  %v1225_v27 = vpack.c.bf16 %v1217_v47, %v1209_v17  ;;  %v2639_v47 = vld [vmem:[#allocation4 + $0x3e0] ss:$8 sps:$4 sm:$0xff]  }
 0x23a   :  { %v1224_v18 = vpack.c.bf16 %v1216_v46, %v1208_v11  ;;  %v2636_v11 = vld [vmem:[#allocation4 + $0x2e0] ss:$8 sps:$4 sm:$0xff]  }
 0x23b   :  { %v1226_v21 = vpack.c.bf16 %v1218_v15, %v1210_v14  ;;  %v2644_v14 = vld [vmem:[#allocation4 + $0x2d4] ss:$8 sps:$4 sm:$0xff]  }
 0x23c   :  { %2031 = vmatprep.mubr.bf16.mxu0 %v1224_v18 }
 0x23d   :  { %2074 = vmatprep.mubr.bf16.mxu1 %v1226_v21  ;;  %2032 = vmatmul.mubr.bf16.vlgmr.msra.gmra.mxu0 %v1223_v20 }
 0x23e   :  { %2075 = vmatmul.mubr.bf16.vlgmr.msra.gmra.mxu1 %v1225_v27  ;;  %2086 = vmatpush1.bf16.msra.mxu0 %v2582_v19  ;;  %v2647_v19 = vld [vmem:[#allocation4 + $0x3d4] ss:$8 sps:$4 sm:$0xff]  }
 0x23f   :  { %2129 = vmatpush1.bf16.msra.mxu1 %v2585_v22  ;;  %2087 = vmatprep.subr.bf16.mxu0 %v2590_v23 }
 0x240   :  { %2130 = vmatprep.subr.bf16.mxu1 %v2593_v24  ;;  %v2642_v24 = vld [vmem:[#allocation4 + $0x2d0] ss:$8 sps:$4 sm:$0xff]  }
 0x242   :  { %2088 = vmatpush1.bf16.msra.mxu0 %v2588_v13  ;;  %v2645_v13 = vld [vmem:[#allocation4 + $0x3d0] ss:$8 sps:$4 sm:$0xff]  }
 0x243   :  { %2131 = vmatpush1.bf16.msra.mxu1 %v2591_v25  ;;  %2089 = vmatprep.subr.bf16.mxu0 %v2596_v26 }
 0x244   :  { %2132 = vmatprep.subr.bf16.mxu1 %v2599_v28  ;;  %v2650_v28 = vld [vmem:[#allocation4 + $0x2c4] ss:$8 sps:$4 sm:$0xff]  }
 0x246   :  { %2090 = vmatpush1.bf16.msra.mxu0 %v2594_v29 }
 0x247   :  { %2133 = vmatpush1.bf16.msra.mxu1 %v2597_v30  ;;  %2091 = vmatprep.subr.bf16.mxu0 %v2602_v31 }
 0x248   :  { %2134 = vmatprep.subr.bf16.mxu1 %v2605_v32  ;;  %v2653_v32 = vld [vmem:[#allocation4 + $0x3c4] ss:$8 sps:$4 sm:$0xff]  }
 0x24a   :  { %2092 = vmatpush1.bf16.msra.mxu0 %v2600_v33 }
 0x24b   :  { %2135 = vmatpush1.bf16.msra.mxu1 %v2603_v34  ;;  %2093 = vmatprep.subr.bf16.mxu0 %v2608_v35  ;;  %v2648_v34 = vld [vmem:[#allocation4 + $0x2c0] ss:$8 sps:$4 sm:$0xff]  }
 0x24c   :  { %2136 = vmatprep.subr.bf16.mxu1 %v2611_v36  ;;  %v2651_v36 = vld [vmem:[#allocation4 + $0x3c0] ss:$8 sps:$4 sm:$0xff]  }
 0x24e   :  { %2094 = vmatpush1.bf16.msra.mxu0 %v2606_v37  ;;  %v2656_v37 = vld [vmem:[#allocation4 + $0x2b4] ss:$8 sps:$4 sm:$0xff]  }
 0x24f   :  { %2137 = vmatpush1.bf16.msra.mxu1 %v2609_v38  ;;  %2095 = vmatprep.subr.bf16.mxu0 %v2614_v39  ;;  %v2659_v38 = vld [vmem:[#allocation4 + $0x3b4] ss:$8 sps:$4 sm:$0xff]   ;;  %v2654_v39 = vld [vmem:[#allocation4 + $0x2b0] ss:$8 sps:$4 sm:$0xff]  }
 0x250   :  { %2138 = vmatprep.subr.bf16.mxu1 %v2617_v42  ;;  %v2657_v42 = vld [vmem:[#allocation4 + $0x3b0] ss:$8 sps:$4 sm:$0xff]  }
 0x252   :  { %2096 = vmatpush1.bf16.msra.mxu0 %v2612_v43  ;;  %v2662_v43 = vld [vmem:[#allocation4 + $0x2a4] ss:$8 sps:$4 sm:$0xff]  }
 0x253   :  { %2139 = vmatpush1.bf16.msra.mxu1 %v2615_v44  ;;  %2097 = vmatprep.subr.bf16.mxu0 %v2620_v45  ;;  %v2665_v44 = vld [vmem:[#allocation4 + $0x3a4] ss:$8 sps:$4 sm:$0xff]   ;;  %v2660_v45 = vld [vmem:[#allocation4 + $0x2a0] ss:$8 sps:$4 sm:$0xff]  }
 0x254   :  { %2140 = vmatprep.subr.bf16.mxu1 %v2623_v48 }
 0x256   :  { %2098 = vmatpush1.bf16.msra.mxu0 %v2618_v49  ;;  %v2663_v49 = vld [vmem:[#allocation4 + $0x3a0] ss:$8 sps:$4 sm:$0xff]  }
 0x257   :  { %2141 = vmatpush1.bf16.msra.mxu1 %v2621_v50  ;;  %2099 = vmatprep.subr.bf16.mxu0 %v2626_v51  ;;  %v2668_v50 = vld [vmem:[#allocation4 + $0x294] ss:$8 sps:$4 sm:$0xff]  }
 0x258   :  { %2142 = vmatprep.subr.bf16.mxu1 %v2629_v52  ;;  %v2671_v52 = vld [vmem:[#allocation4 + $0x394] ss:$8 sps:$4 sm:$0xff]  }
 0x25a   :  { %2100 = vmatpush1.bf16.msra.mxu0 %v2624_v58  ;;  %v2666_v58 = vld [vmem:[#allocation4 + $0x290] ss:$8 sps:$4 sm:$0xff]  }
 0x25b   :  { %2143 = vmatpush1.bf16.msra.mxu1 %v2627_v59  ;;  %2101 = vmatprep.subr.bf16.mxu0 %v2632_v60  ;;  %v2669_v60 = vld [vmem:[#allocation4 + $0x390] ss:$8 sps:$4 sm:$0xff]  }
 0x25c   :  { %2144 = vmatprep.subr.bf16.mxu1 %v2635_v61  ;;  %v2674_v61 = vld [vmem:[#allocation4 + $0x284] ss:$8 sps:$4 sm:$0xff]  }
 0x25d   :  { %v1087_v5 = vpop.f32.mrf.mxu0  ;;  %v1130_v6 = vpop.f32.mrf.mxu1 }
 0x25e   :  { %v3269_v9 = vadd.f32 %v1087_v5, %v296_v0  ;;  %v3271_v53 = vadd.f32 %v1130_v6, %v304_v1  ;;  %2102 = vmatpush2.bf16.msra.mxu0 %v2630_v2 }
 0x25f   :  { %v1089_v10 = vpop.f32.mrf.mxu0  ;;  %v1132_v40 = vpop.f32.mrf.mxu1  ;;  %2145 = vmatpush2.bf16.msra.mxu1 %v2633_v3  ;;  %2103 = vmatprep.subr.bf16.mxu0 %v2638_v4  ;;  %v2677_v3 = vld [vmem:[#allocation4 + $0x384] ss:$8 sps:$4 sm:$0xff]  }
 0x260   :  { %v1163_v46 = vmul.f32 0.70710677, %v3269_v9  ;;  %v1165_v12 = vmul.f32 0.70710677, %v3271_v53  ;;  %v3275_v15 = vadd.f32 %v1089_v10, %v300_v7  ;;  %v3277_v16 = vadd.f32 %v1132_v40, %v308_v41  ;;  %2146 = vmatprep.subr.bf16.mxu1 %v2641_v8 }
 0x261   :  { %v1091_v17 = vpop.f32.mrf.mxu0  ;;  %v1134_v18 = vpop.f32.mrf.mxu1  ;;  %v1147_v63 = vmul.f32 0.5, %v3269_v9  ;;  %v2672_v9 = vld [vmem:[#allocation4 + $0x280] ss:$8 sps:$4 sm:$0xff]  }
 0x262   :  { %v3279_v20 = vadd.f32 %v1091_v17, %v296_v0  ;;  %v3281_v21 = vadd.f32 %v1134_v18, %v304_v1  ;;  %2702 = verf.f32 %v1163_v46  ;;  %v1164_v22 = vmul.f32 0.70710677, %v3275_v15  ;;  %2104 = vmatpush2.bf16.msra.mxu0 %v2636_v11  ;;  %v2675_v17 = vld [vmem:[#allocation4 + $0x380] ss:$8 sps:$4 sm:$0xff]  }
 0x263   :  { %v1093_v23 = vpop.f32.mrf.mxu0  ;;  %v1136_v27 = vpop.f32.mrf.mxu1  ;;  %2704 = verf.f32 %v1165_v12  ;;  %v1166_v25 = vmul.f32 0.70710677, %v3277_v16  ;;  %2147 = vmatpush2.bf16.msra.mxu1 %v2639_v47  ;;  %2105 = vmatprep.subr.bf16.mxu0 %v2644_v14  ;;  %v1148_v0 = vmul.f32 0.5, %v3275_v15  ;;  %v1150_v46 = vmul.f32 0.5, %v3277_v16 }
 0x264   :  { %v1171_v26 = vmul.f32 0.70710677, %v3279_v20  ;;  %2706 = verf.f32 %v1164_v22  ;;  %v1173_v29 = vmul.f32 0.70710677, %v3281_v21  ;;  %v1094_v30 = vadd.f32 %v1093_v23, %v300_v7  ;;  %2148 = vmatprep.subr.bf16.mxu1 %v2647_v19 }
 0x265   :  { %v3287_v31 = vadd.f32 %v1136_v27, %v308_v41  ;;  %2708 = verf.f32 %v1166_v25  ;;  %v1155_v7 = vmul.f32 0.5, %v3279_v20  ;;  %v1157_v40 = vmul.f32 0.5, %v3281_v21 }
 0x266   :  { %2710 = verf.f32 %v1171_v26  ;;  %v1172_v33 = vmul.f32 0.70710677, %v1094_v30  ;;  %2106 = vmatpush2.bf16.msra.mxu0 %v2642_v24  ;;  %v1156_v11 = vmul.f32 0.5, %v1094_v30  ;;  %v1149_v18 = vmul.f32 0.5, %v3271_v53 }
 0x267   :  { %2712 = verf.f32 %v1173_v29  ;;  %v1174_v35 = vmul.f32 0.70710677, %v3287_v31  ;;  %2149 = vmatpush2.bf16.msra.mxu1 %v2645_v13  ;;  %2107 = vmatprep.subr.bf16.mxu0 %v2650_v28  ;;  %v1158_v14 = vmul.f32 0.5, %v3287_v31 }
 0x268   :  { %2714 = verf.f32 %v1172_v33  ;;  %2150 = vmatprep.subr.bf16.mxu1 %v2653_v32 }
 0x269   :  { %2716 = verf.f32 %v1174_v35 }
 0x26a   :  { %2108 = vmatpush2.bf16.msra.mxu0 %v2648_v34 }
 0x26b   :  { %2151 = vmatpush2.bf16.msra.mxu1 %v2651_v36  ;;  %2109 = vmatprep.subr.bf16.mxu0 %v2656_v37  ;;  %v2194_v37 = vld [vmem:[%s3332_s6] sm:$0x3] }
 0x26c   :  { %2152 = vmatprep.subr.bf16.mxu1 %v2659_v38 }
 0x26e   :  { %2110 = vmatpush2.bf16.msra.mxu0 %v2654_v39 }
 0x26f   :  { %v2703_v48 = vpop.eup %2702  ;;  %2153 = vmatpush2.bf16.msra.mxu1 %v2657_v42  ;;  %2111 = vmatprep.subr.bf16.mxu0 %v2662_v43  ;;  %v2182_v43 = vld [vmem:[%s3326_s0] sm:$0xff] }
 0x270   :  { %v2705_v51 = vpop.eup %2704  ;;  %2154 = vmatprep.subr.bf16.mxu1 %v2665_v44  ;;  %v1195_v5 = vadd.f32 1.0, %v2703_v48 }
 0x271   :  { %v2707_v56 = vpop.eup %2706  ;;  %v1197_v10 = vadd.f32 1.0, %v2705_v51 }
 0x272   :  { %v2709_v57 = vpop.eup %2708  ;;  %2112 = vmatpush2.bf16.msra.mxu0 %v2660_v45  ;;  %v1196_v1 = vadd.f32 1.0, %v2707_v56  ;;  %v1211_v21 = vmul.f32 %v1195_v5, %v1147_v63  ;;  %v2203_v56 = vrot.slane %v2194_v37, %v3037_v54  ;;  %v2184_v63 = vld [vmem:[%s3326_s0 + $0x10] sm:$0xff]  ;;  %v2185_v54 = vld [vmem:[%s3326_s0 + $0x18] sm:$0xff] }
 0x273   :  { %v2711_v59 = vpop.eup %2710  ;;  %2155 = vmatpush2.bf16.msra.mxu1 %v2663_v49  ;;  %2113 = vmatprep.subr.bf16.mxu0 %v2668_v50  ;;  %v1198_v6 = vadd.f32 1.0, %v2709_v57  ;;  %v1213_v24 = vmul.f32 %v1197_v10, %v1149_v18  ;;  %v2199_v49 = vrot.slane %v2194_v37, %v3040_v55 }
 0x274   :  { %v2713_v62 = vpop.eup %2712  ;;  %v1203_v2 = vadd.f32 1.0, %v2711_v59  ;;  %2156 = vmatprep.subr.bf16.mxu1 %v2671_v52  ;;  %v1212_v19 = vmul.f32 %v1196_v1, %v1148_v0  ;;  %v2183_v52 = vld [vmem:[%s3326_s0 + $0x8] sm:$0xff] }
 0x275   :  { %v2715_v4 = vpop.eup %2714  ;;  %v1205_v41 = vadd.f32 1.0, %v2713_v62  ;;  %v1214_v23 = vmul.f32 %v1198_v6, %v1150_v46 }
 0x276   :  { %v2717_v8 = vpop.eup %2716  ;;  %v1204_v47 = vadd.f32 1.0, %v2715_v4  ;;  %2114 = vmatpush2.bf16.msra.mxu0 %v2666_v58  ;;  %v1219_v12 = vmul.f32 %v1203_v2, %v1155_v7 }
 0x277   :  { %v1206_v15 = vadd.f32 1.0, %v2717_v8  ;;  %2157 = vmatpush2.bf16.msra.mxu1 %v2669_v60  ;;  %2115 = vmatprep.subr.bf16.mxu0 %v2674_v61  ;;  %v1221_v20 = vmul.f32 %v1205_v41, %v1157_v40 }
 0x278   :  { %v1220_v22 = vmul.f32 %v1204_v47, %v1156_v11  ;;  %2158 = vmatprep.subr.bf16.mxu1 %v2677_v3  ;;  %v1227_v16 = vpack.c.bf16 %v1219_v12, %v1211_v21 }
 0x279   :  { %v1222_v27 = vmul.f32 %v1206_v15, %v1158_v14  ;;  %v1229_v26 = vpack.c.bf16 %v1221_v20, %v1213_v24 }
 0x27a   :  { %2116 = vmatpush2.bf16.msra.mxu0 %v2672_v9  ;;  %v1228_v13 = vpack.c.bf16 %v1220_v22, %v1212_v19 }
 0x27b   :  { %2159 = vmatpush2.bf16.msra.mxu1 %v2675_v17  ;;  %v1230_v25 = vpack.c.bf16 %v1222_v27, %v1214_v23 }
 0x27c   :  { %2117 = vmatprep.mubr.bf16.mxu0 %v1228_v13 }
 0x27d   :  { %2160 = vmatprep.mubr.bf16.mxu1 %v1230_v25  ;;  %2118 = vmatmul.mubr.bf16.vlgmr.msra.gmra.mxu0 %v1227_v16 }
 0x27e   :  { %2161 = vmatmul.mubr.bf16.vlgmr.msra.gmra.mxu1 %v1229_v26 }
 0x2fd   :  { %v2033_v28 = vpop.f32.mrf.mxu0 }
 0x2fe   :  { %v2076_v53 = vpop.f32.mrf.mxu1 }
 0x2ff   :  { %v2035_v29 = vpop.f32.mrf.mxu0  ;;  %v2077_v34 = vadd.f32 %v2076_v53, %v2033_v28 }
 0x300   :  { %v2078_v30 = vpop.f32.mrf.mxu1 }
 0x301   :  { %v2037_v31 = vpop.f32.mrf.mxu0  ;;  %v2079_v38 = vadd.f32 %v2078_v30, %v2035_v29 }
 0x302   :  { %v2080_v32 = vpop.f32.mrf.mxu1 }
 0x303   :  { %v2039_v33 = vpop.f32.mrf.mxu0  ;;  %v2081_v45 = vadd.f32 %v2080_v32, %v2037_v31 }
 0x304   :  { %v2082_v35 = vpop.f32.mrf.mxu1 }
 0x305   :  { %v2083_v58 = vadd.f32 %v2082_v35, %v2039_v33 }
 0x33d   :  { %v2119_v36 = vpop.f32.mrf.mxu0 }
 0x33e   :  { %v2120_v39 = vadd.f32 %v2119_v36, %v2077_v34  ;;  %v2162_v42 = vpop.f32.mrf.mxu1 }
 0x33f   :  { %v2121_v44 = vpop.f32.mrf.mxu0 }
 0x340   :  { %v2163_v48 = vadd.f32 %v2162_v42, %v2120_v39  ;;  %v2122_v50 = vadd.f32 %v2121_v44, %v2079_v38  ;;  %v2164_v51 = vpop.f32.mrf.mxu1 }
 0x341   :  { %v2123_v57 = vpop.f32.mrf.mxu0 }
 0x342   :  { %v2190_v59 = vadd.f32 %v2182_v43, %v2163_v48  ;;  %v2165_v60 = vadd.f32 %v2164_v51, %v2122_v50  ;;  %v2124_v61 = vadd.f32 %v2123_v57, %v2081_v45  ;;  %v2166_v62 = vpop.f32.mrf.mxu1 }
 0x343   :  { %v2125_v0 = vpop.f32.mrf.mxu0 }
 0x344   :  { %v2206_v55 = vadd.f32 %v2199_v49, %v2190_v59  ;;  %v2191_v1 = vadd.f32 %v2183_v52, %v2165_v60  ;;  %v2167_v2 = vadd.f32 %v2166_v62, %v2124_v61  ;;  %v2126_v3 = vadd.f32 %v2125_v0, %v2083_v58  ;;  %v2168_v4 = vpop.f32.mrf.mxu1 }
 0x346   :  { %2210 = vst [vmem:[%s3333_s7] sm:$0xff] %v2206_v55  ;;  %v2207_v5 = vadd.f32 %v2203_v56, %v2191_v1  ;;  %v2192_v6 = vadd.f32 %v2184_v63, %v2167_v2  ;;  %v2169_v7 = vadd.f32 %v2168_v4, %v2126_v3 }
 0x348   :  { %2211 = vst [vmem:[%s3333_s7 + $0x8] sm:$0xff] %v2207_v5  ;;  %v2208_v41 = vadd.f32 %v2199_v49, %v2192_v6  ;;  %v2193_v8 = vadd.f32 %v2185_v54, %v2169_v7 }
 0x34a   :  { %2212 = vst [vmem:[%s3333_s7 + $0x10] sm:$0xff] %v2208_v41  ;;  %v2209_v10 = vadd.f32 %v2203_v56, %v2193_v8 }
 0x34c   :  { %2213 = vst [vmem:[%s3333_s7 + $0x18] sm:$0xff] %v2209_v10 }
 0x34d   :  { %2218 = vsyncpa [#allocation5], 1 }

// kernel: _lambda_.19
= control target key start
LH: loop header
LB: loop body
LE: loop exit
PB: predicated region body
PF: predicated region fallthrough
CT: control target
= control target key end

     0   :  { %v67_v38 = vlaneseq  ;;  %s958_s1 = inlined_call_operand.vmem [shape: bf16[256,256], index: 1, kind: input, shape index: {}]   ;;  %s959_s0 = inlined_call_operand.vmem [shape: f32[16,256], index: 0, kind: input, shape index: {}]   ;;  %s960_s2 = inlined_call_operand.vmem [shape: f32[1,256], index: 2, kind: input, shape index: {}]   ;;  %s961_s5 = inlined_call_operand.vmem [shape: bf16[256,128], index: 5, kind: input, shape index: {}]   ;;  %s962_s3 = inlined_call_operand.vmem [shape: f32[1,256], index: 3, kind: input, shape index: {}]   ;;  %s963_s4 = inlined_call_operand.vmem [shape: f32[1,256], index: 4, kind: input, shape index: {}]   ;;  %s964_s6 = inlined_call_operand.vmem [shape: f32[1,128], index: 6, kind: input, shape index: {}]   ;;  %s965_s7 = inlined_call_operand.vmem [shape: f32[16,128], index: 7, kind: output, shape index: {}]  }
   0x1   :  { %v634_v0 = vld [vmem:[%s958_s1 + $0x74] ss:$8 sps:$4 sm:$0xff]   ;;  %v636_v1 = vld [vmem:[%s958_s1 + $0x70] ss:$8 sps:$4 sm:$0xff]   ;;  %v637_v2 = vld [vmem:[%s958_s1 + $0x64] ss:$8 sps:$4 sm:$0xff]  }
   0x2   :  { %237 = vmatprep.subr.bf16.mxu0 %v634_v0  ;;  %v639_v3 = vld [vmem:[%s958_s1 + $0x60] ss:$8 sps:$4 sm:$0xff]   ;;  %v640_v4 = vld [vmem:[%s958_s1 + $0x54] ss:$8 sps:$4 sm:$0xff]   ;;  %v642_v5 = vld [vmem:[%s958_s1 + $0x50] ss:$8 sps:$4 sm:$0xff]  }
   0x3   :  { %238 = vmatpush1.bf16.msra.mxu0 %v636_v1  ;;  %v643_v6 = vld [vmem:[%s958_s1 + $0x44] ss:$8 sps:$4 sm:$0xff]   ;;  %v645_v7 = vld [vmem:[%s958_s1 + $0x40] ss:$8 sps:$4 sm:$0xff]   ;;  %v646_v8 = vld [vmem:[%s958_s1 + $0x34] ss:$8 sps:$4 sm:$0xff]  }
   0x4   :  { %239 = vmatprep.subr.bf16.mxu0 %v637_v2  ;;  %v648_v9 = vld [vmem:[%s958_s1 + $0x30] ss:$8 sps:$4 sm:$0xff]   ;;  %v649_v10 = vld [vmem:[%s958_s1 + $0x24] ss:$8 sps:$4 sm:$0xff]   ;;  %v651_v11 = vld [vmem:[%s958_s1 + $0x20] ss:$8 sps:$4 sm:$0xff]  }
   0x5   :  { %v652_v12 = vld [vmem:[%s958_s1 + $0x14] ss:$8 sps:$4 sm:$0xff]   ;;  %v28_v13 = vld [vmem:[%s959_s0 + $0x8] sm:$0xff]  ;;  %v654_v16 = vld [vmem:[%s958_s1 + $0x10] ss:$8 sps:$4 sm:$0xff]   ;;  %v68_v39 = vshrl.u32 %v67_v38, 7 }
   0x6   :  { %v30_v14 = vld [vmem:[%s959_s0 + $0x18] sm:$0xff]  ;;  %v655_v17 = vld [vmem:[%s958_s1 + $0x4] ss:$8 sps:$4 sm:$0xff]   ;;  %v657_v18 = vld [vmem:[%s958_s1] ss:$8 sps:$4 sm:$0xff]  }
   0x7   :  { %240 = vmatpush1.bf16.msra.mxu0 %v639_v3  ;;  %v32_v15 = vpack.c.bf16 %v30_v14, %v28_v13  ;;  %v658_v19 = vld [vmem:[%s958_s1 + $0xf4] ss:$8 sps:$4 sm:$0xff]   ;;  %v660_v20 = vld [vmem:[%s958_s1 + $0xf0] ss:$8 sps:$4 sm:$0xff]   ;;  %v661_v21 = vld [vmem:[%s958_s1 + $0xe4] ss:$8 sps:$4 sm:$0xff]  }
   0x8   :  { %241 = vmatprep.subr.bf16.mxu0 %v640_v4  ;;  %v663_v22 = vld [vmem:[%s958_s1 + $0xe0] ss:$8 sps:$4 sm:$0xff]   ;;  %v664_v23 = vld [vmem:[%s958_s1 + $0xd4] ss:$8 sps:$4 sm:$0xff]   ;;  %v666_v24 = vld [vmem:[%s958_s1 + $0xd0] ss:$8 sps:$4 sm:$0xff]  }
   0x9   :  { %269 = vmatprep.mubr.bf16.mxu0 %v32_v15  ;;  %v667_v25 = vld [vmem:[%s958_s1 + $0xc4] ss:$8 sps:$4 sm:$0xff]   ;;  %v669_v26 = vld [vmem:[%s958_s1 + $0xc0] ss:$8 sps:$4 sm:$0xff]   ;;  %v670_v27 = vld [vmem:[%s958_s1 + $0xb4] ss:$8 sps:$4 sm:$0xff]  }
   0xa   :  { %v672_v28 = vld [vmem:[%s958_s1 + $0xb0] ss:$8 sps:$4 sm:$0xff]   ;;  %v673_v29 = vld [vmem:[%s958_s1 + $0xa4] ss:$8 sps:$4 sm:$0xff]   ;;  %v675_v30 = vld [vmem:[%s958_s1 + $0xa0] ss:$8 sps:$4 sm:$0xff]  }
   0xb   :  { %242 = vmatpush1.bf16.msra.mxu0 %v642_v5  ;;  %v676_v31 = vld [vmem:[%s958_s1 + $0x94] ss:$8 sps:$4 sm:$0xff]   ;;  %v678_v32 = vld [vmem:[%s958_s1 + $0x90] ss:$8 sps:$4 sm:$0xff]   ;;  %v679_v33 = vld [vmem:[%s958_s1 + $0x84] ss:$8 sps:$4 sm:$0xff]  }
   0xc   :  { %243 = vmatprep.subr.bf16.mxu0 %v643_v6  ;;  %v681_v34 = vld [vmem:[%s958_s1 + $0x80] ss:$8 sps:$4 sm:$0xff]   ;;  %v29_v36 = vld [vmem:[%s959_s0 + $0x10] sm:$0xff]  ;;  %v862_v40 = vsub.s32 0, %v68_v39  ;;  %v867_v42 = vsub.s32 1, %v68_v39 }
   0xd   :  { %v27_v35 = vld [vmem:[%s959_s0] sm:$0xff]  ;;  %v695_v38 = vld [vmem:[%s961_s5 + $0x8] sm:$0xff]  }
   0xe   :  { %v31_v37 = vpack.c.bf16 %v29_v36, %v27_v35  ;;  %v65_v41 = vld [vmem:[%s960_s2] sm:$0x3]  ;;  %v692_v35 = vld [vmem:[%s961_s5 + $0x50] sm:$0xff]  }
   0xf   :  { %244 = vmatpush1.bf16.msra.mxu0 %v645_v7  ;;  %v70_v43 = vrot.slane %v65_v41, %v862_v40  ;;  %v74_v44 = vrot.slane %v65_v41, %v867_v42  ;;  %v693_v36 = vld [vmem:[%s961_s5 + $0x10] sm:$0xff]   ;;  %v696_v39 = vld [vmem:[%s961_s5 + $0x40] sm:$0xff]  }
  0x10   :  { %245 = vmatprep.subr.bf16.mxu0 %v646_v8  ;;  %v697_v41 = vld [vmem:[%s961_s5] sm:$0xff]  }
  0x13   :  { %246 = vmatpush1.bf16.msra.mxu0 %v648_v9 }
  0x14   :  { %247 = vmatprep.subr.bf16.mxu0 %v649_v10 }
  0x17   :  { %248 = vmatpush1.bf16.msra.mxu0 %v651_v11 }
  0x18   :  { %249 = vmatprep.subr.bf16.mxu0 %v652_v12 }
  0x1b   :  { %250 = vmatpush1.bf16.msra.mxu0 %v654_v16 }
  0x1c   :  { %251 = vmatprep.subr.bf16.mxu0 %v655_v17 }
  0x1f   :  { %252 = vmatpush1.bf16.msra.mxu0 %v657_v18 }
  0x20   :  { %253 = vmatprep.subr.bf16.mxu0 %v658_v19 }
  0x23   :  { %254 = vmatpush2.bf16.msra.mxu0 %v660_v20 }
  0x24   :  { %255 = vmatprep.subr.bf16.mxu0 %v661_v21 }
  0x27   :  { %256 = vmatpush2.bf16.msra.mxu0 %v663_v22 }
  0x28   :  { %257 = vmatprep.subr.bf16.mxu0 %v664_v23 }
  0x2b   :  { %258 = vmatpush2.bf16.msra.mxu0 %v666_v24 }
  0x2c   :  { %259 = vmatprep.subr.bf16.mxu0 %v667_v25  ;;  %v682_v25 = vld [vmem:[%s961_s5 + $0x78] sm:$0xff]  }
  0x2d   :  { %612 = vmatprep.subr.bf16.mxu1 %v682_v25 }
  0x2f   :  { %260 = vmatpush2.bf16.msra.mxu0 %v669_v26  ;;  %v683_v26 = vld [vmem:[%s961_s5 + $0x38] sm:$0xff]  }
  0x30   :  { %261 = vmatprep.subr.bf16.mxu0 %v670_v27  ;;  %613 = vmatpush3.bf16.msra.mxu1 %v683_v26  ;;  %v684_v27 = vld [vmem:[%s961_s5 + $0x70] sm:$0xff]  }
  0x31   :  { %614 = vmatprep.subr.bf16.mxu1 %v684_v27 }
  0x33   :  { %262 = vmatpush2.bf16.msra.mxu0 %v672_v28  ;;  %v685_v28 = vld [vmem:[%s961_s5 + $0x30] sm:$0xff]  }
  0x34   :  { %263 = vmatprep.subr.bf16.mxu0 %v673_v29  ;;  %615 = vmatpush3.bf16.msra.mxu1 %v685_v28  ;;  %v686_v29 = vld [vmem:[%s961_s5 + $0x68] sm:$0xff]  }
  0x35   :  { %616 = vmatprep.subr.bf16.mxu1 %v686_v29 }
  0x37   :  { %264 = vmatpush2.bf16.msra.mxu0 %v675_v30  ;;  %v687_v30 = vld [vmem:[%s961_s5 + $0x28] sm:$0xff]  }
  0x38   :  { %265 = vmatprep.subr.bf16.mxu0 %v676_v31  ;;  %v688_v31 = vld [vmem:[%s961_s5 + $0x60] sm:$0xff]   ;;  %617 = vmatpush3.bf16.msra.mxu1 %v687_v30 }
  0x39   :  { %618 = vmatprep.subr.bf16.mxu1 %v688_v31 }
  0x3b   :  { %266 = vmatpush2.bf16.msra.mxu0 %v678_v32  ;;  %v689_v32 = vld [vmem:[%s961_s5 + $0x20] sm:$0xff]  }
  0x3c   :  { %267 = vmatprep.subr.bf16.mxu0 %v679_v33  ;;  %v690_v33 = vld [vmem:[%s961_s5 + $0x58] sm:$0xff]   ;;  %619 = vmatpush3.bf16.msra.mxu1 %v689_v32 }
  0x3d   :  { %620 = vmatprep.subr.bf16.mxu1 %v690_v33 }
  0x3f   :  { %268 = vmatpush2.bf16.msra.mxu0 %v681_v34  ;;  %v691_v34 = vld [vmem:[%s961_s5 + $0x18] sm:$0xff]  }
  0x40   :  { %621 = vmatpush3.bf16.msra.mxu1 %v691_v34 }
  0x41   :  { %622 = vmatprep.subr.bf16.mxu1 %v692_v35 }
  0x42   :  { %270 = vmatmul.mubr.bf16.vlgmr.msra.gmra.mxu0 %v31_v37  ;;  %v694_v37 = vld [vmem:[%s961_s5 + $0x48] sm:$0xff]  }
  0x44   :  { %623 = vmatpush3.bf16.msra.mxu1 %v693_v36 }
  0x45   :  { %624 = vmatprep.subr.bf16.mxu1 %v694_v37 }
  0x48   :  { %625 = vmatpush3.bf16.msra.mxu1 %v695_v38 }
  0x49   :  { %626 = vmatprep.subr.bf16.mxu1 %v696_v39 }
  0x4c   :  { %627 = vmatpush3.bf16.msra.mxu1 %v697_v41 }
 0x102   :  { %v271_v45 = vpop.f32.mrf.mxu0 }
 0x103   :  { %v272_v46 = vadd.f32 %v271_v45, %v70_v43 }
 0x104   :  { %v273_v47 = vpop.f32.mrf.mxu0 }
 0x105   :  { %v284_v48 = vmul.f32 0.70710677, %v272_v46  ;;  %v274_v49 = vadd.f32 %v273_v47, %v74_v44  ;;  %v280_v60 = vmul.f32 0.5, %v272_v46 }
 0x106   :  { %v275_v50 = vpop.f32.mrf.mxu0 }
 0x107   :  { %698 = verf.f32 %v284_v48  ;;  %v285_v51 = vmul.f32 0.70710677, %v274_v49  ;;  %v276_v52 = vadd.f32 %v275_v50, %v70_v43  ;;  %v281_v61 = vmul.f32 0.5, %v274_v49 }
 0x108   :  { %v277_v53 = vpop.f32.mrf.mxu0 }
 0x109   :  { %700 = verf.f32 %v285_v51  ;;  %v286_v54 = vmul.f32 0.70710677, %v276_v52  ;;  %v278_v55 = vadd.f32 %v277_v53, %v74_v44  ;;  %v282_v4 = vmul.f32 0.5, %v276_v52 }
 0x10b   :  { %702 = verf.f32 %v286_v54  ;;  %v287_v56 = vmul.f32 0.70710677, %v278_v55  ;;  %v283_v5 = vmul.f32 0.5, %v278_v55 }
 0x10d   :  { %704 = verf.f32 %v287_v56 }
 0x114   :  { %v699_v57 = vpop.eup %698 }
 0x115   :  { %v292_v58 = vadd.f32 1.0, %v699_v57 }
 0x116   :  { %v701_v59 = vpop.eup %700 }
 0x117   :  { %v293_v62 = vadd.f32 1.0, %v701_v59  ;;  %v296_v0 = vmul.f32 %v292_v58, %v280_v60  ;;  %v300_v59 = vld [vmem:[%s962_s3] sm:$0x3] }
 0x118   :  { %v703_v63 = vpop.eup %702 }
 0x119   :  { %v297_v1 = vmul.f32 %v293_v62, %v281_v61  ;;  %v294_v2 = vadd.f32 1.0, %v703_v63  ;;  %v301_v61 = vld [vmem:[%s963_s4] sm:$0x3]  ;;  %v353_v63 = vrot.slane %v300_v59, %v862_v40 }
 0x11a   :  { %v705_v3 = vpop.eup %704 }
 0x11b   :  { %v302_v6 = vadd.f32 %v297_v1, %v296_v0  ;;  %v295_v7 = vadd.f32 1.0, %v705_v3  ;;  %v298_v8 = vmul.f32 %v294_v2, %v282_v4  ;;  %v368_v3 = vrot.slane %v301_v61, %v862_v40  ;;  %v595_v40 = vld [vmem:[%s964_s6] ss:$0 sm:$0xff] }
 0x11c   :  { %v372_v4 = vrot.slane %v301_v61, %v867_v42 }
 0x11d   :  { %303 = vadd.xlane.f32.xlu0 %v302_v6  ;;  %v299_v9 = vmul.f32 %v295_v7, %v283_v5 }
 0x11f   :  { %v305_v10 = vadd.f32 %v299_v9, %v298_v8 }
 0x121   :  { %306 = vadd.xlane.f32.xlu0 %v305_v10 }
 0x1a6   :  { %v304_v11 = vpop.xlane.xlu0 %303 }
 0x1a7   :  { %v309_v12 = vmul.f32 0.00390625, %v304_v11 }
 0x1a9   :  { %v871_v13 = vsub.f32 %v296_v0, %v309_v12  ;;  %v873_v14 = vsub.f32 %v297_v1, %v309_v12  ;;  %v357_v0 = vrot.slane %v300_v59, %v867_v42 }
 0x1aa   :  { %v307_v15 = vpop.xlane.xlu0 %306 }
 0x1ab   :  { %v310_v16 = vmul.f32 0.00390625, %v307_v15  ;;  %v315_v17 = vmul.f32 %v871_v13, %v871_v13  ;;  %v316_v18 = vmul.f32 %v873_v14, %v873_v14 }
 0x1ad   :  { %v879_v19 = vsub.f32 %v298_v8, %v310_v16  ;;  %v881_v20 = vsub.f32 %v299_v9, %v310_v16  ;;  %v319_v21 = vadd.f32 %v316_v18, %v315_v17 }
 0x1af   :  { %320 = vadd.xlane.f32.xlu1 %v319_v21  ;;  %v317_v22 = vmul.f32 %v879_v19, %v879_v19  ;;  %v318_v23 = vmul.f32 %v881_v20, %v881_v20 }
 0x1b1   :  { %v322_v24 = vadd.f32 %v318_v23, %v317_v22 }
 0x1b3   :  { %323 = vadd.xlane.f32.xlu1 %v322_v24 }
 0x238   :  { %v321_v43 = vpop.xlane.xlu1 %320 }
 0x239   :  { %v325_v44 = vmul.f32 0.00390625, %v321_v43 }
 0x23b   :  { %v327_v45 = vadd.f32 1e-05, %v325_v44 }
 0x23c   :  { %v324_v46 = vpop.xlane.xlu1 %323 }
 0x23d   :  { %706 = vrsqrt.f32 %v327_v45  ;;  %v326_v47 = vmul.f32 0.00390625, %v324_v46  ;;  %vm331_vm0 = vcmp.eq.f32.partialorder %v327_v45, inf  ;;  %v334_v51 = vand.u32 2147483648, %v327_v45 }
 0x23e   :  { %vm333_vm1 = vcmp.eq.f32.partialorder %v327_v45, 0.0 }
 0x23f   :  { %v328_v48 = vadd.f32 1e-05, %v326_v47 }
 0x241   :  { %708 = vrsqrt.f32 %v328_v48  ;;  %vm338_vm2 = vcmp.eq.f32.partialorder %v328_v48, inf  ;;  %v341_v56 = vand.u32 2147483648, %v328_v48  ;;  %vm340_vm3 = vcmp.eq.f32.partialorder %v328_v48, 0.0 }
 0x24a   :  { %v707_v49 = vpop.eup %706 }
 0x24b   :  { %v330_v50 = vmul.f32 %v707_v49, %v327_v45 }
 0x24d   :  { %v332_v52 = vsel %vm331_vm0, %v327_v45, %v330_v50 }
 0x24e   :  { %v335_v53 = vsel %vm333_vm1, %v334_v51, %v332_v52  ;;  %v709_v54 = vpop.eup %708 }
 0x24f   :  { %710 = vrcp.f32 %v335_v53  ;;  %v337_v55 = vmul.f32 %v709_v54, %v328_v48 }
 0x251   :  { %v339_v57 = vsel %vm338_vm2, %v328_v48, %v337_v55 }
 0x252   :  { %v342_v58 = vsel %vm340_vm3, %v341_v56, %v339_v57 }
 0x253   :  { %712 = vrcp.f32 %v342_v58 }
 0x25c   :  { %v711_v60 = vpop.eup %710 }
 0x25d   :  { %v345_v62 = vmul.f32 %v711_v60, %v873_v14  ;;  %v344_v1 = vmul.f32 %v711_v60, %v871_v13 }
 0x25f   :  { %v361_v6 = vmul.f32 %v357_v0, %v345_v62  ;;  %v360_v8 = vmul.f32 %v353_v63, %v344_v1 }
 0x260   :  { %v713_v2 = vpop.eup %712 }
 0x261   :  { %v348_v5 = vmul.f32 %v713_v2, %v881_v20  ;;  %v347_v7 = vmul.f32 %v713_v2, %v879_v19  ;;  %v376_v11 = vadd.f32 %v372_v4, %v361_v6  ;;  %v375_v14 = vadd.f32 %v368_v3, %v360_v8 }
 0x263   :  { %v363_v9 = vmul.f32 %v357_v0, %v348_v5  ;;  %v362_v10 = vmul.f32 %v353_v63, %v347_v7 }
 0x265   :  { %v378_v12 = vadd.f32 %v372_v4, %v363_v9  ;;  %v377_v15 = vadd.f32 %v368_v3, %v362_v10 }
 0x267   :  { %v380_v16 = vpack.c.bf16 %v378_v12, %v376_v11  ;;  %v379_v17 = vpack.c.bf16 %v377_v15, %v375_v14 }
 0x269   :  { %548 = vmatprep.mubr.bf16.mxu1 %v380_v16 }
 0x26a   :  { %549 = vmatmul.mubr.bf16.vlgmr.msra.gmra.mxu1 %v379_v17 }
 0x32a   :  { %v628_v13 = vpop.f32.mrf.mxu1 }
 0x32c   :  { %v629_v42 = vpop.f32.mrf.mxu1 }
 0x32d   :  { %v630_v18 = vadd.f32 %v629_v42, %v628_v13 }
 0x32e   :  { %v631_v20 = vpop.f32.mrf.mxu1 }
 0x32f   :  { %v551_v19 = vadd.f32 %v630_v18, %v595_v40 }
 0x330   :  { %v632_v21 = vpop.f32.mrf.mxu1 }
 0x331   :  { %557 = vst [vmem:[%s965_s7] sm:$0xff] %v551_v19  ;;  %v633_v22 = vadd.f32 %v632_v21, %v631_v20 }
 0x333   :  { %v554_v23 = vadd.f32 %v633_v22, %v595_v40 }
 0x335   :  { %558 = vst [vmem:[%s965_s7 + $0x8] sm:$0xff] %v554_v23 }

// kernel: _lambda_.17
= control target key start
LH: loop header
LB: loop body
LE: loop exit
PB: predicated region body
PF: predicated region fallthrough
CT: control target
= control target key end

     0   :  { %s3668_s0 = inlined_call_operand.vmem [shape: f32[16,256], index: 0, kind: input, shape index: {}]   ;;  %s3669_s3 = inlined_call_operand.vmem [shape: bf16[256,1024], index: 3, kind: input, shape index: {}]   ;;  %s3670_s5 = inlined_call_operand.vmem [shape: bf16[1024,256], index: 5, kind: input, shape index: {}]   ;;  %s3671_s1 = inlined_call_operand.vmem [shape: f32[1,256], index: 1, kind: input, shape index: {}]   ;;  %s3672_s2 = inlined_call_operand.vmem [shape: f32[1,256], index: 2, kind: input, shape index: {}]   ;;  %s3673_s4 = inlined_call_operand.vmem [shape: f32[1,1024], index: 4, kind: input, shape index: {}]   ;;  %s3674_s6 = inlined_call_operand.vmem [shape: f32[1,256], index: 6, kind: input, shape index: {}]   ;;  %s3675_s7 = inlined_call_operand.vmem [shape: f32[16,256], index: 7, kind: output, shape index: {}]  }
   0x1   :  { %v30_v0 = vld [vmem:[%s3668_s0] sm:$0xff]  ;;  %v31_v1 = vld [vmem:[%s3668_s0 + $0x8] sm:$0xff]  ;;  %v2749_v2 = vld [vmem:[%s3668_s0 + $0x10] sm:$0xff] }
   0x2   :  { %v36_v3 = vadd.f32 %v31_v1, %v30_v0  ;;  %v33_v4 = vld [vmem:[%s3668_s0 + $0x18] sm:$0xff]  ;;  %v189_v6 = vld [vmem:[%s3669_s3 + $0x1c0] sm:$0xff]  ;;  %v190_v8 = vld [vmem:[%s3669_s3 + $0x1c8] sm:$0xff] }
   0x3   :  { %v39_v5 = vadd.f32 %v33_v4, %v2749_v2  ;;  %v193_v7 = vld [vmem:[%s3669_s3 + $0x1e0] sm:$0xff]  ;;  %v194_v10 = vld [vmem:[%s3669_s3 + $0x1e8] sm:$0xff] }
   0x4   :  { %37 = vadd.xlane.f32.xlu0 %v36_v3  ;;  %v2265_v9 = vcombine.high %v189_v6, %v193_v7  ;;  %v2264_v11 = vcombine.low %v189_v6, %v193_v7  ;;  %v181_v12 = vld [vmem:[%s3669_s3 + $0x180] sm:$0xff]  ;;  %v2267_v14 = vcombine.high %v190_v8, %v194_v10  ;;  %v2266_v15 = vcombine.low %v190_v8, %v194_v10  ;;  %v182_v17 = vld [vmem:[%s3669_s3 + $0x188] sm:$0xff] }
   0x5   :  { %v185_v13 = vld [vmem:[%s3669_s3 + $0x1a0] sm:$0xff]  ;;  %v186_v18 = vld [vmem:[%s3669_s3 + $0x1a8] sm:$0xff] }
   0x6   :  { %v2257_v16 = vcombine.high %v181_v12, %v185_v13  ;;  %v173_v19 = vld [vmem:[%s3669_s3 + $0x140] sm:$0xff]  ;;  %953 = vmatprep.subr.bf16.mxu0 %v2265_v9  ;;  %v2259_v20 = vcombine.high %v182_v17, %v186_v18  ;;  %v174_v22 = vld [vmem:[%s3669_s3 + $0x148] sm:$0xff]  ;;  %996 = vmatprep.subr.bf16.mxu1 %v2267_v14  ;;  %v2256_v24 = vcombine.low %v181_v12, %v185_v13 }
   0x7   :  { %v177_v21 = vld [vmem:[%s3669_s3 + $0x160] sm:$0xff]  ;;  %v178_v23 = vld [vmem:[%s3669_s3 + $0x168] sm:$0xff]  ;;  %954 = vmatpush1.bf16.msra.mxu0 %v2264_v11  ;;  %997 = vmatpush1.bf16.msra.mxu1 %v2266_v15  ;;  %v2258_v25 = vcombine.low %v182_v17, %v186_v18 }
   0x8   :  { %40 = vadd.xlane.f32.xlu0 %v39_v5  ;;  %955 = vmatprep.subr.bf16.mxu0 %v2257_v16  ;;  %v2249_v26 = vcombine.high %v173_v19, %v177_v21  ;;  %v2251_v27 = vcombine.high %v174_v22, %v178_v23  ;;  %v165_v28 = vld [vmem:[%s3669_s3 + $0x100] sm:$0xff]  ;;  %v166_v30 = vld [vmem:[%s3669_s3 + $0x108] sm:$0xff]  ;;  %v2248_v32 = vcombine.low %v173_v19, %v177_v21 }
   0x9   :  { %998 = vmatprep.subr.bf16.mxu1 %v2259_v20  ;;  %v169_v29 = vld [vmem:[%s3669_s3 + $0x120] sm:$0xff]  ;;  %v170_v31 = vld [vmem:[%s3669_s3 + $0x128] sm:$0xff]  ;;  %v2250_v33 = vcombine.low %v174_v22, %v178_v23 }
   0xa   :  { %v2241_v34 = vcombine.high %v165_v28, %v169_v29  ;;  %v2243_v35 = vcombine.high %v166_v30, %v170_v31  ;;  %v2240_v36 = vcombine.low %v165_v28, %v169_v29  ;;  %v2242_v37 = vcombine.low %v166_v30, %v170_v31  ;;  %v157_v52 = vld [vmem:[%s3669_s3 + $0xc0] sm:$0xff]  ;;  %v158_v54 = vld [vmem:[%s3669_s3 + $0xc8] sm:$0xff] }
   0xb   :  { %956 = vmatpush1.bf16.msra.mxu0 %v2256_v24  ;;  %999 = vmatpush1.bf16.msra.mxu1 %v2258_v25  ;;  %v161_v53 = vld [vmem:[%s3669_s3 + $0xe0] sm:$0xff]  ;;  %v162_v56 = vld [vmem:[%s3669_s3 + $0xe8] sm:$0xff] }
   0xc   :  { %957 = vmatprep.subr.bf16.mxu0 %v2249_v26  ;;  %1000 = vmatprep.subr.bf16.mxu1 %v2251_v27  ;;  %v2233_v55 = vcombine.high %v157_v52, %v161_v53  ;;  %v2235_v57 = vcombine.high %v158_v54, %v162_v56  ;;  %v2232_v58 = vcombine.low %v157_v52, %v161_v53  ;;  %v149_v60 = vld [vmem:[%s3669_s3 + $0x80] sm:$0xff]  ;;  %v150_v62 = vld [vmem:[%s3669_s3 + $0x88] sm:$0xff] }
   0xd   :  { %v2234_v59 = vcombine.low %v158_v54, %v162_v56  ;;  %v153_v61 = vld [vmem:[%s3669_s3 + $0xa0] sm:$0xff]  ;;  %v142_v6 = vld [vmem:[%s3669_s3 + $0x48] sm:$0xff] }
   0xe   :  { %v2225_v63 = vcombine.high %v149_v60, %v153_v61  ;;  %v145_v5 = vld [vmem:[%s3669_s3 + $0x60] sm:$0xff]  ;;  %v146_v8 = vld [vmem:[%s3669_s3 + $0x68] sm:$0xff] }
   0xf   :  { %958 = vmatpush1.bf16.msra.mxu0 %v2248_v32  ;;  %1001 = vmatpush1.bf16.msra.mxu1 %v2250_v33  ;;  %v2219_v9 = vcombine.high %v142_v6, %v146_v8  ;;  %v2218_v11 = vcombine.low %v142_v6, %v146_v8  ;;  %v133_v12 = vld [vmem:[%s3669_s3] sm:$0xff]  ;;  %v134_v14 = vld [vmem:[%s3669_s3 + $0x8] sm:$0xff] }
  0x10   :  { %959 = vmatprep.subr.bf16.mxu0 %v2241_v34  ;;  %1002 = vmatprep.subr.bf16.mxu1 %v2243_v35  ;;  %v137_v13 = vld [vmem:[%s3669_s3 + $0x20] sm:$0xff]  ;;  %v138_v16 = vld [vmem:[%s3669_s3 + $0x28] sm:$0xff] }
  0x11   :  { %v2209_v15 = vcombine.high %v133_v12, %v137_v13  ;;  %v2211_v17 = vcombine.high %v134_v14, %v138_v16  ;;  %v2208_v18 = vcombine.low %v133_v12, %v137_v13  ;;  %v2210_v19 = vcombine.low %v134_v14, %v138_v16  ;;  %v253_v20 = vld [vmem:[%s3669_s3 + $0x3c0] sm:$0xff]  ;;  %v254_v22 = vld [vmem:[%s3669_s3 + $0x3c8] sm:$0xff] }
  0x12   :  { %v257_v21 = vld [vmem:[%s3669_s3 + $0x3e0] sm:$0xff]  ;;  %v258_v24 = vld [vmem:[%s3669_s3 + $0x3e8] sm:$0xff] }
  0x13   :  { %960 = vmatpush1.bf16.msra.mxu0 %v2240_v36  ;;  %1003 = vmatpush1.bf16.msra.mxu1 %v2242_v37  ;;  %v2329_v23 = vcombine.high %v253_v20, %v257_v21  ;;  %v2331_v25 = vcombine.high %v254_v22, %v258_v24  ;;  %v2328_v26 = vcombine.low %v253_v20, %v257_v21  ;;  %v245_v28 = vld [vmem:[%s3669_s3 + $0x380] sm:$0xff]  ;;  %v246_v30 = vld [vmem:[%s3669_s3 + $0x388] sm:$0xff] }
  0x14   :  { %961 = vmatprep.subr.bf16.mxu0 %v2233_v55  ;;  %1004 = vmatprep.subr.bf16.mxu1 %v2235_v57  ;;  %v2330_v27 = vcombine.low %v254_v22, %v258_v24  ;;  %v249_v29 = vld [vmem:[%s3669_s3 + $0x3a0] sm:$0xff]  ;;  %v250_v32 = vld [vmem:[%s3669_s3 + $0x3a8] sm:$0xff]  ;;  %v2967_v24 = vld [vmem:[%s3669_s3 + $0x1d0] sm:$0xff] }
  0x15   :  { %v2321_v31 = vcombine.high %v245_v28, %v249_v29  ;;  %v2323_v33 = vcombine.high %v246_v30, %v250_v32  ;;  %v2320_v34 = vcombine.low %v245_v28, %v249_v29  ;;  %v2322_v35 = vcombine.low %v246_v30, %v250_v32  ;;  %v237_v36 = vld [vmem:[%s3669_s3 + $0x340] sm:$0xff]  ;;  %v234_v52 = vld [vmem:[%s3669_s3 + $0x328] sm:$0xff]  ;;  %v2984_v28 = vld [vmem:[%s3669_s3 + $0x1f8] sm:$0xff] }
  0x16   :  { %v241_v37 = vld [vmem:[%s3669_s3 + $0x360] sm:$0xff]  ;;  %v206_v8 = vld [vmem:[%s3669_s3 + $0x248] sm:$0xff] }
  0x17   :  { %962 = vmatpush1.bf16.msra.mxu0 %v2232_v58  ;;  %1005 = vmatpush1.bf16.msra.mxu1 %v2234_v59  ;;  %v221_v54 = vld [vmem:[%s3669_s3 + $0x2c0] sm:$0xff]  ;;  %v222_v59 = vld [vmem:[%s3669_s3 + $0x2c8] sm:$0xff] }
  0x18   :  { %963 = vmatprep.subr.bf16.mxu0 %v2225_v63  ;;  %v225_v55 = vld [vmem:[%s3669_s3 + $0x2e0] sm:$0xff]  ;;  %v198_v16 = vld [vmem:[%s3669_s3 + $0x208] sm:$0xff] }
  0x19   :  { %v2297_v58 = vcombine.high %v221_v54, %v225_v55  ;;  %v217_v63 = vld [vmem:[%s3669_s3 + $0x2a0] sm:$0xff] }
  0x1a   :  { %v205_v6 = vld [vmem:[%s3669_s3 + $0x240] sm:$0xff] }
  0x1b   :  { %v197_v14 = vld [vmem:[%s3669_s3 + $0x200] sm:$0xff] }
  0x8d   :  { %v38_v38 = vpop.xlane.xlu0 %37 }
  0x8e   :  { %v43_v39 = vmul.f32 0.00390625, %v38_v38  ;;  %v238_v38 = vld [vmem:[%s3669_s3 + $0x348] sm:$0xff] }
  0x90   :  { %v2803_v40 = vsub.f32 %v30_v0, %v43_v39  ;;  %v2805_v41 = vsub.f32 %v31_v1, %v43_v39  ;;  %v154_v0 = vld [vmem:[%s3669_s3 + $0xa8] sm:$0xff]  ;;  %v2313_v39 = vcombine.high %v237_v36, %v241_v37 }
  0x91   :  { %v41_v42 = vpop.xlane.xlu0 %40  ;;  %v2227_v1 = vcombine.high %v150_v62, %v154_v0  ;;  %v2226_v3 = vcombine.low %v150_v62, %v154_v0  ;;  %v214_v0 = vld [vmem:[%s3669_s3 + $0x288] sm:$0xff] }
  0x92   :  { %v44_v43 = vmul.f32 0.00390625, %v41_v42  ;;  %v49_v44 = vmul.f32 %v2803_v40, %v2803_v40  ;;  %v50_v45 = vmul.f32 %v2805_v41, %v2805_v41  ;;  %v242_v42 = vld [vmem:[%s3669_s3 + $0x368] sm:$0xff] }
  0x93   :  { %1006 = vmatprep.subr.bf16.mxu1 %v2227_v1  ;;  %v218_v1 = vld [vmem:[%s3669_s3 + $0x2a8] sm:$0xff] }
  0x94   :  { %v2812_v46 = vsub.f32 %v2749_v2, %v44_v43  ;;  %v2814_v47 = vsub.f32 %v33_v4, %v44_v43  ;;  %v53_v48 = vadd.f32 %v50_v45, %v49_v44  ;;  %v2224_v2 = vcombine.low %v149_v60, %v153_v61  ;;  %v141_v4 = vld [vmem:[%s3669_s3 + $0x40] sm:$0xff]  ;;  %1007 = vmatpush1.bf16.msra.mxu1 %v2226_v3  ;;  %v226_v60 = vld [vmem:[%s3669_s3 + $0x2e8] sm:$0xff] }
  0x95   :  { %v2217_v7 = vcombine.high %v141_v4, %v145_v5  ;;  %v2216_v10 = vcombine.low %v141_v4, %v145_v5  ;;  %1008 = vmatprep.subr.bf16.mxu1 %v2219_v9  ;;  %v2315_v43 = vcombine.high %v238_v38, %v242_v42  ;;  %v2312_v44 = vcombine.low %v237_v36, %v241_v37  ;;  %v213_v61 = vld [vmem:[%s3669_s3 + $0x280] sm:$0xff]  ;;  %v210_v9 = vld [vmem:[%s3669_s3 + $0x268] sm:$0xff] }
  0x96   :  { %54 = vadd.xlane.f32.xlu1 %v53_v48  ;;  %v51_v49 = vmul.f32 %v2812_v46, %v2812_v46  ;;  %v52_v50 = vmul.f32 %v2814_v47, %v2814_v47  ;;  %964 = vmatpush1.bf16.msra.mxu0 %v2224_v2  ;;  %v2314_v45 = vcombine.low %v238_v38, %v242_v42  ;;  %v229_v48 = vld [vmem:[%s3669_s3 + $0x300] sm:$0xff] }
  0x97   :  { %965 = vmatprep.subr.bf16.mxu0 %v2217_v7  ;;  %v2299_v62 = vcombine.high %v222_v59, %v226_v60  ;;  %v2296_v2 = vcombine.low %v221_v54, %v225_v55  ;;  %v2298_v3 = vcombine.low %v222_v59, %v226_v60  ;;  %v2289_v4 = vcombine.high %v213_v61, %v217_v63  ;;  %v209_v7 = vld [vmem:[%s3669_s3 + $0x260] sm:$0xff] }
  0x98   :  { %v56_v51 = vadd.f32 %v52_v50, %v51_v49  ;;  %1009 = vmatpush1.bf16.msra.mxu1 %v2218_v11  ;;  %v233_v49 = vld [vmem:[%s3669_s3 + $0x320] sm:$0xff]  ;;  %v230_v50 = vld [vmem:[%s3669_s3 + $0x308] sm:$0xff]  ;;  %v2291_v5 = vcombine.high %v214_v0, %v218_v1  ;;  %v2290_v11 = vcombine.low %v214_v0, %v218_v1  ;;  %v2281_v12 = vcombine.high %v205_v6, %v209_v7 }
  0x99   :  { %1010 = vmatprep.subr.bf16.mxu1 %v2211_v17  ;;  %v2304_v53 = vcombine.low %v229_v48, %v233_v49  ;;  %v2307_v56 = vcombine.high %v230_v50, %v234_v52  ;;  %v2306_v57 = vcombine.low %v230_v50, %v234_v52  ;;  %v2283_v13 = vcombine.high %v206_v8, %v210_v9  ;;  %v202_v17 = vld [vmem:[%s3669_s3 + $0x228] sm:$0xff]  ;;  %v34_v54 = vld [vmem:[%s3671_s1] sm:$0x3] }
  0x9a   :  { %57 = vadd.xlane.f32.xlu1 %v56_v51  ;;  %966 = vmatpush1.bf16.msra.mxu0 %v2216_v10  ;;  %v2305_v51 = vcombine.high %v229_v48, %v233_v49  ;;  %v2288_v10 = vcombine.low %v213_v61, %v217_v63  ;;  %v2275_v21 = vcombine.high %v198_v16, %v202_v17 }
  0x9b   :  { %967 = vmatprep.subr.bf16.mxu0 %v2209_v15  ;;  %v201_v15 = vld [vmem:[%s3669_s3 + $0x220] sm:$0xff] }
  0x9c   :  { %1011 = vmatpush1.bf16.msra.mxu1 %v2210_v19  ;;  %v2282_v19 = vcombine.low %v206_v8, %v210_v9  ;;  %v2273_v20 = vcombine.high %v197_v14, %v201_v15  ;;  %v2272_v22 = vcombine.low %v197_v14, %v201_v15  ;;  %v175_v14 = vld [vmem:[%s3669_s3 + $0x150] sm:$0xff] }
  0x9d   :  { %1012 = vmatprep.subr.bf16.mxu1 %v2331_v25  ;;  %v2972_v25 = vld [vmem:[%s3669_s3 + $0x1f0] sm:$0xff] }
  0x9e   :  { %968 = vmatpush1.bf16.msra.mxu0 %v2208_v18  ;;  %v2280_v18 = vcombine.low %v205_v6, %v209_v7  ;;  %v2268_v29 = vcombine.low %v2967_v24, %v2972_v25 }
  0x9f   :  { %969 = vmatprep.subr.bf16.mxu0 %v2329_v23  ;;  %v2274_v23 = vcombine.low %v198_v16, %v202_v17  ;;  %v179_v17 = vld [vmem:[%s3669_s3 + $0x170] sm:$0xff] }
  0xa0   :  { %1013 = vmatpush2.bf16.msra.mxu1 %v2330_v27  ;;  %v2269_v27 = vcombine.high %v2967_v24, %v2972_v25  ;;  %v171_v24 = vld [vmem:[%s3669_s3 + $0x130] sm:$0xff]  ;;  %v168_v25 = vld [vmem:[%s3669_s3 + $0x118] sm:$0xff] }
  0xa1   :  { %1014 = vmatprep.subr.bf16.mxu1 %v2323_v33 }
  0xa2   :  { %970 = vmatpush2.bf16.msra.mxu0 %v2328_v26  ;;  %v2977_v26 = vld [vmem:[%s3669_s3 + $0x1d8] sm:$0xff] }
  0xa3   :  { %971 = vmatprep.subr.bf16.mxu0 %v2321_v31  ;;  %v2270_v30 = vcombine.low %v2977_v26, %v2984_v28  ;;  %v2271_v31 = vcombine.high %v2977_v26, %v2984_v28  ;;  %v172_v26 = vld [vmem:[%s3669_s3 + $0x138] sm:$0xff]  ;;  %v2252_v28 = vcombine.low %v175_v14, %v179_v17 }
  0xa4   :  { %1015 = vmatpush2.bf16.msra.mxu1 %v2322_v35 }
  0xa5   :  { %1016 = vmatprep.subr.bf16.mxu1 %v2315_v43 }
  0xa6   :  { %972 = vmatpush2.bf16.msra.mxu0 %v2320_v34 }
  0xa7   :  { %973 = vmatprep.subr.bf16.mxu0 %v2313_v39 }
  0xa8   :  { %1017 = vmatpush2.bf16.msra.mxu1 %v2314_v45 }
  0xa9   :  { %1018 = vmatprep.subr.bf16.mxu1 %v2307_v56 }
  0xaa   :  { %974 = vmatpush2.bf16.msra.mxu0 %v2312_v44 }
  0xab   :  { %975 = vmatprep.subr.bf16.mxu0 %v2305_v51  ;;  %v84_v51 = vlaneseq }
  0xac   :  { %1019 = vmatpush2.bf16.msra.mxu1 %v2306_v57 }
  0xad   :  { %1020 = vmatprep.subr.bf16.mxu1 %v2299_v62 }
  0xae   :  { %976 = vmatpush2.bf16.msra.mxu0 %v2304_v53  ;;  %v2992_v53 = vshrl.u32 %v84_v51, 7 }
  0xaf   :  { %977 = vmatprep.subr.bf16.mxu0 %v2297_v58  ;;  %v35_v58 = vld [vmem:[%s3672_s2] sm:$0x3] }
  0xb0   :  { %1021 = vmatpush2.bf16.msra.mxu1 %v2298_v3  ;;  %v2998_v55 = vsub.s32 1, %v2992_v53  ;;  %v3001_v56 = vsub.s32 0, %v2992_v53 }
  0xb1   :  { %1022 = vmatprep.subr.bf16.mxu1 %v2291_v5 }
  0xb2   :  { %978 = vmatpush2.bf16.msra.mxu0 %v2296_v2  ;;  %v91_v60 = vrot.slane %v34_v54, %v2998_v55  ;;  %v87_v62 = vrot.slane %v34_v54, %v3001_v56  ;;  %v106_v0 = vrot.slane %v35_v58, %v2998_v55  ;;  %v102_v1 = vrot.slane %v35_v58, %v3001_v56  ;;  %v147_v54 = vld [vmem:[%s3669_s3 + $0x70] sm:$0xff]  ;;  %v148_v58 = vld [vmem:[%s3669_s3 + $0x78] sm:$0xff] }
  0xb3   :  { %979 = vmatprep.subr.bf16.mxu0 %v2289_v4 }
  0xb4   :  { %1023 = vmatpush2.bf16.msra.mxu1 %v2290_v11  ;;  %v187_v11 = vld [vmem:[%s3669_s3 + $0x1b0] sm:$0xff] }
  0xb5   :  { %1024 = vmatprep.subr.bf16.mxu1 %v2283_v13 }
  0xb6   :  { %980 = vmatpush2.bf16.msra.mxu0 %v2288_v10 }
  0xb7   :  { %981 = vmatprep.subr.bf16.mxu0 %v2281_v12 }
  0xb8   :  { %1025 = vmatpush2.bf16.msra.mxu1 %v2282_v19  ;;  %v180_v19 = vld [vmem:[%s3669_s3 + $0x178] sm:$0xff] }
  0xb9   :  { %1026 = vmatprep.subr.bf16.mxu1 %v2275_v21 }
  0xba   :  { %982 = vmatpush2.bf16.msra.mxu0 %v2280_v18  ;;  %v176_v18 = vld [vmem:[%s3669_s3 + $0x158] sm:$0xff] }
  0xbb   :  { %983 = vmatprep.subr.bf16.mxu0 %v2273_v20 }
  0xbc   :  { %1027 = vmatpush2.bf16.msra.mxu1 %v2274_v23  ;;  %v2255_v23 = vcombine.high %v176_v18, %v180_v19 }
  0xbd   :  { %1082 = vmatprep.subr.bf16.mxu1 %v2271_v31  ;;  %v2247_v31 = vcombine.high %v168_v25, %v172_v26 }
  0xbe   :  { %984 = vmatpush2.bf16.msra.mxu0 %v2272_v22  ;;  %v2253_v22 = vcombine.high %v175_v14, %v179_v17  ;;  %v248_v14 = vld [vmem:[%s3669_s3 + $0x398] sm:$0xff] }
  0xbf   :  { %1039 = vmatprep.subr.bf16.mxu0 %v2269_v27  ;;  %v167_v27 = vld [vmem:[%s3669_s3 + $0x110] sm:$0xff] }
 0x11f   :  { %v55_v32 = vpop.xlane.xlu1 %54 }
 0x120   :  { %v59_v33 = vmul.f32 0.00390625, %v55_v32  ;;  %v159_v32 = vld [vmem:[%s3669_s3 + $0xd0] sm:$0xff] }
 0x122   :  { %v61_v34 = vadd.f32 1e-05, %v59_v33  ;;  %v163_v33 = vld [vmem:[%s3669_s3 + $0xf0] sm:$0xff] }
 0x123   :  { %v58_v35 = vpop.xlane.xlu1 %57 }
 0x124   :  { %2660 = vrsqrt.f32 %v61_v34  ;;  %v60_v36 = vmul.f32 0.00390625, %v58_v35  ;;  %vm65_vm0 = vcmp.eq.f32.partialorder %v61_v34, inf  ;;  %v68_v42 = vand.u32 2147483648, %v61_v34  ;;  %v164_v35 = vld [vmem:[%s3669_s3 + $0xf8] sm:$0xff] }
 0x125   :  { %vm67_vm1 = vcmp.eq.f32.partialorder %v61_v34, 0.0 }
 0x126   :  { %v62_v37 = vadd.f32 1e-05, %v60_v36  ;;  %v2244_v36 = vcombine.low %v167_v27, %v171_v24 }
 0x128   :  { %2662 = vrsqrt.f32 %v62_v37  ;;  %vm72_vm2 = vcmp.eq.f32.partialorder %v62_v37, inf  ;;  %v75_v49 = vand.u32 2147483648, %v62_v37  ;;  %vm74_vm3 = vcmp.eq.f32.partialorder %v62_v37, 0.0 }
 0x131   :  { %v2661_v38 = vpop.eup %2660 }
 0x132   :  { %v64_v39 = vmul.f32 %v2661_v38, %v61_v34  ;;  %v2237_v38 = vcombine.high %v159_v32, %v163_v33 }
 0x134   :  { %v66_v43 = vsel %vm65_vm0, %v61_v34, %v64_v39  ;;  %v160_v34 = vld [vmem:[%s3669_s3 + $0xd8] sm:$0xff] }
 0x135   :  { %v69_v44 = vsel %vm67_vm1, %v68_v42, %v66_v43  ;;  %v2663_v45 = vpop.eup %2662  ;;  %v2239_v39 = vcombine.high %v160_v34, %v164_v35  ;;  %v151_v42 = vld [vmem:[%s3669_s3 + $0x90] sm:$0xff] }
 0x136   :  { %2664 = vrcp.f32 %v69_v44  ;;  %v71_v48 = vmul.f32 %v2663_v45, %v62_v37  ;;  %v155_v43 = vld [vmem:[%s3669_s3 + $0xb0] sm:$0xff]  ;;  %v152_v44 = vld [vmem:[%s3669_s3 + $0x98] sm:$0xff] }
 0x137   :  { %v156_v45 = vld [vmem:[%s3669_s3 + $0xb8] sm:$0xff] }
 0x138   :  { %v73_v50 = vsel %vm72_vm2, %v62_v37, %v71_v48  ;;  %v2246_v37 = vcombine.low %v168_v25, %v172_v26  ;;  %v2236_v48 = vcombine.low %v159_v32, %v163_v33  ;;  %v2231_v51 = vcombine.high %v152_v44, %v156_v45 }
 0x139   :  { %v76_v52 = vsel %vm74_vm3, %v75_v49, %v73_v50  ;;  %v2238_v49 = vcombine.low %v160_v34, %v164_v35  ;;  %v2229_v50 = vcombine.high %v151_v42, %v155_v43 }
 0x13a   :  { %2666 = vrcp.f32 %v76_v52  ;;  %v143_v52 = vld [vmem:[%s3669_s3 + $0x50] sm:$0xff] }
 0x143   :  { %v2665_v57 = vpop.eup %2664 }
 0x144   :  { %v79_v59 = vmul.f32 %v2665_v57, %v2805_v41  ;;  %v78_v61 = vmul.f32 %v2665_v57, %v2803_v40  ;;  %v183_v40 = vld [vmem:[%s3669_s3 + $0x190] sm:$0xff]  ;;  %v144_v57 = vld [vmem:[%s3669_s3 + $0x58] sm:$0xff] }
 0x145   :  { %v2261_v15 = vcombine.high %v183_v40, %v187_v11  ;;  %v2260_v20 = vcombine.low %v183_v40, %v187_v11 }
 0x146   :  { %v95_v3 = vmul.f32 %v91_v60, %v79_v59  ;;  %v94_v5 = vmul.f32 %v87_v62, %v78_v61  ;;  %v2228_v59 = vcombine.low %v151_v42, %v155_v43  ;;  %v2221_v61 = vcombine.high %v143_v52, %v147_v54 }
 0x147   :  { %v2667_v63 = vpop.eup %2666 }
 0x148   :  { %v82_v2 = vmul.f32 %v2667_v63, %v2814_v47  ;;  %v81_v4 = vmul.f32 %v2667_v63, %v2812_v46  ;;  %v110_v41 = vadd.f32 %v106_v0, %v95_v3  ;;  %v109_v9 = vadd.f32 %v102_v1, %v94_v5  ;;  %v184_v47 = vld [vmem:[%s3669_s3 + $0x198] sm:$0xff]  ;;  %v135_v63 = vld [vmem:[%s3669_s3 + $0x10] sm:$0xff] }
 0x149   :  { %v188_v46 = vld [vmem:[%s3669_s3 + $0x1b8] sm:$0xff]  ;;  %v2220_v3 = vcombine.low %v143_v52, %v147_v54 }
 0x14a   :  { %v97_v6 = vmul.f32 %v91_v60, %v82_v2  ;;  %v96_v7 = vmul.f32 %v87_v62, %v81_v4  ;;  %v2263_v16 = vcombine.high %v184_v47, %v188_v46  ;;  %v2262_v21 = vcombine.low %v184_v47, %v188_v46  ;;  %v140_v2 = vld [vmem:[%s3669_s3 + $0x38] sm:$0xff]  ;;  %v247_v46 = vld [vmem:[%s3669_s3 + $0x390] sm:$0xff] }
 0x14b   :  { %v2230_v60 = vcombine.low %v152_v44, %v156_v45  ;;  %v2223_v62 = vcombine.high %v144_v57, %v148_v58  ;;  %v2222_v4 = vcombine.low %v144_v57, %v148_v58 }
 0x14c   :  { %v112_v8 = vadd.f32 %v106_v0, %v97_v6  ;;  %v111_v10 = vadd.f32 %v102_v1, %v96_v7  ;;  %v139_v0 = vld [vmem:[%s3669_s3 + $0x30] sm:$0xff]  ;;  %v136_v1 = vld [vmem:[%s3669_s3 + $0x18] sm:$0xff] }
 0x14d   :  { %v2213_v5 = vcombine.high %v135_v63, %v139_v0  ;;  %v2215_v6 = vcombine.high %v136_v1, %v140_v2  ;;  %v255_v7 = vld [vmem:[%s3669_s3 + $0x3d0] sm:$0xff]  ;;  %v2214_v40 = vcombine.low %v136_v1, %v140_v2 }
 0x14e   :  { %v2467_v12 = vpack.c.bf16 %v112_v8, %v110_v41  ;;  %v3026_v13 = vpack.c.bf16 %v111_v10, %v109_v9  ;;  %v259_v41 = vld [vmem:[%s3669_s3 + $0x3f0] sm:$0xff]  ;;  %v256_v8 = vld [vmem:[%s3669_s3 + $0x3d8] sm:$0xff]  ;;  %v2212_v10 = vcombine.low %v135_v63, %v139_v0 }
 0x14f   :  { %v260_v9 = vld [vmem:[%s3669_s3 + $0x3f8] sm:$0xff]  ;;  %v2333_v11 = vcombine.high %v255_v7, %v259_v41 }
 0x150   :  { %985 = vmatprep.mubr.bf16.mxu0 %v2467_v12  ;;  %1028 = vmatprep.mubr.bf16.mxu1 %v2467_v12  ;;  %v2335_v47 = vcombine.high %v256_v8, %v260_v9  ;;  %v2334_v17 = vcombine.low %v256_v8, %v260_v9 }
 0x151   :  { %986 = vmatmul.mubr.bf16.vlgmr.msra.gmra.mxu0 %v3026_v13  ;;  %1029 = vmatmul.mubr.bf16.vlgmr.msra.gmra.mxu1 %v3026_v13 }
 0x152   :  { %1040 = vmatpush1.bf16.msra.mxu0 %v2268_v29  ;;  %1083 = vmatpush1.bf16.msra.mxu1 %v2270_v30  ;;  %v2254_v29 = vcombine.low %v176_v18, %v180_v19  ;;  %v2245_v30 = vcombine.high %v167_v27, %v171_v24 }
 0x153   :  { %1071 = vmatprep.mubr.bf16.mxu0 %v2467_v12  ;;  %1114 = vmatprep.mubr.bf16.mxu1 %v2467_v12  ;;  %v251_v12 = vld [vmem:[%s3669_s3 + $0x3b0] sm:$0xff] }
 0x154   :  { %1041 = vmatprep.subr.bf16.mxu0 %v2261_v15  ;;  %1084 = vmatprep.subr.bf16.mxu1 %v2263_v16  ;;  %v252_v15 = vld [vmem:[%s3669_s3 + $0x3b8] sm:$0xff]  ;;  %v2332_v16 = vcombine.low %v255_v7, %v259_v41  ;;  %v2325_v18 = vcombine.high %v247_v46, %v251_v12  ;;  %v2324_v27 = vcombine.low %v247_v46, %v251_v12 }
 0x155   :  { %v2327_v19 = vcombine.high %v248_v14, %v252_v15  ;;  %v2326_v24 = vcombine.low %v248_v14, %v252_v15  ;;  %v2468_v46 = vld [vmem:[%s3670_s5 + $0x70] ss:$8 sps:$4 sm:$0xff]   ;;  %v2476_v14 = vld [vmem:[%s3670_s5 + $0x64] ss:$8 sps:$4 sm:$0xff]  }
 0x156   :  { %1042 = vmatpush1.bf16.msra.mxu0 %v2260_v20  ;;  %1085 = vmatpush1.bf16.msra.mxu1 %v2262_v21  ;;  %v239_v20 = vld [vmem:[%s3669_s3 + $0x350] sm:$0xff]  ;;  %v2479_v15 = vld [vmem:[%s3670_s5 + $0x164] ss:$8 sps:$4 sm:$0xff]  }
 0x157   :  { %1043 = vmatprep.subr.bf16.mxu0 %v2253_v22  ;;  %1086 = vmatprep.subr.bf16.mxu1 %v2255_v23  ;;  %v243_v21 = vld [vmem:[%s3669_s3 + $0x370] sm:$0xff]  ;;  %v240_v22 = vld [vmem:[%s3669_s3 + $0x358] sm:$0xff] }
 0x158   :  { %v244_v23 = vld [vmem:[%s3669_s3 + $0x378] sm:$0xff]  ;;  %v2317_v25 = vcombine.high %v239_v20, %v243_v21  ;;  %v2316_v32 = vcombine.low %v239_v20, %v243_v21  ;;  %v2488_v21 = vld [vmem:[%s3670_s5 + $0x44] ss:$8 sps:$4 sm:$0xff]  }
 0x159   :  { %v2319_v26 = vcombine.high %v240_v22, %v244_v23  ;;  %v2318_v33 = vcombine.low %v240_v22, %v244_v23  ;;  %v2471_v12 = vld [vmem:[%s3670_s5 + $0x170] ss:$8 sps:$4 sm:$0xff]   ;;  %v2491_v22 = vld [vmem:[%s3670_s5 + $0x144] ss:$8 sps:$4 sm:$0xff]   ;;  %v2486_v23 = vld [vmem:[%s3670_s5 + $0x40] ss:$8 sps:$4 sm:$0xff]  }
 0x15a   :  { %1044 = vmatpush1.bf16.msra.mxu0 %v2252_v28  ;;  %1087 = vmatpush1.bf16.msra.mxu1 %v2254_v29  ;;  %v231_v28 = vld [vmem:[%s3669_s3 + $0x310] sm:$0xff] }
 0x15b   :  { %1045 = vmatprep.subr.bf16.mxu0 %v2245_v30  ;;  %1088 = vmatprep.subr.bf16.mxu1 %v2247_v31  ;;  %v235_v29 = vld [vmem:[%s3669_s3 + $0x330] sm:$0xff]  ;;  %v232_v30 = vld [vmem:[%s3669_s3 + $0x318] sm:$0xff] }
 0x15c   :  { %v236_v31 = vld [vmem:[%s3669_s3 + $0x338] sm:$0xff]  ;;  %v2309_v34 = vcombine.high %v231_v28, %v235_v29  ;;  %v2308_v42 = vcombine.low %v231_v28, %v235_v29  ;;  %v2500_v29 = vld [vmem:[%s3670_s5 + $0x24] ss:$8 sps:$4 sm:$0xff]  }
 0x15d   :  { %v2311_v35 = vcombine.high %v232_v30, %v236_v31  ;;  %v2310_v43 = vcombine.low %v232_v30, %v236_v31  ;;  %v2483_v20 = vld [vmem:[%s3670_s5 + $0x150] ss:$8 sps:$4 sm:$0xff]   ;;  %v2503_v30 = vld [vmem:[%s3670_s5 + $0x124] ss:$8 sps:$4 sm:$0xff]   ;;  %v2498_v31 = vld [vmem:[%s3670_s5 + $0x20] ss:$8 sps:$4 sm:$0xff]  }
 0x15e   :  { %1046 = vmatpush1.bf16.msra.mxu0 %v2244_v36  ;;  %1089 = vmatpush1.bf16.msra.mxu1 %v2246_v37  ;;  %v223_v36 = vld [vmem:[%s3669_s3 + $0x2d0] sm:$0xff] }
 0x15f   :  { %1047 = vmatprep.subr.bf16.mxu0 %v2237_v38  ;;  %1090 = vmatprep.subr.bf16.mxu1 %v2239_v39  ;;  %v227_v37 = vld [vmem:[%s3669_s3 + $0x2f0] sm:$0xff]  ;;  %v224_v38 = vld [vmem:[%s3669_s3 + $0x2d8] sm:$0xff] }
 0x160   :  { %v228_v39 = vld [vmem:[%s3669_s3 + $0x2f8] sm:$0xff]  ;;  %v2301_v44 = vcombine.high %v223_v36, %v227_v37  ;;  %v2300_v52 = vcombine.low %v223_v36, %v227_v37  ;;  %v2512_v37 = vld [vmem:[%s3670_s5 + $0x4] ss:$8 sps:$4 sm:$0xff]  }
 0x161   :  { %v2303_v45 = vcombine.high %v224_v38, %v228_v39  ;;  %v2302_v54 = vcombine.low %v224_v38, %v228_v39  ;;  %v2495_v28 = vld [vmem:[%s3670_s5 + $0x130] ss:$8 sps:$4 sm:$0xff]   ;;  %v2515_v38 = vld [vmem:[%s3670_s5 + $0x104] ss:$8 sps:$4 sm:$0xff]   ;;  %v2510_v39 = vld [vmem:[%s3670_s5] ss:$8 sps:$4 sm:$0xff]  }
 0x162   :  { %1048 = vmatpush1.bf16.msra.mxu0 %v2236_v48  ;;  %1091 = vmatpush1.bf16.msra.mxu1 %v2238_v49  ;;  %v215_v48 = vld [vmem:[%s3669_s3 + $0x290] sm:$0xff] }
 0x163   :  { %1049 = vmatprep.subr.bf16.mxu0 %v2229_v50  ;;  %1092 = vmatprep.subr.bf16.mxu1 %v2231_v51  ;;  %v219_v49 = vld [vmem:[%s3669_s3 + $0x2b0] sm:$0xff]  ;;  %v216_v50 = vld [vmem:[%s3669_s3 + $0x298] sm:$0xff] }
 0x164   :  { %v220_v51 = vld [vmem:[%s3669_s3 + $0x2b8] sm:$0xff]  ;;  %v2293_v57 = vcombine.high %v215_v48, %v219_v49  ;;  %v2292_v63 = vcombine.low %v215_v48, %v219_v49  ;;  %v2524_v49 = vld [vmem:[%s3670_s5 + $0xe4] ss:$8 sps:$4 sm:$0xff]  }
 0x165   :  { %v2295_v58 = vcombine.high %v216_v50, %v220_v51  ;;  %v2294_v0 = vcombine.low %v216_v50, %v220_v51  ;;  %v2507_v36 = vld [vmem:[%s3670_s5 + $0x110] ss:$8 sps:$4 sm:$0xff]   ;;  %v2527_v50 = vld [vmem:[%s3670_s5 + $0x1e4] ss:$8 sps:$4 sm:$0xff]   ;;  %v2522_v51 = vld [vmem:[%s3670_s5 + $0xe0] ss:$8 sps:$4 sm:$0xff]  }
 0x166   :  { %1050 = vmatpush1.bf16.msra.mxu0 %v2228_v59  ;;  %1093 = vmatpush1.bf16.msra.mxu1 %v2230_v60  ;;  %v207_v59 = vld [vmem:[%s3669_s3 + $0x250] sm:$0xff] }
 0x167   :  { %1051 = vmatprep.subr.bf16.mxu0 %v2221_v61  ;;  %1094 = vmatprep.subr.bf16.mxu1 %v2223_v62  ;;  %v211_v60 = vld [vmem:[%s3669_s3 + $0x270] sm:$0xff]  ;;  %v208_v61 = vld [vmem:[%s3669_s3 + $0x258] sm:$0xff] }
 0x168   :  { %v212_v62 = vld [vmem:[%s3669_s3 + $0x278] sm:$0xff]  ;;  %v2285_v1 = vcombine.high %v207_v59, %v211_v60  ;;  %v2284_v7 = vcombine.low %v207_v59, %v211_v60  ;;  %v2536_v60 = vld [vmem:[%s3670_s5 + $0xc4] ss:$8 sps:$4 sm:$0xff]  }
 0x169   :  { %v2287_v2 = vcombine.high %v208_v61, %v212_v62  ;;  %v2286_v41 = vcombine.low %v208_v61, %v212_v62  ;;  %v2519_v48 = vld [vmem:[%s3670_s5 + $0x1f0] ss:$8 sps:$4 sm:$0xff]   ;;  %v2539_v61 = vld [vmem:[%s3670_s5 + $0x1c4] ss:$8 sps:$4 sm:$0xff]   ;;  %v2534_v62 = vld [vmem:[%s3670_s5 + $0xc0] ss:$8 sps:$4 sm:$0xff]  }
 0x16a   :  { %1052 = vmatpush1.bf16.msra.mxu0 %v2220_v3  ;;  %1095 = vmatpush1.bf16.msra.mxu1 %v2222_v4  ;;  %v199_v3 = vld [vmem:[%s3669_s3 + $0x210] sm:$0xff] }
 0x16b   :  { %1053 = vmatprep.subr.bf16.mxu0 %v2213_v5  ;;  %1096 = vmatprep.subr.bf16.mxu1 %v2215_v6  ;;  %v203_v4 = vld [vmem:[%s3669_s3 + $0x230] sm:$0xff]  ;;  %v200_v5 = vld [vmem:[%s3669_s3 + $0x218] sm:$0xff] }
 0x16c   :  { %v204_v6 = vld [vmem:[%s3669_s3 + $0x238] sm:$0xff]  ;;  %v2277_v8 = vcombine.high %v199_v3, %v203_v4 }
 0x16d   :  { %v2279_v9 = vcombine.high %v200_v5, %v204_v6  ;;  %v2531_v59 = vld [vmem:[%s3670_s5 + $0x1d0] ss:$8 sps:$4 sm:$0xff]  }
 0x16e   :  { %1054 = vmatpush1.bf16.msra.mxu0 %v2212_v10  ;;  %1097 = vmatpush1.bf16.msra.mxu1 %v2214_v40  ;;  %v2276_v10 = vcombine.low %v199_v3, %v203_v4  ;;  %v2278_v40 = vcombine.low %v200_v5, %v204_v6  ;;  %v2543_v3 = vld [vmem:[%s3670_s5 + $0x1b0] ss:$8 sps:$4 sm:$0xff]   ;;  %v2548_v4 = vld [vmem:[%s3670_s5 + $0xa4] ss:$8 sps:$4 sm:$0xff]   ;;  %v2546_v6 = vld [vmem:[%s3670_s5 + $0xa0] ss:$8 sps:$4 sm:$0xff]  }
 0x16f   :  { %1055 = vmatprep.subr.bf16.mxu0 %v2333_v11  ;;  %1098 = vmatprep.subr.bf16.mxu1 %v2335_v47  ;;  %v2470_v11 = vld [vmem:[%s3670_s5 + $0x74] ss:$8 sps:$4 sm:$0xff]   ;;  %v2551_v5 = vld [vmem:[%s3670_s5 + $0x1a4] ss:$8 sps:$4 sm:$0xff]  }
 0x170   :  { %v2473_v47 = vld [vmem:[%s3670_s5 + $0x174] ss:$8 sps:$4 sm:$0xff]  }
 0x172   :  { %1056 = vmatpush2.bf16.msra.mxu0 %v2332_v16  ;;  %1099 = vmatpush2.bf16.msra.mxu1 %v2334_v17  ;;  %v2474_v16 = vld [vmem:[%s3670_s5 + $0x60] ss:$8 sps:$4 sm:$0xff]  }
 0x173   :  { %1057 = vmatprep.subr.bf16.mxu0 %v2325_v18  ;;  %1100 = vmatprep.subr.bf16.mxu1 %v2327_v19  ;;  %v2477_v17 = vld [vmem:[%s3670_s5 + $0x160] ss:$8 sps:$4 sm:$0xff]   ;;  %v2482_v18 = vld [vmem:[%s3670_s5 + $0x54] ss:$8 sps:$4 sm:$0xff]   ;;  %v2480_v19 = vld [vmem:[%s3670_s5 + $0x50] ss:$8 sps:$4 sm:$0xff]  }
 0x176   :  { %1058 = vmatpush2.bf16.msra.mxu0 %v2324_v27  ;;  %1101 = vmatpush2.bf16.msra.mxu1 %v2326_v24  ;;  %v2489_v27 = vld [vmem:[%s3670_s5 + $0x140] ss:$8 sps:$4 sm:$0xff]   ;;  %v2494_v24 = vld [vmem:[%s3670_s5 + $0x34] ss:$8 sps:$4 sm:$0xff]  }
 0x177   :  { %1059 = vmatprep.subr.bf16.mxu0 %v2317_v25  ;;  %1102 = vmatprep.subr.bf16.mxu1 %v2319_v26  ;;  %v2497_v25 = vld [vmem:[%s3670_s5 + $0x134] ss:$8 sps:$4 sm:$0xff]   ;;  %v2492_v26 = vld [vmem:[%s3670_s5 + $0x30] ss:$8 sps:$4 sm:$0xff]  }
 0x17a   :  { %1060 = vmatpush2.bf16.msra.mxu0 %v2316_v32  ;;  %1103 = vmatpush2.bf16.msra.mxu1 %v2318_v33  ;;  %v2501_v32 = vld [vmem:[%s3670_s5 + $0x120] ss:$8 sps:$4 sm:$0xff]   ;;  %v2506_v33 = vld [vmem:[%s3670_s5 + $0x14] ss:$8 sps:$4 sm:$0xff]  }
 0x17b   :  { %1061 = vmatprep.subr.bf16.mxu0 %v2309_v34  ;;  %1104 = vmatprep.subr.bf16.mxu1 %v2311_v35  ;;  %v2509_v34 = vld [vmem:[%s3670_s5 + $0x114] ss:$8 sps:$4 sm:$0xff]   ;;  %v2504_v35 = vld [vmem:[%s3670_s5 + $0x10] ss:$8 sps:$4 sm:$0xff]  }
 0x17e   :  { %1062 = vmatpush2.bf16.msra.mxu0 %v2308_v42  ;;  %1105 = vmatpush2.bf16.msra.mxu1 %v2310_v43  ;;  %v2513_v42 = vld [vmem:[%s3670_s5 + $0x100] ss:$8 sps:$4 sm:$0xff]   ;;  %v2518_v43 = vld [vmem:[%s3670_s5 + $0xf4] ss:$8 sps:$4 sm:$0xff]  }
 0x17f   :  { %1063 = vmatprep.subr.bf16.mxu0 %v2301_v44  ;;  %1106 = vmatprep.subr.bf16.mxu1 %v2303_v45  ;;  %v2521_v44 = vld [vmem:[%s3670_s5 + $0x1f4] ss:$8 sps:$4 sm:$0xff]   ;;  %v2516_v45 = vld [vmem:[%s3670_s5 + $0xf0] ss:$8 sps:$4 sm:$0xff]  }
 0x182   :  { %1064 = vmatpush2.bf16.msra.mxu0 %v2300_v52  ;;  %1107 = vmatpush2.bf16.msra.mxu1 %v2302_v54  ;;  %v2525_v52 = vld [vmem:[%s3670_s5 + $0x1e0] ss:$8 sps:$4 sm:$0xff]   ;;  %v2530_v54 = vld [vmem:[%s3670_s5 + $0xd4] ss:$8 sps:$4 sm:$0xff]  }
 0x183   :  { %1065 = vmatprep.subr.bf16.mxu0 %v2293_v57  ;;  %1108 = vmatprep.subr.bf16.mxu1 %v2295_v58  ;;  %v2533_v57 = vld [vmem:[%s3670_s5 + $0x1d4] ss:$8 sps:$4 sm:$0xff]   ;;  %v2528_v58 = vld [vmem:[%s3670_s5 + $0xd0] ss:$8 sps:$4 sm:$0xff]  }
 0x186   :  { %1066 = vmatpush2.bf16.msra.mxu0 %v2292_v63  ;;  %1109 = vmatpush2.bf16.msra.mxu1 %v2294_v0  ;;  %v2537_v63 = vld [vmem:[%s3670_s5 + $0x1c0] ss:$8 sps:$4 sm:$0xff]   ;;  %v2542_v0 = vld [vmem:[%s3670_s5 + $0xb4] ss:$8 sps:$4 sm:$0xff]  }
 0x187   :  { %1067 = vmatprep.subr.bf16.mxu0 %v2285_v1  ;;  %1110 = vmatprep.subr.bf16.mxu1 %v2287_v2  ;;  %v2545_v1 = vld [vmem:[%s3670_s5 + $0x1b4] ss:$8 sps:$4 sm:$0xff]   ;;  %v2540_v2 = vld [vmem:[%s3670_s5 + $0xb0] ss:$8 sps:$4 sm:$0xff]  }
 0x18a   :  { %1068 = vmatpush2.bf16.msra.mxu0 %v2284_v7  ;;  %1111 = vmatpush2.bf16.msra.mxu1 %v2286_v41  ;;  %v2549_v7 = vld [vmem:[%s3670_s5 + $0x1a0] ss:$8 sps:$4 sm:$0xff]   ;;  %v2554_v41 = vld [vmem:[%s3670_s5 + $0x94] ss:$8 sps:$4 sm:$0xff]  }
 0x18b   :  { %1069 = vmatprep.subr.bf16.mxu0 %v2277_v8  ;;  %1112 = vmatprep.subr.bf16.mxu1 %v2279_v9  ;;  %v2557_v8 = vld [vmem:[%s3670_s5 + $0x194] ss:$8 sps:$4 sm:$0xff]   ;;  %v2552_v9 = vld [vmem:[%s3670_s5 + $0x90] ss:$8 sps:$4 sm:$0xff]  }
 0x18e   :  { %1070 = vmatpush2.bf16.msra.mxu0 %v2276_v10  ;;  %1113 = vmatpush2.bf16.msra.mxu1 %v2278_v40  ;;  %v2555_v10 = vld [vmem:[%s3670_s5 + $0x190] ss:$8 sps:$4 sm:$0xff]   ;;  %v2560_v40 = vld [vmem:[%s3670_s5 + $0x84] ss:$8 sps:$4 sm:$0xff]  }
 0x18f   :  { %1985 = vmatprep.subr.bf16.mxu0 %v2470_v11  ;;  %2028 = vmatprep.subr.bf16.mxu1 %v2473_v47  ;;  %v2563_v11 = vld [vmem:[%s3670_s5 + $0x184] ss:$8 sps:$4 sm:$0xff]   ;;  %v2558_v47 = vld [vmem:[%s3670_s5 + $0x80] ss:$8 sps:$4 sm:$0xff]  }
 0x191   :  { %1072 = vmatmul.mubr.bf16.vlgmr.msra.gmra.mxu0 %v3026_v13  ;;  %1115 = vmatmul.mubr.bf16.vlgmr.msra.gmra.mxu1 %v3026_v13  ;;  %v2485_v13 = vld [vmem:[%s3670_s5 + $0x154] ss:$8 sps:$4 sm:$0xff]  }
 0x192   :  { %1986 = vmatpush1.bf16.msra.mxu0 %v2468_v46  ;;  %2029 = vmatpush1.bf16.msra.mxu1 %v2471_v12  ;;  %v2561_v46 = vld [vmem:[%s3670_s5 + $0x180] ss:$8 sps:$4 sm:$0xff]   ;;  %v2566_v12 = vld [vmem:[%s3670_s5 + $0x274] ss:$8 sps:$4 sm:$0xff]  }
 0x193   :  { %1987 = vmatprep.subr.bf16.mxu0 %v2476_v14  ;;  %2030 = vmatprep.subr.bf16.mxu1 %v2479_v15  ;;  %v2569_v14 = vld [vmem:[%s3670_s5 + $0x374] ss:$8 sps:$4 sm:$0xff]   ;;  %v273_v15 = vsub.s32 2, %v2992_v53 }
 0x196   :  { %1988 = vmatpush1.bf16.msra.mxu0 %v2474_v16  ;;  %2031 = vmatpush1.bf16.msra.mxu1 %v2477_v17  ;;  %v3408_v16 = vld [vmem:[%s3673_s4] sm:$0xff]  ;;  %v277_v17 = vsub.s32 3, %v2992_v53 }
 0x197   :  { %1989 = vmatprep.subr.bf16.mxu0 %v2482_v18  ;;  %2032 = vmatprep.subr.bf16.mxu1 %v2485_v13  ;;  %v266_v18 = vrot.slane %v3408_v16, %v3001_v56  ;;  %v274_v13 = vrot.slane %v3408_v16, %v273_v15 }
 0x19a   :  { %1990 = vmatpush1.bf16.msra.mxu0 %v2480_v19  ;;  %2033 = vmatpush1.bf16.msra.mxu1 %v2483_v20 }
 0x19b   :  { %1991 = vmatprep.subr.bf16.mxu0 %v2488_v21  ;;  %2034 = vmatprep.subr.bf16.mxu1 %v2491_v22  ;;  %v270_v21 = vrot.slane %v3408_v16, %v2998_v55  ;;  %v278_v22 = vrot.slane %v3408_v16, %v277_v17 }
 0x19e   :  { %1992 = vmatpush1.bf16.msra.mxu0 %v2486_v23  ;;  %2035 = vmatpush1.bf16.msra.mxu1 %v2489_v27 }
 0x19f   :  { %1993 = vmatprep.subr.bf16.mxu0 %v2494_v24  ;;  %2036 = vmatprep.subr.bf16.mxu1 %v2497_v25 }
 0x1a2   :  { %1994 = vmatpush1.bf16.msra.mxu0 %v2492_v26  ;;  %2037 = vmatpush1.bf16.msra.mxu1 %v2495_v28 }
 0x1a3   :  { %1995 = vmatprep.subr.bf16.mxu0 %v2500_v29  ;;  %2038 = vmatprep.subr.bf16.mxu1 %v2503_v30 }
 0x1a6   :  { %1996 = vmatpush1.bf16.msra.mxu0 %v2498_v31  ;;  %2039 = vmatpush1.bf16.msra.mxu1 %v2501_v32 }
 0x1a7   :  { %1997 = vmatprep.subr.bf16.mxu0 %v2506_v33  ;;  %2040 = vmatprep.subr.bf16.mxu1 %v2509_v34 }
 0x1aa   :  { %1998 = vmatpush1.bf16.msra.mxu0 %v2504_v35  ;;  %2041 = vmatpush1.bf16.msra.mxu1 %v2507_v36 }
 0x1ab   :  { %1999 = vmatprep.subr.bf16.mxu0 %v2512_v37  ;;  %2042 = vmatprep.subr.bf16.mxu1 %v2515_v38 }
 0x1ae   :  { %2000 = vmatpush1.bf16.msra.mxu0 %v2510_v39  ;;  %2043 = vmatpush1.bf16.msra.mxu1 %v2513_v42 }
 0x1af   :  { %2001 = vmatprep.subr.bf16.mxu0 %v2518_v43  ;;  %2044 = vmatprep.subr.bf16.mxu1 %v2521_v44 }
 0x1b2   :  { %2002 = vmatpush2.bf16.msra.mxu0 %v2516_v45  ;;  %2045 = vmatpush2.bf16.msra.mxu1 %v2519_v48 }
 0x1b3   :  { %2003 = vmatprep.subr.bf16.mxu0 %v2524_v49  ;;  %2046 = vmatprep.subr.bf16.mxu1 %v2527_v50 }
 0x1b6   :  { %2004 = vmatpush2.bf16.msra.mxu0 %v2522_v51  ;;  %2047 = vmatpush2.bf16.msra.mxu1 %v2525_v52 }
 0x1b7   :  { %2005 = vmatprep.subr.bf16.mxu0 %v2530_v54  ;;  %2048 = vmatprep.subr.bf16.mxu1 %v2533_v57 }
 0x1ba   :  { %2006 = vmatpush2.bf16.msra.mxu0 %v2528_v58  ;;  %2049 = vmatpush2.bf16.msra.mxu1 %v2531_v59 }
 0x1bb   :  { %2007 = vmatprep.subr.bf16.mxu0 %v2536_v60  ;;  %2050 = vmatprep.subr.bf16.mxu1 %v2539_v61 }
 0x1be   :  { %2008 = vmatpush2.bf16.msra.mxu0 %v2534_v62  ;;  %2051 = vmatpush2.bf16.msra.mxu1 %v2537_v63 }
 0x1bf   :  { %2009 = vmatprep.subr.bf16.mxu0 %v2542_v0  ;;  %2052 = vmatprep.subr.bf16.mxu1 %v2545_v1 }
 0x1c2   :  { %2010 = vmatpush2.bf16.msra.mxu0 %v2540_v2  ;;  %2053 = vmatpush2.bf16.msra.mxu1 %v2543_v3 }
 0x1c3   :  { %2011 = vmatprep.subr.bf16.mxu0 %v2548_v4  ;;  %2054 = vmatprep.subr.bf16.mxu1 %v2551_v5 }
 0x1c6   :  { %2012 = vmatpush2.bf16.msra.mxu0 %v2546_v6  ;;  %2055 = vmatpush2.bf16.msra.mxu1 %v2549_v7 }
 0x1c7   :  { %2013 = vmatprep.subr.bf16.mxu0 %v2554_v41  ;;  %2056 = vmatprep.subr.bf16.mxu1 %v2557_v8 }
 0x1ca   :  { %2014 = vmatpush2.bf16.msra.mxu0 %v2552_v9  ;;  %2057 = vmatpush2.bf16.msra.mxu1 %v2555_v10 }
 0x1cb   :  { %2015 = vmatprep.subr.bf16.mxu0 %v2560_v40  ;;  %2058 = vmatprep.subr.bf16.mxu1 %v2563_v11 }
 0x1ce   :  { %2016 = vmatpush2.bf16.msra.mxu0 %v2558_v47  ;;  %2059 = vmatpush2.bf16.msra.mxu1 %v2561_v46 }
 0x1cf   :  { %2071 = vmatprep.subr.bf16.mxu0 %v2566_v12  ;;  %2114 = vmatprep.subr.bf16.mxu1 %v2569_v14 }
 0x211   :  { %v987_v19 = vpop.f32.mrf.mxu0  ;;  %v1030_v20 = vpop.f32.mrf.mxu1 }
 0x212   :  { %v988_v23 = vadd.f32 %v987_v19, %v266_v18  ;;  %v1031_v27 = vadd.f32 %v1030_v20, %v274_v13 }
 0x213   :  { %v989_v24 = vpop.f32.mrf.mxu0  ;;  %v1032_v25 = vpop.f32.mrf.mxu1 }
 0x214   :  { %v1145_v26 = vmul.f32 0.70710677, %v988_v23  ;;  %v1147_v28 = vmul.f32 0.70710677, %v1031_v27  ;;  %v990_v29 = vadd.f32 %v989_v24, %v270_v21  ;;  %v1033_v30 = vadd.f32 %v1032_v25, %v278_v22  ;;  %v2570_v24 = vld [vmem:[%s3670_s5 + $0x260] ss:$8 sps:$4 sm:$0xff]  }
 0x215   :  { %v991_v31 = vpop.f32.mrf.mxu0  ;;  %v1034_v32 = vpop.f32.mrf.mxu1  ;;  %v1129_v58 = vmul.f32 0.5, %v988_v23  ;;  %v1131_v40 = vmul.f32 0.5, %v1031_v27  ;;  %v2575_v27 = vld [vmem:[%s3670_s5 + $0x364] ss:$8 sps:$4 sm:$0xff]   ;;  %v2573_v25 = vld [vmem:[%s3670_s5 + $0x360] ss:$8 sps:$4 sm:$0xff]  }
 0x216   :  { %v992_v33 = vadd.f32 %v991_v31, %v266_v18  ;;  %v1035_v34 = vadd.f32 %v1034_v32, %v274_v13  ;;  %2668 = verf.f32 %v1145_v26  ;;  %v1146_v35 = vmul.f32 0.70710677, %v990_v29  ;;  %v2564_v13 = vld [vmem:[%s3670_s5 + $0x270] ss:$8 sps:$4 sm:$0xff]   ;;  %v2578_v26 = vld [vmem:[%s3670_s5 + $0x254] ss:$8 sps:$4 sm:$0xff]  }
 0x217   :  { %v993_v36 = vpop.f32.mrf.mxu0  ;;  %v1036_v37 = vpop.f32.mrf.mxu1  ;;  %2670 = verf.f32 %v1147_v28  ;;  %v1148_v38 = vmul.f32 0.70710677, %v1033_v30  ;;  %v1130_v59 = vmul.f32 0.5, %v990_v29  ;;  %v1132_v41 = vmul.f32 0.5, %v1033_v30  ;;  %v2581_v28 = vld [vmem:[%s3670_s5 + $0x354] ss:$8 sps:$4 sm:$0xff]  }
 0x218   :  { %v1153_v39 = vmul.f32 0.70710677, %v992_v33  ;;  %2672 = verf.f32 %v1146_v35  ;;  %v1155_v42 = vmul.f32 0.70710677, %v1035_v34  ;;  %v994_v43 = vadd.f32 %v993_v36, %v270_v21  ;;  %v2567_v21 = vld [vmem:[%s3670_s5 + $0x370] ss:$8 sps:$4 sm:$0xff]  }
 0x219   :  { %v1037_v44 = vadd.f32 %v1036_v37, %v278_v22  ;;  %2674 = verf.f32 %v1148_v38  ;;  %v1137_v1 = vmul.f32 0.5, %v992_v33  ;;  %v1139_v5 = vmul.f32 0.5, %v1035_v34  ;;  %v2572_v22 = vld [vmem:[%s3670_s5 + $0x264] ss:$8 sps:$4 sm:$0xff]   ;;  %v2576_v29 = vld [vmem:[%s3670_s5 + $0x250] ss:$8 sps:$4 sm:$0xff]  }
 0x21a   :  { %2676 = verf.f32 %v1153_v39  ;;  %v1154_v45 = vmul.f32 0.70710677, %v994_v43  ;;  %v1138_v6 = vmul.f32 0.5, %v994_v43  ;;  %v2579_v30 = vld [vmem:[%s3670_s5 + $0x350] ss:$8 sps:$4 sm:$0xff]  }
 0x21b   :  { %2678 = verf.f32 %v1155_v42  ;;  %v1156_v48 = vmul.f32 0.70710677, %v1037_v44  ;;  %v1140_v9 = vmul.f32 0.5, %v1037_v44  ;;  %v2584_v31 = vld [vmem:[%s3670_s5 + $0x244] ss:$8 sps:$4 sm:$0xff]  }
 0x21c   :  { %2680 = verf.f32 %v1154_v45  ;;  %v2587_v32 = vld [vmem:[%s3670_s5 + $0x344] ss:$8 sps:$4 sm:$0xff]   ;;  %v2582_v33 = vld [vmem:[%s3670_s5 + $0x240] ss:$8 sps:$4 sm:$0xff]   ;;  %v2590_v35 = vld [vmem:[%s3670_s5 + $0x234] ss:$8 sps:$4 sm:$0xff]  }
 0x21d   :  { %2682 = verf.f32 %v1156_v48  ;;  %v2585_v34 = vld [vmem:[%s3670_s5 + $0x340] ss:$8 sps:$4 sm:$0xff]   ;;  %v2593_v36 = vld [vmem:[%s3670_s5 + $0x334] ss:$8 sps:$4 sm:$0xff]   ;;  %v2588_v37 = vld [vmem:[%s3670_s5 + $0x230] ss:$8 sps:$4 sm:$0xff]  }
 0x21e   :  { %v2591_v38 = vld [vmem:[%s3670_s5 + $0x330] ss:$8 sps:$4 sm:$0xff]   ;;  %v2596_v39 = vld [vmem:[%s3670_s5 + $0x224] ss:$8 sps:$4 sm:$0xff]   ;;  %v2594_v43 = vld [vmem:[%s3670_s5 + $0x220] ss:$8 sps:$4 sm:$0xff]  }
 0x21f   :  { %v2599_v42 = vld [vmem:[%s3670_s5 + $0x324] ss:$8 sps:$4 sm:$0xff]   ;;  %v2597_v44 = vld [vmem:[%s3670_s5 + $0x320] ss:$8 sps:$4 sm:$0xff]   ;;  %v2602_v45 = vld [vmem:[%s3670_s5 + $0x214] ss:$8 sps:$4 sm:$0xff]  }
 0x220   :  { %v2605_v48 = vld [vmem:[%s3670_s5 + $0x314] ss:$8 sps:$4 sm:$0xff]  }
 0x223   :  { %v2669_v49 = vpop.eup %2668 }
 0x224   :  { %v2671_v50 = vpop.eup %2670  ;;  %v1177_v63 = vadd.f32 1.0, %v2669_v49  ;;  %v2600_v49 = vld [vmem:[%s3670_s5 + $0x210] ss:$8 sps:$4 sm:$0xff]  }
 0x225   :  { %v2673_v51 = vpop.eup %2672  ;;  %v1179_v4 = vadd.f32 1.0, %v2671_v50  ;;  %v2603_v50 = vld [vmem:[%s3670_s5 + $0x310] ss:$8 sps:$4 sm:$0xff]  }
 0x226   :  { %v2675_v52 = vpop.eup %2674  ;;  %v1178_v60 = vadd.f32 1.0, %v2673_v51  ;;  %v1193_v12 = vmul.f32 %v1177_v63, %v1129_v58  ;;  %v2608_v51 = vld [vmem:[%s3670_s5 + $0x204] ss:$8 sps:$4 sm:$0xff]   ;;  %v2606_v58 = vld [vmem:[%s3670_s5 + $0x200] ss:$8 sps:$4 sm:$0xff]   ;;  %v293_v63 = vsub.s32 7, %v2992_v53 }
 0x227   :  { %v2677_v54 = vpop.eup %2676  ;;  %v1180_v0 = vadd.f32 1.0, %v2675_v52  ;;  %v1195_v17 = vmul.f32 %v1179_v4, %v1131_v40  ;;  %v2611_v52 = vld [vmem:[%s3670_s5 + $0x304] ss:$8 sps:$4 sm:$0xff]  }
 0x228   :  { %v2679_v57 = vpop.eup %2678  ;;  %v1185_v61 = vadd.f32 1.0, %v2677_v54  ;;  %v1194_v11 = vmul.f32 %v1178_v60, %v1130_v59  ;;  %v281_v54 = vsub.s32 4, %v2992_v53  ;;  %v2609_v59 = vld [vmem:[%s3670_s5 + $0x300] ss:$8 sps:$4 sm:$0xff]   ;;  %v2614_v60 = vld [vmem:[%s3670_s5 + $0x2f4] ss:$8 sps:$4 sm:$0xff]  }
 0x229   :  { %v2681_v62 = vpop.eup %2680  ;;  %v1187_v2 = vadd.f32 1.0, %v2679_v57  ;;  %v1196_v14 = vmul.f32 %v1180_v0, %v1132_v41  ;;  %v289_v57 = vsub.s32 6, %v2992_v53  ;;  %v2620_v4 = vld [vmem:[%s3670_s5 + $0x2e4] ss:$8 sps:$4 sm:$0xff]  }
 0x22a   :  { %v2683_v3 = vpop.eup %2682  ;;  %v1186_v7 = vadd.f32 1.0, %v2681_v62  ;;  %v1201_v8 = vmul.f32 %v1185_v61, %v1137_v1  ;;  %v2617_v61 = vld [vmem:[%s3670_s5 + $0x3f4] ss:$8 sps:$4 sm:$0xff]   ;;  %v285_v62 = vsub.s32 5, %v2992_v53  ;;  %v282_v0 = vrot.slane %v3408_v16, %v281_v54  ;;  %v2623_v41 = vld [vmem:[%s3670_s5 + $0x3e4] ss:$8 sps:$4 sm:$0xff]  }
 0x22b   :  { %v1188_v10 = vadd.f32 1.0, %v2683_v3  ;;  %v1203_v47 = vmul.f32 %v1187_v2, %v1139_v5  ;;  %v290_v1 = vrot.slane %v3408_v16, %v289_v57  ;;  %v2612_v2 = vld [vmem:[%s3670_s5 + $0x2f0] ss:$8 sps:$4 sm:$0xff]  }
 0x22c   :  { %v1202_v46 = vmul.f32 %v1186_v7, %v1138_v6  ;;  %v1209_v19 = vpack.c.bf16 %v1201_v8, %v1193_v12  ;;  %v2615_v3 = vld [vmem:[%s3670_s5 + $0x3f0] ss:$8 sps:$4 sm:$0xff]   ;;  %v286_v6 = vrot.slane %v3408_v16, %v285_v62  ;;  %v294_v7 = vrot.slane %v3408_v16, %v293_v63  ;;  %v2626_v12 = vld [vmem:[%s3670_s5 + $0x2d4] ss:$8 sps:$4 sm:$0xff]  }
 0x22d   :  { %v1204_v15 = vmul.f32 %v1188_v10, %v1140_v9  ;;  %v1211_v23 = vpack.c.bf16 %v1203_v47, %v1195_v17  ;;  %v2621_v47 = vld [vmem:[%s3670_s5 + $0x3e0] ss:$8 sps:$4 sm:$0xff]  }
 0x22e   :  { %v1210_v18 = vpack.c.bf16 %v1202_v46, %v1194_v11  ;;  %v2618_v11 = vld [vmem:[%s3670_s5 + $0x2e0] ss:$8 sps:$4 sm:$0xff]  }
 0x22f   :  { %v1212_v20 = vpack.c.bf16 %v1204_v15, %v1196_v14 }
 0x230   :  { %2017 = vmatprep.mubr.bf16.mxu0 %v1210_v18 }
 0x231   :  { %2060 = vmatprep.mubr.bf16.mxu1 %v1212_v20  ;;  %2018 = vmatmul.mubr.bf16.vlgmr.msra.gmra.mxu0 %v1209_v19 }
 0x232   :  { %2061 = vmatmul.mubr.bf16.vlgmr.msra.gmra.mxu1 %v1211_v23  ;;  %2072 = vmatpush1.bf16.msra.mxu0 %v2564_v13  ;;  %v2629_v13 = vld [vmem:[%s3670_s5 + $0x3d4] ss:$8 sps:$4 sm:$0xff]  }
 0x233   :  { %2115 = vmatpush1.bf16.msra.mxu1 %v2567_v21  ;;  %2073 = vmatprep.subr.bf16.mxu0 %v2572_v22 }
 0x234   :  { %2116 = vmatprep.subr.bf16.mxu1 %v2575_v27  ;;  %v2624_v27 = vld [vmem:[%s3670_s5 + $0x2d0] ss:$8 sps:$4 sm:$0xff]  }
 0x236   :  { %2074 = vmatpush1.bf16.msra.mxu0 %v2570_v24  ;;  %v2627_v24 = vld [vmem:[%s3670_s5 + $0x3d0] ss:$8 sps:$4 sm:$0xff]  }
 0x237   :  { %2117 = vmatpush1.bf16.msra.mxu1 %v2573_v25  ;;  %2075 = vmatprep.subr.bf16.mxu0 %v2578_v26 }
 0x238   :  { %2118 = vmatprep.subr.bf16.mxu1 %v2581_v28  ;;  %v2632_v28 = vld [vmem:[%s3670_s5 + $0x2c4] ss:$8 sps:$4 sm:$0xff]  }
 0x23a   :  { %2076 = vmatpush1.bf16.msra.mxu0 %v2576_v29 }
 0x23b   :  { %2119 = vmatpush1.bf16.msra.mxu1 %v2579_v30  ;;  %2077 = vmatprep.subr.bf16.mxu0 %v2584_v31 }
 0x23c   :  { %2120 = vmatprep.subr.bf16.mxu1 %v2587_v32  ;;  %v2635_v32 = vld [vmem:[%s3670_s5 + $0x3c4] ss:$8 sps:$4 sm:$0xff]  }
 0x23e   :  { %2078 = vmatpush1.bf16.msra.mxu0 %v2582_v33 }
 0x23f   :  { %2121 = vmatpush1.bf16.msra.mxu1 %v2585_v34  ;;  %2079 = vmatprep.subr.bf16.mxu0 %v2590_v35  ;;  %v2630_v34 = vld [vmem:[%s3670_s5 + $0x2c0] ss:$8 sps:$4 sm:$0xff]  }
 0x240   :  { %2122 = vmatprep.subr.bf16.mxu1 %v2593_v36  ;;  %v2633_v36 = vld [vmem:[%s3670_s5 + $0x3c0] ss:$8 sps:$4 sm:$0xff]  }
 0x242   :  { %2080 = vmatpush1.bf16.msra.mxu0 %v2588_v37  ;;  %v2638_v37 = vld [vmem:[%s3670_s5 + $0x2b4] ss:$8 sps:$4 sm:$0xff]  }
 0x243   :  { %2123 = vmatpush1.bf16.msra.mxu1 %v2591_v38  ;;  %2081 = vmatprep.subr.bf16.mxu0 %v2596_v39  ;;  %v2641_v38 = vld [vmem:[%s3670_s5 + $0x3b4] ss:$8 sps:$4 sm:$0xff]   ;;  %v2636_v39 = vld [vmem:[%s3670_s5 + $0x2b0] ss:$8 sps:$4 sm:$0xff]  }
 0x244   :  { %2124 = vmatprep.subr.bf16.mxu1 %v2599_v42  ;;  %v2639_v42 = vld [vmem:[%s3670_s5 + $0x3b0] ss:$8 sps:$4 sm:$0xff]  }
 0x246   :  { %2082 = vmatpush1.bf16.msra.mxu0 %v2594_v43  ;;  %v2644_v43 = vld [vmem:[%s3670_s5 + $0x2a4] ss:$8 sps:$4 sm:$0xff]  }
 0x247   :  { %2125 = vmatpush1.bf16.msra.mxu1 %v2597_v44  ;;  %2083 = vmatprep.subr.bf16.mxu0 %v2602_v45  ;;  %v2647_v44 = vld [vmem:[%s3670_s5 + $0x3a4] ss:$8 sps:$4 sm:$0xff]   ;;  %v2642_v45 = vld [vmem:[%s3670_s5 + $0x2a0] ss:$8 sps:$4 sm:$0xff]  }
 0x248   :  { %2126 = vmatprep.subr.bf16.mxu1 %v2605_v48 }
 0x24a   :  { %2084 = vmatpush1.bf16.msra.mxu0 %v2600_v49  ;;  %v2645_v49 = vld [vmem:[%s3670_s5 + $0x3a0] ss:$8 sps:$4 sm:$0xff]  }
 0x24b   :  { %2127 = vmatpush1.bf16.msra.mxu1 %v2603_v50  ;;  %2085 = vmatprep.subr.bf16.mxu0 %v2608_v51  ;;  %v2650_v50 = vld [vmem:[%s3670_s5 + $0x294] ss:$8 sps:$4 sm:$0xff]  }
 0x24c   :  { %2128 = vmatprep.subr.bf16.mxu1 %v2611_v52  ;;  %v2653_v52 = vld [vmem:[%s3670_s5 + $0x394] ss:$8 sps:$4 sm:$0xff]  }
 0x24e   :  { %2086 = vmatpush1.bf16.msra.mxu0 %v2606_v58  ;;  %v2648_v58 = vld [vmem:[%s3670_s5 + $0x290] ss:$8 sps:$4 sm:$0xff]  }
 0x24f   :  { %2129 = vmatpush1.bf16.msra.mxu1 %v2609_v59  ;;  %2087 = vmatprep.subr.bf16.mxu0 %v2614_v60  ;;  %v2651_v60 = vld [vmem:[%s3670_s5 + $0x390] ss:$8 sps:$4 sm:$0xff]  }
 0x250   :  { %2130 = vmatprep.subr.bf16.mxu1 %v2617_v61  ;;  %v2656_v61 = vld [vmem:[%s3670_s5 + $0x284] ss:$8 sps:$4 sm:$0xff]  }
 0x251   :  { %v1073_v53 = vpop.f32.mrf.mxu0  ;;  %v1116_v5 = vpop.f32.mrf.mxu1 }
 0x252   :  { %v3533_v8 = vadd.f32 %v1073_v53, %v282_v0  ;;  %v3535_v9 = vadd.f32 %v1116_v5, %v290_v1  ;;  %2088 = vmatpush2.bf16.msra.mxu0 %v2612_v2 }
 0x253   :  { %v1075_v10 = vpop.f32.mrf.mxu0  ;;  %v1118_v40 = vpop.f32.mrf.mxu1  ;;  %2131 = vmatpush2.bf16.msra.mxu1 %v2615_v3  ;;  %2089 = vmatprep.subr.bf16.mxu0 %v2620_v4  ;;  %v2659_v3 = vld [vmem:[%s3670_s5 + $0x384] ss:$8 sps:$4 sm:$0xff]  }
 0x254   :  { %v1149_v16 = vmul.f32 0.70710677, %v3533_v8  ;;  %v1151_v46 = vmul.f32 0.70710677, %v3535_v9  ;;  %v3548_v14 = vadd.f32 %v1075_v10, %v286_v6  ;;  %v3550_v15 = vadd.f32 %v1118_v40, %v294_v7  ;;  %2132 = vmatprep.subr.bf16.mxu1 %v2623_v41 }
 0x255   :  { %v1077_v17 = vpop.f32.mrf.mxu0  ;;  %v1120_v18 = vpop.f32.mrf.mxu1  ;;  %v1133_v63 = vmul.f32 0.5, %v3533_v8 }
 0x256   :  { %v3555_v19 = vadd.f32 %v1077_v17, %v282_v0  ;;  %v3557_v20 = vadd.f32 %v1120_v18, %v290_v1  ;;  %2684 = verf.f32 %v1149_v16  ;;  %v1150_v21 = vmul.f32 0.70710677, %v3548_v14  ;;  %2090 = vmatpush2.bf16.msra.mxu0 %v2618_v11  ;;  %v2657_v17 = vld [vmem:[%s3670_s5 + $0x380] ss:$8 sps:$4 sm:$0xff]  }
 0x257   :  { %v1079_v22 = vpop.f32.mrf.mxu0  ;;  %v1122_v23 = vpop.f32.mrf.mxu1  ;;  %2686 = verf.f32 %v1151_v46  ;;  %v1152_v25 = vmul.f32 0.70710677, %v3550_v15  ;;  %2133 = vmatpush2.bf16.msra.mxu1 %v2621_v47  ;;  %2091 = vmatprep.subr.bf16.mxu0 %v2626_v12  ;;  %v1134_v0 = vmul.f32 0.5, %v3548_v14  ;;  %v2654_v47 = vld [vmem:[%s3670_s5 + $0x280] ss:$8 sps:$4 sm:$0xff]   ;;  %v1136_v16 = vmul.f32 0.5, %v3550_v15 }
 0x258   :  { %v1157_v26 = vmul.f32 0.70710677, %v3555_v19  ;;  %2688 = verf.f32 %v1150_v21  ;;  %v1159_v29 = vmul.f32 0.70710677, %v3557_v20  ;;  %v1080_v30 = vadd.f32 %v1079_v22, %v286_v6  ;;  %2134 = vmatprep.subr.bf16.mxu1 %v2629_v13 }
 0x259   :  { %v3572_v31 = vadd.f32 %v1122_v23, %v294_v7  ;;  %2690 = verf.f32 %v1152_v25  ;;  %v1141_v6 = vmul.f32 0.5, %v3555_v19  ;;  %v1143_v40 = vmul.f32 0.5, %v3557_v20 }
 0x25a   :  { %2692 = verf.f32 %v1157_v26  ;;  %v1158_v33 = vmul.f32 0.70710677, %v1080_v30  ;;  %2092 = vmatpush2.bf16.msra.mxu0 %v2624_v27  ;;  %v1142_v8 = vmul.f32 0.5, %v1080_v30  ;;  %v1135_v18 = vmul.f32 0.5, %v3535_v9 }
 0x25b   :  { %2694 = verf.f32 %v1159_v29  ;;  %v1160_v35 = vmul.f32 0.70710677, %v3572_v31  ;;  %2135 = vmatpush2.bf16.msra.mxu1 %v2627_v24  ;;  %2093 = vmatprep.subr.bf16.mxu0 %v2632_v28  ;;  %v1144_v12 = vmul.f32 0.5, %v3572_v31 }
 0x25c   :  { %2696 = verf.f32 %v1158_v33  ;;  %2136 = vmatprep.subr.bf16.mxu1 %v2635_v32 }
 0x25d   :  { %2698 = verf.f32 %v1160_v35 }
 0x25e   :  { %2094 = vmatpush2.bf16.msra.mxu0 %v2630_v34 }
 0x25f   :  { %2137 = vmatpush2.bf16.msra.mxu1 %v2633_v36  ;;  %2095 = vmatprep.subr.bf16.mxu0 %v2638_v37  ;;  %v2180_v37 = vld [vmem:[%s3674_s6] sm:$0x3] }
 0x260   :  { %2138 = vmatprep.subr.bf16.mxu1 %v2641_v38 }
 0x262   :  { %2096 = vmatpush2.bf16.msra.mxu0 %v2636_v39 }
 0x263   :  { %v2685_v48 = vpop.eup %2684  ;;  %2139 = vmatpush2.bf16.msra.mxu1 %v2639_v42  ;;  %2097 = vmatprep.subr.bf16.mxu0 %v2644_v43  ;;  %v2168_v43 = vld [vmem:[%s3668_s0] sm:$0xff] }
 0x264   :  { %v2687_v51 = vpop.eup %2686  ;;  %2140 = vmatprep.subr.bf16.mxu1 %v2647_v44  ;;  %v1181_v53 = vadd.f32 1.0, %v2685_v48 }
 0x265   :  { %v2689_v54 = vpop.eup %2688  ;;  %v1183_v10 = vadd.f32 1.0, %v2687_v51 }
 0x266   :  { %v2691_v57 = vpop.eup %2690  ;;  %2098 = vmatpush2.bf16.msra.mxu0 %v2642_v45  ;;  %v1182_v1 = vadd.f32 1.0, %v2689_v54  ;;  %v1197_v21 = vmul.f32 %v1181_v53, %v1133_v63  ;;  %v2189_v54 = vrot.slane %v2180_v37, %v2998_v55  ;;  %v2170_v63 = vld [vmem:[%s3668_s0 + $0x10] sm:$0xff]  ;;  %v2171_v55 = vld [vmem:[%s3668_s0 + $0x18] sm:$0xff] }
 0x267   :  { %v2693_v59 = vpop.eup %2692  ;;  %2141 = vmatpush2.bf16.msra.mxu1 %v2645_v49  ;;  %2099 = vmatprep.subr.bf16.mxu0 %v2650_v50  ;;  %v1184_v5 = vadd.f32 1.0, %v2691_v57  ;;  %v1199_v15 = vmul.f32 %v1183_v10, %v1135_v18  ;;  %v2185_v49 = vrot.slane %v2180_v37, %v3001_v56 }
 0x268   :  { %v2695_v62 = vpop.eup %2694  ;;  %v1189_v2 = vadd.f32 1.0, %v2693_v59  ;;  %2142 = vmatprep.subr.bf16.mxu1 %v2653_v52  ;;  %v1198_v13 = vmul.f32 %v1182_v1, %v1134_v0  ;;  %v2169_v52 = vld [vmem:[%s3668_s0 + $0x8] sm:$0xff] }
 0x269   :  { %v2697_v4 = vpop.eup %2696  ;;  %v1191_v7 = vadd.f32 1.0, %v2695_v62  ;;  %v1200_v22 = vmul.f32 %v1184_v5, %v1136_v16 }
 0x26a   :  { %v2699_v41 = vpop.eup %2698  ;;  %v1190_v11 = vadd.f32 1.0, %v2697_v4  ;;  %2100 = vmatpush2.bf16.msra.mxu0 %v2648_v58  ;;  %v1205_v46 = vmul.f32 %v1189_v2, %v1141_v6 }
 0x26b   :  { %v1192_v14 = vadd.f32 1.0, %v2699_v41  ;;  %2143 = vmatpush2.bf16.msra.mxu1 %v2651_v60  ;;  %2101 = vmatprep.subr.bf16.mxu0 %v2656_v61  ;;  %v1207_v19 = vmul.f32 %v1191_v7, %v1143_v40 }
 0x26c   :  { %v1206_v20 = vmul.f32 %v1190_v11, %v1142_v8  ;;  %2144 = vmatprep.subr.bf16.mxu1 %v2659_v3  ;;  %v1213_v24 = vpack.c.bf16 %v1205_v46, %v1197_v21 }
 0x26d   :  { %v1208_v23 = vmul.f32 %v1192_v14, %v1144_v12  ;;  %v1215_v26 = vpack.c.bf16 %v1207_v19, %v1199_v15 }
 0x26e   :  { %2102 = vmatpush2.bf16.msra.mxu0 %v2654_v47  ;;  %v1214_v27 = vpack.c.bf16 %v1206_v20, %v1198_v13 }
 0x26f   :  { %2145 = vmatpush2.bf16.msra.mxu1 %v2657_v17  ;;  %v1216_v25 = vpack.c.bf16 %v1208_v23, %v1200_v22 }
 0x270   :  { %2103 = vmatprep.mubr.bf16.mxu0 %v1214_v27 }
 0x271   :  { %2146 = vmatprep.mubr.bf16.mxu1 %v1216_v25  ;;  %2104 = vmatmul.mubr.bf16.vlgmr.msra.gmra.mxu0 %v1213_v24 }
 0x272   :  { %2147 = vmatmul.mubr.bf16.vlgmr.msra.gmra.mxu1 %v1215_v26 }
 0x2f1   :  { %v2019_v28 = vpop.f32.mrf.mxu0 }
 0x2f2   :  { %v2062_v9 = vpop.f32.mrf.mxu1 }
 0x2f3   :  { %v2021_v29 = vpop.f32.mrf.mxu0  ;;  %v2063_v34 = vadd.f32 %v2062_v9, %v2019_v28 }
 0x2f4   :  { %v2064_v30 = vpop.f32.mrf.mxu1 }
 0x2f5   :  { %v2023_v31 = vpop.f32.mrf.mxu0  ;;  %v2065_v38 = vadd.f32 %v2064_v30, %v2021_v29 }
 0x2f6   :  { %v2066_v32 = vpop.f32.mrf.mxu1 }
 0x2f7   :  { %v2025_v33 = vpop.f32.mrf.mxu0  ;;  %v2067_v45 = vadd.f32 %v2066_v32, %v2023_v31 }
 0x2f8   :  { %v2068_v35 = vpop.f32.mrf.mxu1 }
 0x2f9   :  { %v2069_v58 = vadd.f32 %v2068_v35, %v2025_v33 }
 0x331   :  { %v2105_v36 = vpop.f32.mrf.mxu0 }
 0x332   :  { %v2106_v39 = vadd.f32 %v2105_v36, %v2063_v34  ;;  %v2148_v42 = vpop.f32.mrf.mxu1 }
 0x333   :  { %v2107_v44 = vpop.f32.mrf.mxu0 }
 0x334   :  { %v2149_v48 = vadd.f32 %v2148_v42, %v2106_v39  ;;  %v2108_v50 = vadd.f32 %v2107_v44, %v2065_v38  ;;  %v2150_v51 = vpop.f32.mrf.mxu1 }
 0x335   :  { %v2109_v57 = vpop.f32.mrf.mxu0 }
 0x336   :  { %v2176_v59 = vadd.f32 %v2168_v43, %v2149_v48  ;;  %v2151_v60 = vadd.f32 %v2150_v51, %v2108_v50  ;;  %v2110_v61 = vadd.f32 %v2109_v57, %v2067_v45  ;;  %v2152_v62 = vpop.f32.mrf.mxu1 }
 0x337   :  { %v2111_v0 = vpop.f32.mrf.mxu0 }
 0x338   :  { %v2192_v56 = vadd.f32 %v2185_v49, %v2176_v59  ;;  %v2177_v1 = vadd.f32 %v2169_v52, %v2151_v60  ;;  %v2153_v2 = vadd.f32 %v2152_v62, %v2110_v61  ;;  %v2112_v3 = vadd.f32 %v2111_v0, %v2069_v58  ;;  %v2154_v4 = vpop.f32.mrf.mxu1 }
 0x33a   :  { %2196 = vst [vmem:[%s3675_s7] sm:$0xff] %v2192_v56  ;;  %v2193_v53 = vadd.f32 %v2189_v54, %v2177_v1  ;;  %v2178_v5 = vadd.f32 %v2170_v63, %v2153_v2  ;;  %v2155_v6 = vadd.f32 %v2154_v4, %v2112_v3 }
 0x33c   :  { %2197 = vst [vmem:[%s3675_s7 + $0x8] sm:$0xff] %v2193_v53  ;;  %v2194_v7 = vadd.f32 %v2185_v49, %v2178_v5  ;;  %v2179_v41 = vadd.f32 %v2171_v55, %v2155_v6 }
 0x33e   :  { %2198 = vst [vmem:[%s3675_s7 + $0x10] sm:$0xff] %v2194_v7  ;;  %v2195_v10 = vadd.f32 %v2189_v54, %v2179_v41 }
 0x340   :  { %2199 = vst [vmem:[%s3675_s7 + $0x18] sm:$0xff] %v2195_v10 }

</bundles_post_ra>
